<compile_context>
chip_gen: v6e
topology: v6e:2x2x1
jax: 0.10.0
libtpu: 0.0.40
codegen_flags: <defaults>
</compile_context>

<pallas_src>
import functools

import jax
import jax.numpy as jnp
from jax.experimental import pallas as pl
from jax.experimental.pallas import tpu as pltpu


# ----------------------------------------------------------------------------
# Kernel A: feature net (3x conv3x3+ReLU) + merged policy/value 1x1 conv + ReLU
# ----------------------------------------------------------------------------
def _feature_head_kernel(xp_ref, w1_ref, b1_ref, w2_ref, b2_ref, w3_ref, b3_ref,
                         wh_ref, bh_ref, head_ref, pad1_ref, pad2_ref):
    TB, Hp, Wp, _ = xp_ref.shape          # padded NHWC batch tile (bf16)
    H, W = Hp - 2, Wp - 2
    M = TB * H * W

    def conv3x3_relu(src_ref, w_ref, b_ref):
        """3x3 / stride 1 / pad 1 conv over the zero-padded bf16 NHWC block,
        lowered as 9 accumulated bf16 MXU matmuls; returns bf16 activations."""
        cin = src_ref.shape[-1]
        acc = jnp.dot(src_ref[:, 0:H, 0:W, :].reshape(M, cin), w_ref[0],
                      preferred_element_type=jnp.float32)   # tap 0 inits acc
        for t in range(1, 9):                                # static unroll
            kh, kw = divmod(t, 3)
            win = src_ref[:, kh:kh + H, kw:kw + W, :].reshape(M, cin)
            acc = acc + jnp.dot(win, w_ref[t], preferred_element_type=jnp.float32)
        return jnp.maximum(acc + b_ref[...], 0.0).astype(jnp.bfloat16)

    def pad_store(dst_ref, f):
        """Write bf16 activations into the interior of the padded scratch and
        zero ONLY the 1-px border (interior is fully overwritten each step)."""
        c = dst_ref.shape[-1]
        dst_ref[:, 0:1, :, :] = jnp.zeros((TB, 1, Wp, c), dst_ref.dtype)
        dst_ref[:, Hp - 1:Hp, :, :] = jnp.zeros((TB, 1, Wp, c), dst_ref.dtype)
        dst_ref[:, 1:1 + H, 0:1, :] = jnp.zeros((TB, H, 1, c), dst_ref.dtype)
        dst_ref[:, 1:1 + H, Wp - 1:Wp, :] = jnp.zeros((TB, H, 1, c), dst_ref.dtype)
        dst_ref[:, 1:1 + H, 1:1 + W, :] = f.reshape(TB, H, W, c)

    f1 = conv3x3_relu(xp_ref, w1_ref, b1_ref)                # [M, 32]  bf16
    pad_store(pad1_ref, f1)
    f2 = conv3x3_relu(pad1_ref, w2_ref, b2_ref)              # [M, 64]  bf16
    pad_store(pad2_ref, f2)
    f3 = conv3x3_relu(pad2_ref, w3_ref, b3_ref)              # [M, 128] bf16

    # merged 1x1 head conv: policy(4) + value(2) -> 6 lanes, padded to 8 + ReLU
    head = jnp.dot(f3, wh_ref[...], preferred_element_type=jnp.float32) + bh_ref[...]
    head_ref[...] = jnp.maximum(head, 0.0).astype(head_ref.dtype)   # one (M,8) slab


# ----------------------------------------------------------------------------
# Kernel B: policy linear + softmax  and  value MLP (64 -> 1) + tanh, fused.
# Both heads consume the same lane-dense (TBB, HW*8) input; the head split and
# the torch NCHW flatten are folded into zero-padded weight rows.
# ----------------------------------------------------------------------------
def _heads_kernel(h_ref, plw_ref, plb_ref, vl1w_ref, vl1b_ref,
                  vl2w_ref, vl2b_ref, prob_ref, val_ref):
    hb = h_ref[...]                                          # (TBB, HW*8) bf16

    # --- policy head: linear + row-wise softmax ---
    logits = jnp.dot(hb, plw_ref[...], preferred_element_type=jnp.float32) + plb_ref[...]
    z = logits - jnp.max(logits, axis=-1, keepdims=True)
    e = jnp.exp(z)
    s = jnp.sum(e, axis=-1, keepdims=True)
    r = pl.reciprocal(s, approx=True)        # EUP slot (otherwise idle)
    r = r * (2.0 - s * r)                    # one Newton step -> ~exact
    prob_ref[...] = (e * r).astype(prob_ref.dtype)

    # --- value head: linear(64) + ReLU + 64->1 projection (VPU) + tanh ---
    h1 = jnp.dot(hb, vl1w_ref[...], preferred_element_type=jnp.float32) + vl1b_ref[...]
    h1 = jnp.maximum(h1, 0.0)                                # (TBB, 64) f32
    v = jnp.sum(h1 * vl2w_ref[...], axis=-1, keepdims=True) + vl2b_ref[...]
    val_ref[...] = jnp.tanh(v).astype(val_ref.dtype)


# ----------------------------------------------------------------------------
# Parameters: synthetic torch-layout init + one-time kernel-ready preparation
# (bf16 casts, per-tap conv weights, head merge, flatten-permutation folding).
# ----------------------------------------------------------------------------
def init_params(key, board_size):
    s = board_size
    ks = jax.random.split(key, 16)

    def conv_w(k, cout, cin, ksz):
        fan_in = cin * ksz * ksz
        return jax.random.normal(k, (cout, cin, ksz, ksz), jnp.float32) * (2.0 / fan_in) ** 0.5

    def lin_w(k, fin, fout):
        return jax.random.normal(k, (fin, fout), jnp.float32) * (2.0 / fin) ** 0.5

    def bias(k, n):
        return jax.random.normal(k, (n,), jnp.float32) * 0.05

    return {
        # feature_net (torch OIHW conv weights)
        "c1w": conv_w(ks[0], 32, 4, 3),   "c1b": bias(ks[8], 32),
        "c2w": conv_w(ks[1], 64, 32, 3),  "c2b": bias(ks[9], 64),
        "c3w": conv_w(ks[2], 128, 64, 3), "c3b": bias(ks[10], 128),
        # policy_net (linear rows follow torch's NCHW flatten order: c*HW + hw)
        "pw": conv_w(ks[3], 4, 128, 1),   "pb": bias(ks[11], 4),
        "plw": lin_w(ks[4], 4 * s * s, s * s), "plb": bias(ks[12], s * s),
        # value_net
        "vw": conv_w(ks[5], 2, 128, 1),   "vb": bias(ks[13], 2),
        "vl1w": lin_w(ks[6], 2 * s * s, 64), "vl1b": bias(ks[14], 64),
        "vl2w": lin_w(ks[7], 64, 1),      "vl2b": bias(ks[15], 1),
    }


def prepare_params(p, board_size, cin_pad=8):
    """One-time conversion from torch layout to kernel-ready layout."""
    s = board_size
    HW = s * s
    bf16, f32 = jnp.bfloat16, jnp.float32

    def conv3_taps(w_oihw, pad_cin=None):
        cout, cin, kh, kw = w_oihw.shape
        w = jnp.transpose(w_oihw, (2, 3, 1, 0)).reshape(kh * kw, cin, cout)  # [9,Cin,Cout]
        if pad_cin is not None and pad_cin > cin:
            w = jnp.pad(w, ((0, 0), (0, pad_cin - cin), (0, 0)))
        return w.astype(bf16)

    def head_rows(w_lin, n_c, c_off):
        # torch flatten rows are (c, hw)-major over this head's own channels;
        # remap to the kernel's (hw, c8)-major merged-head flatten and zero-fill
        # the rows belonging to the other head / padding channels.
        fin, fout = w_lin.shape
        w = w_lin.reshape(n_c, HW, fout)
        w8 = jnp.zeros((8, HW, fout), f32).at[c_off:c_off + n_c].set(w)
        return w8.transpose(1, 0, 2).reshape(8 * HW, fout).astype(bf16)

    # merged 1x1 head conv: policy(4) + value(2) -> 6 lanes, padded to 8
    pw = p["pw"].reshape(p["pw"].shape[0], p["pw"].shape[1]).T      # [128, 4]
    vw = p["vw"].reshape(p["vw"].shape[0], p["vw"].shape[1]).T      # [128, 2]
    wh = jnp.concatenate([pw, vw, jnp.zeros((pw.shape[0], 2), f32)], axis=1)
    bh = jnp.concatenate([p["pb"], p["vb"], jnp.zeros((2,), f32)])

    row = lambda b: b.reshape(1, -1).astype(f32)
    return {
        "w1": conv3_taps(p["c1w"], pad_cin=cin_pad), "b1": row(p["c1b"]),
        "w2": conv3_taps(p["c2w"]),                  "b2": row(p["c2b"]),
        "w3": conv3_taps(p["c3w"]),                  "b3": row(p["c3b"]),
        "wh": wh.astype(bf16),                       "bh": row(bh),
        "plw8": head_rows(p["plw"], 4, 0),           "plb": row(p["plb"]),
        "vl1w8": head_rows(p["vl1w"], 2, 4),         "vl1b": row(p["vl1b"]),
        "vl2w": p["vl2w"].reshape(1, -1).astype(f32), "vl2b": row(p["vl2b"]),
    }


# ----------------------------------------------------------------------------
# Forward pass (mirrors PolicyValueNet.forward).
# ----------------------------------------------------------------------------
def policy_value_net(prep, x_nchw, batch_tile=64):
    B, Cin, H, W = x_nchw.shape
    HW = H * W
    cin_pad = prep["w1"].shape[1]
    Hp, Wp = H + 2, W + 2

    # NCHW -> NHWC in bf16 (halves the input DMA), zero-pad spatial ring + channels.
    x = jnp.transpose(x_nchw, (0, 2, 3, 1)).astype(jnp.bfloat16)
    xp = jnp.pad(x, ((0, 0), (1, 1), (1, 1), (0, cin_pad - Cin)))

    # Batch tile: large (amortize ~0.35 us/step), but capped at cdiv(B, 2) so the
    # "parallel" grid has >= 2 steps and can shard across both v7x TensorCores.
    TB = max(1, min(batch_tile, pl.cdiv(B, 2)))
    M = TB * HW
    c2 = lambda i: (0, 0)
    c3 = lambda i: (0, 0, 0)

    # ---- Kernel A: feature net + merged 1x1 heads -> one (B*HW, 8) bf16 slab ----
    head = pl.pallas_call(
        _feature_head_kernel,
        out_shape=jax.ShapeDtypeStruct((B * HW, 8), jnp.bfloat16),
        grid_spec=pltpu.PrefetchScalarGridSpec(
            num_scalar_prefetch=0,
            grid=(pl.cdiv(B, TB),),
            in_specs=[
                pl.BlockSpec((TB, Hp, Wp, cin_pad), lambda i: (i, 0, 0, 0)),
                pl.BlockSpec((9, cin_pad, 32), c3), pl.BlockSpec((1, 32), c2),
                pl.BlockSpec((9, 32, 64), c3),      pl.BlockSpec((1, 64), c2),
                pl.BlockSpec((9, 64, 128), c3),     pl.BlockSpec((1, 128), c2),
                pl.BlockSpec((128, 8), c2),         pl.BlockSpec((1, 8), c2),
            ],
            out_specs=pl.BlockSpec((M, 8), lambda i: (i, 0)),
            scratch_shapes=[pltpu.VMEM((TB, Hp, Wp, 32), jnp.bfloat16),
                            pltpu.VMEM((TB, Hp, Wp, 64), jnp.bfloat16)],
        ),
        compiler_params=pltpu.CompilerParams(
            dimension_semantics=("parallel",),
            vmem_limit_bytes=32 * 1024 * 1024),
    )(xp, prep["w1"], prep["b1"], prep["w2"], prep["b2"],
      prep["w3"], prep["b3"], prep["wh"], prep["bh"])

    # Free row-major metadata reshape: (B*HW, 8) -> (B, HW*8).  The (hw, c8)-major
    # row order was folded into plw8 / vl1w8 at prepare_params() time.
    head_flat = head.reshape(B, HW * 8)

    # ---- Kernel B: fused policy (linear+softmax) and value (MLP+tanh) heads ----
    TBB = min(B, 256)
    prob, value = pl.pallas_call(
        _heads_kernel,
        out_shape=(jax.ShapeDtypeStruct((B, HW), jnp.float32),
                   jax.ShapeDtypeStruct((B, 1), jnp.float32)),
        grid_spec=pltpu.PrefetchScalarGridSpec(
            num_scalar_prefetch=0,
            grid=(pl.cdiv(B, TBB),),
            in_specs=[
                pl.BlockSpec((TBB, HW * 8), lambda i: (i, 0)),
                pl.BlockSpec((HW * 8, HW), c2), pl.BlockSpec((1, HW), c2),
                pl.BlockSpec((HW * 8, 64), c2), pl.BlockSpec((1, 64), c2),
                pl.BlockSpec((1, 64), c2),      pl.BlockSpec((1, 1), c2),
            ],
            out_specs=(pl.BlockSpec((TBB, HW), lambda i: (i, 0)),
                       pl.BlockSpec((TBB, 1), lambda i: (i, 0))),
        ),
        compiler_params=pltpu.CompilerParams(
            dimension_semantics=("parallel",),
            vmem_limit_bytes=32 * 1024 * 1024),
    )(head_flat, prep["plw8"], prep["plb"],
      prep["vl1w8"], prep["vl1b"], prep["vl2w"], prep["vl2b"])

    return prob, value


# ----------------------------------------------------------------------------
# Pure-JAX reference built from the ORIGINAL torch-layout params (validates the
# conv tap decomposition, head merge and the flatten weight permutation), with
# bf16 operands / f32 accumulation at the same points as the kernels.
# ----------------------------------------------------------------------------
def _ref_forward(p, x_nchw):
    f32, bf16 = jnp.float32, jnp.bfloat16
    x = jnp.transpose(x_nchw, (0, 2, 3, 1)).astype(f32)   # NHWC

    def conv3x3(a, w_oihw, b):
        Bn, H, W, cin = a.shape
        cout = w_oihw.shape[0]
        ap = jnp.pad(a, ((0, 0), (1, 1), (1, 1), (0, 0))).astype(bf16)
        wt = jnp.transpose(w_oihw, (2, 3, 1, 0)).astype(bf16)   # [3,3,cin,cout]
        acc = jnp.zeros((Bn, H, W, cout), f32)
        for kh in range(3):
            for kw in range(3):
                acc = acc + jnp.einsum("bhwc,cd->bhwd",
                                       ap[:, kh:kh + H, kw:kw + W, :], wt[kh, kw],
                                       preferred_element_type=f32)
        return jnp.maximum(acc + b, 0.0)

    f = conv3x3(x, p["c1w"], p["c1b"])
    f = conv3x3(f, p["c2w"], p["c2b"])
    f = conv3x3(f, p["c3w"], p["c3b"])
    B, H, W, _ = f.shape

    def conv1x1(a, w_oihw, b):
        cout, cin = w_oihw.shape[:2]
        y = jnp.einsum("bhwc,cd->bhwd", a.astype(bf16),
                       w_oihw.reshape(cout, cin).T.astype(bf16),
                       preferred_element_type=f32)
        return jnp.maximum(y + b, 0.0)

    pol = conv1x1(f, p["pw"], p["pb"])    # [B,H,W,4]
    val = conv1x1(f, p["vw"], p["vb"])    # [B,H,W,2]
    # torch nn.Flatten operates on NCHW
    pol_flat = jnp.transpose(pol, (0, 3, 1, 2)).reshape(B, 4 * H * W).astype(bf16)
    val_flat = jnp.transpose(val, (0, 3, 1, 2)).reshape(B, 2 * H * W).astype(bf16)

    logits = jnp.dot(pol_flat, p["plw"].astype(bf16), preferred_element_type=f32) + p["plb"]
    prob = jax.nn.softmax(logits, axis=-1)
    h = jnp.maximum(jnp.dot(val_flat, p["vl1w"].astype(bf16),
                            preferred_element_type=f32) + p["vl1b"], 0.0)
    v = jnp.dot(h, p["vl2w"], preferred_element_type=f32) + p["vl2b"]   # f32, like the kernel
    return prob, jnp.tanh(v)


if __name__ == "__main__":
    board_size = 8
    batch = 4          # with the cdiv(B,2) tile cap -> TB=2, grid=2 (exercises
                       # scratch reuse across steps and v7x dual-TC sharding)

    key = jax.random.PRNGKey(0)
    k_param, k_x = jax.random.split(key)
    params = init_params(k_param, board_size)
    prep = prepare_params(params, board_size)
    x = jax.random.normal(k_x, (batch, 4, board_size, board_size), jnp.float32)

    fwd = jax.jit(functools.partial(policy_value_net, batch_tile=64))
    prob, value = fwd(prep, x)
    jax.block_until_ready((prob, value))

    # sanity checks
    assert prob.shape == (batch, board_size * board_size)
    assert value.shape == (batch, 1)
    assert bool(jnp.all(jnp.isfinite(prob))) and bool(jnp.all(jnp.isfinite(value)))
    assert jnp.allclose(jnp.sum(prob, axis=-1), 1.0, atol=1e-3)
    assert bool(jnp.all(jnp.abs(value) <= 1.0 + 1e-5))

    # cross-check against the pure-JAX reference built from torch-layout params
    prob_ref, value_ref = jax.jit(_ref_forward)(params, x)
    assert jnp.allclose(prob, prob_ref, atol=3e-3), float(jnp.max(jnp.abs(prob - prob_ref)))
    assert jnp.allclose(value, value_ref, atol=3e-3), float(jnp.max(jnp.abs(value - value_ref)))

    print("KERNEL_OK")
</pallas_src>

<mosaic_0001>
module attributes {stable_mosaic.version = 11 : i64} {
  func.func @_heads_kernel(%arg0: i32, %arg1: memref<4x512xbf16, #tpu.memory_space<vmem>>, %arg2: memref<512x64xbf16, #tpu.memory_space<vmem>>, %arg3: memref<1x64xf32, #tpu.memory_space<vmem>>, %arg4: memref<512x64xbf16, #tpu.memory_space<vmem>>, %arg5: memref<1x64xf32, #tpu.memory_space<vmem>>, %arg6: memref<1x64xf32, #tpu.memory_space<vmem>>, %arg7: memref<1x1xf32, #tpu.memory_space<vmem>>, %arg8: memref<4x64xf32, #tpu.memory_space<vmem>>, %arg9: memref<4x1xf32, #tpu.memory_space<vmem>>) attributes {dimension_semantics = [#tpu.dimension_semantics<parallel>], iteration_bounds = array<i64: 1>, scalar_prefetch = 0 : i64, scratch_operands = 0 : i64, tpu.core_type = #tpu.core_type<tc>, window_params = [{transform_indices = @transform_0, window_bounds = array<i64: 4, 512>}, {pipeline_mode = #tpu.pipeline_mode<synchronous>, transform_indices = @transform_1, window_bounds = array<i64: 512, 64>}, {pipeline_mode = #tpu.pipeline_mode<synchronous>, transform_indices = @transform_2, window_bounds = array<i64: 1, 64>}, {pipeline_mode = #tpu.pipeline_mode<synchronous>, transform_indices = @transform_3, window_bounds = array<i64: 512, 64>}, {pipeline_mode = #tpu.pipeline_mode<synchronous>, transform_indices = @transform_4, window_bounds = array<i64: 1, 64>}, {pipeline_mode = #tpu.pipeline_mode<synchronous>, transform_indices = @transform_5, window_bounds = array<i64: 1, 64>}, {pipeline_mode = #tpu.pipeline_mode<synchronous>, transform_indices = @transform_6, window_bounds = array<i64: 1, 1>}, {transform_indices = @transform_7, window_bounds = array<i64: 4, 64>}, {transform_indices = @transform_8, window_bounds = array<i64: 4, 1>}]} {
    %c0 = arith.constant 0 : index
    %c0_0 = arith.constant 0 : index
    %0 = vector.load %arg1[%c0, %c0_0] : memref<4x512xbf16, #tpu.memory_space<vmem>>, vector<4x512xbf16>
    %c0_1 = arith.constant 0 : index
    %c0_2 = arith.constant 0 : index
    %1 = vector.load %arg2[%c0_1, %c0_2] : memref<512x64xbf16, #tpu.memory_space<vmem>>, vector<512x64xbf16>
    %cst = arith.constant dense<0.000000e+00> : vector<4x64xf32>
    %2 = tpu.matmul %0, %1, %cst {dimension_numbers = #tpu.dot_dimension_numbers<[1], [0], [0], [1], [0, 0, 1, 1], [], []>} : vector<4x512xbf16>, vector<512x64xbf16>, vector<4x64xf32> -> vector<4x64xf32>
    %c0_3 = arith.constant 0 : index
    %c0_4 = arith.constant 0 : index
    %3 = vector.load %arg3[%c0_3, %c0_4] : memref<1x64xf32, #tpu.memory_space<vmem>>, vector<1x64xf32>
    %4 = vector.broadcast %3 : vector<1x64xf32> to vector<4x64xf32>
    %5 = arith.addf %2, %4 : vector<4x64xf32>
    %cst_5 = arith.constant dense<0xFF800000> : vector<4xf32>
    %6 = vector.multi_reduction <maximumf>, %5, %cst_5 [1] : vector<4x64xf32> to vector<4xf32>
    %7 = vector.shape_cast %6 : vector<4xf32> to vector<4x1xf32>
    %8 = vector.broadcast %7 : vector<4x1xf32> to vector<4x64xf32>
    %9 = arith.subf %5, %8 : vector<4x64xf32>
    %10 = math.exp %9 : vector<4x64xf32>
    %cst_6 = arith.constant dense<0.000000e+00> : vector<4xf32>
    %11 = vector.multi_reduction <add>, %10, %cst_6 [1] : vector<4x64xf32> to vector<4xf32>
    %12 = vector.shape_cast %11 : vector<4xf32> to vector<4x1xf32>
    %13 = tpu.reciprocal %12 {approx = true} : vector<4x1xf32> -> vector<4x1xf32>
    %14 = arith.mulf %12, %13 : vector<4x1xf32>
    %cst_7 = arith.constant 2.000000e+00 : f32
    %15 = vector.broadcast %cst_7 : f32 to vector<4x1xf32>
    %16 = arith.subf %15, %14 : vector<4x1xf32>
    %17 = arith.mulf %13, %16 : vector<4x1xf32>
    %18 = vector.broadcast %17 : vector<4x1xf32> to vector<4x64xf32>
    %19 = arith.mulf %10, %18 : vector<4x64xf32>
    %c0_8 = arith.constant 0 : index
    %c0_9 = arith.constant 0 : index
    %20 = vector.load %arg8[%c0_8, %c0_9] : memref<4x64xf32, #tpu.memory_space<vmem>>, vector<4x64xf32>
    tpu.vector_store %arg8[%c0_8, %c0_9], %19 {strides = array<i32>} : memref<4x64xf32, #tpu.memory_space<vmem>>, vector<4x64xf32>,
    %c0_10 = arith.constant 0 : index
    %c0_11 = arith.constant 0 : index
    %21 = vector.load %arg4[%c0_10, %c0_11] : memref<512x64xbf16, #tpu.memory_space<vmem>>, vector<512x64xbf16>
    %cst_12 = arith.constant dense<0.000000e+00> : vector<4x64xf32>
    %22 = tpu.matmul %0, %21, %cst_12 {dimension_numbers = #tpu.dot_dimension_numbers<[1], [0], [0], [1], [0, 0, 1, 1], [], []>} : vector<4x512xbf16>, vector<512x64xbf16>, vector<4x64xf32> -> vector<4x64xf32>
    %c0_13 = arith.constant 0 : index
    %c0_14 = arith.constant 0 : index
    %23 = vector.load %arg5[%c0_13, %c0_14] : memref<1x64xf32, #tpu.memory_space<vmem>>, vector<1x64xf32>
    %24 = vector.broadcast %23 : vector<1x64xf32> to vector<4x64xf32>
    %25 = arith.addf %22, %24 : vector<4x64xf32>
    %cst_15 = arith.constant 0.000000e+00 : f32
    %26 = vector.broadcast %cst_15 : f32 to vector<4x64xf32>
    %27 = arith.maximumf %25, %26 : vector<4x64xf32>
    %c0_16 = arith.constant 0 : index
    %c0_17 = arith.constant 0 : index
    %28 = vector.load %arg6[%c0_16, %c0_17] : memref<1x64xf32, #tpu.memory_space<vmem>>, vector<1x64xf32>
    %29 = vector.broadcast %28 : vector<1x64xf32> to vector<4x64xf32>
    %30 = arith.mulf %27, %29 : vector<4x64xf32>
    %cst_18 = arith.constant dense<0.000000e+00> : vector<4xf32>
    %31 = vector.multi_reduction <add>, %30, %cst_18 [1] : vector<4x64xf32> to vector<4xf32>
    %32 = vector.shape_cast %31 : vector<4xf32> to vector<4x1xf32>
    %c0_19 = arith.constant 0 : index
    %c0_20 = arith.constant 0 : index
    %33 = vector.load %arg7[%c0_19, %c0_20] : memref<1x1xf32, #tpu.memory_space<vmem>>, vector<1x1xf32>
    %34 = vector.broadcast %33 : vector<1x1xf32> to vector<4x1xf32>
    %35 = arith.addf %32, %34 : vector<4x1xf32>
    %36 = math.tanh %35 : vector<4x1xf32>
    %c0_21 = arith.constant 0 : index
    %c0_22 = arith.constant 0 : index
    %37 = vector.load %arg9[%c0_21, %c0_22] : memref<4x1xf32, #tpu.memory_space<vmem>>, vector<4x1xf32>
    tpu.vector_store %arg9[%c0_21, %c0_22], %36 {strides = array<i32>} : memref<4x1xf32, #tpu.memory_space<vmem>>, vector<4x1xf32>,
    return
  }
  func.func @transform_0(%arg0: i32) -> (i32, i32) {
    %c0_i32 = arith.constant 0 : i32
    %c0_i32_0 = arith.constant 0 : i32
    return %arg0, %c0_i32 : i32, i32
  }
  func.func @transform_1(%arg0: i32) -> (i32, i32) {
    %c0_i32 = arith.constant 0 : i32
    %c0_i32_0 = arith.constant 0 : i32
    %c0_i32_1 = arith.constant 0 : i32
    return %c0_i32, %c0_i32_0 : i32, i32
  }
  func.func @transform_2(%arg0: i32) -> (i32, i32) {
    %c0_i32 = arith.constant 0 : i32
    %c0_i32_0 = arith.constant 0 : i32
    %c0_i32_1 = arith.constant 0 : i32
    return %c0_i32, %c0_i32_0 : i32, i32
  }
  func.func @transform_3(%arg0: i32) -> (i32, i32) {
    %c0_i32 = arith.constant 0 : i32
    %c0_i32_0 = arith.constant 0 : i32
    %c0_i32_1 = arith.constant 0 : i32
    return %c0_i32, %c0_i32_0 : i32, i32
  }
  func.func @transform_4(%arg0: i32) -> (i32, i32) {
    %c0_i32 = arith.constant 0 : i32
    %c0_i32_0 = arith.constant 0 : i32
    %c0_i32_1 = arith.constant 0 : i32
    return %c0_i32, %c0_i32_0 : i32, i32
  }
  func.func @transform_5(%arg0: i32) -> (i32, i32) {
    %c0_i32 = arith.constant 0 : i32
    %c0_i32_0 = arith.constant 0 : i32
    %c0_i32_1 = arith.constant 0 : i32
    return %c0_i32, %c0_i32_0 : i32, i32
  }
  func.func @transform_6(%arg0: i32) -> (i32, i32) {
    %c0_i32 = arith.constant 0 : i32
    %c0_i32_0 = arith.constant 0 : i32
    %c0_i32_1 = arith.constant 0 : i32
    return %c0_i32, %c0_i32_0 : i32, i32
  }
  func.func @transform_7(%arg0: i32) -> (i32, i32) {
    %c0_i32 = arith.constant 0 : i32
    %c0_i32_0 = arith.constant 0 : i32
    return %arg0, %c0_i32 : i32, i32
  }
  func.func @transform_8(%arg0: i32) -> (i32, i32) {
    %c0_i32 = arith.constant 0 : i32
    %c0_i32_0 = arith.constant 0 : i32
    return %arg0, %c0_i32 : i32, i32
  }
}

module attributes {stable_mosaic.version = 11 : i64} {
  func.func @_feature_head_kernel(%arg0: i32, %arg1: memref<2x10x10x8xbf16, #tpu.memory_space<vmem>>, %arg2: memref<9x8x32xbf16, #tpu.memory_space<vmem>>, %arg3: memref<1x32xf32, #tpu.memory_space<vmem>>, %arg4: memref<9x32x64xbf16, #tpu.memory_space<vmem>>, %arg5: memref<1x64xf32, #tpu.memory_space<vmem>>, %arg6: memref<9x64x128xbf16, #tpu.memory_space<vmem>>, %arg7: memref<1x128xf32, #tpu.memory_space<vmem>>, %arg8: memref<128x8xbf16, #tpu.memory_space<vmem>>, %arg9: memref<1x8xf32, #tpu.memory_space<vmem>>, %arg10: memref<128x8xbf16, #tpu.memory_space<vmem>>, %arg11: memref<2x10x10x32xbf16, #tpu.memory_space<vmem>>, %arg12: memref<2x10x10x64xbf16, #tpu.memory_space<vmem>>) attributes {dimension_semantics = [#tpu.dimension_semantics<parallel>], iteration_bounds = array<i64: 2>, scalar_prefetch = 0 : i64, scratch_operands = 2 : i64, tpu.core_type = #tpu.core_type<tc>, window_params = [{transform_indices = @transform_0, window_bounds = array<i64: 2, 10, 10, 8>}, {pipeline_mode = #tpu.pipeline_mode<synchronous>, transform_indices = @transform_1, window_bounds = array<i64: 9, 8, 32>}, {pipeline_mode = #tpu.pipeline_mode<synchronous>, transform_indices = @transform_2, window_bounds = array<i64: 1, 32>}, {pipeline_mode = #tpu.pipeline_mode<synchronous>, transform_indices = @transform_3, window_bounds = array<i64: 9, 32, 64>}, {pipeline_mode = #tpu.pipeline_mode<synchronous>, transform_indices = @transform_4, window_bounds = array<i64: 1, 64>}, {pipeline_mode = #tpu.pipeline_mode<synchronous>, transform_indices = @transform_5, window_bounds = array<i64: 9, 64, 128>}, {pipeline_mode = #tpu.pipeline_mode<synchronous>, transform_indices = @transform_6, window_bounds = array<i64: 1, 128>}, {pipeline_mode = #tpu.pipeline_mode<synchronous>, transform_indices = @transform_7, window_bounds = array<i64: 128, 8>}, {pipeline_mode = #tpu.pipeline_mode<synchronous>, transform_indices = @transform_8, window_bounds = array<i64: 1, 8>}, {transform_indices = @transform_9, window_bounds = array<i64: 128, 8>}]} {
    %c0 = arith.constant 0 : index
    %c0_0 = arith.constant 0 : index
    %c0_1 = arith.constant 0 : index
    %c0_2 = arith.constant 0 : index
    %0 = vector.load %arg1[%c0, %c0_0, %c0_1, %c0_2] : memref<2x10x10x8xbf16, #tpu.memory_space<vmem>>, vector<2x8x8x8xbf16>
    %1 = vector.shape_cast %0 : vector<2x8x8x8xbf16> to vector<128x8xbf16>
    %c0_3 = arith.constant 0 : index
    %c0_4 = arith.constant 0 : index
    %c0_5 = arith.constant 0 : index
    %2 = vector.load %arg2[%c0_3, %c0_4, %c0_5] : memref<9x8x32xbf16, #tpu.memory_space<vmem>>, vector<1x8x32xbf16>
    %3 = vector.shape_cast %2 : vector<1x8x32xbf16> to vector<8x32xbf16>
    %cst = arith.constant dense<0.000000e+00> : vector<128x32xf32>
    %4 = tpu.matmul %1, %3, %cst {dimension_numbers = #tpu.dot_dimension_numbers<[1], [0], [0], [1], [0, 0, 1, 1], [], []>} : vector<128x8xbf16>, vector<8x32xbf16>, vector<128x32xf32> -> vector<128x32xf32>
    %c0_6 = arith.constant 0 : index
    %c0_7 = arith.constant 0 : index
    %c1 = arith.constant 1 : index
    %c0_8 = arith.constant 0 : index
    %5 = vector.load %arg1[%c0_6, %c0_7, %c1, %c0_8] : memref<2x10x10x8xbf16, #tpu.memory_space<vmem>>, vector<2x8x8x8xbf16>
    %6 = vector.shape_cast %5 : vector<2x8x8x8xbf16> to vector<128x8xbf16>
    %c1_9 = arith.constant 1 : index
    %c0_10 = arith.constant 0 : index
    %c0_11 = arith.constant 0 : index
    %7 = vector.load %arg2[%c1_9, %c0_10, %c0_11] : memref<9x8x32xbf16, #tpu.memory_space<vmem>>, vector<1x8x32xbf16>
    %8 = vector.shape_cast %7 : vector<1x8x32xbf16> to vector<8x32xbf16>
    %cst_12 = arith.constant dense<0.000000e+00> : vector<128x32xf32>
    %9 = tpu.matmul %6, %8, %cst_12 {dimension_numbers = #tpu.dot_dimension_numbers<[1], [0], [0], [1], [0, 0, 1, 1], [], []>} : vector<128x8xbf16>, vector<8x32xbf16>, vector<128x32xf32> -> vector<128x32xf32>
    %10 = arith.addf %4, %9 : vector<128x32xf32>
    %c0_13 = arith.constant 0 : index
    %c0_14 = arith.constant 0 : index
    %c2 = arith.constant 2 : index
    %c0_15 = arith.constant 0 : index
    %11 = vector.load %arg1[%c0_13, %c0_14, %c2, %c0_15] : memref<2x10x10x8xbf16, #tpu.memory_space<vmem>>, vector<2x8x8x8xbf16>
    %12 = vector.shape_cast %11 : vector<2x8x8x8xbf16> to vector<128x8xbf16>
    %c2_16 = arith.constant 2 : index
    %c0_17 = arith.constant 0 : index
    %c0_18 = arith.constant 0 : index
    %13 = vector.load %arg2[%c2_16, %c0_17, %c0_18] : memref<9x8x32xbf16, #tpu.memory_space<vmem>>, vector<1x8x32xbf16>
    %14 = vector.shape_cast %13 : vector<1x8x32xbf16> to vector<8x32xbf16>
    %cst_19 = arith.constant dense<0.000000e+00> : vector<128x32xf32>
    %15 = tpu.matmul %12, %14, %cst_19 {dimension_numbers = #tpu.dot_dimension_numbers<[1], [0], [0], [1], [0, 0, 1, 1], [], []>} : vector<128x8xbf16>, vector<8x32xbf16>, vector<128x32xf32> -> vector<128x32xf32>
    %16 = arith.addf %10, %15 : vector<128x32xf32>
    %c0_20 = arith.constant 0 : index
    %c1_21 = arith.constant 1 : index
    %c0_22 = arith.constant 0 : index
    %c0_23 = arith.constant 0 : index
    %17 = vector.load %arg1[%c0_20, %c1_21, %c0_22, %c0_23] : memref<2x10x10x8xbf16, #tpu.memory_space<vmem>>, vector<2x8x8x8xbf16>
    %18 = vector.shape_cast %17 : vector<2x8x8x8xbf16> to vector<128x8xbf16>
    %c3 = arith.constant 3 : index
    %c0_24 = arith.constant 0 : index
    %c0_25 = arith.constant 0 : index
    %19 = vector.load %arg2[%c3, %c0_24, %c0_25] : memref<9x8x32xbf16, #tpu.memory_space<vmem>>, vector<1x8x32xbf16>
    %20 = vector.shape_cast %19 : vector<1x8x32xbf16> to vector<8x32xbf16>
    %cst_26 = arith.constant dense<0.000000e+00> : vector<128x32xf32>
    %21 = tpu.matmul %18, %20, %cst_26 {dimension_numbers = #tpu.dot_dimension_numbers<[1], [0], [0], [1], [0, 0, 1, 1], [], []>} : vector<128x8xbf16>, vector<8x32xbf16>, vector<128x32xf32> -> vector<128x32xf32>
    %22 = arith.addf %16, %21 : vector<128x32xf32>
    %c0_27 = arith.constant 0 : index
    %c1_28 = arith.constant 1 : index
    %c1_29 = arith.constant 1 : index
    %c0_30 = arith.constant 0 : index
    %23 = vector.load %arg1[%c0_27, %c1_28, %c1_29, %c0_30] : memref<2x10x10x8xbf16, #tpu.memory_space<vmem>>, vector<2x8x8x8xbf16>
    %24 = vector.shape_cast %23 : vector<2x8x8x8xbf16> to vector<128x8xbf16>
    %c4 = arith.constant 4 : index
    %c0_31 = arith.constant 0 : index
    %c0_32 = arith.constant 0 : index
    %25 = vector.load %arg2[%c4, %c0_31, %c0_32] : memref<9x8x32xbf16, #tpu.memory_space<vmem>>, vector<1x8x32xbf16>
    %26 = vector.shape_cast %25 : vector<1x8x32xbf16> to vector<8x32xbf16>
    %cst_33 = arith.constant dense<0.000000e+00> : vector<128x32xf32>
    %27 = tpu.matmul %24, %26, %cst_33 {dimension_numbers = #tpu.dot_dimension_numbers<[1], [0], [0], [1], [0, 0, 1, 1], [], []>} : vector<128x8xbf16>, vector<8x32xbf16>, vector<128x32xf32> -> vector<128x32xf32>
    %28 = arith.addf %22, %27 : vector<128x32xf32>
    %c0_34 = arith.constant 0 : index
    %c1_35 = arith.constant 1 : index
    %c2_36 = arith.constant 2 : index
    %c0_37 = arith.constant 0 : index
    %29 = vector.load %arg1[%c0_34, %c1_35, %c2_36, %c0_37] : memref<2x10x10x8xbf16, #tpu.memory_space<vmem>>, vector<2x8x8x8xbf16>
    %30 = vector.shape_cast %29 : vector<2x8x8x8xbf16> to vector<128x8xbf16>
    %c5 = arith.constant 5 : index
    %c0_38 = arith.constant 0 : index
    %c0_39 = arith.constant 0 : index
    %31 = vector.load %arg2[%c5, %c0_38, %c0_39] : memref<9x8x32xbf16, #tpu.memory_space<vmem>>, vector<1x8x32xbf16>
    %32 = vector.shape_cast %31 : vector<1x8x32xbf16> to vector<8x32xbf16>
    %cst_40 = arith.constant dense<0.000000e+00> : vector<128x32xf32>
    %33 = tpu.matmul %30, %32, %cst_40 {dimension_numbers = #tpu.dot_dimension_numbers<[1], [0], [0], [1], [0, 0, 1, 1], [], []>} : vector<128x8xbf16>, vector<8x32xbf16>, vector<128x32xf32> -> vector<128x32xf32>
    %34 = arith.addf %28, %33 : vector<128x32xf32>
    %c0_41 = arith.constant 0 : index
    %c2_42 = arith.constant 2 : index
    %c0_43 = arith.constant 0 : index
    %c0_44 = arith.constant 0 : index
    %35 = vector.load %arg1[%c0_41, %c2_42, %c0_43, %c0_44] : memref<2x10x10x8xbf16, #tpu.memory_space<vmem>>, vector<2x8x8x8xbf16>
    %36 = vector.shape_cast %35 : vector<2x8x8x8xbf16> to vector<128x8xbf16>
    %c6 = arith.constant 6 : index
    %c0_45 = arith.constant 0 : index
    %c0_46 = arith.constant 0 : index
    %37 = vector.load %arg2[%c6, %c0_45, %c0_46] : memref<9x8x32xbf16, #tpu.memory_space<vmem>>, vector<1x8x32xbf16>
    %38 = vector.shape_cast %37 : vector<1x8x32xbf16> to vector<8x32xbf16>
    %cst_47 = arith.constant dense<0.000000e+00> : vector<128x32xf32>
    %39 = tpu.matmul %36, %38, %cst_47 {dimension_numbers = #tpu.dot_dimension_numbers<[1], [0], [0], [1], [0, 0, 1, 1], [], []>} : vector<128x8xbf16>, vector<8x32xbf16>, vector<128x32xf32> -> vector<128x32xf32>
    %40 = arith.addf %34, %39 : vector<128x32xf32>
    %c0_48 = arith.constant 0 : index
    %c2_49 = arith.constant 2 : index
    %c1_50 = arith.constant 1 : index
    %c0_51 = arith.constant 0 : index
    %41 = vector.load %arg1[%c0_48, %c2_49, %c1_50, %c0_51] : memref<2x10x10x8xbf16, #tpu.memory_space<vmem>>, vector<2x8x8x8xbf16>
    %42 = vector.shape_cast %41 : vector<2x8x8x8xbf16> to vector<128x8xbf16>
    %c7 = arith.constant 7 : index
    %c0_52 = arith.constant 0 : index
    %c0_53 = arith.constant 0 : index
    %43 = vector.load %arg2[%c7, %c0_52, %c0_53] : memref<9x8x32xbf16, #tpu.memory_space<vmem>>, vector<1x8x32xbf16>
    %44 = vector.shape_cast %43 : vector<1x8x32xbf16> to vector<8x32xbf16>
    %cst_54 = arith.constant dense<0.000000e+00> : vector<128x32xf32>
    %45 = tpu.matmul %42, %44, %cst_54 {dimension_numbers = #tpu.dot_dimension_numbers<[1], [0], [0], [1], [0, 0, 1, 1], [], []>} : vector<128x8xbf16>, vector<8x32xbf16>, vector<128x32xf32> -> vector<128x32xf32>
    %46 = arith.addf %40, %45 : vector<128x32xf32>
    %c0_55 = arith.constant 0 : index
    %c2_56 = arith.constant 2 : index
    %c2_57 = arith.constant 2 : index
    %c0_58 = arith.constant 0 : index
    %47 = vector.load %arg1[%c0_55, %c2_56, %c2_57, %c0_58] : memref<2x10x10x8xbf16, #tpu.memory_space<vmem>>, vector<2x8x8x8xbf16>
    %48 = vector.shape_cast %47 : vector<2x8x8x8xbf16> to vector<128x8xbf16>
    %c8 = arith.constant 8 : index
    %c0_59 = arith.constant 0 : index
    %c0_60 = arith.constant 0 : index
    %49 = vector.load %arg2[%c8, %c0_59, %c0_60] : memref<9x8x32xbf16, #tpu.memory_space<vmem>>, vector<1x8x32xbf16>
    %50 = vector.shape_cast %49 : vector<1x8x32xbf16> to vector<8x32xbf16>
    %cst_61 = arith.constant dense<0.000000e+00> : vector<128x32xf32>
    %51 = tpu.matmul %48, %50, %cst_61 {dimension_numbers = #tpu.dot_dimension_numbers<[1], [0], [0], [1], [0, 0, 1, 1], [], []>} : vector<128x8xbf16>, vector<8x32xbf16>, vector<128x32xf32> -> vector<128x32xf32>
    %52 = arith.addf %46, %51 : vector<128x32xf32>
    %c0_62 = arith.constant 0 : index
    %c0_63 = arith.constant 0 : index
    %53 = vector.load %arg3[%c0_62, %c0_63] : memref<1x32xf32, #tpu.memory_space<vmem>>, vector<1x32xf32>
    %54 = vector.broadcast %53 : vector<1x32xf32> to vector<128x32xf32>
    %55 = arith.addf %52, %54 : vector<128x32xf32>
    %cst_64 = arith.constant 0.000000e+00 : f32
    %56 = vector.broadcast %cst_64 : f32 to vector<128x32xf32>
    %57 = arith.maximumf %55, %56 : vector<128x32xf32>
    %58 = arith.truncf %57 : vector<128x32xf32> to vector<128x32xbf16>
    %cst_65 = arith.constant 0.000000e+00 : bf16
    %59 = vector.broadcast %cst_65 : bf16 to vector<2x1x10x32xbf16>
    %c0_66 = arith.constant 0 : index
    %c0_67 = arith.constant 0 : index
    %c0_68 = arith.constant 0 : index
    %c0_69 = arith.constant 0 : index
    %60 = vector.load %arg11[%c0_66, %c0_67, %c0_68, %c0_69] : memref<2x10x10x32xbf16, #tpu.memory_space<vmem>>, vector<2x1x10x32xbf16>
    tpu.vector_store %arg11[%c0_66, %c0_67, %c0_68, %c0_69], %59 {strides = array<i32>} : memref<2x10x10x32xbf16, #tpu.memory_space<vmem>>, vector<2x1x10x32xbf16>,
    %cst_70 = arith.constant 0.000000e+00 : bf16
    %61 = vector.broadcast %cst_70 : bf16 to vector<2x1x10x32xbf16>
    %c0_71 = arith.constant 0 : index
    %c9 = arith.constant 9 : index
    %c0_72 = arith.constant 0 : index
    %c0_73 = arith.constant 0 : index
    %62 = vector.load %arg11[%c0_71, %c9, %c0_72, %c0_73] : memref<2x10x10x32xbf16, #tpu.memory_space<vmem>>, vector<2x1x10x32xbf16>
    tpu.vector_store %arg11[%c0_71, %c9, %c0_72, %c0_73], %61 {strides = array<i32>} : memref<2x10x10x32xbf16, #tpu.memory_space<vmem>>, vector<2x1x10x32xbf16>,
    %cst_74 = arith.constant 0.000000e+00 : bf16
    %63 = vector.broadcast %cst_74 : bf16 to vector<2x8x1x32xbf16>
    %c0_75 = arith.constant 0 : index
    %c1_76 = arith.constant 1 : index
    %c0_77 = arith.constant 0 : index
    %c0_78 = arith.constant 0 : index
    %64 = vector.load %arg11[%c0_75, %c1_76, %c0_77, %c0_78] : memref<2x10x10x32xbf16, #tpu.memory_space<vmem>>, vector<2x8x1x32xbf16>
    tpu.vector_store %arg11[%c0_75, %c1_76, %c0_77, %c0_78], %63 {strides = array<i32>} : memref<2x10x10x32xbf16, #tpu.memory_space<vmem>>, vector<2x8x1x32xbf16>,
    %cst_79 = arith.constant 0.000000e+00 : bf16
    %65 = vector.broadcast %cst_79 : bf16 to vector<2x8x1x32xbf16>
    %c0_80 = arith.constant 0 : index
    %c1_81 = arith.constant 1 : index
    %c9_82 = arith.constant 9 : index
    %c0_83 = arith.constant 0 : index
    %66 = vector.load %arg11[%c0_80, %c1_81, %c9_82, %c0_83] : memref<2x10x10x32xbf16, #tpu.memory_space<vmem>>, vector<2x8x1x32xbf16>
    tpu.vector_store %arg11[%c0_80, %c1_81, %c9_82, %c0_83], %65 {strides = array<i32>} : memref<2x10x10x32xbf16, #tpu.memory_space<vmem>>, vector<2x8x1x32xbf16>,
    %67 = vector.shape_cast %58 : vector<128x32xbf16> to vector<2x8x8x32xbf16>
    %c0_84 = arith.constant 0 : index
    %c1_85 = arith.constant 1 : index
    %c1_86 = arith.constant 1 : index
    %c0_87 = arith.constant 0 : index
    %68 = vector.load %arg11[%c0_84, %c1_85, %c1_86, %c0_87] : memref<2x10x10x32xbf16, #tpu.memory_space<vmem>>, vector<2x8x8x32xbf16>
    tpu.vector_store %arg11[%c0_84, %c1_85, %c1_86, %c0_87], %67 {strides = array<i32>} : memref<2x10x10x32xbf16, #tpu.memory_space<vmem>>, vector<2x8x8x32xbf16>,
    %c0_88 = arith.constant 0 : index
    %c0_89 = arith.constant 0 : index
    %c0_90 = arith.constant 0 : index
    %c0_91 = arith.constant 0 : index
    %69 = vector.load %arg11[%c0_88, %c0_89, %c0_90, %c0_91] : memref<2x10x10x32xbf16, #tpu.memory_space<vmem>>, vector<2x8x8x32xbf16>
    %70 = vector.shape_cast %69 : vector<2x8x8x32xbf16> to vector<128x32xbf16>
    %c0_92 = arith.constant 0 : index
    %c0_93 = arith.constant 0 : index
    %c0_94 = arith.constant 0 : index
    %71 = vector.load %arg4[%c0_92, %c0_93, %c0_94] : memref<9x32x64xbf16, #tpu.memory_space<vmem>>, vector<1x32x64xbf16>
    %72 = vector.shape_cast %71 : vector<1x32x64xbf16> to vector<32x64xbf16>
    %cst_95 = arith.constant dense<0.000000e+00> : vector<128x64xf32>
    %73 = tpu.matmul %70, %72, %cst_95 {dimension_numbers = #tpu.dot_dimension_numbers<[1], [0], [0], [1], [0, 0, 1, 1], [], []>} : vector<128x32xbf16>, vector<32x64xbf16>, vector<128x64xf32> -> vector<128x64xf32>
    %c0_96 = arith.constant 0 : index
    %c0_97 = arith.constant 0 : index
    %c1_98 = arith.constant 1 : index
    %c0_99 = arith.constant 0 : index
    %74 = vector.load %arg11[%c0_96, %c0_97, %c1_98, %c0_99] : memref<2x10x10x32xbf16, #tpu.memory_space<vmem>>, vector<2x8x8x32xbf16>
    %75 = vector.shape_cast %74 : vector<2x8x8x32xbf16> to vector<128x32xbf16>
    %c1_100 = arith.constant 1 : index
    %c0_101 = arith.constant 0 : index
    %c0_102 = arith.constant 0 : index
    %76 = vector.load %arg4[%c1_100, %c0_101, %c0_102] : memref<9x32x64xbf16, #tpu.memory_space<vmem>>, vector<1x32x64xbf16>
    %77 = vector.shape_cast %76 : vector<1x32x64xbf16> to vector<32x64xbf16>
    %cst_103 = arith.constant dense<0.000000e+00> : vector<128x64xf32>
    %78 = tpu.matmul %75, %77, %cst_103 {dimension_numbers = #tpu.dot_dimension_numbers<[1], [0], [0], [1], [0, 0, 1, 1], [], []>} : vector<128x32xbf16>, vector<32x64xbf16>, vector<128x64xf32> -> vector<128x64xf32>
    %79 = arith.addf %73, %78 : vector<128x64xf32>
    %c0_104 = arith.constant 0 : index
    %c0_105 = arith.constant 0 : index
    %c2_106 = arith.constant 2 : index
    %c0_107 = arith.constant 0 : index
    %80 = vector.load %arg11[%c0_104, %c0_105, %c2_106, %c0_107] : memref<2x10x10x32xbf16, #tpu.memory_space<vmem>>, vector<2x8x8x32xbf16>
    %81 = vector.shape_cast %80 : vector<2x8x8x32xbf16> to vector<128x32xbf16>
    %c2_108 = arith.constant 2 : index
    %c0_109 = arith.constant 0 : index
    %c0_110 = arith.constant 0 : index
    %82 = vector.load %arg4[%c2_108, %c0_109, %c0_110] : memref<9x32x64xbf16, #tpu.memory_space<vmem>>, vector<1x32x64xbf16>
    %83 = vector.shape_cast %82 : vector<1x32x64xbf16> to vector<32x64xbf16>
    %cst_111 = arith.constant dense<0.000000e+00> : vector<128x64xf32>
    %84 = tpu.matmul %81, %83, %cst_111 {dimension_numbers = #tpu.dot_dimension_numbers<[1], [0], [0], [1], [0, 0, 1, 1], [], []>} : vector<128x32xbf16>, vector<32x64xbf16>, vector<128x64xf32> -> vector<128x64xf32>
    %85 = arith.addf %79, %84 : vector<128x64xf32>
    %c0_112 = arith.constant 0 : index
    %c1_113 = arith.constant 1 : index
    %c0_114 = arith.constant 0 : index
    %c0_115 = arith.constant 0 : index
    %86 = vector.load %arg11[%c0_112, %c1_113, %c0_114, %c0_115] : memref<2x10x10x32xbf16, #tpu.memory_space<vmem>>, vector<2x8x8x32xbf16>
    %87 = vector.shape_cast %86 : vector<2x8x8x32xbf16> to vector<128x32xbf16>
    %c3_116 = arith.constant 3 : index
    %c0_117 = arith.constant 0 : index
    %c0_118 = arith.constant 0 : index
    %88 = vector.load %arg4[%c3_116, %c0_117, %c0_118] : memref<9x32x64xbf16, #tpu.memory_space<vmem>>, vector<1x32x64xbf16>
    %89 = vector.shape_cast %88 : vector<1x32x64xbf16> to vector<32x64xbf16>
    %cst_119 = arith.constant dense<0.000000e+00> : vector<128x64xf32>
    %90 = tpu.matmul %87, %89, %cst_119 {dimension_numbers = #tpu.dot_dimension_numbers<[1], [0], [0], [1], [0, 0, 1, 1], [], []>} : vector<128x32xbf16>, vector<32x64xbf16>, vector<128x64xf32> -> vector<128x64xf32>
    %91 = arith.addf %85, %90 : vector<128x64xf32>
    %c0_120 = arith.constant 0 : index
    %c1_121 = arith.constant 1 : index
    %c1_122 = arith.constant 1 : index
    %c0_123 = arith.constant 0 : index
    %92 = vector.load %arg11[%c0_120, %c1_121, %c1_122, %c0_123] : memref<2x10x10x32xbf16, #tpu.memory_space<vmem>>, vector<2x8x8x32xbf16>
    %93 = vector.shape_cast %92 : vector<2x8x8x32xbf16> to vector<128x32xbf16>
    %c4_124 = arith.constant 4 : index
    %c0_125 = arith.constant 0 : index
    %c0_126 = arith.constant 0 : index
    %94 = vector.load %arg4[%c4_124, %c0_125, %c0_126] : memref<9x32x64xbf16, #tpu.memory_space<vmem>>, vector<1x32x64xbf16>
    %95 = vector.shape_cast %94 : vector<1x32x64xbf16> to vector<32x64xbf16>
    %cst_127 = arith.constant dense<0.000000e+00> : vector<128x64xf32>
    %96 = tpu.matmul %93, %95, %cst_127 {dimension_numbers = #tpu.dot_dimension_numbers<[1], [0], [0], [1], [0, 0, 1, 1], [], []>} : vector<128x32xbf16>, vector<32x64xbf16>, vector<128x64xf32> -> vector<128x64xf32>
    %97 = arith.addf %91, %96 : vector<128x64xf32>
    %c0_128 = arith.constant 0 : index
    %c1_129 = arith.constant 1 : index
    %c2_130 = arith.constant 2 : index
    %c0_131 = arith.constant 0 : index
    %98 = vector.load %arg11[%c0_128, %c1_129, %c2_130, %c0_131] : memref<2x10x10x32xbf16, #tpu.memory_space<vmem>>, vector<2x8x8x32xbf16>
    %99 = vector.shape_cast %98 : vector<2x8x8x32xbf16> to vector<128x32xbf16>
    %c5_132 = arith.constant 5 : index
    %c0_133 = arith.constant 0 : index
    %c0_134 = arith.constant 0 : index
    %100 = vector.load %arg4[%c5_132, %c0_133, %c0_134] : memref<9x32x64xbf16, #tpu.memory_space<vmem>>, vector<1x32x64xbf16>
    %101 = vector.shape_cast %100 : vector<1x32x64xbf16> to vector<32x64xbf16>
    %cst_135 = arith.constant dense<0.000000e+00> : vector<128x64xf32>
    %102 = tpu.matmul %99, %101, %cst_135 {dimension_numbers = #tpu.dot_dimension_numbers<[1], [0], [0], [1], [0, 0, 1, 1], [], []>} : vector<128x32xbf16>, vector<32x64xbf16>, vector<128x64xf32> -> vector<128x64xf32>
    %103 = arith.addf %97, %102 : vector<128x64xf32>
    %c0_136 = arith.constant 0 : index
    %c2_137 = arith.constant 2 : index
    %c0_138 = arith.constant 0 : index
    %c0_139 = arith.constant 0 : index
    %104 = vector.load %arg11[%c0_136, %c2_137, %c0_138, %c0_139] : memref<2x10x10x32xbf16, #tpu.memory_space<vmem>>, vector<2x8x8x32xbf16>
    %105 = vector.shape_cast %104 : vector<2x8x8x32xbf16> to vector<128x32xbf16>
    %c6_140 = arith.constant 6 : index
    %c0_141 = arith.constant 0 : index
    %c0_142 = arith.constant 0 : index
    %106 = vector.load %arg4[%c6_140, %c0_141, %c0_142] : memref<9x32x64xbf16, #tpu.memory_space<vmem>>, vector<1x32x64xbf16>
    %107 = vector.shape_cast %106 : vector<1x32x64xbf16> to vector<32x64xbf16>
    %cst_143 = arith.constant dense<0.000000e+00> : vector<128x64xf32>
    %108 = tpu.matmul %105, %107, %cst_143 {dimension_numbers = #tpu.dot_dimension_numbers<[1], [0], [0], [1], [0, 0, 1, 1], [], []>} : vector<128x32xbf16>, vector<32x64xbf16>, vector<128x64xf32> -> vector<128x64xf32>
    %109 = arith.addf %103, %108 : vector<128x64xf32>
    %c0_144 = arith.constant 0 : index
    %c2_145 = arith.constant 2 : index
    %c1_146 = arith.constant 1 : index
    %c0_147 = arith.constant 0 : index
    %110 = vector.load %arg11[%c0_144, %c2_145, %c1_146, %c0_147] : memref<2x10x10x32xbf16, #tpu.memory_space<vmem>>, vector<2x8x8x32xbf16>
    %111 = vector.shape_cast %110 : vector<2x8x8x32xbf16> to vector<128x32xbf16>
    %c7_148 = arith.constant 7 : index
    %c0_149 = arith.constant 0 : index
    %c0_150 = arith.constant 0 : index
    %112 = vector.load %arg4[%c7_148, %c0_149, %c0_150] : memref<9x32x64xbf16, #tpu.memory_space<vmem>>, vector<1x32x64xbf16>
    %113 = vector.shape_cast %112 : vector<1x32x64xbf16> to vector<32x64xbf16>
    %cst_151 = arith.constant dense<0.000000e+00> : vector<128x64xf32>
    %114 = tpu.matmul %111, %113, %cst_151 {dimension_numbers = #tpu.dot_dimension_numbers<[1], [0], [0], [1], [0, 0, 1, 1], [], []>} : vector<128x32xbf16>, vector<32x64xbf16>, vector<128x64xf32> -> vector<128x64xf32>
    %115 = arith.addf %109, %114 : vector<128x64xf32>
    %c0_152 = arith.constant 0 : index
    %c2_153 = arith.constant 2 : index
    %c2_154 = arith.constant 2 : index
    %c0_155 = arith.constant 0 : index
    %116 = vector.load %arg11[%c0_152, %c2_153, %c2_154, %c0_155] : memref<2x10x10x32xbf16, #tpu.memory_space<vmem>>, vector<2x8x8x32xbf16>
    %117 = vector.shape_cast %116 : vector<2x8x8x32xbf16> to vector<128x32xbf16>
    %c8_156 = arith.constant 8 : index
    %c0_157 = arith.constant 0 : index
    %c0_158 = arith.constant 0 : index
    %118 = vector.load %arg4[%c8_156, %c0_157, %c0_158] : memref<9x32x64xbf16, #tpu.memory_space<vmem>>, vector<1x32x64xbf16>
    %119 = vector.shape_cast %118 : vector<1x32x64xbf16> to vector<32x64xbf16>
    %cst_159 = arith.constant dense<0.000000e+00> : vector<128x64xf32>
    %120 = tpu.matmul %117, %119, %cst_159 {dimension_numbers = #tpu.dot_dimension_numbers<[1], [0], [0], [1], [0, 0, 1, 1], [], []>} : vector<128x32xbf16>, vector<32x64xbf16>, vector<128x64xf32> -> vector<128x64xf32>
    %121 = arith.addf %115, %120 : vector<128x64xf32>
    %c0_160 = arith.constant 0 : index
    %c0_161 = arith.constant 0 : index
    %122 = vector.load %arg5[%c0_160, %c0_161] : memref<1x64xf32, #tpu.memory_space<vmem>>, vector<1x64xf32>
    %123 = vector.broadcast %122 : vector<1x64xf32> to vector<128x64xf32>
    %124 = arith.addf %121, %123 : vector<128x64xf32>
    %cst_162 = arith.constant 0.000000e+00 : f32
    %125 = vector.broadcast %cst_162 : f32 to vector<128x64xf32>
    %126 = arith.maximumf %124, %125 : vector<128x64xf32>
    %127 = arith.truncf %126 : vector<128x64xf32> to vector<128x64xbf16>
    %cst_163 = arith.constant 0.000000e+00 : bf16
    %128 = vector.broadcast %cst_163 : bf16 to vector<2x1x10x64xbf16>
    %c0_164 = arith.constant 0 : index
    %c0_165 = arith.constant 0 : index
    %c0_166 = arith.constant 0 : index
    %c0_167 = arith.constant 0 : index
    %129 = vector.load %arg12[%c0_164, %c0_165, %c0_166, %c0_167] : memref<2x10x10x64xbf16, #tpu.memory_space<vmem>>, vector<2x1x10x64xbf16>
    tpu.vector_store %arg12[%c0_164, %c0_165, %c0_166, %c0_167], %128 {strides = array<i32>} : memref<2x10x10x64xbf16, #tpu.memory_space<vmem>>, vector<2x1x10x64xbf16>,
    %cst_168 = arith.constant 0.000000e+00 : bf16
    %130 = vector.broadcast %cst_168 : bf16 to vector<2x1x10x64xbf16>
    %c0_169 = arith.constant 0 : index
    %c9_170 = arith.constant 9 : index
    %c0_171 = arith.constant 0 : index
    %c0_172 = arith.constant 0 : index
    %131 = vector.load %arg12[%c0_169, %c9_170, %c0_171, %c0_172] : memref<2x10x10x64xbf16, #tpu.memory_space<vmem>>, vector<2x1x10x64xbf16>
    tpu.vector_store %arg12[%c0_169, %c9_170, %c0_171, %c0_172], %130 {strides = array<i32>} : memref<2x10x10x64xbf16, #tpu.memory_space<vmem>>, vector<2x1x10x64xbf16>,
    %cst_173 = arith.constant 0.000000e+00 : bf16
    %132 = vector.broadcast %cst_173 : bf16 to vector<2x8x1x64xbf16>
    %c0_174 = arith.constant 0 : index
    %c1_175 = arith.constant 1 : index
    %c0_176 = arith.constant 0 : index
    %c0_177 = arith.constant 0 : index
    %133 = vector.load %arg12[%c0_174, %c1_175, %c0_176, %c0_177] : memref<2x10x10x64xbf16, #tpu.memory_space<vmem>>, vector<2x8x1x64xbf16>
    tpu.vector_store %arg12[%c0_174, %c1_175, %c0_176, %c0_177], %132 {strides = array<i32>} : memref<2x10x10x64xbf16, #tpu.memory_space<vmem>>, vector<2x8x1x64xbf16>,
    %cst_178 = arith.constant 0.000000e+00 : bf16
    %134 = vector.broadcast %cst_178 : bf16 to vector<2x8x1x64xbf16>
    %c0_179 = arith.constant 0 : index
    %c1_180 = arith.constant 1 : index
    %c9_181 = arith.constant 9 : index
    %c0_182 = arith.constant 0 : index
    %135 = vector.load %arg12[%c0_179, %c1_180, %c9_181, %c0_182] : memref<2x10x10x64xbf16, #tpu.memory_space<vmem>>, vector<2x8x1x64xbf16>
    tpu.vector_store %arg12[%c0_179, %c1_180, %c9_181, %c0_182], %134 {strides = array<i32>} : memref<2x10x10x64xbf16, #tpu.memory_space<vmem>>, vector<2x8x1x64xbf16>,
    %136 = vector.shape_cast %127 : vector<128x64xbf16> to vector<2x8x8x64xbf16>
    %c0_183 = arith.constant 0 : index
    %c1_184 = arith.constant 1 : index
    %c1_185 = arith.constant 1 : index
    %c0_186 = arith.constant 0 : index
    %137 = vector.load %arg12[%c0_183, %c1_184, %c1_185, %c0_186] : memref<2x10x10x64xbf16, #tpu.memory_space<vmem>>, vector<2x8x8x64xbf16>
    tpu.vector_store %arg12[%c0_183, %c1_184, %c1_185, %c0_186], %136 {strides = array<i32>} : memref<2x10x10x64xbf16, #tpu.memory_space<vmem>>, vector<2x8x8x64xbf16>,
    %c0_187 = arith.constant 0 : index
    %c0_188 = arith.constant 0 : index
    %c0_189 = arith.constant 0 : index
    %c0_190 = arith.constant 0 : index
    %138 = vector.load %arg12[%c0_187, %c0_188, %c0_189, %c0_190] : memref<2x10x10x64xbf16, #tpu.memory_space<vmem>>, vector<2x8x8x64xbf16>
    %139 = vector.shape_cast %138 : vector<2x8x8x64xbf16> to vector<128x64xbf16>
    %c0_191 = arith.constant 0 : index
    %c0_192 = arith.constant 0 : index
    %c0_193 = arith.constant 0 : index
    %140 = vector.load %arg6[%c0_191, %c0_192, %c0_193] : memref<9x64x128xbf16, #tpu.memory_space<vmem>>, vector<1x64x128xbf16>
    %141 = vector.shape_cast %140 : vector<1x64x128xbf16> to vector<64x128xbf16>
    %cst_194 = arith.constant dense<0.000000e+00> : vector<128x128xf32>
    %142 = tpu.matmul %139, %141, %cst_194 {dimension_numbers = #tpu.dot_dimension_numbers<[1], [0], [0], [1], [0, 0, 1, 1], [], []>} : vector<128x64xbf16>, vector<64x128xbf16>, vector<128x128xf32> -> vector<128x128xf32>
    %c0_195 = arith.constant 0 : index
    %c0_196 = arith.constant 0 : index
    %c1_197 = arith.constant 1 : index
    %c0_198 = arith.constant 0 : index
    %143 = vector.load %arg12[%c0_195, %c0_196, %c1_197, %c0_198] : memref<2x10x10x64xbf16, #tpu.memory_space<vmem>>, vector<2x8x8x64xbf16>
    %144 = vector.shape_cast %143 : vector<2x8x8x64xbf16> to vector<128x64xbf16>
    %c1_199 = arith.constant 1 : index
    %c0_200 = arith.constant 0 : index
    %c0_201 = arith.constant 0 : index
    %145 = vector.load %arg6[%c1_199, %c0_200, %c0_201] : memref<9x64x128xbf16, #tpu.memory_space<vmem>>, vector<1x64x128xbf16>
    %146 = vector.shape_cast %145 : vector<1x64x128xbf16> to vector<64x128xbf16>
    %cst_202 = arith.constant dense<0.000000e+00> : vector<128x128xf32>
    %147 = tpu.matmul %144, %146, %cst_202 {dimension_numbers = #tpu.dot_dimension_numbers<[1], [0], [0], [1], [0, 0, 1, 1], [], []>} : vector<128x64xbf16>, vector<64x128xbf16>, vector<128x128xf32> -> vector<128x128xf32>
    %148 = arith.addf %142, %147 : vector<128x128xf32>
    %c0_203 = arith.constant 0 : index
    %c0_204 = arith.constant 0 : index
    %c2_205 = arith.constant 2 : index
    %c0_206 = arith.constant 0 : index
    %149 = vector.load %arg12[%c0_203, %c0_204, %c2_205, %c0_206] : memref<2x10x10x64xbf16, #tpu.memory_space<vmem>>, vector<2x8x8x64xbf16>
    %150 = vector.shape_cast %149 : vector<2x8x8x64xbf16> to vector<128x64xbf16>
    %c2_207 = arith.constant 2 : index
    %c0_208 = arith.constant 0 : index
    %c0_209 = arith.constant 0 : index
    %151 = vector.load %arg6[%c2_207, %c0_208, %c0_209] : memref<9x64x128xbf16, #tpu.memory_space<vmem>>, vector<1x64x128xbf16>
    %152 = vector.shape_cast %151 : vector<1x64x128xbf16> to vector<64x128xbf16>
    %cst_210 = arith.constant dense<0.000000e+00> : vector<128x128xf32>
    %153 = tpu.matmul %150, %152, %cst_210 {dimension_numbers = #tpu.dot_dimension_numbers<[1], [0], [0], [1], [0, 0, 1, 1], [], []>} : vector<128x64xbf16>, vector<64x128xbf16>, vector<128x128xf32> -> vector<128x128xf32>
    %154 = arith.addf %148, %153 : vector<128x128xf32>
    %c0_211 = arith.constant 0 : index
    %c1_212 = arith.constant 1 : index
    %c0_213 = arith.constant 0 : index
    %c0_214 = arith.constant 0 : index
    %155 = vector.load %arg12[%c0_211, %c1_212, %c0_213, %c0_214] : memref<2x10x10x64xbf16, #tpu.memory_space<vmem>>, vector<2x8x8x64xbf16>
    %156 = vector.shape_cast %155 : vector<2x8x8x64xbf16> to vector<128x64xbf16>
    %c3_215 = arith.constant 3 : index
    %c0_216 = arith.constant 0 : index
    %c0_217 = arith.constant 0 : index
    %157 = vector.load %arg6[%c3_215, %c0_216, %c0_217] : memref<9x64x128xbf16, #tpu.memory_space<vmem>>, vector<1x64x128xbf16>
    %158 = vector.shape_cast %157 : vector<1x64x128xbf16> to vector<64x128xbf16>
    %cst_218 = arith.constant dense<0.000000e+00> : vector<128x128xf32>
    %159 = tpu.matmul %156, %158, %cst_218 {dimension_numbers = #tpu.dot_dimension_numbers<[1], [0], [0], [1], [0, 0, 1, 1], [], []>} : vector<128x64xbf16>, vector<64x128xbf16>, vector<128x128xf32> -> vector<128x128xf32>
    %160 = arith.addf %154, %159 : vector<128x128xf32>
    %c0_219 = arith.constant 0 : index
    %c1_220 = arith.constant 1 : index
    %c1_221 = arith.constant 1 : index
    %c0_222 = arith.constant 0 : index
    %161 = vector.load %arg12[%c0_219, %c1_220, %c1_221, %c0_222] : memref<2x10x10x64xbf16, #tpu.memory_space<vmem>>, vector<2x8x8x64xbf16>
    %162 = vector.shape_cast %161 : vector<2x8x8x64xbf16> to vector<128x64xbf16>
    %c4_223 = arith.constant 4 : index
    %c0_224 = arith.constant 0 : index
    %c0_225 = arith.constant 0 : index
    %163 = vector.load %arg6[%c4_223, %c0_224, %c0_225] : memref<9x64x128xbf16, #tpu.memory_space<vmem>>, vector<1x64x128xbf16>
    %164 = vector.shape_cast %163 : vector<1x64x128xbf16> to vector<64x128xbf16>
    %cst_226 = arith.constant dense<0.000000e+00> : vector<128x128xf32>
    %165 = tpu.matmul %162, %164, %cst_226 {dimension_numbers = #tpu.dot_dimension_numbers<[1], [0], [0], [1], [0, 0, 1, 1], [], []>} : vector<128x64xbf16>, vector<64x128xbf16>, vector<128x128xf32> -> vector<128x128xf32>
    %166 = arith.addf %160, %165 : vector<128x128xf32>
    %c0_227 = arith.constant 0 : index
    %c1_228 = arith.constant 1 : index
    %c2_229 = arith.constant 2 : index
    %c0_230 = arith.constant 0 : index
    %167 = vector.load %arg12[%c0_227, %c1_228, %c2_229, %c0_230] : memref<2x10x10x64xbf16, #tpu.memory_space<vmem>>, vector<2x8x8x64xbf16>
    %168 = vector.shape_cast %167 : vector<2x8x8x64xbf16> to vector<128x64xbf16>
    %c5_231 = arith.constant 5 : index
    %c0_232 = arith.constant 0 : index
    %c0_233 = arith.constant 0 : index
    %169 = vector.load %arg6[%c5_231, %c0_232, %c0_233] : memref<9x64x128xbf16, #tpu.memory_space<vmem>>, vector<1x64x128xbf16>
    %170 = vector.shape_cast %169 : vector<1x64x128xbf16> to vector<64x128xbf16>
    %cst_234 = arith.constant dense<0.000000e+00> : vector<128x128xf32>
    %171 = tpu.matmul %168, %170, %cst_234 {dimension_numbers = #tpu.dot_dimension_numbers<[1], [0], [0], [1], [0, 0, 1, 1], [], []>} : vector<128x64xbf16>, vector<64x128xbf16>, vector<128x128xf32> -> vector<128x128xf32>
    %172 = arith.addf %166, %171 : vector<128x128xf32>
    %c0_235 = arith.constant 0 : index
    %c2_236 = arith.constant 2 : index
    %c0_237 = arith.constant 0 : index
    %c0_238 = arith.constant 0 : index
    %173 = vector.load %arg12[%c0_235, %c2_236, %c0_237, %c0_238] : memref<2x10x10x64xbf16, #tpu.memory_space<vmem>>, vector<2x8x8x64xbf16>
    %174 = vector.shape_cast %173 : vector<2x8x8x64xbf16> to vector<128x64xbf16>
    %c6_239 = arith.constant 6 : index
    %c0_240 = arith.constant 0 : index
    %c0_241 = arith.constant 0 : index
    %175 = vector.load %arg6[%c6_239, %c0_240, %c0_241] : memref<9x64x128xbf16, #tpu.memory_space<vmem>>, vector<1x64x128xbf16>
    %176 = vector.shape_cast %175 : vector<1x64x128xbf16> to vector<64x128xbf16>
    %cst_242 = arith.constant dense<0.000000e+00> : vector<128x128xf32>
    %177 = tpu.matmul %174, %176, %cst_242 {dimension_numbers = #tpu.dot_dimension_numbers<[1], [0], [0], [1], [0, 0, 1, 1], [], []>} : vector<128x64xbf16>, vector<64x128xbf16>, vector<128x128xf32> -> vector<128x128xf32>
    %178 = arith.addf %172, %177 : vector<128x128xf32>
    %c0_243 = arith.constant 0 : index
    %c2_244 = arith.constant 2 : index
    %c1_245 = arith.constant 1 : index
    %c0_246 = arith.constant 0 : index
    %179 = vector.load %arg12[%c0_243, %c2_244, %c1_245, %c0_246] : memref<2x10x10x64xbf16, #tpu.memory_space<vmem>>, vector<2x8x8x64xbf16>
    %180 = vector.shape_cast %179 : vector<2x8x8x64xbf16> to vector<128x64xbf16>
    %c7_247 = arith.constant 7 : index
    %c0_248 = arith.constant 0 : index
    %c0_249 = arith.constant 0 : index
    %181 = vector.load %arg6[%c7_247, %c0_248, %c0_249] : memref<9x64x128xbf16, #tpu.memory_space<vmem>>, vector<1x64x128xbf16>
    %182 = vector.shape_cast %181 : vector<1x64x128xbf16> to vector<64x128xbf16>
    %cst_250 = arith.constant dense<0.000000e+00> : vector<128x128xf32>
    %183 = tpu.matmul %180, %182, %cst_250 {dimension_numbers = #tpu.dot_dimension_numbers<[1], [0], [0], [1], [0, 0, 1, 1], [], []>} : vector<128x64xbf16>, vector<64x128xbf16>, vector<128x128xf32> -> vector<128x128xf32>
    %184 = arith.addf %178, %183 : vector<128x128xf32>
    %c0_251 = arith.constant 0 : index
    %c2_252 = arith.constant 2 : index
    %c2_253 = arith.constant 2 : index
    %c0_254 = arith.constant 0 : index
    %185 = vector.load %arg12[%c0_251, %c2_252, %c2_253, %c0_254] : memref<2x10x10x64xbf16, #tpu.memory_space<vmem>>, vector<2x8x8x64xbf16>
    %186 = vector.shape_cast %185 : vector<2x8x8x64xbf16> to vector<128x64xbf16>
    %c8_255 = arith.constant 8 : index
    %c0_256 = arith.constant 0 : index
    %c0_257 = arith.constant 0 : index
    %187 = vector.load %arg6[%c8_255, %c0_256, %c0_257] : memref<9x64x128xbf16, #tpu.memory_space<vmem>>, vector<1x64x128xbf16>
    %188 = vector.shape_cast %187 : vector<1x64x128xbf16> to vector<64x128xbf16>
    %cst_258 = arith.constant dense<0.000000e+00> : vector<128x128xf32>
    %189 = tpu.matmul %186, %188, %cst_258 {dimension_numbers = #tpu.dot_dimension_numbers<[1], [0], [0], [1], [0, 0, 1, 1], [], []>} : vector<128x64xbf16>, vector<64x128xbf16>, vector<128x128xf32> -> vector<128x128xf32>
    %190 = arith.addf %184, %189 : vector<128x128xf32>
    %c0_259 = arith.constant 0 : index
    %c0_260 = arith.constant 0 : index
    %191 = vector.load %arg7[%c0_259, %c0_260] : memref<1x128xf32, #tpu.memory_space<vmem>>, vector<1x128xf32>
    %192 = vector.broadcast %191 : vector<1x128xf32> to vector<128x128xf32>
    %193 = arith.addf %190, %192 : vector<128x128xf32>
    %cst_261 = arith.constant 0.000000e+00 : f32
    %194 = vector.broadcast %cst_261 : f32 to vector<128x128xf32>
    %195 = arith.maximumf %193, %194 : vector<128x128xf32>
    %196 = arith.truncf %195 : vector<128x128xf32> to vector<128x128xbf16>
    %c0_262 = arith.constant 0 : index
    %c0_263 = arith.constant 0 : index
    %197 = vector.load %arg8[%c0_262, %c0_263] : memref<128x8xbf16, #tpu.memory_space<vmem>>, vector<128x8xbf16>
    %cst_264 = arith.constant dense<0.000000e+00> : vector<128x8xf32>
    %198 = tpu.matmul %196, %197, %cst_264 {dimension_numbers = #tpu.dot_dimension_numbers<[1], [0], [0], [1], [0, 0, 1, 1], [], []>} : vector<128x128xbf16>, vector<128x8xbf16>, vector<128x8xf32> -> vector<128x8xf32>
    %c0_265 = arith.constant 0 : index
    %c0_266 = arith.constant 0 : index
    %199 = vector.load %arg9[%c0_265, %c0_266] : memref<1x8xf32, #tpu.memory_space<vmem>>, vector<1x8xf32>
    %200 = vector.broadcast %199 : vector<1x8xf32> to vector<128x8xf32>
    %201 = arith.addf %198, %200 : vector<128x8xf32>
    %cst_267 = arith.constant 0.000000e+00 : f32
    %202 = vector.broadcast %cst_267 : f32 to vector<128x8xf32>
    %203 = arith.maximumf %201, %202 : vector<128x8xf32>
    %204 = arith.truncf %203 : vector<128x8xf32> to vector<128x8xbf16>
    %c0_268 = arith.constant 0 : index
    %c0_269 = arith.constant 0 : index
    %205 = vector.load %arg10[%c0_268, %c0_269] : memref<128x8xbf16, #tpu.memory_space<vmem>>, vector<128x8xbf16>
    tpu.vector_store %arg10[%c0_268, %c0_269], %204 {strides = array<i32>} : memref<128x8xbf16, #tpu.memory_space<vmem>>, vector<128x8xbf16>,
    return
  }
  func.func @transform_0(%arg0: i32) -> (i32, i32, i32, i32) {
    %c0_i32 = arith.constant 0 : i32
    %c0_i32_0 = arith.constant 0 : i32
    %c0_i32_1 = arith.constant 0 : i32
    %c0_i32_2 = arith.constant 0 : i32
    return %arg0, %c0_i32, %c0_i32_0, %c0_i32_1 : i32, i32, i32, i32
  }
  func.func @transform_1(%arg0: i32) -> (i32, i32, i32) {
    %c0_i32 = arith.constant 0 : i32
    %c0_i32_0 = arith.constant 0 : i32
    %c0_i32_1 = arith.constant 0 : i32
    %c0_i32_2 = arith.constant 0 : i32
    return %c0_i32, %c0_i32_0, %c0_i32_1 : i32, i32, i32
  }
  func.func @transform_2(%arg0: i32) -> (i32, i32) {
    %c0_i32 = arith.constant 0 : i32
    %c0_i32_0 = arith.constant 0 : i32
    %c0_i32_1 = arith.constant 0 : i32
    return %c0_i32, %c0_i32_0 : i32, i32
  }
  func.func @transform_3(%arg0: i32) -> (i32, i32, i32) {
    %c0_i32 = arith.constant 0 : i32
    %c0_i32_0 = arith.constant 0 : i32
    %c0_i32_1 = arith.constant 0 : i32
    %c0_i32_2 = arith.constant 0 : i32
    return %c0_i32, %c0_i32_0, %c0_i32_1 : i32, i32, i32
  }
  func.func @transform_4(%arg0: i32) -> (i32, i32) {
    %c0_i32 = arith.constant 0 : i32
    %c0_i32_0 = arith.constant 0 : i32
    %c0_i32_1 = arith.constant 0 : i32
    return %c0_i32, %c0_i32_0 : i32, i32
  }
  func.func @transform_5(%arg0: i32) -> (i32, i32, i32) {
    %c0_i32 = arith.constant 0 : i32
    %c0_i32_0 = arith.constant 0 : i32
    %c0_i32_1 = arith.constant 0 : i32
    %c0_i32_2 = arith.constant 0 : i32
    return %c0_i32, %c0_i32_0, %c0_i32_1 : i32, i32, i32
  }
  func.func @transform_6(%arg0: i32) -> (i32, i32) {
    %c0_i32 = arith.constant 0 : i32
    %c0_i32_0 = arith.constant 0 : i32
    %c0_i32_1 = arith.constant 0 : i32
    return %c0_i32, %c0_i32_0 : i32, i32
  }
  func.func @transform_7(%arg0: i32) -> (i32, i32) {
    %c0_i32 = arith.constant 0 : i32
    %c0_i32_0 = arith.constant 0 : i32
    %c0_i32_1 = arith.constant 0 : i32
    return %c0_i32, %c0_i32_0 : i32, i32
  }
  func.func @transform_8(%arg0: i32) -> (i32, i32) {
    %c0_i32 = arith.constant 0 : i32
    %c0_i32_0 = arith.constant 0 : i32
    %c0_i32_1 = arith.constant 0 : i32
    return %c0_i32, %c0_i32_0 : i32, i32
  }
  func.func @transform_9(%arg0: i32) -> (i32, i32) {
    %c0_i32 = arith.constant 0 : i32
    %c0_i32_0 = arith.constant 0 : i32
    return %arg0, %c0_i32 : i32, i32
  }
}

</mosaic_0001>

<bundles_post_ra>
// kernel: policy_value_net.3
= control target key start
LH: loop header
LB: loop body
LE: loop exit
PB: predicated region body
PF: predicated region fallthrough
CT: control target
= control target key end

     0   :  { %s1325_s0 = inlined_call_operand.vmem [shape: bf16[4,512], index: 0, kind: input, shape index: {}]   ;;  %s1326_s1 = inlined_call_operand.vmem [shape: bf16[512,64], index: 1, kind: input, shape index: {}]   ;;  %s1327_s2 = inlined_call_operand.vmem [shape: f32[1,64], index: 2, kind: input, shape index: {}]   ;;  %s1328_s3 = inlined_call_operand.vmem [shape: bf16[512,64], index: 3, kind: input, shape index: {}]   ;;  %s1329_s4 = inlined_call_operand.vmem [shape: f32[1,64], index: 4, kind: input, shape index: {}]   ;;  %s1330_s5 = inlined_call_operand.vmem [shape: f32[1,64], index: 5, kind: input, shape index: {}]   ;;  %s1331_s6 = inlined_call_operand.<no memory space> [shape: f32[1,1], index: 6, kind: input, shape index: {}]   ;;  %s1332_s7 = inlined_call_operand.hbm [shape: f32[4,64], index: 7, kind: output, shape index: {0}]   ;;  %s1333_s8 = inlined_call_operand.vmem [shape: f32[4,1], index: 8, kind: output, shape index: {1}]  }
   0x1   :  { %v14_v0 = vstv %s1331_s6 }
   0x2   :  { %15 = vst [vmem:[#allocation2] sm:$0x1] %v14_v0 }
   0x3   :  { %v956_v1 = vld [vmem:[%s1326_s1 + $0x78] sm:$0xff]   ;;  %v960_v5 = vld [vmem:[%s1326_s1 + $0x70] sm:$0xff]   ;;  %v964_v9 = vld [vmem:[%s1326_s1 + $0x68] sm:$0xff]   ;;  %v109_v29 = vlaneseq  ;;  %v1049_v37 = vmov 1983009808  }
   0x4   :  { %v957_v2 = vld [vmem:[%s1326_s1 + $0xf8] sm:$0xff]   ;;  %866 = vmatprep.subr.bf16.mxu0 %v956_v1  ;;  %v961_v6 = vld [vmem:[%s1326_s1 + $0xf0] sm:$0xff]   ;;  %v965_v10 = vld [vmem:[%s1326_s1 + $0xe8] sm:$0xff]   ;;  %v107_v38 = vunpack.c.l.s4 %v1049_v37 }
   0x5   :  { %v958_v3 = vld [vmem:[%s1326_s1 + $0x38] sm:$0xff]   ;;  %888 = vmatprep.subr.bf16.mxu1 %v957_v2  ;;  %v962_v7 = vld [vmem:[%s1326_s1 + $0x30] sm:$0xff]   ;;  %v966_v11 = vld [vmem:[%s1326_s1 + $0x28] sm:$0xff]   ;;  %v110_v34 = vshrl.u32 %v109_v29, 7 }
   0x6   :  { %v959_v4 = vld [vmem:[%s1326_s1 + $0xb8] sm:$0xff]   ;;  %867 = vmatpush3.bf16.msra.mxu0 %v958_v3  ;;  %v963_v8 = vld [vmem:[%s1326_s1 + $0xb0] sm:$0xff]   ;;  %v967_v12 = vld [vmem:[%s1326_s1 + $0xa8] sm:$0xff]   ;;  %v108_v39 = vunpack.c.0.s8 %v107_v38 }
   0x7   :  { %889 = vmatpush3.bf16.msra.mxu1 %v959_v4  ;;  %868 = vmatprep.subr.bf16.mxu0 %v960_v5  ;;  %v968_v13 = vld [vmem:[%s1326_s1 + $0x60] sm:$0xff]   ;;  %v972_v17 = vld [vmem:[%s1326_s1 + $0x58] sm:$0xff]   ;;  %v976_v21 = vld [vmem:[%s1326_s1 + $0x50] sm:$0xff]  }
   0x8   :  { %890 = vmatprep.subr.bf16.mxu1 %v961_v6  ;;  %v969_v14 = vld [vmem:[%s1326_s1 + $0xe0] sm:$0xff]   ;;  %v973_v18 = vld [vmem:[%s1326_s1 + $0xd8] sm:$0xff]   ;;  %v977_v22 = vld [vmem:[%s1326_s1 + $0xd0] sm:$0xff]   ;;  %v111_v42 = vsub.s32 %v108_v39, %v110_v34 }
   0x9   :  { %v970_v15 = vld [vmem:[%s1326_s1 + $0x20] sm:$0xff]   ;;  %v974_v19 = vld [vmem:[%s1326_s1 + $0x18] sm:$0xff]   ;;  %v978_v23 = vld [vmem:[%s1326_s1 + $0x10] sm:$0xff]  }
   0xa   :  { %869 = vmatpush3.bf16.msra.mxu0 %v962_v7  ;;  %v971_v16 = vld [vmem:[%s1326_s1 + $0xa0] sm:$0xff]   ;;  %v975_v20 = vld [vmem:[%s1326_s1 + $0x98] sm:$0xff]   ;;  %v979_v24 = vld [vmem:[%s1326_s1 + $0x90] sm:$0xff]  }
   0xb   :  { %891 = vmatpush3.bf16.msra.mxu1 %v963_v8  ;;  %870 = vmatprep.subr.bf16.mxu0 %v964_v9  ;;  %v980_v25 = vld [vmem:[%s1326_s1 + $0x48] sm:$0xff]   ;;  %v984_v30 = vld [vmem:[%s1326_s1 + $0x40] sm:$0xff]   ;;  %v989_v36 = vld [vmem:[%s1328_s3 + $0x78] sm:$0xff]  }
   0xc   :  { %892 = vmatprep.subr.bf16.mxu1 %v965_v10  ;;  %v981_v26 = vld [vmem:[%s1326_s1 + $0xc8] sm:$0xff]   ;;  %v985_v31 = vld [vmem:[%s1326_s1 + $0xc0] sm:$0xff]   ;;  %v991_v41 = vld [vmem:[%s1328_s3 + $0xf8] sm:$0xff]  }
   0xd   :  { %v982_v27 = vld [vmem:[%s1326_s1 + $0x8] sm:$0xff]   ;;  %v986_v32 = vld [vmem:[%s1326_s1] sm:$0xff]   ;;  %v990_v45 = vld [vmem:[%s1328_s3 + $0x38] sm:$0xff]  }
   0xe   :  { %871 = vmatpush3.bf16.msra.mxu0 %v966_v11  ;;  %v983_v28 = vld [vmem:[%s1326_s1 + $0x88] sm:$0xff]   ;;  %v987_v33 = vld [vmem:[%s1326_s1 + $0x80] sm:$0xff]   ;;  %v992_v46 = vld [vmem:[%s1328_s3 + $0xb8] sm:$0xff]  }
   0xf   :  { %893 = vmatpush3.bf16.msra.mxu1 %v967_v12  ;;  %872 = vmatprep.subr.bf16.mxu0 %v968_v13  ;;  %v32_v35 = vld [vmem:[%s1325_s0] sm:$0xff]  ;;  %v993_v49 = vld [vmem:[%s1328_s3 + $0x70] sm:$0xff]   ;;  %v997_v53 = vld [vmem:[%s1328_s3 + $0x68] sm:$0xff]  }
  0x10   :  { %894 = vmatprep.subr.bf16.mxu1 %v969_v14  ;;  %v105_v40 = vcombine.high %v32_v35, %v32_v35  ;;  %v1204_v43 = vrot.slane %v32_v35, %v111_v42  ;;  %v995_v50 = vld [vmem:[%s1328_s3 + $0xf0] sm:$0xff]   ;;  %v999_v54 = vld [vmem:[%s1328_s3 + $0xe8] sm:$0xff]   ;;  %v1001_v57 = vld [vmem:[%s1328_s3 + $0x60] sm:$0xff]  }
  0x11   :  { %v994_v51 = vld [vmem:[%s1328_s3 + $0x30] sm:$0xff]   ;;  %v998_v55 = vld [vmem:[%s1328_s3 + $0x28] sm:$0xff]   ;;  %v1003_v58 = vld [vmem:[%s1328_s3 + $0xe0] sm:$0xff]  }
  0x12   :  { %873 = vmatpush3.bf16.msra.mxu0 %v970_v15  ;;  %v1206_v44 = vrot.slane %v105_v40, %v111_v42  ;;  %v120_v47 = vcombine.high %v1204_v43, %v1204_v43  ;;  %v996_v52 = vld [vmem:[%s1328_s3 + $0xb0] sm:$0xff]   ;;  %v1000_v56 = vld [vmem:[%s1328_s3 + $0xa8] sm:$0xff]   ;;  %v1002_v59 = vld [vmem:[%s1328_s3 + $0x20] sm:$0xff]  }
  0x13   :  { %895 = vmatpush3.bf16.msra.mxu1 %v971_v16  ;;  %874 = vmatprep.subr.bf16.mxu0 %v972_v17  ;;  %v1004_v60 = vld [vmem:[%s1328_s3 + $0xa0] sm:$0xff]   ;;  %v1005_v61 = vld [vmem:[%s1328_s3 + $0x58] sm:$0xff]   ;;  %v1009_v1 = vld [vmem:[%s1328_s3 + $0x50] sm:$0xff]  }
  0x14   :  { %896 = vmatprep.subr.bf16.mxu1 %v973_v18  ;;  %v121_v48 = vcombine.high %v1206_v44, %v1206_v44  ;;  %350 = vmatprep.mubr.bf16.mxu0 %v120_v47  ;;  %v1007_v62 = vld [vmem:[%s1328_s3 + $0xd8] sm:$0xff]   ;;  %v1011_v2 = vld [vmem:[%s1328_s3 + $0xd0] sm:$0xff]   ;;  %v1013_v5 = vld [vmem:[%s1328_s3 + $0x48] sm:$0xff]  }
  0x15   :  { %v1006_v63 = vld [vmem:[%s1328_s3 + $0x18] sm:$0xff]   ;;  %v1010_v3 = vld [vmem:[%s1328_s3 + $0x10] sm:$0xff]   ;;  %v1015_v6 = vld [vmem:[%s1328_s3 + $0xc8] sm:$0xff]  }
  0x16   :  { %875 = vmatpush3.bf16.msra.mxu0 %v974_v19  ;;  %390 = vmatprep.mubr.bf16.mxu1 %v121_v48  ;;  %v1008_v0 = vld [vmem:[%s1328_s3 + $0x98] sm:$0xff]   ;;  %v1012_v4 = vld [vmem:[%s1328_s3 + $0x90] sm:$0xff]  }
  0x17   :  { %897 = vmatpush3.bf16.msra.mxu1 %v975_v20  ;;  %876 = vmatprep.subr.bf16.mxu0 %v976_v21 }
  0x18   :  { %898 = vmatprep.subr.bf16.mxu1 %v977_v22 }
  0x1a   :  { %877 = vmatpush3.bf16.msra.mxu0 %v978_v23 }
  0x1b   :  { %899 = vmatpush3.bf16.msra.mxu1 %v979_v24  ;;  %878 = vmatprep.subr.bf16.mxu0 %v980_v25 }
  0x1c   :  { %900 = vmatprep.subr.bf16.mxu1 %v981_v26 }
  0x1e   :  { %879 = vmatpush3.bf16.msra.mxu0 %v982_v27 }
  0x1f   :  { %901 = vmatpush3.bf16.msra.mxu1 %v983_v28  ;;  %880 = vmatprep.subr.bf16.mxu0 %v984_v30 }
  0x20   :  { %902 = vmatprep.subr.bf16.mxu1 %v985_v31 }
  0x22   :  { %881 = vmatpush3.bf16.msra.mxu0 %v986_v32 }
  0x23   :  { %903 = vmatpush3.bf16.msra.mxu1 %v987_v33  ;;  %910 = vmatprep.subr.bf16.mxu0 %v989_v36 }
  0x24   :  { %932 = vmatprep.subr.bf16.mxu1 %v991_v41 }
  0x25   :  { %351 = vmatmul.mubr.bf16.vlgmr.msra.gmra.mxu0 %v1204_v43 }
  0x26   :  { %391 = vmatmul.mubr.bf16.vlgmr.msra.gmra.mxu1 %v1206_v44  ;;  %911 = vmatpush3.bf16.msra.mxu0 %v990_v45 }
  0x27   :  { %933 = vmatpush3.bf16.msra.mxu1 %v992_v46  ;;  %912 = vmatprep.subr.bf16.mxu0 %v993_v49 }
  0x28   :  { %934 = vmatprep.subr.bf16.mxu1 %v995_v50  ;;  %709 = vmatprep.mubr.bf16.mxu0 %v120_v47 }
  0x29   :  { %749 = vmatprep.mubr.bf16.mxu1 %v121_v48 }
  0x2a   :  { %913 = vmatpush3.bf16.msra.mxu0 %v994_v51 }
  0x2b   :  { %935 = vmatpush3.bf16.msra.mxu1 %v996_v52  ;;  %914 = vmatprep.subr.bf16.mxu0 %v997_v53 }
  0x2c   :  { %936 = vmatprep.subr.bf16.mxu1 %v999_v54 }
  0x2e   :  { %915 = vmatpush3.bf16.msra.mxu0 %v998_v55 }
  0x2f   :  { %937 = vmatpush3.bf16.msra.mxu1 %v1000_v56  ;;  %916 = vmatprep.subr.bf16.mxu0 %v1001_v57 }
  0x30   :  { %938 = vmatprep.subr.bf16.mxu1 %v1003_v58 }
  0x32   :  { %917 = vmatpush3.bf16.msra.mxu0 %v1002_v59 }
  0x33   :  { %939 = vmatpush3.bf16.msra.mxu1 %v1004_v60  ;;  %918 = vmatprep.subr.bf16.mxu0 %v1005_v61 }
  0x34   :  { %940 = vmatprep.subr.bf16.mxu1 %v1007_v62 }
  0x36   :  { %919 = vmatpush3.bf16.msra.mxu0 %v1006_v63 }
  0x37   :  { %941 = vmatpush3.bf16.msra.mxu1 %v1008_v0  ;;  %920 = vmatprep.subr.bf16.mxu0 %v1009_v1 }
  0x38   :  { %942 = vmatprep.subr.bf16.mxu1 %v1011_v2 }
  0x39   :  { %16 = vsyncpa [#allocation4], 0  ;;  %v1014_v7 = vld [vmem:[%s1328_s3 + $0x8] sm:$0xff]   ;;  %v1017_v9 = vld [vmem:[%s1328_s3 + $0x40] sm:$0xff]   ;;  %vm398_vm0 = vcmask 519168   ;;  %vm778_vm1 = vcmask 3072  }
  0x3a   :  { %921 = vmatpush3.bf16.msra.mxu0 %v1010_v3  ;;  %v1016_v8 = vld [vmem:[%s1328_s3 + $0x88] sm:$0xff]   ;;  %v1019_v10 = vld [vmem:[%s1328_s3 + $0xc0] sm:$0xff]   ;;  %s1050_s19 = smov [#allocation3]  }
  0x3b   :  { %943 = vmatpush3.bf16.msra.mxu1 %v1012_v4  ;;  %922 = vmatprep.subr.bf16.mxu0 %v1013_v5  ;;  %v1018_v11 = vld [vmem:[%s1328_s3] sm:$0xff]   ;;  %s786_s20 = sshll.u32 %s1050_s19, 4  ;;  %s787_s20 = int_to_ptr.vmem [resolvable:$true] %s786_s20 }
  0x3c   :  { %944 = vmatprep.subr.bf16.mxu1 %v1015_v6  ;;  %v1020_v12 = vld [vmem:[%s1328_s3 + $0x80] sm:$0xff]   ;;  %s1027_s21 = scalar_lea.vmem %s787_s20, 64  ;;  %p1032_p1 = scmp.lt.s32.totalorder %s787_s20, %s787_s20 }
  0x3d   :  { %v798_v15 = vld [vmem:[%s1327_s2] ss:$0 sm:$0xff]  ;;  %p1028_p0 = scmp.ne.s32.totalorder %s787_s20, %s1027_s21  ;;  %p1033_p2 = scmp.lt.s32.totalorder %s1027_s21, %s1027_s21 }
  0x3e   :  { %923 = vmatpush3.bf16.msra.mxu0 %v1014_v7  ;;  %v831_v29 = vld [vmem:[%s1329_s4] ss:$0 sm:$0xff] }
  0x3f   :  { %945 = vmatpush3.bf16.msra.mxu1 %v1016_v8  ;;  %924 = vmatprep.subr.bf16.mxu0 %v1017_v9  ;;  %v864_v40 = vld [vmem:[%s1330_s5] ss:$0 sm:$0xff]  ;;  %p1034_p3 = por %p1033_p2, %p1032_p1 }
  0x40   :  { %946 = vmatprep.subr.bf16.mxu1 %v1019_v10  ;;  %v865_v49 = vld [vmem:[#allocation2] ss:$0 sm:$0xff] }
  0x41   :  { %p1035_p4 = pnand %p1034_p3, %p1028_p0 }
  0x42   :  { %925 = vmatpush3.bf16.msra.mxu0 %v1018_v11 }
  0x43   :  { %947 = vmatpush3.bf16.msra.mxu1 %v1020_v12 }
  0x45   :  { %710 = vmatmul.mubr.bf16.vlgmr.msra.gmra.mxu0 %v1204_v43 }
  0x46   :  { %750 = vmatmul.mubr.bf16.vlgmr.msra.gmra.mxu1 %v1206_v44 }
  0xe5   :  { %v882_v13 = vpop.f32.mrf.mxu0 }
  0xe6   :  { %v904_v14 = vpop.f32.mrf.mxu1 }
  0xe7   :  { %v883_v16 = vpop.f32.mrf.mxu0 }
  0xe8   :  { %v905_v17 = vpop.f32.mrf.mxu1  ;;  %v884_v18 = vadd.f32 %v883_v16, %v882_v13 }
  0xe9   :  { %v885_v19 = vpop.f32.mrf.mxu0  ;;  %v906_v22 = vadd.f32 %v905_v17, %v904_v14 }
  0xea   :  { %v907_v20 = vpop.f32.mrf.mxu1  ;;  %v353_v21 = vadd.f32 %v884_v18, %v798_v15 }
  0xeb   :  { %v886_v23 = vpop.f32.mrf.mxu0 }
  0xec   :  { %v908_v24 = vpop.f32.mrf.mxu1  ;;  %v393_v25 = vadd.f32 %v906_v22, %v353_v21 }
  0xee   :  { %v399_v26 = vsel %vm398_vm0, %v393_v25, -inf }
  0xef   :  { %400 = vmax.xlane.f32.xlu0 %v399_v26 }
 0x105   :  { %v926_v27 = vpop.f32.mrf.mxu0 }
 0x106   :  { %v948_v28 = vpop.f32.mrf.mxu1 }
 0x107   :  { %v927_v30 = vpop.f32.mrf.mxu0 }
 0x108   :  { %v949_v31 = vpop.f32.mrf.mxu1  ;;  %v928_v32 = vadd.f32 %v927_v30, %v926_v27 }
 0x109   :  { %v950_v33 = vadd.f32 %v949_v31, %v948_v28  ;;  %v929_v34 = vpop.f32.mrf.mxu0 }
 0x10a   :  { %v951_v35 = vpop.f32.mrf.mxu1  ;;  %v712_v36 = vadd.f32 %v928_v32, %v831_v29 }
 0x10b   :  { %v930_v37 = vpop.f32.mrf.mxu0 }
 0x10c   :  { %v952_v38 = vpop.f32.mrf.mxu1  ;;  %v752_v39 = vadd.f32 %v950_v33, %v712_v36 }
 0x10e   :  { %v757_v41 = vmax.f32 %v752_v39, 0.0 }
 0x110   :  { %v765_v42 = vmul.f32 %v864_v40, %v757_v41 }
 0x112   :  { %v766_v43 = vsel %vm398_vm0, %v765_v42, 0.0 }
 0x113   :  { %767 = vadd.xlane.f32.xlu1 %v766_v43 }
 0x178   :  { %v401_v44 = vpop.xlane.xlu0 %400 }
 0x179   :  { %v402_v45 = vsub.f32 %v393_v25, %v401_v44 }
 0x17b   :  { %v403_v46 = vmul.f32 1.442695, %v402_v45 }
 0x17d   :  { %1021 = vpow2.f32 %v403_v46 }
 0x18a   :  { %v1022_v47 = vpop.eup %1021 }
 0x18b   :  { %v405_v48 = vsel %vm398_vm0, %v1022_v47, 0.0 }
 0x18c   :  { %406 = vadd.xlane.f32.xlu0 %v405_v48 }
 0x19c   :  { %v768_v50 = vpop.xlane.xlu1 %767 }
 0x19d   :  { %v776_v51 = vadd.f32 %v865_v49, %v768_v50 }
 0x19f   :  { %1023 = vtanh.f32 %v776_v51 }
 0x1ac   :  { %v1024_v52 = vpop.eup %1023 }
 0x1ad   :  { %779 = vst.msk [vmem:[%s1333_s8] sm:$0xf] %vm778_vm1, %v1024_v52 }
 0x215   :  { %v407_v53 = vpop.xlane.xlu0 %406 }
 0x216   :  { %1025 = vrcp.f32 %v407_v53 }
 0x223   :  { %v1026_v54 = vpop.eup %1025 }
 0x224   :  { %v409_v55 = vmul.f32 %v1026_v54, %v407_v53 }
 0x226   :  { %v410_v56 = vsub.f32 2.0, %v409_v55 }
 0x228   :  { %v411_v57 = vmul.f32 %v1026_v54, %v410_v56 }
 0x22a   :  { %v412_v58 = vmul.f32 %v1022_v47, %v411_v57 }
 0x22c   :  { %413 = vst.msk [vmem:[#allocation3] sm:$0xf] %vm398_vm0, %v412_v58 }
 0x22d   :  { %1038 = shalt.err (!%p1035_p4)
}
 0x22e   :  { %789 = dma.vmem_to_hbm [thread:$0]  %s787_s20, 64, %s1332_s7, [#allocation4]  }
 0x22f   :  { %1047 = dma.done.wait [#allocation4], 64  }
 0x230   :  { %1048 = vsyncadd [#allocation4], 4294967232 }
 0x231   :  { %797 = vsyncpa [#allocation4], 1 }

// kernel: policy_value_net.2
= control target key start
LH: loop header
LB: loop body
LE: loop exit
PB: predicated region body
PF: predicated region fallthrough
CT: control target
= control target key end

     0   :  { %s12012_s30 = smov 0   ;;  %s15743_s0 = inlined_call_operand.vmem [shape: bf16[4,10,10,8], index: 0, kind: input, shape index: {}]   ;;  %s15744_s1 = inlined_call_operand.vmem [shape: bf16[9,8,32], index: 1, kind: input, shape index: {}]   ;;  %s15745_s2 = inlined_call_operand.vmem [shape: f32[1,32], index: 2, kind: input, shape index: {}]   ;;  %s15746_s3 = inlined_call_operand.vmem [shape: bf16[9,32,64], index: 3, kind: input, shape index: {}]   ;;  %s15747_s4 = inlined_call_operand.vmem [shape: f32[1,64], index: 4, kind: input, shape index: {}]   ;;  %s15748_s5 = inlined_call_operand.vmem [shape: bf16[9,64,128], index: 5, kind: input, shape index: {}]   ;;  %s15749_s6 = inlined_call_operand.vmem [shape: f32[1,128], index: 6, kind: input, shape index: {}]   ;;  %s15750_s7 = inlined_call_operand.vmem [shape: bf16[128,8], index: 7, kind: input, shape index: {}]   ;;  %s15751_s8 = inlined_call_operand.vmem [shape: f32[1,8], index: 8, kind: input, shape index: {}]   ;;  %s15752_s9 = inlined_call_operand.vmem [shape: bf16[256,8], index: 9, kind: output, shape index: {}]  }
   0x1 LB: > { %s9931_s10 = sadd.s32 4294967295, %s11959_s30   ;;  %p9935_p0 = scmp.ge.s32.totalorder %s11959_s30, 1  ;;  %s11959_s30 = sphi %s12012_s30, %s19_s30  }
   0x2   : > { %p289_p1 = scmp.lt.s32.totalorder %s11959_s30, 3 }
   0x4   : > { %p290_p2 = pnand %p9935_p0, %p289_p1 }
   0x6   : > { %293 = sbr.rel (%p290_p2) target bundleno = 1409 (0x581), region = 56 }
   0xb   : > { %v9940_v0 = vld [vmem:[%s15744_s1 + $0x4] sm:$0xf]  ;;  %vm651_vm0 = vcmask 1043456   ;;  %v356_v1 = vld [vmem:[%s15744_s1] sm:$0xf]  ;;  %s9936_s15 = sshll.u32 %s9931_s10, 1 }
   0xc   : > { %11797 = vmatprep.subr.msk.bf16.mxu0 %vm651_vm0, %v9940_v0  ;;  %v653_v2 = vsel %vm651_vm0, %v9940_v0, 0  ;;  %11798 = vmatprep.subr.msk.bf16.mxu1 %vm651_vm0, %v356_v1  ;;  %v817_v3 = vsel %vm651_vm0, %v356_v1, 0  ;;  %p327_p3 = scmp.lt.s32.totalorder %s9936_s15, 3  ;;  %v9989_v4 = vld [vmem:[%s15744_s1 + $0x8] sm:$0xf]  ;;  %vm626_vm2 = vcmask 64512  }
   0xd   : > { %11208 = vmatpush3.bf16.msra.mxu0 %v653_v2  ;;  %11226 = vmatpush3.bf16.msra.mxu1 %v817_v3  ;;  %v10022_v5 = vld [vmem:[%s15744_s1 + $0xc] sm:$0xf]  ;;  %vm373_vm1 = vsmask.f32 3328  ;;  %vm374_vm3 = vsmask.f32 7440 }
   0xe   : > { %s15975_s15 = smov (!%p327_p3, %s9936_s15), 3  ;;  %11799 = vmatprep.subr.msk.bf16.mxu0 %vm651_vm0, %v9989_v4  ;;  %11800 = vmatprep.subr.msk.bf16.mxu1 %vm651_vm0, %v10022_v5  ;;  %v12043_v6 = vld [vmem:[%s15744_s1 + $0x10] sm:$0xf]  ;;  %v12048_v7 = vld [vmem:[%s15744_s1 + $0x14] sm:$0xf]  ;;  %v12051_v8 = vsel %vm651_vm0, %v9989_v4, 0  ;;  %vm12114_vm4 = vmor %vm373_vm1, %vm374_vm3 }
   0xf   : > { %s11806_s24 = smul.u32 80, %s15975_s15  ;;  %v1281_v9 = vsel %vm651_vm0, %v10022_v5, 0  ;;  %v12056_v10 = vsel %vm651_vm0, %v12043_v6, 0  ;;  %v12061_v11 = vld [vmem:[%s15744_s1 + $0x18] sm:$0xf]  ;;  %v12065_v12 = vsel %vm651_vm0, %v12048_v7, 0 }
  0x10   : > { %v12069_v13 = vsel %vm651_vm0, %v12061_v11, 0  ;;  %v12074_v14 = vld [vmem:[%s15744_s1 + $0x1c] sm:$0xf]  ;;  %v10251_v15 = vld [vmem:[%s15744_s1 + $0x20] sm:$0xf]  ;;  %v15769_v46 = vmov 0 }
  0x11   : > { %s12082_s14 = scalar_lea.vmem %s15743_s0, %s11806_s24  ;;  %v12086_v16 = vsel %vm651_vm0, %v12074_v14, 0  ;;  %v12089_v17 = vsel %vm651_vm0, %v10251_v15, 0  ;;  %v15770_v46 = vsel %vm12114_vm4, 4294967295, %v15769_v46  ;;  %vm964_vm5 = vcmask 1042432   ;;  %s9938_s18 = sshll.u32 %s9931_s10, 4 }
  0x12   : > { %v340_v18 = vld [vmem:[%s12082_s14] sm:$0xf]  ;;  %v341_v19 = vld [vmem:[%s12082_s14 + $0x8] sm:$0xf]  ;;  %v12094_v20 = vld [vmem:[%s12082_s14 + $0x4] sm:$0x1] }
  0x13   : > { %v12097_v21 = vld [vmem:[%s12082_s14 + $0xc] sm:$0x1]  ;;  %v377_v22 = vshrl.u32 %v340_v18, 16  ;;  %v380_v23 = vshll.u32 %v340_v18, 16  ;;  %v386_v24 = vshll.u32 %v12094_v20, 16  ;;  %v391_v25 = vshrl.u32 %v341_v19, 16 }
  0x14   : > { %v394_v26 = vshll.u32 %v341_v19, 16  ;;  %v400_v27 = vshll.u32 %v12097_v21, 16  ;;  %v969_v28 = vrot.slane %v12094_v20, 5  ;;  %v973_v29 = vrot.slane %v12097_v21, 5  ;;  %v342_v30 = vld [vmem:[%s12082_s14 + $0x10] sm:$0xf] }
  0x15   : > { %v379_v31 = vrot.slane %v377_v22, 4  ;;  %v382_v32 = vrot.slane %v380_v23, 5  ;;  %v388_v33 = vrot.slane %v386_v24, 5  ;;  %v393_v34 = vrot.slane %v391_v25, 4  ;;  %v343_v35 = vld [vmem:[%s12082_s14 + $0x18] sm:$0xf] }
  0x16   : > { %v396_v36 = vrot.slane %v394_v26, 5  ;;  %v402_v37 = vrot.slane %v400_v27, 5  ;;  %v9957_v38 = vcombine.low %v340_v18, %v341_v19  ;;  %v12106_v39 = vld [vmem:[%s12082_s14 + $0x14] sm:$0x1]  ;;  %v12109_v40 = vld [vmem:[%s12082_s14 + $0x1c] sm:$0x1]  ;;  %v9958_v41 = vcombine.low %v342_v30, %v343_v35 }
  0x17   : > { %v383_v42 = vor.u32 %v382_v32, %v379_v31  ;;  %v405_v43 = vshrl.u32 %v342_v30, 16  ;;  %v408_v44 = vshll.u32 %v342_v30, 16  ;;  %v414_v45 = vshll.u32 %v12106_v39, 16  ;;  %15771 = vst [vmem:[#allocation4_spill] sm:$0xff] %v15770_v46  ;;  %v344_v51 = vld [vmem:[%s12082_s14 + $0x20] sm:$0xf] }
  0x18   : > { %v397_v47 = vor.u32 %v396_v36, %v393_v34  ;;  %11227 = vmatprep.mubr.msk.bf16.mxu1 %vm626_vm2, %v9957_v38  ;;  %v419_v48 = vshrl.u32 %v343_v35, 16  ;;  %v422_v49 = vshll.u32 %v343_v35, 16  ;;  %v428_v50 = vshll.u32 %v12109_v40, 16  ;;  %v345_v56 = vld [vmem:[%s12082_s14 + $0x28] sm:$0xf]  ;;  %p334_p4 = scmp.lt.s32.totalorder %s9938_s18, 31 }
  0x19   : > { %v384_v52 = vrot.slane %v383_v42, 4  ;;  %v407_v53 = vrot.slane %v405_v43, 4  ;;  %v410_v54 = vrot.slane %v408_v44, 5  ;;  %v416_v55 = vrot.slane %v414_v45, 5  ;;  %11228 = vmatmul.mubr.msk.bf16.vlgmr.msra.gmra.mxu1 %vm626_vm2, %v9958_v41  ;;  %v12124_v61 = vld [vmem:[%s12082_s14 + $0x24] sm:$0x1] }
  0x1a   : > { %v398_v57 = vrot.slane %v397_v47, 4  ;;  %v421_v58 = vrot.slane %v419_v48, 4  ;;  %v424_v59 = vrot.slane %v422_v49, 5  ;;  %v430_v60 = vrot.slane %v428_v50, 5  ;;  %11262 = vmatpush3.bf16.msra.mxu1 %v1281_v9  ;;  %v12135_v4 = vld [vmem:[%s12082_s14 + $0x2c] sm:$0x1] }
  0x1b   : > { %v389_v62 = vsel %vm12114_vm4, %v384_v52, %v388_v33  ;;  %v411_v63 = vor.u32 %v410_v54, %v407_v53  ;;  %v977_v0 = vrot.slane %v12106_v39, 5  ;;  %v981_v1 = vrot.slane %v12109_v40, 5  ;;  %11802 = vmatprep.subr.msk.bf16.mxu1 %vm651_vm0, %v12048_v7  ;;  %v346_v23 = vld [vmem:[%s12082_s14 + $0x30] sm:$0xf]  ;;  %v347_v27 = vld [vmem:[%s12082_s14 + $0x38] sm:$0xf] }
  0x1c   : > { %v403_v2 = vsel %vm12114_vm4, %v398_v57, %v402_v37  ;;  %v425_v3 = vor.u32 %v424_v59, %v421_v58  ;;  %v433_v5 = vshrl.u32 %v344_v51, 16  ;;  %v436_v9 = vshll.u32 %v344_v51, 16  ;;  %v12145_v34 = vld [vmem:[%s12082_s14 + $0x34] sm:$0x1]  ;;  %v12150_v41 = vld [vmem:[%s12082_s14 + $0x3c] sm:$0x1] }
  0x1d   : > { %v9941_v15 = vcombine.low %v389_v62, %v403_v2  ;;  %v412_v18 = vrot.slane %v411_v63, 4  ;;  %v442_v19 = vshll.u32 %v12124_v61, 16  ;;  %v447_v22 = vshrl.u32 %v345_v56, 16  ;;  %v348_v52 = vld [vmem:[%s12082_s14 + $0x50] sm:$0xf]  ;;  %s15977_s18 = smov (!%p334_p4, %s9938_s18), 31 }
  0x1e   : > { %v426_v24 = vrot.slane %v425_v3, 4  ;;  %v435_v25 = vrot.slane %v433_v5, 4  ;;  %v438_v26 = vrot.slane %v436_v9, 5  ;;  %v450_v7 = vshll.u32 %v345_v56, 16  ;;  %v349_v62 = vld [vmem:[%s12082_s14 + $0x58] sm:$0xf] }
  0x1f   : > { %11209 = vmatprep.mubr.msk.bf16.mxu0 %vm626_vm2, %v9941_v15  ;;  %v417_v30 = vsel %vm12114_vm4, %v412_v18, %v416_v55  ;;  %v444_v31 = vrot.slane %v442_v19, 5  ;;  %v449_v32 = vrot.slane %v447_v22, 4  ;;  %v456_v33 = vshll.u32 %v12135_v4, 16  ;;  %s9939_s21 = sshll.u32 %s15977_s18, 2 }
  0x20   : > { %v431_v35 = vsel %vm12114_vm4, %v426_v24, %v430_v60  ;;  %v439_v36 = vor.u32 %v438_v26, %v435_v25  ;;  %v452_v37 = vrot.slane %v450_v7, 5  ;;  %v9959_v38 = vcombine.low %v344_v51, %v345_v56  ;;  %v12158_v56 = vld [vmem:[%s12082_s14 + $0x54] sm:$0x1]  ;;  %v350_v26 = vld [vmem:[%s12082_s14 + $0x60] sm:$0xf]  ;;  %s15692_s24 = scalar_lea.vmem %s15752_s9, %s9939_s21 }
  0x21   : > { %v9942_v42 = vcombine.low %v417_v30, %v431_v35  ;;  %v458_v43 = vrot.slane %v456_v33, 5  ;;  %v461_v44 = vshrl.u32 %v346_v23, 16  ;;  %v464_v45 = vshll.u32 %v346_v23, 16 }
  0x22   : > { %v440_v47 = vrot.slane %v439_v36, 4  ;;  %v453_v48 = vor.u32 %v452_v37, %v449_v32  ;;  %11231 = vmatprep.mubr.msk.bf16.mxu1 %vm626_vm2, %v9959_v38  ;;  %v470_v49 = vshll.u32 %v12145_v34, 16  ;;  %v475_v50 = vshrl.u32 %v347_v27, 16 }
  0x23   : > { %11210 = vmatmul.mubr.msk.bf16.vlgmr.msra.gmra.mxu0 %vm626_vm2, %v9942_v42  ;;  %v463_v53 = vrot.slane %v461_v44, 4  ;;  %v466_v51 = vrot.slane %v464_v45, 5  ;;  %v478_v54 = vshll.u32 %v347_v27, 16  ;;  %v484_v55 = vshll.u32 %v12150_v41, 16  ;;  %v12183_v44 = vld [vmem:[%s12082_s14 + $0x6c] sm:$0x1] }
  0x24   : > { %11244 = vmatpush3.bf16.msra.mxu0 %v12051_v8  ;;  %v445_v57 = vsel %vm12114_vm4, %v440_v47, %v444_v31  ;;  %v454_v58 = vrot.slane %v453_v48, 4  ;;  %v472_v59 = vrot.slane %v470_v49, 5  ;;  %v477_v60 = vrot.slane %v475_v50, 4  ;;  %v12169_v8 = vld [vmem:[%s12082_s14 + $0x5c] sm:$0x1] }
  0x25   : > { %v467_v63 = vor.u32 %v466_v51, %v463_v53  ;;  %v480_v2 = vrot.slane %v478_v54, 5  ;;  %v486_v3 = vrot.slane %v484_v55, 5  ;;  %v9960_v5 = vcombine.low %v346_v23, %v347_v27  ;;  %11801 = vmatprep.subr.msk.bf16.mxu0 %vm651_vm0, %v12043_v6  ;;  %v12175_v31 = vld [vmem:[%s12082_s14 + $0x64] sm:$0x1]  ;;  %v352_v53 = vld [vmem:[%s12082_s14 + $0x70] sm:$0xf] }
  0x26   : > { %v459_v9 = vsel %vm12114_vm4, %v454_v58, %v458_v43  ;;  %v489_v15 = vshrl.u32 %v348_v52, 16  ;;  %v492_v18 = vshll.u32 %v348_v52, 16  ;;  %v498_v19 = vshll.u32 %v12158_v56, 16  ;;  %v351_v43 = vld [vmem:[%s12082_s14 + $0x68] sm:$0xf] }
  0x27   : > { %v9943_v22 = vcombine.low %v445_v57, %v459_v9  ;;  %v468_v24 = vrot.slane %v467_v63, 4  ;;  %v481_v25 = vor.u32 %v480_v2, %v477_v60  ;;  %11232 = vmatmul.mubr.msk.bf16.gmra.mxu1 %vm626_vm2, %v9960_v5  ;;  %v503_v23 = vshrl.u32 %v349_v62, 16  ;;  %v353_v9 = vld [vmem:[%s12082_s14 + $0x78] sm:$0xf] }
  0x28   : > { %v491_v6 = vrot.slane %v489_v15, 4  ;;  %v494_v7 = vrot.slane %v492_v18, 5  ;;  %v500_v27 = vrot.slane %v498_v19, 5  ;;  %v506_v30 = vshll.u32 %v349_v62, 16 }
  0x29   : > { %11213 = vmatprep.mubr.msk.bf16.mxu0 %vm626_vm2, %v9943_v22  ;;  %v473_v32 = vsel %vm12114_vm4, %v468_v24, %v472_v59  ;;  %v482_v33 = vrot.slane %v481_v25, 4  ;;  %v505_v35 = vrot.slane %v503_v23, 4  ;;  %v512_v36 = vshll.u32 %v12169_v8, 16  ;;  %v12202_v23 = vld [vmem:[%s12082_s14 + $0x7c] sm:$0x1] }
  0x2a   : > { %v495_v37 = vor.u32 %v494_v7, %v491_v6  ;;  %v508_v38 = vrot.slane %v506_v30, 5  ;;  %v9961_v42 = vcombine.low %v348_v52, %v349_v62  ;;  %v517_v45 = vshrl.u32 %v350_v26, 16  ;;  %v12191_v52 = vld [vmem:[%s12082_s14 + $0x74] sm:$0x1] }
  0x2b   : > { %v487_v47 = vsel %vm12114_vm4, %v482_v33, %v486_v3  ;;  %v514_v48 = vrot.slane %v512_v36, 5  ;;  %v520_v49 = vshll.u32 %v350_v26, 16  ;;  %v526_v50 = vshll.u32 %v12175_v31, 16  ;;  %v354_v33 = vld [vmem:[%s12082_s14 + $0x80] sm:$0xf] }
  0x2c   : > { %v9944_v51 = vcombine.low %v473_v32, %v487_v47  ;;  %v496_v54 = vrot.slane %v495_v37, 4  ;;  %v509_v55 = vor.u32 %v508_v38, %v505_v35  ;;  %11235 = vmatprep.mubr.msk.bf16.mxu1 %vm626_vm2, %v9961_v42  ;;  %v519_v57 = vrot.slane %v517_v45, 4  ;;  %v355_v42 = vld [vmem:[%s12082_s14 + $0x88] sm:$0xf] }
  0x2d   : > { %v522_v58 = vrot.slane %v520_v49, 5  ;;  %v528_v59 = vrot.slane %v526_v50, 5  ;;  %v531_v60 = vshrl.u32 %v351_v43, 16  ;;  %v534_v62 = vshll.u32 %v351_v43, 16  ;;  %v12215_v50 = vld [vmem:[%s12082_s14 + $0x8c] sm:$0x1] }
  0x2e   : > { %vm965_vm6 = vcmask 1046532   ;;  %11214 = vmatmul.mubr.msk.bf16.gmra.mxu0 %vm626_vm2, %v9944_v51  ;;  %v501_v63 = vsel %vm12114_vm4, %v496_v54, %v500_v27  ;;  %v510_v2 = vrot.slane %v509_v55, 4  ;;  %v540_v3 = vshll.u32 %v12183_v44, 16 }
  0x2f   : > { %v9962_v5 = vcombine.low %v350_v26, %v351_v43  ;;  %v523_v15 = vor.u32 %v522_v58, %v519_v57  ;;  %v533_v18 = vrot.slane %v531_v60, 4  ;;  %v536_v19 = vrot.slane %v534_v62, 5  ;;  %v12208_v43 = vld [vmem:[%s12082_s14 + $0x84] sm:$0x1]  ;;  %v916_v58 = vld [vmem:[%s12082_s14] sm:$0xe]  ;;  %vm12231_vm7 = vmor %vm964_vm5, %vm965_vm6 }
  0x30   : > { %v545_v22 = vshrl.u32 %v352_v53, 16  ;;  %v515_v24 = vsel %vm12114_vm4, %v510_v2, %v514_v48  ;;  %v542_v25 = vrot.slane %v540_v3, 5  ;;  %v548_v6 = vshll.u32 %v352_v53, 16  ;;  %v917_v2 = vld [vmem:[%s12082_s14 + $0x8] sm:$0xe] }
  0x31   : > { %11236 = vmatmul.mubr.msk.bf16.gmra.mxu1 %vm626_vm2, %v9962_v5  ;;  %v554_v7 = vshll.u32 %v12191_v52, 16  ;;  %v9945_v26 = vcombine.low %v501_v63, %v515_v24  ;;  %v524_v27 = vrot.slane %v523_v15, 4  ;;  %v537_v30 = vor.u32 %v536_v19, %v533_v18  ;;  %v918_v3 = vld [vmem:[%s12082_s14 + $0x10] sm:$0xe] }
  0x32   : > { %v547_v32 = vrot.slane %v545_v22, 4  ;;  %v550_v35 = vrot.slane %v548_v6, 5  ;;  %v559_v37 = vshrl.u32 %v353_v9, 16  ;;  %v562_v38 = vshll.u32 %v353_v9, 16 }
  0x33   : > { %v556_v36 = vrot.slane %v554_v7, 5  ;;  %11217 = vmatprep.mubr.msk.bf16.mxu0 %vm626_vm2, %v9945_v26  ;;  %v529_v45 = vsel %vm12114_vm4, %v524_v27, %v528_v59  ;;  %v538_v47 = vrot.slane %v537_v30, 4  ;;  %v568_v48 = vshll.u32 %v12202_v23, 16 }
  0x34   : > { %v9963_v49 = vcombine.low %v352_v53, %v353_v9  ;;  %v551_v51 = vor.u32 %v550_v35, %v547_v32  ;;  %v561_v54 = vrot.slane %v559_v37, 4  ;;  %v564_v55 = vrot.slane %v562_v38, 5  ;;  %v919_v32 = vld [vmem:[%s12082_s14 + $0x18] sm:$0xe]  ;;  %v920_v35 = vld [vmem:[%s12082_s14 + $0x20] sm:$0xe] }
  0x35   : > { %v573_v57 = vshrl.u32 %v354_v33, 16  ;;  %v543_v60 = vsel %vm12114_vm4, %v538_v47, %v542_v25  ;;  %v570_v62 = vrot.slane %v568_v48, 5  ;;  %v576_v59 = vshll.u32 %v354_v33, 16  ;;  %v11824_v25 = vld [vmem:[%s12082_s14 + $0x8] ss:$8 sps:$4 sm:$0xff]  }
  0x36   : > { %11239 = vmatprep.mubr.msk.bf16.mxu1 %vm626_vm2, %v9963_v49  ;;  %v582_v63 = vshll.u32 %v12208_v43, 16  ;;  %v9946_v53 = vcombine.low %v529_v45, %v543_v60  ;;  %v552_v5 = vrot.slane %v551_v51, 4  ;;  %v565_v9 = vor.u32 %v564_v55, %v561_v54  ;;  %v921_v48 = vld [vmem:[%s12082_s14 + $0x28] sm:$0xe]  ;;  %v922_v51 = vld [vmem:[%s12082_s14 + $0x30] sm:$0xe] }
  0x37   : > { %v575_v15 = vrot.slane %v573_v57, 4  ;;  %v578_v18 = vrot.slane %v576_v59, 5  ;;  %v587_v22 = vshrl.u32 %v355_v42, 16  ;;  %v590_v24 = vshll.u32 %v355_v42, 16 }
  0x38   : > { %v584_v19 = vrot.slane %v582_v63, 5  ;;  %11218 = vmatmul.mubr.msk.bf16.gmra.mxu0 %vm626_vm2, %v9946_v53  ;;  %v557_v6 = vsel %vm12114_vm4, %v552_v5, %v556_v36  ;;  %v566_v7 = vrot.slane %v565_v9, 4  ;;  %v596_v26 = vshll.u32 %v12215_v50, 16  ;;  %v11825_v63 = vld [vmem:[%s12082_s14 + $0x18] ss:$8 sps:$4 sm:$0xff]  }
  0x39   : > { %v9964_v27 = vcombine.low %v354_v33, %v355_v42  ;;  %v15772_v30 = vmov 0  ;;  %v579_v37 = vor.u32 %v578_v18, %v575_v15  ;;  %v589_v38 = vrot.slane %v587_v22, 4  ;;  %v924_v53 = vld [vmem:[%s12082_s14 + $0x50] sm:$0xe]  ;;  %v925_v18 = vld [vmem:[%s12082_s14 + $0x58] sm:$0xe] }
  0x3a   : > { %v15773_v30 = vsel %vm12231_vm7, 4294967295, %v15772_v30  ;;  %v592_v45 = vrot.slane %v590_v24, 5  ;;  %v9973_v47 = vrot.slane %v916_v58, 9  ;;  %v571_v36 = vsel %vm12114_vm4, %v566_v7, %v570_v62  ;;  %v927_v24 = vld [vmem:[%s12082_s14 + $0x68] sm:$0xe] }
  0x3b   : > { %15774 = vst [vmem:[#allocation5_spill] sm:$0xff] %v15773_v30  ;;  %v598_v49 = vrot.slane %v596_v26, 5  ;;  %11240 = vmatmul.mubr.msk.bf16.gmra.mxu1 %vm626_vm2, %v9964_v27  ;;  %v9974_v33 = vrot.slane %v917_v2, 9  ;;  %v9975_v42 = vrot.slane %v918_v3, 9  ;;  %v9947_v54 = vcombine.low %v557_v6, %v571_v36  ;;  %v923_v2 = vld [vmem:[%s12082_s14 + $0x38] sm:$0xe] }
  0x3c   : > { %v580_v55 = vrot.slane %v579_v37, 4  ;;  %v593_v57 = vor.u32 %v592_v45, %v589_v38  ;;  %v970_v58 = vsel %vm12231_vm7, %v9973_v47, %v969_v28  ;;  %11263 = vmatprep.mubr.msk.bf16.mxu1 %vm626_vm2, %v11824_v25  ;;  %v9976_v59 = vrot.slane %v919_v32, 9  ;;  %v11826_v3 = vld [vmem:[%s12082_s14 + $0x28] ss:$8 sps:$4 sm:$0xff]   ;;  %v929_v37 = vld [vmem:[%s12082_s14 + $0x78] sm:$0xe] }
  0x3d   : > { %v974_v60 = vsel %vm12231_vm7, %v9974_v33, %v973_v29  ;;  %v12255_v62 = vsel %vm12231_vm7, %v9975_v42, %v977_v0  ;;  %v9977_v20 = vrot.slane %v920_v35, 9  ;;  %11221 = vmatprep.mubr.msk.bf16.mxu0 %vm626_vm2, %v9947_v54  ;;  %v985_v39 = vrot.slane %v12124_v61, 5  ;;  %v928_v26 = vld [vmem:[%s12082_s14 + $0x70] sm:$0xe]  ;;  %v930_v33 = vld [vmem:[%s12082_s14 + $0x80] sm:$0xe] }
  0x3e   : > { %v585_v21 = vsel %vm12114_vm4, %v580_v55, %v584_v19  ;;  %v594_v28 = vrot.slane %v593_v57, 4  ;;  %v9990_v29 = vcombine.low %v970_v58, %v974_v60  ;;  %v12269_v0 = vsel %vm12231_vm7, %v9976_v59, %v981_v1  ;;  %v926_v1 = vld [vmem:[%s12082_s14 + $0x60] sm:$0xe]  ;;  %v931_v55 = vld [vmem:[%s12082_s14 + $0x88] sm:$0xe]  ;;  %v14341_v30 = vld [vmem:[%s15748_s5 + $0x78] sm:$0xff]  }
  0x3f   : > { %v9978_v5 = vrot.slane %v921_v48, 9  ;;  %v989_v9 = vrot.slane %v12135_v4, 5  ;;  %v9979_v15 = vrot.slane %v922_v51, 9  ;;  %v9991_v61 = vcombine.low %v12255_v62, %v12269_v0  ;;  %v11827_v57 = vld [vmem:[%s12082_s14 + $0x38] ss:$8 sps:$4 sm:$0xff]  }
  0x40   : > { %v599_v19 = vsel %vm12114_vm4, %v594_v28, %v598_v49  ;;  %v12279_v40 = vsel %vm12231_vm7, %v9977_v20, %v985_v39  ;;  %v993_v22 = vrot.slane %v12145_v34, 5  ;;  %v9980_v6 = vrot.slane %v923_v2, 9  ;;  %v10039_v59 = vld [vmem:[%s12082_s14 + $0x8] sm:$0xf]  ;;  %v12344_v2 = vld [vmem:[%s12082_s14 + $0xc] sm:$0x1] }
  0x41   : > { %v9948_v25 = vcombine.low %v585_v21, %v599_v19  ;;  %v12286_v4 = vsel %vm12231_vm7, %v9978_v5, %v989_v9  ;;  %v997_v7 = vrot.slane %v12150_v41, 5  ;;  %v9981_v34 = vrot.slane %v924_v53, 9  ;;  %v10041_v21 = vld [vmem:[%s12082_s14 + $0x10] sm:$0xf]  ;;  %v12355_v39 = vld [vmem:[%s12082_s14 + $0x14] sm:$0x1] }
  0x42   : > { %v9992_v27 = vcombine.low %v12279_v40, %v12286_v4  ;;  %v12294_v32 = vsel %vm12231_vm7, %v9979_v15, %v993_v22  ;;  %v1001_v35 = vrot.slane %v12158_v56, 5  ;;  %v9982_v38 = vrot.slane %v925_v18, 9  ;;  %v10043_v15 = vld [vmem:[%s12082_s14 + $0x18] sm:$0xf]  ;;  %v12371_v22 = vld [vmem:[%s12082_s14 + $0x1c] sm:$0x1] }
  0x43   : > { %11222 = vmatmul.mubr.msk.bf16.gmra.mxu0 %vm626_vm2, %v9948_v25  ;;  %11264 = vmatmul.mubr.msk.bf16.vlgmr.msra.gmra.mxu1 %vm626_vm2, %v11825_v63  ;;  %v12302_v41 = vsel %vm12231_vm7, %v9980_v6, %v997_v7  ;;  %v1005_v45 = vrot.slane %v12169_v8, 5  ;;  %v9983_v47 = vrot.slane %v926_v1, 9  ;;  %v1009_v36 = vrot.slane %v12175_v31, 5  ;;  %v10045_v6 = vld [vmem:[%s12082_s14 + $0x20] sm:$0xf] }
  0x44   : > { %11245 = vmatprep.mubr.msk.bf16.mxu0 %vm626_vm2, %v9990_v29  ;;  %v9993_v56 = vcombine.low %v12294_v32, %v12302_v41  ;;  %11267 = vmatprep.mubr.msk.bf16.mxu1 %vm626_vm2, %v11826_v3  ;;  %v12311_v48 = vsel %vm12231_vm7, %v9981_v34, %v1001_v35  ;;  %v9984_v49 = vrot.slane %v927_v24, 9  ;;  %v1013_v42 = vrot.slane %v12183_v44, 5  ;;  %v11828_v3 = vld [vmem:[%s12082_s14 + $0x58] ss:$8 sps:$4 sm:$0xff]   ;;  %v11829_v34 = vld [vmem:[%s12082_s14 + $0x68] ss:$8 sps:$4 sm:$0xff]  }
  0x45   : > { %v12317_v8 = vsel %vm12231_vm7, %v9982_v38, %v1005_v45  ;;  %v9985_v51 = vrot.slane %v928_v26, 9  ;;  %v1017_v54 = vrot.slane %v12191_v52, 5  ;;  %11298 = vmatpush3.bf16.msra.mxu1 %v12065_v12  ;;  %v12328_v58 = vsel %vm12231_vm7, %v9983_v47, %v1009_v36  ;;  %v11830_v45 = vld [vmem:[%s12082_s14 + $0x78] ss:$8 sps:$4 sm:$0xff]  }
  0x46   : > { %v9994_v31 = vcombine.low %v12311_v48, %v12317_v8  ;;  %v9986_v60 = vrot.slane %v929_v37, 9  ;;  %v1021_v44 = vrot.slane %v12202_v23, 5  ;;  %11804 = vmatprep.subr.msk.bf16.mxu1 %vm651_vm0, %v12074_v14  ;;  %v12336_v12 = vsel %vm12231_vm7, %v9984_v49, %v1013_v42 }
  0x47   : > { %v12340_v52 = vsel %vm12231_vm7, %v9985_v51, %v1017_v54  ;;  %v9987_v63 = vrot.slane %v930_v33, 9  ;;  %v1025_v20 = vrot.slane %v12208_v43, 5  ;;  %v9995_v23 = vcombine.low %v12328_v58, %v12336_v12 }
  0x48   : > { %v12351_v14 = vsel %vm12231_vm7, %v9986_v60, %v1021_v44  ;;  %v9988_v28 = vrot.slane %v931_v55, 9  ;;  %v1029_v29 = vrot.slane %v12215_v50, 5  ;;  %v1429_v5 = vshrl.u32 %v10039_v59, 16 }
  0x49   : > { %v9996_v43 = vcombine.low %v12340_v52, %v12351_v14  ;;  %v12362_v53 = vsel %vm12231_vm7, %v9987_v63, %v1025_v20  ;;  %v1432_v9 = vshll.u32 %v10039_v59, 16  ;;  %v1438_v50 = vshll.u32 %v12344_v2, 16  ;;  %v10090_v63 = vld [vmem:[%s12082_s14 + $0x18] sm:$0xe] }
  0x4a   : > { %v12367_v18 = vsel %vm12231_vm7, %v9988_v28, %v1029_v29  ;;  %v1443_v19 = vshrl.u32 %v10041_v21, 16  ;;  %v1446_v40 = vshll.u32 %v10041_v21, 16  ;;  %v1431_v24 = vrot.slane %v1429_v5, 4 }
  0x4b   : > { %11246 = vmatmul.mubr.msk.bf16.vlgmr.msra.gmra.mxu0 %vm626_vm2, %v9991_v61  ;;  %11268 = vmatmul.mubr.msk.bf16.gmra.mxu1 %vm626_vm2, %v11827_v57  ;;  %v9997_v1 = vcombine.low %v12362_v53, %v12367_v18  ;;  %v1434_v25 = vrot.slane %v1432_v9, 5  ;;  %v1452_v4 = vshll.u32 %v12355_v39, 16  ;;  %v1440_v62 = vrot.slane %v1438_v50, 5  ;;  %v12385_v61 = vld [vmem:[%s12082_s14 + $0x24] sm:$0x1] }
  0x4c   : > { %11280 = vmatpush3.bf16.msra.mxu0 %v12056_v10  ;;  %11249 = vmatprep.mubr.msk.bf16.mxu0 %vm626_vm2, %v9992_v27  ;;  %v1445_v0 = vrot.slane %v1443_v19, 4  ;;  %v1448_v7 = vrot.slane %v1446_v40, 5  ;;  %v1457_v26 = vshrl.u32 %v10043_v15, 16  ;;  %v1460_v38 = vshll.u32 %v10043_v15, 16  ;;  %v10088_v27 = vld [vmem:[%s12082_s14 + $0x8] sm:$0xe] }
  0x4d   : > { %11271 = vmatprep.mubr.msk.bf16.mxu1 %vm626_vm2, %v11828_v3  ;;  %v1435_v35 = vor.u32 %v1434_v25, %v1431_v24  ;;  %v1454_v37 = vrot.slane %v1452_v4, 5  ;;  %11803 = vmatprep.subr.msk.bf16.mxu0 %vm651_vm0, %v12061_v11  ;;  %v1466_v10 = vshll.u32 %v12371_v22, 16  ;;  %v1471_v49 = vshrl.u32 %v10045_v6, 16  ;;  %v10089_v57 = vld [vmem:[%s12082_s14 + $0x10] sm:$0xe] }
  0x4e   : > { %v1449_v47 = vor.u32 %v1448_v7, %v1445_v0  ;;  %v1459_v36 = vrot.slane %v1457_v26, 4  ;;  %v1474_v33 = vshll.u32 %v10045_v6, 16  ;;  %v1462_v51 = vrot.slane %v1460_v38, 5  ;;  %v10091_v3 = vld [vmem:[%s12082_s14 + $0x20] sm:$0xe] }
  0x4f   : > { %v1436_v42 = vrot.slane %v1435_v35, 4  ;;  %v1468_v54 = vrot.slane %v1466_v10, 5  ;;  %v1480_v55 = vshll.u32 %v12385_v61, 16  ;;  %v1473_v11 = vrot.slane %v1471_v49, 4  ;;  %v10047_v19 = vld [vmem:[%s12082_s14 + $0x28] sm:$0xf] }
  0x50   : > { %v1450_v60 = vrot.slane %v1449_v47, 4  ;;  %v1476_v44 = vrot.slane %v1474_v33, 5  ;;  %v10104_v59 = vrot.slane %v10088_v27, 9  ;;  %v1463_v21 = vor.u32 %v1462_v51, %v1459_v36  ;;  %v12415_v4 = vld [vmem:[%s12082_s14 + $0x2c] sm:$0x1] }
  0x51   : > { %v1441_v20 = vsel %vm12114_vm4, %v1436_v42, %v1440_v62  ;;  %v1482_v28 = vrot.slane %v1480_v55, 5  ;;  %v1868_v29 = vrot.slane %v12344_v2, 5  ;;  %v10105_v15 = vrot.slane %v10089_v57, 9  ;;  %v10049_v6 = vld [vmem:[%s12082_s14 + $0x30] sm:$0xf] }
  0x52   : > { %v1455_v5 = vsel %vm12114_vm4, %v1450_v60, %v1454_v37  ;;  %v1477_v9 = vor.u32 %v1476_v44, %v1473_v11  ;;  %v1872_v50 = vrot.slane %v12355_v39, 5  ;;  %v1464_v2 = vrot.slane %v1463_v21, 4  ;;  %v11831_v62 = vld [vmem:[%s12082_s14 + $0x88] ss:$8 sps:$4 sm:$0xff]   ;;  %v10051_v37 = vld [vmem:[%s12082_s14 + $0x38] sm:$0xf] }
  0x53   : > { %11250 = vmatmul.mubr.msk.bf16.gmra.mxu0 %vm626_vm2, %v9993_v56  ;;  %11272 = vmatmul.mubr.msk.bf16.gmra.mxu1 %vm626_vm2, %v11829_v34  ;;  %v12410_v40 = vcombine.low %v1441_v20, %v1455_v5  ;;  %v1869_v24 = vsel %vm12231_vm7, %v10104_v59, %v1868_v29  ;;  %v10106_v25 = vrot.slane %v10090_v63, 9  ;;  %v1876_v56 = vrot.slane %v12371_v22, 5  ;;  %v10050_v22 = vld [vmem:[%s12082_s14 + $0x34] sm:$0x1]  ;;  %v10053_v47 = vld [vmem:[%s12082_s14 + $0x40] sm:$0xf] }
  0x54   : > { %11253 = vmatprep.mubr.msk.bf16.mxu0 %vm626_vm2, %v9994_v31  ;;  %11275 = vmatprep.mubr.msk.bf16.mxu1 %vm626_vm2, %v11830_v45  ;;  %v1478_v32 = vrot.slane %v1477_v9, 4  ;;  %v1873_v41 = vsel %vm12231_vm7, %v10105_v15, %v1872_v50  ;;  %v10107_v39 = vrot.slane %v10091_v3, 9  ;;  %v1469_v0 = vsel %vm12114_vm4, %v1464_v2, %v1468_v54  ;;  %v10052_v45 = vld [vmem:[%s12082_s14 + $0x3c] sm:$0x1]  ;;  %v12450_v55 = vld [vmem:[%s12082_s14 + $0x44] sm:$0x1] }
  0x55   : > { %v10121_v48 = vcombine.low %v1869_v24, %v1873_v41  ;;  %v1880_v8 = vrot.slane %v12385_v61, 5  ;;  %v1485_v31 = vshrl.u32 %v10047_v19, 16  ;;  %v12434_v26 = vsel %vm12231_vm7, %v10106_v25, %v1876_v56  ;;  %v10092_v20 = vld [vmem:[%s12082_s14 + $0x28] sm:$0xe]  ;;  %v10093_v5 = vld [vmem:[%s12082_s14 + $0x30] sm:$0xe] }
  0x56   : > { %v1483_v7 = vsel %vm12114_vm4, %v1478_v32, %v1482_v28  ;;  %v1488_v34 = vshll.u32 %v10047_v19, 16  ;;  %v1494_v35 = vshll.u32 %v12415_v4, 16  ;;  %v1499_v27 = vshrl.u32 %v10049_v6, 16  ;;  %v10094_v24 = vld [vmem:[%s12082_s14 + $0x38] sm:$0xe] }
  0x57   : > { %v12439_v38 = vcombine.low %v1469_v0, %v1483_v7  ;;  %v12443_v10 = vsel %vm12231_vm7, %v10107_v39, %v1880_v8  ;;  %v1487_v61 = vrot.slane %v1485_v31, 4  ;;  %v1502_v42 = vshll.u32 %v10049_v6, 16  ;;  %v10095_v6 = vld [vmem:[%s12082_s14 + $0x40] sm:$0xe]  ;;  %v10055_v31 = vld [vmem:[%s12082_s14 + $0x58] sm:$0xf] }
  0x58   : > { %v10122_v36 = vcombine.low %v12434_v26, %v12443_v10  ;;  %v1490_v49 = vrot.slane %v1488_v34, 5  ;;  %v1496_v33 = vrot.slane %v1494_v35, 5  ;;  %v1501_v51 = vrot.slane %v1499_v27, 4  ;;  %v12476_v7 = vld [vmem:[%s12082_s14 + $0x5c] sm:$0x1] }
  0x59   : > { %v1508_v54 = vshll.u32 %v10050_v22, 16  ;;  %v1513_v57 = vshrl.u32 %v10051_v37, 16  ;;  %v1516_v60 = vshll.u32 %v10051_v37, 16  ;;  %v1504_v44 = vrot.slane %v1502_v42, 5  ;;  %v10057_v35 = vld [vmem:[%s12082_s14 + $0x60] sm:$0xf] }
  0x5a   : > { %v1491_v11 = vor.u32 %v1490_v49, %v1487_v61  ;;  %v1522_v59 = vshll.u32 %v10052_v45, 16  ;;  %v1527_v63 = vshrl.u32 %v10053_v47, 16  ;;  %v1530_v3 = vshll.u32 %v10053_v47, 16 }
  0x5b   : > { %11254 = vmatmul.mubr.msk.bf16.gmra.mxu0 %vm626_vm2, %v9995_v23  ;;  %11276 = vmatmul.mubr.msk.bf16.gmra.mxu1 %vm626_vm2, %v11831_v62  ;;  %v1510_v21 = vrot.slane %v1508_v54, 5  ;;  %v1515_v28 = vrot.slane %v1513_v57, 4  ;;  %v1518_v29 = vrot.slane %v1516_v60, 5  ;;  %v1505_v15 = vor.u32 %v1504_v44, %v1501_v51  ;;  %v10059_v51 = vld [vmem:[%s12082_s14 + $0x68] sm:$0xf] }
  0x5c   : > { %11257 = vmatprep.mubr.msk.bf16.mxu0 %vm626_vm2, %v9996_v43  ;;  %11299 = vmatprep.mubr.msk.bf16.mxu1 %vm626_vm2, %v10121_v48  ;;  %v1492_v9 = vrot.slane %v1491_v11, 4  ;;  %v1524_v58 = vrot.slane %v1522_v59, 5  ;;  %v1529_v12 = vrot.slane %v1527_v63, 4  ;;  %v1532_v50 = vrot.slane %v1530_v3, 5  ;;  %v12510_v59 = vld [vmem:[%s12082_s14 + $0x74] sm:$0x1] }
  0x5d   : > { %v1519_v23 = vor.u32 %v1518_v29, %v1515_v28  ;;  %v1536_v19 = vshll.u32 %v12450_v55, 16  ;;  %v10108_v2 = vrot.slane %v10092_v20, 9  ;;  %v1506_v14 = vrot.slane %v1505_v15, 4  ;;  %v10097_v29 = vld [vmem:[%s12082_s14 + $0x60] sm:$0xe] }
  0x5e   : > { %v1497_v52 = vsel %vm12114_vm4, %v1492_v9, %v1496_v33  ;;  %v1884_v43 = vrot.slane %v12415_v4, 5  ;;  %v10109_v25 = vrot.slane %v10093_v5, 9  ;;  %v1533_v41 = vor.u32 %v1532_v50, %v1529_v12 }
  0x5f   : > { %v1520_v32 = vrot.slane %v1519_v23, 4  ;;  %v1538_v56 = vrot.slane %v1536_v19, 5  ;;  %v1888_v39 = vrot.slane %v10050_v22, 5  ;;  %v1511_v62 = vsel %vm12114_vm4, %v1506_v14, %v1510_v21 }
  0x60   : > { %v1885_v0 = vsel %vm12231_vm7, %v10108_v2, %v1884_v43  ;;  %v10110_v48 = vrot.slane %v10094_v24, 9  ;;  %v1892_v8 = vrot.slane %v10052_v45, 5  ;;  %v10074_v4 = vcombine.low %v1497_v52, %v1511_v62  ;;  %v12487_v45 = vld [vmem:[%s12082_s14 + $0x64] sm:$0x1]  ;;  %v10098_v52 = vld [vmem:[%s12082_s14 + $0x68] sm:$0xe] }
  0x61   : > { %v1525_v26 = vsel %vm12114_vm4, %v1520_v32, %v1524_v58  ;;  %v1534_v34 = vrot.slane %v1533_v41, 4  ;;  %v1889_v22 = vsel %vm12231_vm7, %v10109_v25, %v1888_v39  ;;  %v10111_v61 = vrot.slane %v10095_v6, 9  ;;  %v10099_v62 = vld [vmem:[%s12082_s14 + $0x70] sm:$0xe] }
  0x62   : > { %v10123_v37 = vcombine.low %v1885_v0, %v1889_v22  ;;  %v1893_v10 = vsel %vm12231_vm7, %v10110_v48, %v1892_v8  ;;  %v1896_v27 = vrot.slane %v12450_v55, 5  ;;  %v1541_v49 = vshrl.u32 %v10055_v31, 16  ;;  %v10061_v55 = vld [vmem:[%s12082_s14 + $0x70] sm:$0xf] }
  0x63   : > { %11258 = vmatmul.mubr.msk.bf16.gmra.mxu0 %vm626_vm2, %v9997_v1  ;;  %11300 = vmatmul.mubr.msk.bf16.vlgmr.msra.gmra.mxu1 %vm626_vm2, %v10122_v36  ;;  %v1539_v47 = vsel %vm12114_vm4, %v1534_v34, %v1538_v56  ;;  %v1544_v33 = vshll.u32 %v10055_v31, 16  ;;  %v1550_v42 = vshll.u32 %v12476_v7, 16  ;;  %v1555_v18 = vshrl.u32 %v10057_v35, 16  ;;  %v12506_v36 = vld [vmem:[%s12082_s14 + $0x6c] sm:$0x1] }
  0x64   : > { %11281 = vmatprep.mubr.msk.bf16.mxu0 %vm626_vm2, %v12410_v40  ;;  %v12500_v54 = vcombine.low %v1525_v26, %v1539_v47  ;;  %11303 = vmatprep.mubr.msk.bf16.mxu1 %vm626_vm2, %v10123_v37  ;;  %v1897_v53 = vsel %vm12231_vm7, %v10111_v61, %v1896_v27  ;;  %v1558_v1 = vshll.u32 %v10057_v35, 16  ;;  %v1543_v60 = vrot.slane %v1541_v49, 4  ;;  %v10096_v40 = vld [vmem:[%s12082_s14 + $0x58] sm:$0xe]  ;;  %v10065_v27 = vld [vmem:[%s12082_s14 + $0x80] sm:$0xf] }
  0x65   : > { %v10124_v57 = vcombine.low %v1893_v10, %v1897_v53  ;;  %v1546_v11 = vrot.slane %v1544_v33, 5  ;;  %v1552_v44 = vrot.slane %v1550_v42, 5  ;;  %11334 = vmatpush3.bf16.msra.mxu1 %v12086_v16  ;;  %v1557_v63 = vrot.slane %v1555_v18, 4  ;;  %v10063_v31 = vld [vmem:[%s12082_s14 + $0x78] sm:$0xf] }
  0x66   : > { %v1560_v20 = vrot.slane %v1558_v1, 5  ;;  %v1564_v21 = vshll.u32 %v12487_v45, 16  ;;  %v1569_v28 = vshrl.u32 %v10059_v51, 16  ;;  %v1572_v5 = vshll.u32 %v10059_v51, 16  ;;  %v12549_v33 = vld [vmem:[%s12082_s14 + $0x84] sm:$0x1] }
  0x67   : > { %v1547_v3 = vor.u32 %v1546_v11, %v1543_v60  ;;  %v1578_v9 = vshll.u32 %v12506_v36, 16  ;;  %v1583_v15 = vshrl.u32 %v10061_v55, 16  ;;  %v1586_v50 = vshll.u32 %v10061_v55, 16  ;;  %v10067_v51 = vld [vmem:[%s12082_s14 + $0x88] sm:$0xf] }
  0x68   : > { %v1561_v58 = vor.u32 %v1560_v20, %v1557_v63  ;;  %v1566_v12 = vrot.slane %v1564_v21, 5  ;;  %v1571_v23 = vrot.slane %v1569_v28, 4  ;;  %v1574_v2 = vrot.slane %v1572_v5, 5  ;;  %v12558_v55 = vld [vmem:[%s12082_s14 + $0x8c] sm:$0x1] }
  0x69   : > { %v1548_v19 = vrot.slane %v1547_v3, 4  ;;  %v1580_v16 = vrot.slane %v1578_v9, 5  ;;  %v1585_v24 = vrot.slane %v1583_v15, 4  ;;  %v1588_v43 = vrot.slane %v1586_v50, 5  ;;  %v12565_v28 = vld [vmem:[%s12082_s14 + $0x94] sm:$0x1] }
  0x6a   : > { %v1562_v14 = vrot.slane %v1561_v58, 4  ;;  %v1592_v25 = vshll.u32 %v12510_v59, 16  ;;  %v10112_v32 = vrot.slane %v10096_v40, 9  ;;  %v1575_v56 = vor.u32 %v1574_v2, %v1571_v23  ;;  %v10100_v50 = vld [vmem:[%s12082_s14 + $0x78] sm:$0xe] }
  0x6b   : > { %11282 = vmatmul.mubr.msk.bf16.vlgmr.msra.gmra.mxu0 %vm626_vm2, %v12439_v38  ;;  %11304 = vmatmul.mubr.msk.bf16.gmra.mxu1 %vm626_vm2, %v10124_v57  ;;  %v1553_v41 = vsel %vm12114_vm4, %v1548_v19, %v1552_v44  ;;  %v1900_v39 = vrot.slane %v12476_v7, 5  ;;  %v10113_v6 = vrot.slane %v10097_v29, 9  ;;  %v1589_v38 = vor.u32 %v1588_v43, %v1585_v24  ;;  %v10101_v24 = vld [vmem:[%s12082_s14 + $0x80] sm:$0xe] }
  0x6c   : > { %11316 = vmatpush3.bf16.msra.mxu0 %v12069_v13  ;;  %11285 = vmatprep.mubr.msk.bf16.mxu0 %vm626_vm2, %v10074_v4  ;;  %v1567_v0 = vsel %vm12114_vm4, %v1562_v14, %v1566_v12  ;;  %v1594_v48 = vrot.slane %v1592_v25, 5  ;;  %v1904_v8 = vrot.slane %v12487_v45, 5  ;;  %v1576_v34 = vrot.slane %v1575_v56, 4  ;;  %v12535_v13 = vld [vmem:[%s12082_s14 + $0x7c] sm:$0x1] }
  0x6d   : > { %v10076_v26 = vcombine.low %v1553_v41, %v1567_v0  ;;  %v1901_v7 = vsel %vm12231_vm7, %v10112_v32, %v1900_v39  ;;  %v10114_v22 = vrot.slane %v10098_v52, 9  ;;  %v11950_v4 = vld [vmem:[%s15744_s1 + $0x20] sm:$0xf]  ;;  %v1590_v35 = vrot.slane %v1589_v38, 4 }
  0x6e   : > { %11805 = vmatprep.subr.msk.bf16.mxu0 %vm651_vm0, %v11950_v4  ;;  %v1905_v37 = vsel %vm12231_vm7, %v10113_v6, %v1904_v8  ;;  %v1908_v10 = vrot.slane %v12506_v36, 5  ;;  %v10115_v61 = vrot.slane %v10099_v62, 9  ;;  %v1581_v45 = vsel %vm12114_vm4, %v1576_v34, %v1580_v16  ;;  %v10102_v6 = vld [vmem:[%s12082_s14 + $0x88] sm:$0xe]  ;;  %v10103_v8 = vld [vmem:[%s12082_s14 + $0x90] sm:$0xe] }
  0x6f   : > { %v10125_v47 = vcombine.low %v1901_v7, %v1905_v37  ;;  %v1912_v49 = vrot.slane %v12510_v59, 5  ;;  %v1597_v42 = vshrl.u32 %v10063_v31, 16  ;;  %v1595_v53 = vsel %vm12114_vm4, %v1590_v35, %v1594_v48  ;;  %v10069_v59 = vld [vmem:[%s12082_s14 + $0x90] sm:$0xf] }
  0x70   : > { %v1909_v18 = vsel %vm12231_vm7, %v10114_v22, %v1908_v10  ;;  %v1600_v1 = vshll.u32 %v10063_v31, 16  ;;  %v1606_v36 = vshll.u32 %v12535_v13, 16  ;;  %v10077_v57 = vcombine.low %v1581_v45, %v1595_v53  ;;  %v10170_v22 = vld [vmem:[%s12082_s14 + $0x10] sm:$0xf]  ;;  %v12589_v10 = vld [vmem:[%s12082_s14 + $0x14] sm:$0x1] }
  0x71   : > { %11307 = vmatprep.mubr.msk.bf16.mxu1 %vm626_vm2, %v10125_v47  ;;  %v1913_v60 = vsel %vm12231_vm7, %v10115_v61, %v1912_v49  ;;  %v1599_v11 = vrot.slane %v1597_v42, 4  ;;  %v1611_v44 = vshrl.u32 %v10065_v27, 16  ;;  %v1614_v21 = vshll.u32 %v10065_v27, 16  ;;  %v10172_v61 = vld [vmem:[%s12082_s14 + $0x18] sm:$0xf] }
  0x72   : > { %v10126_v40 = vcombine.low %v1909_v18, %v1913_v60  ;;  %v1602_v63 = vrot.slane %v1600_v1, 5  ;;  %v1608_v20 = vrot.slane %v1606_v36, 5  ;;  %v1620_v3 = vshll.u32 %v12549_v33, 16  ;;  %v10174_v42 = vld [vmem:[%s12082_s14 + $0x20] sm:$0xf] }
  0x73   : > { %11286 = vmatmul.mubr.msk.bf16.gmra.mxu0 %vm626_vm2, %v12500_v54  ;;  %v1613_v29 = vrot.slane %v1611_v44, 4  ;;  %v1625_v5 = vshrl.u32 %v10067_v51, 16  ;;  %v1628_v9 = vshll.u32 %v10067_v51, 16  ;;  %v1616_v58 = vrot.slane %v1614_v21, 5  ;;  %v12605_v36 = vld [vmem:[%s12082_s14 + $0x24] sm:$0x1] }
  0x74   : > { %11289 = vmatprep.mubr.msk.bf16.mxu0 %vm626_vm2, %v10076_v26  ;;  %11308 = vmatmul.mubr.msk.bf16.gmra.mxu1 %vm626_vm2, %v10126_v40  ;;  %v1603_v15 = vor.u32 %v1602_v63, %v1599_v11  ;;  %v1634_v12 = vshll.u32 %v12558_v55, 16  ;;  %v1639_v23 = vshrl.u32 %v10069_v59, 16  ;;  %v1622_v19 = vrot.slane %v1620_v3, 5 }
  0x75   : > { %v1627_v2 = vrot.slane %v1625_v5, 4  ;;  %v1630_v54 = vrot.slane %v1628_v9, 5  ;;  %v1642_v16 = vshll.u32 %v10069_v59, 16  ;;  %v1617_v14 = vor.u32 %v1616_v58, %v1613_v29 }
  0x76   : > { %v1604_v52 = vrot.slane %v1603_v15, 4  ;;  %v1636_v43 = vrot.slane %v1634_v12, 5  ;;  %v1641_v25 = vrot.slane %v1639_v23, 4  ;;  %v1648_v56 = vshll.u32 %v12565_v28, 16  ;;  %v12618_v12 = vld [vmem:[%s12082_s14 + $0x2c] sm:$0x1] }
  0x77   : > { %v1631_v32 = vor.u32 %v1630_v54, %v1627_v2  ;;  %v1644_v41 = vrot.slane %v1642_v16, 5  ;;  %v10116_v39 = vrot.slane %v10100_v50, 9  ;;  %v1618_v0 = vrot.slane %v1617_v14, 4  ;;  %v10178_v16 = vld [vmem:[%s12082_s14 + $0x30] sm:$0xf] }
  0x78   : > { %v1609_v62 = vsel %vm12114_vm4, %v1604_v52, %v1608_v20  ;;  %v1916_v38 = vrot.slane %v12535_v13, 5  ;;  %v10117_v48 = vrot.slane %v10101_v24, 9  ;;  %v1650_v34 = vrot.slane %v1648_v56, 5  ;;  %v10176_v20 = vld [vmem:[%s12082_s14 + $0x28] sm:$0xf] }
  0x79   : > { %v1632_v31 = vrot.slane %v1631_v32, 4  ;;  %v1645_v26 = vor.u32 %v1644_v41, %v1641_v25  ;;  %v1920_v7 = vrot.slane %v12549_v33, 5  ;;  %v1623_v4 = vsel %vm12114_vm4, %v1618_v0, %v1622_v19  ;;  %v12598_v33 = vld [vmem:[%s12082_s14 + $0x1c] sm:$0x1]  ;;  %v12624_v25 = vld [vmem:[%s12082_s14 + $0x34] sm:$0x1] }
  0x7a   : > { %v1917_v35 = vsel %vm12231_vm7, %v10116_v39, %v1916_v38  ;;  %v10118_v37 = vrot.slane %v10102_v6, 9  ;;  %v1924_v13 = vrot.slane %v12558_v55, 5  ;;  %v10078_v27 = vcombine.low %v1609_v62, %v1623_v4  ;;  %v10180_v38 = vld [vmem:[%s12082_s14 + $0x38] sm:$0xf]  ;;  %v10182_v4 = vld [vmem:[%s12082_s14 + $0x40] sm:$0xf] }
  0x7b   : > { %11290 = vmatmul.mubr.msk.bf16.gmra.mxu0 %vm626_vm2, %v10077_v57  ;;  %v1637_v45 = vsel %vm12114_vm4, %v1632_v31, %v1636_v43  ;;  %v1646_v47 = vrot.slane %v1645_v26, 4  ;;  %v1921_v49 = vsel %vm12231_vm7, %v10117_v48, %v1920_v7  ;;  %v10119_v18 = vrot.slane %v10103_v8, 9  ;;  %v11833_v8 = vld [vmem:[%s12082_s14 + $0x20] ss:$8 sps:$4 sm:$0xff]  }
  0x7c   : > { %v10127_v51 = vcombine.low %v1917_v35, %v1921_v49  ;;  %v1925_v53 = vsel %vm12231_vm7, %v10118_v37, %v1924_v13  ;;  %v1928_v1 = vrot.slane %v12565_v28, 5  ;;  %11293 = vmatprep.mubr.msk.bf16.mxu0 %vm626_vm2, %v10078_v27  ;;  %v2328_v57 = vshrl.u32 %v10170_v22, 16  ;;  %v11832_v28 = vld [vmem:[%s12082_s14 + $0x10] ss:$8 sps:$4 sm:$0xff]  }
  0x7d   : > { %v1651_v55 = vsel %vm12114_vm4, %v1646_v47, %v1650_v34  ;;  %v2331_v60 = vshll.u32 %v10170_v22, 16  ;;  %v2337_v11 = vshll.u32 %v12589_v10, 16  ;;  %v2342_v40 = vshrl.u32 %v10172_v61, 16  ;;  %v12634_v34 = vld [vmem:[%s12082_s14 + $0x3c] sm:$0x1] }
  0x7e   : > { %v10079_v44 = vcombine.low %v1637_v45, %v1651_v55  ;;  %11311 = vmatprep.mubr.msk.bf16.mxu1 %vm626_vm2, %v10127_v51  ;;  %v1929_v59 = vsel %vm12231_vm7, %v10119_v18, %v1928_v1  ;;  %v2345_v63 = vshll.u32 %v10172_v61, 16  ;;  %v2330_v29 = vrot.slane %v2328_v57, 4  ;;  %v11834_v61 = vld [vmem:[%s12082_s14 + $0x30] ss:$8 sps:$4 sm:$0xff]   ;;  %v12642_v51 = vld [vmem:[%s12082_s14 + $0x44] sm:$0x1] }
  0x7f   : > { %v10128_v21 = vcombine.low %v1925_v53, %v1929_v59  ;;  %v2333_v3 = vrot.slane %v2331_v60, 5  ;;  %v2339_v5 = vrot.slane %v2337_v11, 5  ;;  %v2344_v9 = vrot.slane %v2342_v40, 4  ;;  %v10184_v53 = vld [vmem:[%s12082_s14 + $0x48] sm:$0xf] }
  0x80   : > { %v2347_v15 = vrot.slane %v2345_v63, 5  ;;  %v2351_v58 = vshll.u32 %v12598_v33, 16  ;;  %v2356_v23 = vshrl.u32 %v10174_v42, 16  ;;  %v2359_v19 = vshll.u32 %v10174_v42, 16 }
  0x81   : > { %11312 = vmatmul.mubr.msk.bf16.gmra.mxu1 %vm626_vm2, %v10128_v21  ;;  %v2334_v50 = vor.u32 %v2333_v3, %v2330_v29  ;;  %v2365_v2 = vshll.u32 %v12605_v36, 16  ;;  %v2370_v54 = vshrl.u32 %v10176_v20, 16  ;;  %v2373_v43 = vshll.u32 %v10176_v20, 16  ;;  %v10186_v29 = vld [vmem:[%s12082_s14 + $0x60] sm:$0xf] }
  0x82   : > { %v2348_v24 = vor.u32 %v2347_v15, %v2344_v9  ;;  %v2353_v52 = vrot.slane %v2351_v58, 5  ;;  %v2358_v14 = vrot.slane %v2356_v23, 4  ;;  %v2361_v41 = vrot.slane %v2359_v19, 5 }
  0x83   : > { %11294 = vmatmul.mubr.msk.bf16.gmra.mxu0 %vm626_vm2, %v10079_v44  ;;  %v2335_v32 = vrot.slane %v2334_v50, 4  ;;  %v2367_v56 = vrot.slane %v2365_v2, 5  ;;  %v2372_v39 = vrot.slane %v2370_v54, 4  ;;  %v2375_v62 = vrot.slane %v2373_v43, 5  ;;  %v12650_v44 = vld [vmem:[%s12082_s14 + $0x4c] sm:$0x1] }
  0x84   : > { %11317 = vmatprep.mubr.msk.bf16.mxu0 %vm626_vm2, %v11832_v28  ;;  %v2349_v6 = vrot.slane %v2348_v24, 4  ;;  %v2379_v0 = vshll.u32 %v12618_v12, 16  ;;  %v2384_v48 = vshrl.u32 %v10178_v16, 16  ;;  %v2362_v26 = vor.u32 %v2361_v41, %v2358_v14  ;;  %v12664_v24 = vld [vmem:[%s12082_s14 + $0x64] sm:$0x1] }
  0x85   : > { %v2340_v31 = vsel %vm12114_vm4, %v2335_v32, %v2339_v5  ;;  %v2387_v7 = vshll.u32 %v10178_v16, 16  ;;  %v2393_v22 = vshll.u32 %v12624_v25, 16  ;;  %v2376_v37 = vor.u32 %v2375_v62, %v2372_v39  ;;  %v11835_v14 = vld [vmem:[%s12082_s14 + $0x40] ss:$8 sps:$4 sm:$0xff]   ;;  %v12669_v62 = vld [vmem:[%s12082_s14 + $0x6c] sm:$0x1] }
  0x86   : > { %v2354_v35 = vsel %vm12114_vm4, %v2349_v6, %v2353_v52  ;;  %v2381_v13 = vrot.slane %v2379_v0, 5  ;;  %v2386_v27 = vrot.slane %v2384_v48, 4  ;;  %v2363_v47 = vrot.slane %v2362_v26, 4 }
  0x87   : > { %v10203_v45 = vcombine.low %v2340_v31, %v2354_v35  ;;  %v2389_v49 = vrot.slane %v2387_v7, 5  ;;  %v2395_v42 = vrot.slane %v2393_v22, 5  ;;  %v2377_v18 = vrot.slane %v2376_v37, 4  ;;  %v11836_v31 = vld [vmem:[%s12082_s14 + $0x60] ss:$8 sps:$4 sm:$0xff]  }
  0x88   : > { %v2398_v1 = vshrl.u32 %v10180_v38, 16  ;;  %v2401_v55 = vshll.u32 %v10180_v38, 16  ;;  %v2407_v57 = vshll.u32 %v12634_v34, 16  ;;  %v2368_v60 = vsel %vm12114_vm4, %v2363_v47, %v2367_v56  ;;  %v10190_v22 = vld [vmem:[%s12082_s14 + $0x70] sm:$0xf] }
  0x89   : > { %11335 = vmatprep.mubr.msk.bf16.mxu1 %vm626_vm2, %v10203_v45  ;;  %v2390_v11 = vor.u32 %v2389_v49, %v2386_v27  ;;  %v2412_v59 = vshrl.u32 %v10182_v4, 16  ;;  %v2415_v40 = vshll.u32 %v10182_v4, 16  ;;  %v2382_v63 = vsel %vm12114_vm4, %v2377_v18, %v2381_v13  ;;  %v10192_v27 = vld [vmem:[%s12082_s14 + $0x78] sm:$0xf] }
  0x8a   : > { %v2400_v20 = vrot.slane %v2398_v1, 4  ;;  %v2403_v21 = vrot.slane %v2401_v55, 5  ;;  %v2409_v28 = vrot.slane %v2407_v57, 5  ;;  %v10204_v3 = vcombine.low %v2368_v60, %v2382_v63  ;;  %v12686_v1 = vld [vmem:[%s12082_s14 + $0x7c] sm:$0x1] }
  0x8b   : > { %11318 = vmatmul.mubr.msk.bf16.vlgmr.msra.gmra.mxu0 %vm626_vm2, %v11833_v8  ;;  %v2391_v5 = vrot.slane %v2390_v11, 4  ;;  %v2414_v9 = vrot.slane %v2412_v59, 4  ;;  %v2417_v15 = vrot.slane %v2415_v40, 5  ;;  %v2421_v23 = vshll.u32 %v12642_v51, 16  ;;  %v10194_v63 = vld [vmem:[%s12082_s14 + $0x80] sm:$0xf] }
  0x8c   : > { %11352 = vmatpush3.bf16.msra.mxu0 %v12089_v17  ;;  %11321 = vmatprep.mubr.msk.bf16.mxu0 %vm626_vm2, %v11834_v61  ;;  %v2404_v58 = vor.u32 %v2403_v21, %v2400_v20  ;;  %v2426_v50 = vshrl.u32 %v10184_v53, 16  ;;  %v2429_v19 = vshll.u32 %v10184_v53, 16  ;;  %v2435_v16 = vshll.u32 %v12650_v44, 16  ;;  %v10188_v17 = vld [vmem:[%s12082_s14 + $0x68] sm:$0xf] }
  0x8d   : > { %11336 = vmatmul.mubr.msk.bf16.vlgmr.msra.gmra.mxu1 %vm626_vm2, %v10204_v3  ;;  %v2396_v2 = vsel %vm12114_vm4, %v2391_v5, %v2395_v42  ;;  %v2418_v54 = vor.u32 %v2417_v15, %v2414_v9  ;;  %v2440_v52 = vshrl.u32 %v10186_v29, 16  ;;  %v2423_v32 = vrot.slane %v2421_v23, 5  ;;  %v12679_v61 = vld [vmem:[%s12082_s14 + $0x74] sm:$0x1]  ;;  %v11837_v21 = vld [vmem:[%s12082_s14 + $0x70] ss:$8 sps:$4 sm:$0xff]  }
  0x8e   : > { %v2405_v43 = vrot.slane %v2404_v58, 4  ;;  %v2428_v41 = vrot.slane %v2426_v50, 4  ;;  %v2431_v56 = vrot.slane %v2429_v19, 5  ;;  %v2437_v6 = vrot.slane %v2435_v16, 5  ;;  %v12695_v5 = vld [vmem:[%s12082_s14 + $0x84] sm:$0x1] }
  0x8f   : > { %v2419_v39 = vrot.slane %v2418_v54, 4  ;;  %v2442_v0 = vrot.slane %v2440_v52, 4  ;;  %v2443_v38 = vshll.u32 %v10186_v29, 16  ;;  %v2449_v26 = vshll.u32 %v12664_v24, 16  ;;  %v10196_v50 = vld [vmem:[%s12082_s14 + $0x88] sm:$0xf] }
  0x90   : > { %v2410_v48 = vsel %vm12114_vm4, %v2405_v43, %v2409_v28  ;;  %v2432_v8 = vor.u32 %v2431_v56, %v2428_v41  ;;  %v2454_v7 = vshrl.u32 %v10188_v17, 16  ;;  %v2457_v13 = vshll.u32 %v10188_v17, 16  ;;  %v11838_v16 = vld [vmem:[%s12082_s14 + $0x80] ss:$8 sps:$4 sm:$0xff]   ;;  %v12704_v43 = vld [vmem:[%s12082_s14 + $0x8c] sm:$0x1] }
  0x91   : > { %v10205_v4 = vcombine.low %v2396_v2, %v2410_v48  ;;  %v2424_v35 = vsel %vm12114_vm4, %v2419_v39, %v2423_v32  ;;  %v2445_v37 = vrot.slane %v2443_v38, 5  ;;  %v2451_v47 = vrot.slane %v2449_v26, 5  ;;  %v10198_v38 = vld [vmem:[%s12082_s14 + $0x90] sm:$0xf] }
  0x92   : > { %v2433_v45 = vrot.slane %v2432_v8, 4  ;;  %v2456_v49 = vrot.slane %v2454_v7, 4  ;;  %v2463_v42 = vshll.u32 %v12669_v62, 16  ;;  %v2459_v18 = vrot.slane %v2457_v13, 5  ;;  %v12711_v7 = vld [vmem:[%s12082_s14 + $0x94] sm:$0x1] }
  0x93   : > { %11322 = vmatmul.mubr.msk.bf16.gmra.mxu0 %vm626_vm2, %v11835_v14  ;;  %11339 = vmatprep.mubr.msk.bf16.mxu1 %vm626_vm2, %v10205_v4  ;;  %v2446_v53 = vor.u32 %v2445_v37, %v2442_v0  ;;  %v2468_v55 = vshrl.u32 %v10190_v22, 16  ;;  %v2471_v57 = vshll.u32 %v10190_v22, 16  ;;  %v2477_v59 = vshll.u32 %v12679_v61, 16  ;;  %v10200_v22 = vld [vmem:[%s12082_s14 + $0x98] sm:$0xf] }
  0x94   : > { %v2438_v60 = vsel %vm12114_vm4, %v2433_v45, %v2437_v6  ;;  %11325 = vmatprep.mubr.msk.bf16.mxu0 %vm626_vm2, %v11836_v31  ;;  %v2465_v11 = vrot.slane %v2463_v42, 5  ;;  %v2482_v40 = vshrl.u32 %v10192_v27, 16  ;;  %v2460_v29 = vor.u32 %v2459_v18, %v2456_v49  ;;  %v11839_v18 = vld [vmem:[%s12082_s14 + $0x90] ss:$8 sps:$4 sm:$0xff]  }
  0x95   : > { %v10206_v20 = vcombine.low %v2424_v35, %v2438_v60  ;;  %v2447_v28 = vrot.slane %v2446_v53, 4  ;;  %v2470_v3 = vrot.slane %v2468_v55, 4  ;;  %v2473_v9 = vrot.slane %v2471_v57, 5  ;;  %v10219_v53 = vld [vmem:[%s12082_s14 + $0x10] sm:$0xe] }
  0x96   : > { %v2479_v15 = vrot.slane %v2477_v59, 5  ;;  %v2484_v58 = vrot.slane %v2482_v40, 4  ;;  %v2485_v23 = vshll.u32 %v10192_v27, 16  ;;  %v2461_v2 = vrot.slane %v2460_v29, 4  ;;  %v12717_v27 = vld [vmem:[%s12082_s14 + $0x9c] sm:$0x1] }
  0x97   : > { %11340 = vmatmul.mubr.msk.bf16.gmra.mxu1 %vm626_vm2, %v10206_v20  ;;  %v2452_v19 = vsel %vm12114_vm4, %v2447_v28, %v2451_v47  ;;  %v2491_v54 = vshll.u32 %v12686_v1, 16  ;;  %v2496_v17 = vshrl.u32 %v10194_v63, 16  ;;  %v2474_v52 = vor.u32 %v2473_v9, %v2470_v3  ;;  %v10220_v59 = vld [vmem:[%s12082_s14 + $0x18] sm:$0xe]  ;;  %v10221_v28 = vld [vmem:[%s12082_s14 + $0x20] sm:$0xe] }
  0x98   : > { %v2487_v14 = vrot.slane %v2485_v23, 5  ;;  %v2499_v32 = vshll.u32 %v10194_v63, 16  ;;  %v2505_v41 = vshll.u32 %v12695_v5, 16  ;;  %v2466_v56 = vsel %vm12114_vm4, %v2461_v2, %v2465_v11  ;;  %v10222_v2 = vld [vmem:[%s12082_s14 + $0x28] sm:$0xe] }
  0x99   : > { %v2493_v39 = vrot.slane %v2491_v54, 5  ;;  %v2498_v6 = vrot.slane %v2496_v17, 4  ;;  %v2510_v0 = vshrl.u32 %v10196_v50, 16  ;;  %v10207_v48 = vcombine.low %v2452_v19, %v2466_v56 }
  0x9a   : > { %v2475_v8 = vrot.slane %v2474_v52, 4  ;;  %v2488_v31 = vor.u32 %v2487_v14, %v2484_v58  ;;  %v2501_v26 = vrot.slane %v2499_v32, 5  ;;  %v2507_v4 = vrot.slane %v2505_v41, 5  ;;  %v10223_v14 = vld [vmem:[%s12082_s14 + $0x30] sm:$0xe] }
  0x9b   : > { %11326 = vmatmul.mubr.msk.bf16.gmra.mxu0 %vm626_vm2, %v11837_v21  ;;  %v2512_v35 = vrot.slane %v2510_v0, 4  ;;  %v2513_v37 = vshll.u32 %v10196_v50, 16  ;;  %v2519_v13 = vshll.u32 %v12704_v43, 16  ;;  %11343 = vmatprep.mubr.msk.bf16.mxu1 %vm626_vm2, %v10207_v48  ;;  %v2524_v42 = vshrl.u32 %v10198_v38, 16  ;;  %v10225_v0 = vld [vmem:[%s12082_s14 + $0x40] sm:$0xe] }
  0x9c   : > { %v2480_v45 = vsel %vm12114_vm4, %v2475_v8, %v2479_v15  ;;  %v2489_v47 = vrot.slane %v2488_v31, 4  ;;  %11329 = vmatprep.mubr.msk.bf16.mxu0 %vm626_vm2, %v11838_v16  ;;  %v2502_v49 = vor.u32 %v2501_v26, %v2498_v6  ;;  %v2527_v60 = vshll.u32 %v10198_v38, 16  ;;  %v10224_v6 = vld [vmem:[%s12082_s14 + $0x38] sm:$0xe] }
  0x9d   : > { %v2515_v55 = vrot.slane %v2513_v37, 5  ;;  %v2521_v57 = vrot.slane %v2519_v13, 5  ;;  %v2533_v11 = vshll.u32 %v12711_v7, 16  ;;  %v2526_v20 = vrot.slane %v2524_v42, 4 }
  0x9e   : > { %v2494_v40 = vsel %vm12114_vm4, %v2489_v47, %v2493_v39  ;;  %v2503_v63 = vrot.slane %v2502_v49, 4  ;;  %v2538_v21 = vshrl.u32 %v10200_v22, 16  ;;  %v2529_v9 = vrot.slane %v2527_v60, 5  ;;  %v10227_v47 = vld [vmem:[%s12082_s14 + $0x60] sm:$0xe] }
  0x9f   : > { %v10208_v29 = vcombine.low %v2480_v45, %v2494_v40  ;;  %v2516_v3 = vor.u32 %v2515_v55, %v2512_v35  ;;  %v2535_v15 = vrot.slane %v2533_v11, 5  ;;  %v2541_v50 = vshll.u32 %v10200_v22, 16  ;;  %v10229_v55 = vld [vmem:[%s12082_s14 + $0x70] sm:$0xe] }
  0xa0   : > { %v2508_v58 = vsel %vm12114_vm4, %v2503_v63, %v2507_v4  ;;  %v2540_v23 = vrot.slane %v2538_v21, 4  ;;  %v2547_v19 = vshll.u32 %v12717_v27, 16  ;;  %v2530_v16 = vor.u32 %v2529_v9, %v2526_v20  ;;  %v10226_v4 = vld [vmem:[%s12082_s14 + $0x48] sm:$0xe]  ;;  %v10231_v21 = vld [vmem:[%s12082_s14 + $0x80] sm:$0xe] }
  0xa1   : > { %11344 = vmatmul.mubr.msk.bf16.gmra.mxu1 %vm626_vm2, %v10208_v29  ;;  %v2517_v54 = vrot.slane %v2516_v3, 4  ;;  %v10235_v17 = vrot.slane %v10219_v53, 9  ;;  %v2767_v52 = vrot.slane %v12589_v10, 5  ;;  %v2543_v32 = vrot.slane %v2541_v50, 5  ;;  %v10232_v9 = vld [vmem:[%s12082_s14 + $0x88] sm:$0xe] }
  0xa2   : > { %v2549_v41 = vrot.slane %v2547_v19, 5  ;;  %v10236_v56 = vrot.slane %v10220_v59, 9  ;;  %v2771_v39 = vrot.slane %v12598_v33, 5  ;;  %v2531_v48 = vrot.slane %v2530_v16, 4  ;;  %v10230_v59 = vld [vmem:[%s12082_s14 + $0x78] sm:$0xe] }
  0xa3   : > { %11330 = vmatmul.mubr.msk.bf16.gmra.mxu0 %vm626_vm2, %v11839_v18  ;;  %v2522_v38 = vsel %vm12114_vm4, %v2517_v54, %v2521_v57  ;;  %v2768_v8 = vsel %vm12231_vm7, %v10235_v17, %v2767_v52  ;;  %v10237_v10 = vrot.slane %v10221_v28, 9  ;;  %v2544_v26 = vor.u32 %v2543_v32, %v2540_v23  ;;  %v10228_v18 = vld [vmem:[%s12082_s14 + $0x68] sm:$0xe]  ;;  %v10233_v50 = vld [vmem:[%s12082_s14 + $0x90] sm:$0xe] }
  0xa4   : > { %v10209_v31 = vcombine.low %v2508_v58, %v2522_v38  ;;  %v2772_v33 = vsel %vm12231_vm7, %v10236_v56, %v2771_v39  ;;  %v2775_v22 = vrot.slane %v12605_v36, 5  ;;  %v2536_v35 = vsel %vm12114_vm4, %v2531_v48, %v2535_v15  ;;  %v10234_v16 = vld [vmem:[%s12082_s14 + $0x98] sm:$0xe] }
  0xa5   : > { %v10252_v37 = vcombine.low %v2768_v8, %v2772_v33  ;;  %v10238_v13 = vrot.slane %v10222_v2, 9  ;;  %v2779_v45 = vrot.slane %v12618_v12, 5  ;;  %v2545_v49 = vrot.slane %v2544_v26, 4 }
  0xa6   : > { %11347 = vmatprep.mubr.msk.bf16.mxu1 %vm626_vm2, %v10209_v31  ;;  %v2776_v42 = vsel %vm12231_vm7, %v10237_v10, %v2775_v22  ;;  %v10239_v53 = vrot.slane %v10223_v14, 9  ;;  %v2783_v36 = vrot.slane %v12624_v25, 5  ;;  %v10240_v12 = vrot.slane %v10224_v6, 9 }
  0xa7   : > { %11353 = vmatprep.mubr.msk.bf16.mxu0 %vm626_vm2, %v10252_v37  ;;  %v2780_v57 = vsel %vm12231_vm7, %v10238_v13, %v2779_v45  ;;  %v2787_v60 = vrot.slane %v12634_v34, 5  ;;  %v10241_v11 = vrot.slane %v10225_v0, 9  ;;  %v2550_v40 = vsel %vm12114_vm4, %v2545_v49, %v2549_v41 }
  0xa8   : > { %v10253_v63 = vcombine.low %v2776_v42, %v2780_v57  ;;  %v2784_v25 = vsel %vm12231_vm7, %v10239_v53, %v2783_v36  ;;  %v2791_v20 = vrot.slane %v12642_v51, 5  ;;  %v10210_v28 = vcombine.low %v2536_v35, %v2550_v40 }
  0xa9   : > { %v2788_v29 = vsel %vm12231_vm7, %v10240_v12, %v2787_v60  ;;  %v10242_v3 = vrot.slane %v10226_v4, 9  ;;  %v2795_v34 = vrot.slane %v12650_v44, 5  ;;  %v10243_v58 = vrot.slane %v10227_v47, 9 }
  0xaa   : > { %v10254_v15 = vcombine.low %v2784_v25, %v2788_v29  ;;  %v2799_v23 = vrot.slane %v12664_v24, 5  ;;  %11348 = vmatmul.mubr.msk.bf16.gmra.mxu1 %vm626_vm2, %v10210_v28  ;;  %v2792_v51 = vsel %vm12231_vm7, %v10241_v11, %v2791_v20  ;;  %v10244_v19 = vrot.slane %v10228_v18, 9  ;;  %v3063_v28 = vld [vmem:[#allocation2 + $0x18] sm:$0x1]  ;;  %v3113_v29 = vld [vmem:[#allocation2 + $0x1c] sm:$0x1] }
  0xab   : > { %11354 = vmatmul.mubr.msk.bf16.vlgmr.msra.gmra.mxu0 %vm626_vm2, %v10253_v63  ;;  %v2803_v2 = vrot.slane %v12669_v62, 5  ;;  %v10245_v54 = vrot.slane %v10229_v55, 9  ;;  %v2796_v44 = vsel %vm12231_vm7, %v10242_v3, %v2795_v34  ;;  %v2807_v17 = vrot.slane %v12679_v61, 5 }
  0xac   : > { %11357 = vmatprep.mubr.msk.bf16.mxu0 %vm626_vm2, %v10254_v15  ;;  %v2800_v24 = vsel %vm12231_vm7, %v10243_v58, %v2799_v23  ;;  %v10246_v52 = vrot.slane %v10230_v59, 9  ;;  %v2811_v32 = vrot.slane %v12686_v1, 5  ;;  %v10247_v41 = vrot.slane %v10231_v21, 9 }
  0xad   : > { %v2804_v14 = vsel %vm12231_vm7, %v10244_v19, %v2803_v2  ;;  %v2815_v62 = vrot.slane %v12695_v5, 5  ;;  %v10248_v56 = vrot.slane %v10232_v9, 9  ;;  %v2819_v39 = vrot.slane %v12704_v43, 5  ;;  %v3107_v19 = vld [vmem:[#allocation2 + $0xc] sm:$0x1] }
  0xae   : > { %v10255_v6 = vcombine.low %v2792_v51, %v2796_v44  ;;  %v10249_v0 = vrot.slane %v10233_v50, 9  ;;  %v2823_v38 = vrot.slane %v12711_v7, 5  ;;  %v10256_v48 = vcombine.low %v2800_v24, %v2804_v14  ;;  %v3057_v51 = vld [vmem:[#allocation2 + $0x8] sm:$0x1]  ;;  %v3066_v24 = vld [vmem:[#allocation2 + $0x20] sm:$0x1] }
  0xaf   : > { %v10250_v8 = vrot.slane %v10234_v16, 9  ;;  %v2827_v61 = vrot.slane %v12717_v27, 5  ;;  %v2808_v1 = vsel %vm12231_vm7, %v10245_v54, %v2807_v17  ;;  %v2812_v5 = vsel %vm12231_vm7, %v10246_v52, %v2811_v32  ;;  %v3116_v17 = vld [vmem:[#allocation2 + $0x24] sm:$0x1] }
  0xb0   : > { %v2816_v43 = vsel %vm12231_vm7, %v10247_v41, %v2815_v62  ;;  %v2820_v7 = vsel %vm12231_vm7, %v10248_v56, %v2819_v39  ;;  %v10257_v10 = vcombine.low %v2808_v1, %v2812_v5  ;;  %v2824_v27 = vsel %vm12231_vm7, %v10249_v0, %v2823_v38  ;;  %v3060_v56 = vld [vmem:[#allocation2 + $0x10] sm:$0x1]  ;;  %v3110_v39 = vld [vmem:[#allocation2 + $0x14] sm:$0x1]  ;;  %v3125_v1 = vld [vmem:[#allocation2 + $0x3c] sm:$0x1] }
  0xb1   : > { %v10258_v31 = vcombine.low %v2816_v43, %v2820_v7  ;;  %v2828_v26 = vsel %vm12231_vm7, %v10250_v8, %v2827_v61  ;;  %vm3044_vm8 = vcmask 253952   ;;  %vm3055_vm9 = vsmask.f32 256  ;;  %v3075_v61 = vld [vmem:[#allocation2 + $0x38] sm:$0x1] }
  0xb2   : > { %v10259_v33 = vcombine.low %v2824_v27, %v2828_v26  ;;  %vm12830_vm10 = vmand %vm3044_vm8, %vm3055_vm9  ;;  %v15775_v21 = vmov 0  ;;  %vm3105_vm11 = vsmask.f32 7938  ;;  %v3119_v27 = vld [vmem:[#allocation2 + $0x2c] sm:$0x1]  ;;  %vm3042_vm13 = vcmask 257024  }
  0xb3   : > { %11358 = vmatmul.mubr.msk.bf16.gmra.mxu0 %vm626_vm2, %v10255_v6  ;;  %v15776_v21 = vsel %vm12830_vm10, 4294967295, %v15775_v21  ;;  %v3064_v34 = vsel %vm12830_vm10, 0, %v3063_v28  ;;  %vm12840_vm12 = vmand %vm3044_vm8, %vm3105_vm11  ;;  %v3058_v54 = vsel %vm12830_vm10, 0, %v3057_v51  ;;  %v3067_v32 = vsel %vm12830_vm10, 0, %v3066_v24  ;;  %v3081_v24 = vld [vmem:[#allocation2 + $0x58] sm:$0x1] }
  0xb4   : > { %11361 = vmatprep.mubr.msk.bf16.mxu0 %vm626_vm2, %v10256_v48  ;;  %15777 = vst [vmem:[#allocation6_spill] sm:$0xff] %v15776_v21  ;;  %3065 = vst [vmem:[#allocation2 + $0x18] sm:$0x1] %v3064_v34  ;;  %v3114_v23 = vsel %vm12840_vm12, 0, %v3113_v29  ;;  %v3108_v16 = vsel %vm12840_vm12, 0, %v3107_v19  ;;  %v3117_v41 = vsel %vm12840_vm12, 0, %v3116_v17 }
  0xb5   : > { %3115 = vst [vmem:[#allocation2 + $0x1c] sm:$0x1] %v3114_v23  ;;  %3059 = vst [vmem:[#allocation2 + $0x8] sm:$0x1] %v3058_v54  ;;  %v3061_v38 = vsel %vm12830_vm10, 0, %v3060_v56  ;;  %v3111_v48 = vsel %vm12840_vm12, 0, %v3110_v39 }
  0xb6   : > { %3109 = vst [vmem:[#allocation2 + $0xc] sm:$0x1] %v3108_v16  ;;  %3068 = vst [vmem:[#allocation2 + $0x20] sm:$0x1] %v3067_v32  ;;  %v3076_v7 = vsel %vm12830_vm10, 0, %v3075_v61  ;;  %v15753_v54 = vmov 0  }
  0xb7   : > { %3118 = vst [vmem:[#allocation2 + $0x24] sm:$0x1] %v3117_v41  ;;  %3062 = vst [vmem:[#allocation2 + $0x10] sm:$0x1] %v3061_v38  ;;  %v3087_v34 = vld [vmem:[#allocation2 + $0x68] sm:$0x1] }
  0xb8   : > { %3112 = vst [vmem:[#allocation2 + $0x14] sm:$0x1] %v3111_v48  ;;  %3077 = vst [vmem:[#allocation2 + $0x38] sm:$0x1] %v3076_v7  ;;  %v3088_v19 = vsel %vm12830_vm10, 0, %v3087_v34  ;;  %v3082_v32 = vsel %vm12830_vm10, 0, %v3081_v24 }
  0xb9   : > { %3043 = vst.msk [vmem:[#allocation2] sm:$0xf] %vm3042_vm13, %v15753_v54  ;;  %3046 = vst.msk [vmem:[#allocation2 + $0x50] sm:$0xf] %vm3042_vm13, %v15753_v54  ;;  %v3131_v17 = vld [vmem:[#allocation2 + $0x5c] sm:$0x1] }
  0xba   : > { %3045 = vst.msk [vmem:[#allocation2 + $0x4] sm:$0x1] %vm3044_vm8, %v15753_v54  ;;  %3047 = vst.msk [vmem:[#allocation2 + $0x54] sm:$0x1] %vm3044_vm8, %v15753_v54  ;;  %v3132_v41 = vsel %vm12840_vm12, 0, %v3131_v17  ;;  %vm3754_vm15 = vcmask 261120  }
  0xbb   : > { %11362 = vmatmul.mubr.msk.bf16.gmra.mxu0 %vm626_vm2, %v10257_v10  ;;  %v3126_v10 = vsel %vm12840_vm12, 0, %v3125_v1  ;;  %3049 = vst.msk [vmem:[#allocation2 + $0x48] sm:$0xf] %vm3042_vm13, %v15753_v54  ;;  %3051 = vst.msk [vmem:[#allocation2 + $0x98] sm:$0xf] %vm3042_vm13, %v15753_v54  ;;  %v11842_v1 = vld [vmem:[%s15746_s3 + $0x8] sm:$0xff]  }
  0xbc   : > { %11365 = vmatprep.mubr.msk.bf16.mxu0 %vm626_vm2, %v10258_v31  ;;  %3127 = vst [vmem:[#allocation2 + $0x3c] sm:$0x1] %v3126_v10  ;;  %v3069_v31 = vld [vmem:[#allocation2 + $0x28] sm:$0x1]  ;;  %3050 = vst.msk [vmem:[#allocation2 + $0x4c] sm:$0x1] %vm3044_vm8, %v15753_v54  ;;  %11389 = vmatprep.subr.bf16.mxu0 %v11842_v1 }
  0xbd   : > { %3052 = vst.msk [vmem:[#allocation2 + $0x9c] sm:$0x1] %vm3044_vm8, %v15753_v54  ;;  %3089 = vst [vmem:[#allocation2 + $0x68] sm:$0x1] %v3088_v19  ;;  %v3090_v56 = vld [vmem:[#allocation2 + $0x70] sm:$0x1]  ;;  %11390 = vmatpush3.bf16.msra.mxu0 %v11842_v1 }
  0xbe   : > { %3083 = vst [vmem:[#allocation2 + $0x58] sm:$0x1] %v3082_v32  ;;  %3133 = vst [vmem:[#allocation2 + $0x5c] sm:$0x1] %v3132_v41  ;;  %v3140_v39 = vld [vmem:[#allocation2 + $0x74] sm:$0x1] }
  0xbf   : > { %v3091_v38 = vsel %vm12830_vm10, 0, %v3090_v56  ;;  %v3141_v48 = vsel %vm12840_vm12, 0, %v3140_v39  ;;  %v3084_v10 = vld [vmem:[#allocation2 + $0x60] sm:$0x1]  ;;  %v3143_v34 = vld [vmem:[#allocation2 + $0x7c] sm:$0x1]  ;;  %vm13294_vm14 = vmand %vm3042_vm13, %vm3105_vm11 }
  0xc0   : > { %3092 = vst [vmem:[#allocation2 + $0x70] sm:$0x1] %v3091_v38  ;;  %3142 = vst [vmem:[#allocation2 + $0x74] sm:$0x1] %v3141_v48  ;;  %v3152_v56 = vld [vmem:[#allocation2 + $0x94] sm:$0x1] }
  0xc1   : > { %vm6255_vm0 = vcmask 519168   ;;  %vm6257_vm1 = vcmask 516096   ;;  %vm6985_vm6 = vcmask 523264  }
  0xc2   : > { %vm14112_vm3 = vmand %vm6257_vm1, %vm3105_vm11 }
  0xc3   : > { %11366 = vmatmul.mubr.msk.bf16.gmra.mxu0 %vm626_vm2, %v10259_v33  ;;  %v3070_v33 = vsel %vm12830_vm10, 0, %v3069_v31  ;;  %v3134_v31 = vld [vmem:[#allocation2 + $0x64] sm:$0x1]  ;;  %vm14086_vm2 = vmand %vm6257_vm1, %vm3055_vm9 }
  0xc4   : > { %3071 = vst [vmem:[#allocation2 + $0x28] sm:$0x1] %v3070_v33  ;;  %v3085_v33 = vsel %vm12830_vm10, 0, %v3084_v10  ;;  %vm14571_vm5 = vmand %vm6255_vm0, %vm3105_vm11 }
  0xc5   : > { %3086 = vst [vmem:[#allocation2 + $0x60] sm:$0x1] %v3085_v33 }
  0xd9   : > { %v11229_v22 = vpop.f32.mrf.mxu1 }
  0xdb   : > { %v853_v4 = vpop.f32.mrf.mxu1 }
  0xdd   : > { %v11230_v35 = vpop.f32.mrf.mxu1 }
  0xdf   : > { %v12812_v13 = vpop.f32.mrf.mxu1 }
  0xe3   : > { %v11211_v37 = vpop.f32.mrf.mxu0 }
  0xe4   : > { %v12814_v45 = vadd.f32 %v11229_v22, %v11211_v37  ;;  %v3120_v22 = vsel %vm12840_vm12, 0, %v3119_v27 }
  0xe5   : > { %v689_v47 = vpop.f32.mrf.mxu0  ;;  %3121 = vst [vmem:[#allocation2 + $0x2c] sm:$0x1] %v3120_v22 }
  0xe6   : > { %v12816_v49 = vadd.f32 %v853_v4, %v689_v47  ;;  %v3078_v4 = vld [vmem:[#allocation2 + $0x40] sm:$0x1] }
  0xe7   : > { %v11212_v42 = vpop.f32.mrf.mxu0  ;;  %v11233_v53 = vpop.f32.mrf.mxu1 }
  0xe8   : > { %v12818_v36 = vadd.f32 %v11230_v35, %v11212_v42  ;;  %v3128_v35 = vld [vmem:[#allocation2 + $0x44] sm:$0x1]  ;;  %v3079_v42 = vsel %vm12830_vm10, 0, %v3078_v4 }
  0xe9   : > { %v869_v18 = vpop.f32.mrf.mxu1  ;;  %v12820_v55 = vpop.f32.mrf.mxu0  ;;  %3080 = vst [vmem:[#allocation2 + $0x40] sm:$0x1] %v3079_v42 }
  0xeb   : > { %v11234_v57 = vpop.f32.mrf.mxu1 }
  0xed   : > { %v12822_v12 = vpop.f32.mrf.mxu1 }
  0xee   : > { %v11215_v60 = vpop.f32.mrf.mxu0 }
  0xef   : > { %v12824_v11 = vadd.f32 %v11233_v53, %v11215_v60  ;;  %v3129_v53 = vsel %vm12840_vm12, 0, %v3128_v35  ;;  %v3122_v60 = vld [vmem:[#allocation2 + $0x34] sm:$0x1]  ;;  %v11843_v35 = vld [vmem:[%s15746_s3] sm:$0xff]  }
  0xf0   : > { %v705_v59 = vpop.f32.mrf.mxu0  ;;  %3130 = vst [vmem:[#allocation2 + $0x44] sm:$0x1] %v3129_v53  ;;  %v3123_v29 = vsel %vm12840_vm12, 0, %v3122_v60  ;;  %11391 = vmatprep.subr.bf16.mxu0 %v11843_v35  ;;  %v3099_v53 = vld [vmem:[#allocation2 + $0x88] sm:$0x1] }
  0xf1   : > { %v11237_v40 = vpop.f32.mrf.mxu1  ;;  %v12826_v63 = vadd.f32 %v869_v18, %v705_v59  ;;  %3124 = vst [vmem:[#allocation2 + $0x34] sm:$0x1] %v3123_v29  ;;  %11392 = vmatpush3.bf16.msra.mxu0 %v11843_v35  ;;  %v3093_v29 = vld [vmem:[#allocation2 + $0x78] sm:$0x1] }
  0xf2   : > { %v11216_v25 = vpop.f32.mrf.mxu0  ;;  %v3094_v19 = vsel %vm12830_vm10, 0, %v3093_v29 }
  0xf3   : > { %v885_v20 = vpop.f32.mrf.mxu1  ;;  %v12834_v3 = vadd.f32 %v11234_v57, %v11216_v25  ;;  %v3072_v57 = vld [vmem:[#allocation2 + $0x30] sm:$0x1]  ;;  %v11840_v25 = vld [vmem:[%s15746_s3 + $0x18] sm:$0xff]   ;;  %3095 = vst [vmem:[#allocation2 + $0x78] sm:$0x1] %v3094_v19 }
  0xf4   : > { %v12844_v15 = vpop.f32.mrf.mxu0  ;;  %11369 = vmatprep.subr.bf16.mxu1 %v11840_v25 }
  0xf5   : > { %v11238_v58 = vpop.f32.mrf.mxu1  ;;  %11370 = vmatpush3.bf16.msra.mxu1 %v11840_v25  ;;  %v3100_v25 = vsel %vm12830_vm10, 0, %v3099_v53 }
  0xf6   : > { %3101 = vst [vmem:[#allocation2 + $0x88] sm:$0x1] %v3100_v25 }
  0xf7   : > { %v12848_v50 = vpop.f32.mrf.mxu1 }
  0xf8   : > { %v11219_v2 = vpop.f32.mrf.mxu0 }
  0xf9   : > { %v12854_v44 = vadd.f32 %v11237_v40, %v11219_v2 }
  0xfa   : > { %v721_v52 = vpop.f32.mrf.mxu0 }
  0xfb   : > { %v11241_v14 = vpop.f32.mrf.mxu1  ;;  %v12860_v62 = vadd.f32 %v885_v20, %v721_v52  ;;  %v3073_v20 = vsel %vm12830_vm10, 0, %v3072_v57  ;;  %v3149_v57 = vld [vmem:[#allocation2 + $0x8c] sm:$0x1] }
  0xfc   : > { %v11220_v6 = vpop.f32.mrf.mxu0  ;;  %3074 = vst [vmem:[#allocation2 + $0x30] sm:$0x1] %v3073_v20  ;;  %v3150_v20 = vsel %vm12840_vm12, 0, %v3149_v57 }
  0xfd   : > { %v901_v0 = vpop.f32.mrf.mxu1  ;;  %v12866_v8 = vadd.f32 %v11238_v58, %v11220_v6  ;;  %v3137_v58 = vld [vmem:[#allocation2 + $0x6c] sm:$0x1]  ;;  %3151 = vst [vmem:[#allocation2 + $0x8c] sm:$0x1] %v3150_v20 }
  0xfe   : > { %v12868_v5 = vpop.f32.mrf.mxu0  ;;  %v3138_v2 = vsel %vm12840_vm12, 0, %v3137_v58 }
  0xff   : > { %v11242_v43 = vpop.f32.mrf.mxu1  ;;  %3139 = vst [vmem:[#allocation2 + $0x6c] sm:$0x1] %v3138_v2  ;;  %v3144_v2 = vsel %vm12840_vm12, 0, %v3143_v34 }
 0x100   : > { %3145 = vst [vmem:[#allocation2 + $0x7c] sm:$0x1] %v3144_v2 }
 0x101   : > { %v12874_v26 = vpop.f32.mrf.mxu1 }
 0x103   : > { %v11223_v37 = vpop.f32.mrf.mxu0  ;;  %v12880_v47 = vpop.f32.mrf.mxu1 }
 0x104   : > { %v12886_v18 = vadd.f32 %v11241_v14, %v11223_v37 }
 0x105   : > { %v737_v59 = vpop.f32.mrf.mxu0  ;;  %v12888_v40 = vpop.f32.mrf.mxu1 }
 0x106   : > { %v12895_v28 = vadd.f32 %v901_v0, %v737_v59 }
 0x107   : > { %v11224_v23 = vpop.f32.mrf.mxu0  ;;  %v12899_v51 = vpop.f32.mrf.mxu1 }
 0x108   : > { %v12921_v16 = vadd.f32 %v11242_v43, %v11224_v23 }
 0x109   : > { %v12923_v52 = vpop.f32.mrf.mxu0  ;;  %v12925_v14 = vpop.f32.mrf.mxu1 }
 0x10b   : > { %v11247_v6 = vpop.f32.mrf.mxu0  ;;  %v12931_v0 = vpop.f32.mrf.mxu1 }
 0x10c   : > { %v12938_v61 = vadd.f32 %v11247_v6, %v12814_v45  ;;  %v3135_v45 = vsel %vm12840_vm12, 0, %v3134_v31  ;;  %v11841_v6 = vld [vmem:[%s15746_s3 + $0x10] sm:$0xff]  }
 0x10d   : > { %v1118_v43 = vpop.f32.mrf.mxu0  ;;  %v12943_v7 = vpop.f32.mrf.mxu1  ;;  %3136 = vst [vmem:[#allocation2 + $0x64] sm:$0x1] %v3135_v45  ;;  %11371 = vmatprep.subr.bf16.mxu1 %v11841_v6  ;;  %v3096_v45 = vld [vmem:[#allocation2 + $0x80] sm:$0x1] }
 0x10e   : > { %v12946_v27 = vadd.f32 %v1118_v43, %v12816_v49  ;;  %11372 = vmatpush3.bf16.msra.mxu1 %v11841_v6  ;;  %v3097_v57 = vsel %vm12830_vm10, 0, %v3096_v45 }
 0x10f   : > { %v11248_v22 = vpop.f32.mrf.mxu0  ;;  %v12952_v4 = vpop.f32.mrf.mxu1  ;;  %3098 = vst [vmem:[#allocation2 + $0x80] sm:$0x1] %v3097_v57 }
 0x110   : > { %v12958_v49 = vadd.f32 %v11248_v22, %v12818_v36  ;;  %v3146_v22 = vld [vmem:[#allocation2 + $0x84] sm:$0x1] }
 0x111   : > { %v12960_v37 = vpop.f32.mrf.mxu0  ;;  %v12962_v42 = vpop.f32.mrf.mxu1 }
 0x113   : > { %v11251_v60 = vpop.f32.mrf.mxu0  ;;  %v12964_v59 = vpop.f32.mrf.mxu1 }
 0x114   : > { %v12971_v36 = vadd.f32 %v11251_v60, %v12824_v11  ;;  %v3102_v11 = vld [vmem:[#allocation2 + $0x90] sm:$0x1]  ;;  %v3147_v60 = vsel %vm12840_vm12, 0, %v3146_v22 }
 0x115   : > { %v1134_v58 = vpop.f32.mrf.mxu0  ;;  %v12973_v23 = vpop.f32.mrf.mxu1  ;;  %v3103_v41 = vsel %vm12830_vm10, 0, %v3102_v11  ;;  %3148 = vst [vmem:[#allocation2 + $0x84] sm:$0x1] %v3147_v60 }
 0x116   : > { %v12980_v24 = vadd.f32 %v1134_v58, %v12826_v63  ;;  %3104 = vst [vmem:[#allocation2 + $0x90] sm:$0x1] %v3103_v41  ;;  %v3153_v63 = vsel %vm12840_vm12, 0, %v3152_v56 }
 0x117   : > { %v11252_v17 = vpop.f32.mrf.mxu0  ;;  %v12982_v32 = vpop.f32.mrf.mxu1  ;;  %3154 = vst [vmem:[#allocation2 + $0x94] sm:$0x1] %v3153_v63 }
 0x118   : > { %v12987_v39 = vadd.f32 %v11252_v17, %v12834_v3 }
 0x119   : > { %v12994_v38 = vpop.f32.mrf.mxu0  ;;  %v12996_v48 = vpop.f32.mrf.mxu1 }
 0x11b   : > { %v11255_v1 = vpop.f32.mrf.mxu0  ;;  %v11277_v43 = vpop.f32.mrf.mxu1 }
 0x11c   : > { %v12999_v3 = vadd.f32 %v11255_v1, %v12854_v44 }
 0x11d   : > { %v1150_v10 = vpop.f32.mrf.mxu0  ;;  %v1365_v31 = vpop.f32.mrf.mxu1 }
 0x11e   : > { %v13002_v33 = vadd.f32 %v1150_v10, %v12860_v62 }
 0x11f   : > { %v11256_v35 = vpop.f32.mrf.mxu0  ;;  %v11278_v53 = vpop.f32.mrf.mxu1 }
 0x120   : > { %v13009_v25 = vadd.f32 %v11256_v35, %v12866_v8 }
 0x121   : > { %v13011_v44 = vpop.f32.mrf.mxu0  ;;  %v13013_v20 = vpop.f32.mrf.mxu1 }
 0x123   : > { %v11259_v62 = vpop.f32.mrf.mxu0  ;;  %v13015_v29 = vpop.f32.mrf.mxu1 }
 0x124   : > { %v1195_v34 = vadd.f32 %v11259_v62, %v12886_v18  ;;  %v11848_v18 = vld [vmem:[%s15746_s3 + $0x28] sm:$0xff]  }
 0x125   : > { %v1166_v58 = vpop.f32.mrf.mxu0  ;;  %v13018_v19 = vpop.f32.mrf.mxu1  ;;  %11409 = vmatprep.subr.bf16.mxu1 %v11848_v18 }
 0x126   : > { %v1193_v9 = vadd.f32 %v1166_v58, %v12895_v28  ;;  %v1394_v2 = vadd.f32 %v11277_v43, %v1195_v34 }
 0x127   : > { %v11260_v11 = vpop.f32.mrf.mxu0  ;;  %v13021_v8 = vpop.f32.mrf.mxu1 }
 0x128   : > { %v1196_v17 = vadd.f32 %v11260_v11, %v12921_v16  ;;  %v1392_v41 = vadd.f32 %v1365_v31, %v1193_v9  ;;  %v13066_v11 = vld [vmem:[%s15746_s3 + $0x38] sm:$0xff]  }
 0x129   : > { %v13024_v56 = vpop.f32.mrf.mxu0  ;;  %v13026_v6 = vpop.f32.mrf.mxu1  ;;  %15788 = vst [vmem:[#allocation15_spill] sm:$0xff] %v13066_v11  ;;  %11429 = vmatprep.subr.bf16.mxu0 %v13066_v11 }
 0x12a   : > { %15780 = vst [vmem:[#allocation7_spill] sm:$0xff] %v13026_v6  ;;  %v1395_v63 = vadd.f32 %v11278_v53, %v1196_v17 }
 0x12b   : > { %v13031_v1 = vpop.f32.mrf.mxu0  ;;  %v13033_v10 = vpop.f32.mrf.mxu1 }
 0x12c   : > { %15781 = vst [vmem:[#allocation8_spill] sm:$0xff] %v13033_v10 }
 0x12d   : > { %v13035_v28 = vpop.f32.mrf.mxu0  ;;  %v13037_v43 = vpop.f32.mrf.mxu1 }
 0x12e   : > { %15782 = vst [vmem:[#allocation9_spill] sm:$0xff] %v13037_v43 }
 0x12f   : > { %v13039_v16 = vpop.f32.mrf.mxu0  ;;  %v13041_v31 = vpop.f32.mrf.mxu1 }
 0x130   : > { %15783 = vst [vmem:[#allocation10_spill] sm:$0xff] %v13041_v31 }
 0x131   : > { %v13043_v45 = vpop.f32.mrf.mxu0  ;;  %v13045_v22 = vpop.f32.mrf.mxu1 }
 0x132   : > { %15784 = vst [vmem:[#allocation11_spill] sm:$0xff] %v13045_v22 }
 0x133   : > { %v13047_v35 = vpop.f32.mrf.mxu0 }
 0x134   : > { %v13049_v53 = vpop.f32.mrf.mxu1 }
 0x135   : > { %15785 = vst [vmem:[#allocation12_spill] sm:$0xff] %v13049_v53  ;;  %v13051_v57 = vpop.f32.mrf.mxu0 }
 0x136   : > { %v13053_v60 = vpop.f32.mrf.mxu1 }
 0x137   : > { %15786 = vst [vmem:[#allocation13_spill] sm:$0xff] %v13053_v60  ;;  %v13055_v62 = vpop.f32.mrf.mxu0 }
 0x138   : > { %v13059_v58 = vpop.f32.mrf.mxu1 }
 0x139   : > { %v13057_v34 = vpop.f32.mrf.mxu0  ;;  %15787 = vst [vmem:[#allocation14_spill] sm:$0xff] %v13059_v58 }
 0x13a   : > { %v13070_v18 = vpop.f32.mrf.mxu1 }
 0x13b   : > { %v13061_v9 = vpop.f32.mrf.mxu0  ;;  %15790 = vst [vmem:[#allocation17_spill] sm:$0xff] %v13070_v18 }
 0x13d   : > { %v13068_v17 = vpop.f32.mrf.mxu0 }
 0x13e   : > { %15789 = vst [vmem:[#allocation16_spill] sm:$0xff] %v13068_v17 }
 0x13f   : > { %v13073_v54 = vpop.f32.mrf.mxu0 }
 0x140   : > { %15791 = vst [vmem:[#allocation18_spill] sm:$0xff] %v13073_v54 }
 0x141   : > { %v13075_v21 = vpop.f32.mrf.mxu0  ;;  %v13077_v60 = vpop.f32.mrf.mxu1 }
 0x142   : > { %15792 = vst [vmem:[#allocation19_spill] sm:$0xff] %v13075_v21  ;;  %15793 = vst [vmem:[#allocation20_spill] sm:$0xff] %v13077_v60 }
 0x143   : > { %v11295_v58 = vpop.f32.mrf.mxu0  ;;  %v13079_v53 = vpop.f32.mrf.mxu1 }
 0x144   : > { %15794 = vst [vmem:[#allocation21_spill] sm:$0xff] %v13079_v53  ;;  %v13081_v22 = vadd.f32 %v11295_v58, %v1394_v2  ;;  %v13099_v2 = vld [vmem:[#allocation2] sm:$0xf] }
 0x145   : > { %v1787_v31 = vpop.f32.mrf.mxu0  ;;  %v13083_v43 = vpop.f32.mrf.mxu1  ;;  %15802 = vst [vmem:[#allocation29_spill] sm:$0xff] %v13099_v2 }
 0x146   : > { %15795 = vst [vmem:[#allocation22_spill] sm:$0xff] %v13081_v22  ;;  %15796 = vst [vmem:[#allocation23_spill] sm:$0xff] %v13083_v43  ;;  %v13085_v10 = vadd.f32 %v1787_v31, %v1392_v41  ;;  %v3493_v31 = vshll.u32 %v13099_v2, 16  ;;  %v13117_v22 = vld [vmem:[#allocation2 + $0x50] sm:$0xf] }
 0x147   : > { %v11296_v6 = vpop.f32.mrf.mxu0  ;;  %v13091_v54 = vpop.f32.mrf.mxu1  ;;  %15810 = vst [vmem:[#allocation37_spill] sm:$0xff] %v13117_v22 }
 0x148   : > { %15797 = vst [vmem:[#allocation24_spill] sm:$0xff] %v13085_v10  ;;  %v13087_v18 = vadd.f32 %v11296_v6, %v1395_v63  ;;  %15799 = vst [vmem:[#allocation26_spill] sm:$0xff] %v13091_v54  ;;  %v3490_v63 = vshrl.u32 %v13099_v2, 16  ;;  %v3495_v10 = vrot.slane %v3493_v31, 5  ;;  %v873_v2 = vadd.f32 %v12822_v12, %v12844_v15 }
 0x149   : > { %v13089_v11 = vpop.f32.mrf.mxu0  ;;  %v905_v12 = vadd.f32 %v12874_v26, %v12923_v52  ;;  %v1382_v15 = vadd.f32 %v12880_v47, %v12938_v61  ;;  %v1386_v26 = vadd.f32 %v12931_v0, %v12971_v36 }
 0x14a   : > { %15798 = vst [vmem:[#allocation25_spill] sm:$0xff] %v13087_v18 }
 0x14b   : > { %v13093_v21 = vpop.f32.mrf.mxu0  ;;  %v1194_v0 = vadd.f32 %v13024_v56, %v905_v12  ;;  %v1804_v36 = vadd.f32 %v13031_v1, %v1382_v15  ;;  %v15814_v15 = vld [vmem:[#allocation19_spill] sm:$0xff] }
 0x14d   : > { %v13095_v60 = vpop.f32.mrf.mxu0  ;;  %v13097_v17 = vpop.f32.mrf.mxu1 }
 0x14e   : > { %15800 = vst [vmem:[#allocation27_spill] sm:$0xff] %v13095_v60  ;;  %15801 = vst [vmem:[#allocation28_spill] sm:$0xff] %v13097_v17  ;;  %v3492_v17 = vrot.slane %v3490_v63, 4  ;;  %v3605_v63 = vshll.u32 %v13117_v22, 16 }
 0x14f   : > { %v13101_v58 = vpop.f32.mrf.mxu0  ;;  %v13103_v43 = vpop.f32.mrf.mxu1 }
 0x150   : > { %15803 = vst [vmem:[#allocation30_spill] sm:$0xff] %v13101_v58  ;;  %15804 = vst [vmem:[#allocation31_spill] sm:$0xff] %v13103_v43  ;;  %v857_v43 = vadd.f32 %v12812_v13, %v12820_v55  ;;  %v3473_v58 = vld [vmem:[#allocation2 + $0x4] sm:$0x1]  ;;  %v3496_v60 = vor.u32 %v3495_v10, %v3492_v17  ;;  %v1186_v55 = vadd.f32 %v12994_v38, %v873_v2 }
 0x151   : > { %v13105_v41 = vpop.f32.mrf.mxu0  ;;  %v13107_v6 = vpop.f32.mrf.mxu1  ;;  %v3499_v13 = vshll.u32 %v3473_v58, 16  ;;  %v1383_v10 = vadd.f32 %v12899_v51, %v12958_v49  ;;  %v1384_v51 = vadd.f32 %v12943_v7, %v12980_v24  ;;  %v1390_v49 = vadd.f32 %v12964_v59, %v12999_v3 }
 0x152   : > { %15805 = vst [vmem:[#allocation32_spill] sm:$0xff] %v13105_v41  ;;  %15806 = vst [vmem:[#allocation33_spill] sm:$0xff] %v13107_v6  ;;  %v13157_v61 = vrot.slane %v3496_v60, 4  ;;  %v13172_v60 = vld [vmem:[#allocation2 + $0x54] sm:$0x1]  ;;  %v4099_v2 = vrot.slane %v3473_v58, 5  ;;  %v1388_v7 = vadd.f32 %v12973_v23, %v13002_v33  ;;  %v1393_v33 = vadd.f32 %v13013_v20, %v1194_v0 }
 0x153   : > { %v13111_v54 = vpop.f32.mrf.mxu0  ;;  %v13113_v18 = vpop.f32.mrf.mxu1  ;;  %v1805_v3 = vadd.f32 %v13039_v16, %v1383_v10  ;;  %v1808_v58 = vadd.f32 %v13047_v35, %v1386_v26 }
 0x154   : > { %15807 = vst [vmem:[#allocation34_spill] sm:$0xff] %v13111_v54  ;;  %15808 = vst [vmem:[#allocation35_spill] sm:$0xff] %v13113_v18  ;;  %v1182_v54 = vadd.f32 %v12960_v37, %v857_v43  ;;  %v3602_v18 = vshrl.u32 %v13117_v22, 16  ;;  %v1380_v37 = vadd.f32 %v12888_v40, %v12946_v27  ;;  %v13159_v27 = vrot.slane %v3499_v13, 5 }
 0x155   : > { %v13115_v53 = vpop.f32.mrf.mxu0  ;;  %v1815_v0 = vadd.f32 %v13089_v11, %v1393_v33  ;;  %v15826_v11 = vld [vmem:[#allocation17_spill] sm:$0xff] }
 0x156   : > { %15809 = vst [vmem:[#allocation36_spill] sm:$0xff] %v13115_v53  ;;  %v1381_v38 = vadd.f32 %v12925_v14, %v1182_v54  ;;  %v3604_v17 = vrot.slane %v3602_v18, 4  ;;  %v1387_v54 = vadd.f32 %v12952_v4, %v12987_v39  ;;  %v1385_v14 = vadd.f32 %v12962_v42, %v1186_v55 }
 0x157   : > { %v13121_v41 = vpop.f32.mrf.mxu1  ;;  %v13123_v6 = vpop.f32.mrf.mxu0  ;;  %v1802_v4 = vadd.f32 %v13035_v28, %v1380_v37  ;;  %v3611_v42 = vshll.u32 %v13172_v60, 16  ;;  %v1391_v39 = vadd.f32 %v12982_v32, %v13009_v25  ;;  %v3502_v23 = vsel %vm12114_vm4, %v13157_v61, %v13159_v27 }
 0x158   : > { %15811 = vst [vmem:[#allocation38_spill] sm:$0xff] %v13121_v41  ;;  %v889_v41 = vadd.f32 %v12848_v50, %v12868_v5  ;;  %v3607_v50 = vrot.slane %v3605_v63, 5  ;;  %v4049_v5 = vld [vmem:[#allocation2] sm:$0xe]  ;;  %v1803_v28 = vadd.f32 %v13043_v45, %v1381_v38  ;;  %v1806_v32 = vadd.f32 %v13051_v57, %v1384_v51  ;;  %v15818_v51 = vld [vmem:[#allocation10_spill] sm:$0xff] }
 0x159   : > { %v13130_v31 = vpop.f32.mrf.mxu1  ;;  %v13132_v53 = vpop.f32.mrf.mxu0  ;;  %v10325_v18 = vrot.slane %v4049_v5, 9  ;;  %v1809_v25 = vadd.f32 %v13055_v62, %v1387_v54  ;;  %v1807_v16 = vadd.f32 %v13057_v34, %v1385_v14  ;;  %v2080_v20 = vadd.f32 %v13018_v19, %v1802_v4  ;;  %v15812_v62 = vld [vmem:[#allocation16_spill] sm:$0xff]  ;;  %v15813_v34 = vld [vmem:[#allocation18_spill] sm:$0xff] }
 0x15a   : > { %v1190_v47 = vadd.f32 %v13011_v44, %v889_v41  ;;  %v3608_v24 = vor.u32 %v3607_v50, %v3604_v17  ;;  %v1812_v45 = vadd.f32 %v13061_v9, %v1390_v49  ;;  %v13207_v57 = vrot.slane %v3611_v42, 5  ;;  %v15815_v17 = vld [vmem:[#allocation7_spill] sm:$0xff]  ;;  %v15816_v19 = vld [vmem:[#allocation8_spill] sm:$0xff]  ;;  %v15817_v9 = vld [vmem:[#allocation9_spill] sm:$0xff] }
 0x15b   : > { %v13143_v43 = vpop.f32.mrf.mxu1  ;;  %v13145_v22 = vpop.f32.mrf.mxu0  ;;  %v13201_v13 = vsel %vm12231_vm7, %v10325_v18, %v4099_v2  ;;  %v1810_v55 = vadd.f32 %v15812_v62, %v1388_v7  ;;  %v1813_v12 = vadd.f32 %v15813_v34, %v1391_v39  ;;  %v2081_v50 = vadd.f32 %v15815_v17, %v1803_v28  ;;  %v15820_v49 = vld [vmem:[#allocation27_spill] sm:$0xff]  ;;  %v15821_v7 = vld [vmem:[#allocation12_spill] sm:$0xff] }
 0x15c   : > { %v1389_v59 = vadd.f32 %v12996_v48, %v1190_v47  ;;  %v2082_v48 = vadd.f32 %v13015_v29, %v1804_v36  ;;  %v13205_v35 = vrot.slane %v3608_v24, 4  ;;  %v2083_v29 = vadd.f32 %v13021_v8, %v1805_v3  ;;  %v15819_v8 = vld [vmem:[#allocation11_spill] sm:$0xff]  ;;  %v15822_v24 = vld [vmem:[#allocation30_spill] sm:$0xff]  ;;  %v15823_v39 = vld [vmem:[#allocation32_spill] sm:$0xff] }
 0x15d   : > { %v13153_v52 = vpop.f32.mrf.mxu1  ;;  %v13155_v40 = vpop.f32.mrf.mxu0  ;;  %v2086_v5 = vadd.f32 %v15816_v19, %v1808_v58  ;;  %v2084_v26 = vadd.f32 %v15817_v9, %v1806_v32  ;;  %v2087_v54 = vadd.f32 %v15818_v51, %v1809_v25  ;;  %v2085_v14 = vadd.f32 %v15819_v8, %v1807_v16  ;;  %v15824_v3 = vld [vmem:[#allocation13_spill] sm:$0xff]  ;;  %v15825_v58 = vld [vmem:[#allocation14_spill] sm:$0xff]  ;;  %v15830_v34 = vld [vmem:[#allocation24_spill] sm:$0xff]  ;;  %15862 = vst [vmem:[#allocation30_spill] sm:$0xff] %v14341_v30 }
 0x15e   : > { %v1811_v37 = vadd.f32 %v15814_v15, %v1389_v59  ;;  %v2281_v47 = vadd.f32 %v13093_v21, %v2082_v48  ;;  %v2279_v36 = vadd.f32 %v15820_v49, %v2080_v20  ;;  %v2090_v4 = vadd.f32 %v15821_v7, %v1812_v45  ;;  %v15827_v48 = vld [vmem:[#allocation34_spill] sm:$0xff]  ;;  %v15831_v15 = vld [vmem:[#allocation21_spill] sm:$0xff]  ;;  %v15833_v9 = vld [vmem:[#allocation36_spill] sm:$0xff] }
 0x15f   : > { %v13170_v44 = vpop.f32.mrf.mxu0  ;;  %v2282_v42 = vadd.f32 %v15822_v24, %v2083_v29  ;;  %v2280_v59 = vadd.f32 %v15823_v39, %v2081_v50  ;;  %v3614_v21 = vsel %vm12114_vm4, %v13205_v35, %v13207_v57  ;;  %v2088_v28 = vadd.f32 %v15824_v3, %v1810_v55  ;;  %v13234_v20 = vld [vmem:[#allocation2 + $0x50] sm:$0xe]  ;;  %v15829_v29 = vld [vmem:[#allocation20_spill] sm:$0xff]  ;;  %v15834_v55 = vld [vmem:[#allocation25_spill] sm:$0xff] }
 0x160   : > { %v2091_v32 = vadd.f32 %v15825_v58, %v1813_v12  ;;  %v2089_v33 = vadd.f32 %v15826_v11, %v1811_v37  ;;  %v2285_v25 = vadd.f32 %v15827_v48, %v2086_v5  ;;  %v15828_v45 = vld [vmem:[#allocation22_spill] sm:$0xff]  ;;  %v2092_v17 = vadd.f32 %v15831_v15, %v15830_v34  ;;  %v15832_v50 = vld [vmem:[#allocation28_spill] sm:$0xff]  ;;  %v15835_v8 = vld [vmem:[#allocation23_spill] sm:$0xff] }
 0x161   : > { %v13182_v56 = vpop.f32.mrf.mxu1  ;;  %v13184_v1 = vpop.f32.mrf.mxu0  ;;  %v2094_v62 = vadd.f32 %v15829_v29, %v15828_v45  ;;  %v2703_v19 = vadd.f32 %v15832_v50, %v2281_v47  ;;  %v2283_v51 = vadd.f32 %v15833_v9, %v2084_v26  ;;  %v2095_v12 = vadd.f32 %v15835_v8, %v15834_v55  ;;  %v15836_v49 = vld [vmem:[#allocation26_spill] sm:$0xff]  ;;  %v15837_v7 = vld [vmem:[#allocation31_spill] sm:$0xff]  ;;  %v13250_v58 = vld [vmem:[%s15745_s2] ss:$0 sm:$0xff] }
 0x162   : > { %v2093_v37 = vadd.f32 %v15836_v49, %v1815_v0  ;;  %v2701_v5 = vadd.f32 %v15837_v7, %v2279_v36  ;;  %v2286_v24 = vadd.f32 %v13123_v6, %v2087_v54  ;;  %v15838_v11 = vld [vmem:[#allocation33_spill] sm:$0xff]  ;;  %v15839_v48 = vld [vmem:[#allocation35_spill] sm:$0xff]  ;;  %v10333_v29 = vrot.slane %v13234_v20, 9  ;;  %v15840_v34 = vld [vmem:[#allocation38_spill] sm:$0xff] }
 0x163   : > { %v13197_v41 = vpop.f32.mrf.mxu1  ;;  %v11331_v63 = vpop.f32.mrf.mxu0  ;;  %v2704_v47 = vadd.f32 %v15838_v11, %v2282_v42  ;;  %v2702_v26 = vadd.f32 %v15839_v48, %v2280_v59  ;;  %v2707_v0 = vadd.f32 %v15840_v34, %v2285_v25  ;;  %v2284_v36 = vadd.f32 %v13132_v53, %v2085_v14  ;;  %v3372_v34 = vld [vmem:[#allocation2 + $0x1c] sm:$0x1] }
 0x164   : > { %v2289_v6 = vadd.f32 %v13145_v22, %v2090_v4  ;;  %v4131_v50 = vrot.slane %v13172_v60, 5  ;;  %v2705_v9 = vadd.f32 %v13130_v31, %v2283_v51  ;;  %v2287_v55 = vadd.f32 %v13155_v40, %v2088_v28 }
 0x165   : > { %v13213_v10 = vpop.f32.mrf.mxu1  ;;  %v2264_v38 = vpop.f32.mrf.mxu0  ;;  %v2290_v25 = vadd.f32 %v13170_v44, %v2091_v32  ;;  %v2288_v53 = vadd.f32 %v13184_v1, %v2089_v33  ;;  %v2293_v14 = vadd.f32 %v11331_v63, %v2094_v62  ;;  %v13269_v40 = vadd.f32 %v13153_v52, %v2284_v36 }
 0x166   : > { %v2291_v8 = vadd.f32 %v2264_v38, %v2092_v17  ;;  %v13272_v28 = vadd.f32 %v13182_v56, %v2289_v6  ;;  %v13275_v44 = vadd.f32 %v13197_v41, %v2287_v55 }
 0x167   : > { %v2673_v18 = vpop.f32.mrf.mxu1  ;;  %v11332_v2 = vpop.f32.mrf.mxu0  ;;  %v13279_v33 = vadd.f32 %v13213_v10, %v2290_v25 }
 0x168   : > { %v13281_v62 = vadd.f32 %v2673_v18, %v2288_v53  ;;  %v3357_v53 = vld [vmem:[#allocation2 + $0x8] sm:$0xf] }
 0x169   : > { %v2267_v16 = vpop.f32.mrf.mxu0 }
 0x16a   : > { %v11349_v39 = vpop.f32.mrf.mxu1  ;;  %v2292_v51 = vadd.f32 %v2267_v16, %v2093_v37 }
 0x16b   : > { %v11355_v3 = vpop.f32.mrf.mxu0  ;;  %v13283_v52 = vadd.f32 %v11349_v39, %v2293_v14  ;;  %v3360_v14 = vld [vmem:[#allocation2 + $0xc] sm:$0x1] }
 0x16c   : > { %v2981_v45 = vadd.f32 %v11355_v3, %v2703_v19  ;;  %v2686_v54 = vpop.f32.mrf.mxu1  ;;  %v13263_v19 = vadd.f32 %v13143_v43, %v2286_v24  ;;  %v2294_v43 = vadd.f32 %v11332_v2, %v2095_v12 }
 0x16d   : > { %v2916_v15 = vpop.f32.mrf.mxu0  ;;  %v13285_v2 = vadd.f32 %v2686_v54, %v2291_v8 }
 0x16e   : > { %v3004_v42 = vadd.f32 %v13250_v58, %v2981_v45  ;;  %v2979_v59 = vadd.f32 %v2916_v15, %v2701_v5  ;;  %v11350_v22 = vpop.f32.mrf.mxu1  ;;  %v3369_v45 = vld [vmem:[#allocation2 + $0x18] sm:$0xf] }
 0x16f   : > { %v11356_v4 = vpop.f32.mrf.mxu0  ;;  %v13287_v37 = vadd.f32 %v11350_v22, %v2294_v43 }
 0x170   : > { %v3020_v49 = vmax.f32 %v3004_v42, 0.0  ;;  %v3002_v7 = vadd.f32 %v13250_v58, %v2979_v59  ;;  %v2982_v31 = vadd.f32 %v11356_v4, %v2704_v47  ;;  %v2689_v1 = vpop.f32.mrf.mxu1 }
 0x171   : > { %v2919_v5 = vpop.f32.mrf.mxu0  ;;  %v13289_v24 = vadd.f32 %v2689_v1, %v2292_v51 }
 0x172   : > { %v10866_v63 = vpack.c.bf16 %v3020_v49, %v3020_v49  ;;  %v3018_v32 = vmax.f32 %v3002_v7, 0.0  ;;  %v3005_v38 = vadd.f32 %v13250_v58, %v2982_v31  ;;  %v2980_v56 = vadd.f32 %v2919_v5, %v2702_v26 }
 0x173   : > { %v11359_v17 = vpop.f32.mrf.mxu0 }
 0x174   : > { %v3212_v16 = vshrl.u32 %v10866_v63, 16  ;;  %v10864_v12 = vpack.c.bf16 %v3018_v32, %v3018_v32  ;;  %v3021_v41 = vmax.f32 %v3005_v38, 0.0  ;;  %v3003_v3 = vadd.f32 %v13250_v58, %v2980_v56 }
 0x175   : > { %v2985_v11 = vadd.f32 %v11359_v17, %v2707_v0  ;;  %v2932_v10 = vpop.f32.mrf.mxu0  ;;  %v3215_v18 = vshll.u32 %v10866_v63, 16 }
 0x176   : > { %v3214_v47 = vrot.slane %v3212_v16, 7  ;;  %v3196_v48 = vshrl.u32 %v10864_v12, 16  ;;  %v10867_v39 = vpack.c.bf16 %v3021_v41, %v3021_v41  ;;  %v3199_v36 = vshll.u32 %v10864_v12, 16  ;;  %v3375_v12 = vld [vmem:[#allocation2 + $0x20] sm:$0xf] }
 0x177   : > { %v3019_v6 = vmax.f32 %v3003_v3, 0.0  ;;  %v3008_v54 = vadd.f32 %v13250_v58, %v2985_v11  ;;  %v2983_v15 = vadd.f32 %v2932_v10, %v2705_v9  ;;  %v11360_v55 = vpop.f32.mrf.mxu0  ;;  %v3378_v41 = vld [vmem:[#allocation2 + $0x24] sm:$0x1] }
 0x178   : > { %v3217_v0 = vor.u32 %v3215_v18, %v3214_v47  ;;  %v3218_v42 = vrot.slane %v3214_v47, 4  ;;  %v3198_v59 = vrot.slane %v3196_v48, 7  ;;  %v3220_v25 = vshrl.u32 %v10867_v39, 16 }
 0x179   : > { %v3223_v22 = vshll.u32 %v10867_v39, 16  ;;  %v10865_v4 = vpack.c.bf16 %v3019_v6, %v3019_v6  ;;  %v3024_v8 = vmax.f32 %v3008_v54, 0.0  ;;  %v3006_v49 = vadd.f32 %v13250_v58, %v2983_v15  ;;  %v2935_v7 = vpop.f32.mrf.mxu0 }
 0x17a   : > { %v3370_v31 = vsel %vm13294_vm14, %v3217_v0, %v3369_v45  ;;  %v3373_v51 = vsel %vm12830_vm10, %v3218_v42, %v3372_v34  ;;  %v3201_v9 = vor.u32 %v3199_v36, %v3198_v59  ;;  %v3202_v5 = vrot.slane %v3198_v59, 4  ;;  %v3363_v45 = vld [vmem:[#allocation2 + $0x10] sm:$0xf]  ;;  %v3366_v34 = vld [vmem:[#allocation2 + $0x14] sm:$0x1] }
 0x17b   : > { %3371 = vst [vmem:[#allocation2 + $0x18] sm:$0xf] %v3370_v31  ;;  %3374 = vst [vmem:[#allocation2 + $0x1c] sm:$0x1] %v3373_v51  ;;  %v3222_v1 = vrot.slane %v3220_v25, 7  ;;  %v3204_v63 = vshrl.u32 %v10865_v4, 16  ;;  %v10870_v38 = vpack.c.bf16 %v3024_v8, %v3024_v8  ;;  %v11363_v56 = vpop.f32.mrf.mxu0  ;;  %v2986_v11 = vadd.f32 %v11360_v55, %v13263_v19 }
 0x17c   : > { %v3207_v32 = vshll.u32 %v10865_v4, 16  ;;  %v3358_v17 = vsel %vm13294_vm14, %v3201_v9, %v3357_v53  ;;  %v3361_v16 = vsel %vm12830_vm10, %v3202_v5, %v3360_v14  ;;  %v3022_v3 = vmax.f32 %v3006_v49, 0.0  ;;  %v3393_v8 = vld [vmem:[#allocation2 + $0x38] sm:$0xf]  ;;  %v3396_v49 = vld [vmem:[#allocation2 + $0x3c] sm:$0x1] }
 0x17d   : > { %3359 = vst [vmem:[#allocation2 + $0x8] sm:$0xf] %v3358_v17  ;;  %3362 = vst [vmem:[#allocation2 + $0xc] sm:$0x1] %v3361_v16  ;;  %v3225_v10 = vor.u32 %v3223_v22, %v3222_v1  ;;  %v3226_v47 = vrot.slane %v3222_v1, 4  ;;  %v3206_v18 = vrot.slane %v3204_v63, 7  ;;  %v2948_v39 = vpop.f32.mrf.mxu0  ;;  %v3009_v54 = vadd.f32 %v13250_v58, %v2986_v11 }
 0x17e   : > { %v3244_v48 = vshrl.u32 %v10870_v38, 16  ;;  %v3247_v36 = vshll.u32 %v10870_v38, 16  ;;  %v10868_v6 = vpack.c.bf16 %v3022_v3, %v3022_v3  ;;  %v2984_v15 = vadd.f32 %v2935_v7, %v13269_v40  ;;  %v3381_v63 = vld [vmem:[#allocation2 + $0x28] sm:$0xf]  ;;  %v3384_v38 = vld [vmem:[#allocation2 + $0x2c] sm:$0x1] }
 0x17f   : > { %v3376_v0 = vsel %vm13294_vm14, %v3225_v10, %v3375_v12  ;;  %v3379_v19 = vsel %vm12830_vm10, %v3226_v47, %v3378_v41  ;;  %v3209_v55 = vor.u32 %v3207_v32, %v3206_v18  ;;  %v3210_v42 = vrot.slane %v3206_v18, 4  ;;  %v11364_v59 = vpop.f32.mrf.mxu0 }
 0x180   : > { %3377 = vst [vmem:[#allocation2 + $0x20] sm:$0xf] %v3376_v0  ;;  %3380 = vst [vmem:[#allocation2 + $0x24] sm:$0x1] %v3379_v19  ;;  %v3246_v25 = vrot.slane %v3244_v48, 7  ;;  %v3228_v53 = vshrl.u32 %v10868_v6, 16  ;;  %v3007_v7 = vadd.f32 %v13250_v58, %v2984_v15  ;;  %v2989_v31 = vadd.f32 %v11363_v56, %v13272_v28 }
 0x181   : > { %v3231_v14 = vshll.u32 %v10868_v6, 16  ;;  %v3025_v22 = vmax.f32 %v3009_v54, 0.0  ;;  %v3364_v4 = vsel %vm13294_vm14, %v3209_v55, %v3363_v45  ;;  %v3367_v40 = vsel %vm12830_vm10, %v3210_v42, %v3366_v34  ;;  %v2951_v51 = vpop.f32.mrf.mxu0  ;;  %v3399_v6 = vld [vmem:[#allocation2 + $0x40] sm:$0xf]  ;;  %v3402_v19 = vld [vmem:[#allocation2 + $0x44] sm:$0x1] }
 0x182   : > { %3365 = vst [vmem:[#allocation2 + $0x10] sm:$0xf] %v3364_v4  ;;  %3368 = vst [vmem:[#allocation2 + $0x14] sm:$0x1] %v3367_v40  ;;  %v3249_v9 = vor.u32 %v3247_v36, %v3246_v25  ;;  %v3250_v5 = vrot.slane %v3246_v25, 4  ;;  %v3230_v1 = vrot.slane %v3228_v53, 7  ;;  %v3012_v16 = vadd.f32 %v13250_v58, %v2989_v31 }
 0x183   : > { %v10871_v32 = vpack.c.bf16 %v3025_v22, %v3025_v22  ;;  %v3023_v17 = vmax.f32 %v3007_v7, 0.0  ;;  %v2987_v12 = vadd.f32 %v2948_v39, %v13275_v44  ;;  %v2990_v41 = vadd.f32 %v11364_v59, %v13279_v33  ;;  %v11367_v10 = vpop.f32.mrf.mxu0  ;;  %v3387_v40 = vld [vmem:[#allocation2 + $0x30] sm:$0xf] }
 0x184   : > { %v3394_v3 = vsel %vm13294_vm14, %v3249_v9, %v3393_v8  ;;  %v3397_v28 = vsel %vm12830_vm10, %v3250_v5, %v3396_v49  ;;  %v3233_v56 = vor.u32 %v3231_v14, %v3230_v1  ;;  %v3234_v11 = vrot.slane %v3230_v1, 4  ;;  %v3390_v49 = vld [vmem:[#allocation2 + $0x34] sm:$0x1] }
 0x185   : > { %3395 = vst [vmem:[#allocation2 + $0x38] sm:$0xf] %v3394_v3  ;;  %3398 = vst [vmem:[#allocation2 + $0x3c] sm:$0x1] %v3397_v28  ;;  %v3252_v47 = vshrl.u32 %v10871_v32, 16  ;;  %v3255_v18 = vshll.u32 %v10871_v32, 16  ;;  %v10869_v48 = vpack.c.bf16 %v3023_v17, %v3023_v17  ;;  %v3010_v39 = vadd.f32 %v13250_v58, %v2987_v12  ;;  %v2964_v53 = vpop.f32.mrf.mxu0 }
 0x186   : > { %v3028_v45 = vmax.f32 %v3012_v16, 0.0  ;;  %v3382_v44 = vsel %vm13294_vm14, %v3233_v56, %v3381_v63  ;;  %v3385_v33 = vsel %vm12830_vm10, %v3234_v11, %v3384_v38  ;;  %v3013_v34 = vadd.f32 %v13250_v58, %v2990_v41  ;;  %v3417_v32 = vld [vmem:[#allocation2 + $0x68] sm:$0xf]  ;;  %v3420_v28 = vld [vmem:[#allocation2 + $0x6c] sm:$0x1] }
 0x187   : > { %3383 = vst [vmem:[#allocation2 + $0x28] sm:$0xf] %v3382_v44  ;;  %3386 = vst [vmem:[#allocation2 + $0x2c] sm:$0x1] %v3385_v33  ;;  %v3254_v36 = vrot.slane %v3252_v47, 7  ;;  %v3236_v54 = vshrl.u32 %v10869_v48, 16  ;;  %v2988_v59 = vadd.f32 %v2951_v51, %v13281_v62  ;;  %v2993_v25 = vadd.f32 %v11367_v10, %v13283_v52  ;;  %v11368_v12 = vpop.f32.mrf.mxu0 }
 0x188   : > { %v3239_v15 = vshll.u32 %v10869_v48, 16  ;;  %v10874_v0 = vpack.c.bf16 %v3028_v45, %v3028_v45  ;;  %v3026_v55 = vmax.f32 %v3010_v39, 0.0  ;;  %v3029_v42 = vmax.f32 %v3013_v34, 0.0  ;;  %v3405_v45 = vld [vmem:[#allocation2 + $0x58] sm:$0xf] }
 0x189   : > { %v3257_v14 = vor.u32 %v3255_v18, %v3254_v36  ;;  %v3258_v22 = vrot.slane %v3254_v36, 4  ;;  %v3238_v4 = vrot.slane %v3236_v54, 7  ;;  %v3011_v5 = vadd.f32 %v13250_v58, %v2988_v59  ;;  %v3408_v44 = vld [vmem:[#allocation2 + $0x5c] sm:$0x1] }
 0x18a   : > { %v3276_v8 = vshrl.u32 %v10874_v0, 16  ;;  %v3279_v7 = vshll.u32 %v10874_v0, 16  ;;  %v10872_v31 = vpack.c.bf16 %v3026_v55, %v3026_v55  ;;  %v10875_v9 = vpack.c.bf16 %v3029_v42, %v3029_v42  ;;  %v3426_v55 = vld [vmem:[#allocation2 + $0x74] sm:$0x1] }
 0x18b   : > { %v3400_v1 = vsel %vm13294_vm14, %v3257_v14, %v3399_v6  ;;  %v3403_v62 = vsel %vm12830_vm10, %v3258_v22, %v3402_v19  ;;  %v3241_v51 = vor.u32 %v3239_v15, %v3238_v4  ;;  %v3242_v52 = vrot.slane %v3238_v4, 4  ;;  %v3423_v19 = vld [vmem:[#allocation2 + $0x70] sm:$0xf]  ;;  %v3454_v22 = vld [vmem:[#allocation2 + $0x8] sm:$0xf] }
 0x18c   : > { %3401 = vst [vmem:[#allocation2 + $0x40] sm:$0xf] %v3400_v1  ;;  %3404 = vst [vmem:[#allocation2 + $0x44] sm:$0x1] %v3403_v62  ;;  %v3278_v63 = vrot.slane %v3276_v8, 7  ;;  %v3260_v38 = vshrl.u32 %v10872_v31, 16  ;;  %v3016_v39 = vadd.f32 %v13250_v58, %v2993_v25  ;;  %v2991_v34 = vadd.f32 %v2964_v53, %v13285_v2 }
 0x18d   : > { %v3263_v17 = vshll.u32 %v10872_v31, 16  ;;  %v3284_v16 = vshrl.u32 %v10875_v9, 16  ;;  %v3388_v41 = vsel %vm13294_vm14, %v3241_v51, %v3387_v40  ;;  %v3391_v3 = vsel %vm12830_vm10, %v3242_v52, %v3390_v49 }
 0x18e   : > { %v3287_v56 = vshll.u32 %v10875_v9, 16  ;;  %v3027_v11 = vmax.f32 %v3011_v5, 0.0  ;;  %3389 = vst [vmem:[#allocation2 + $0x30] sm:$0xf] %v3388_v41  ;;  %3392 = vst [vmem:[#allocation2 + $0x34] sm:$0x1] %v3391_v3  ;;  %v3281_v10 = vor.u32 %v3279_v7, %v3278_v63  ;;  %v2994_v36 = vadd.f32 %v11368_v12, %v13287_v37 }
 0x18f   : > { %v3282_v47 = vrot.slane %v3278_v63, 4  ;;  %v3262_v18 = vrot.slane %v3260_v38, 7  ;;  %v3286_v48 = vrot.slane %v3284_v16, 7  ;;  %v3032_v53 = vmax.f32 %v3016_v39, 0.0  ;;  %v3411_v7 = vld [vmem:[#allocation2 + $0x60] sm:$0xf]  ;;  %v2967_v16 = vpop.f32.mrf.mxu0 }
 0x190   : > { %v10873_v33 = vpack.c.bf16 %v3027_v11, %v3027_v11  ;;  %v3418_v6 = vsel %vm13294_vm14, %v3281_v10, %v3417_v32  ;;  %v3014_v4 = vadd.f32 %v13250_v58, %v2991_v34  ;;  %v3017_v31 = vadd.f32 %v13250_v58, %v2994_v36  ;;  %v3414_v9 = vld [vmem:[#allocation2 + $0x64] sm:$0x1]  ;;  %v15844_v38 = vld [vmem:[#allocation29_spill] sm:$0xff]  ;;  %v13363_v12 = vld [vmem:[#allocation2 + $0x10] sm:$0xf] }
 0x191   : > { %v3421_v54 = vsel %vm12830_vm10, %v3282_v47, %v3420_v28  ;;  %v3265_v15 = vor.u32 %v3263_v17, %v3262_v18  ;;  %v3266_v0 = vrot.slane %v3262_v18, 4  ;;  %3419 = vst [vmem:[#allocation2 + $0x68] sm:$0xf] %v3418_v6  ;;  %v3289_v42 = vor.u32 %v3287_v56, %v3286_v48  ;;  %v3441_v47 = vld [vmem:[#allocation2 + $0x88] sm:$0xf] }
 0x192   : > { %3422 = vst [vmem:[#allocation2 + $0x6c] sm:$0x1] %v3421_v54  ;;  %v3290_v59 = vrot.slane %v3286_v48, 4  ;;  %v3268_v14 = vshrl.u32 %v10873_v33, 16  ;;  %v3271_v25 = vshll.u32 %v10873_v33, 16  ;;  %v10878_v5 = vpack.c.bf16 %v3032_v53, %v3032_v53 }
 0x193   : > { %v3406_v2 = vsel %vm13294_vm14, %v3265_v15, %v3405_v45  ;;  %v3409_v37 = vsel %vm12830_vm10, %v3266_v0, %v3408_v44  ;;  %v3424_v40 = vsel %vm13294_vm14, %v3289_v42, %v3423_v19  ;;  %v3030_v1 = vmax.f32 %v3014_v4, 0.0  ;;  %v3444_v18 = vld [vmem:[#allocation2 + $0x8c] sm:$0x1]  ;;  %v3456_v36 = vld [vmem:[#allocation2 + $0x18] sm:$0xf] }
 0x194   : > { %3407 = vst [vmem:[#allocation2 + $0x58] sm:$0xf] %v3406_v2  ;;  %3410 = vst [vmem:[#allocation2 + $0x5c] sm:$0x1] %v3409_v37  ;;  %v3427_v8 = vsel %vm12830_vm10, %v3290_v59, %v3426_v55  ;;  %v3270_v49 = vrot.slane %v3268_v14, 7  ;;  %v3504_v62 = vshrl.u32 %v3454_v22, 16  ;;  %v10307_v17 = vcombine.low %v15844_v38, %v3454_v22 }
 0x195   : > { %3425 = vst [vmem:[#allocation2 + $0x70] sm:$0xf] %v3424_v40  ;;  %3428 = vst [vmem:[#allocation2 + $0x74] sm:$0x1] %v3427_v8  ;;  %v3507_v51 = vshll.u32 %v3454_v22, 16  ;;  %v3033_v32 = vmax.f32 %v3017_v31, 0.0  ;;  %v10876_v28 = vpack.c.bf16 %v3030_v1, %v3030_v1  ;;  %v2992_v34 = vadd.f32 %v2967_v16, %v13289_v24 }
 0x196   : > { %v3273_v52 = vor.u32 %v3271_v25, %v3270_v49  ;;  %v3274_v63 = vrot.slane %v3270_v49, 4  ;;  %v3308_v41 = vshrl.u32 %v10878_v5, 16  ;;  %v3311_v3 = vshll.u32 %v10878_v5, 16  ;;  %11393 = vmatprep.mubr.msk.bf16.mxu0 %vm3754_vm15, %v10307_v17  ;;  %v3429_v6 = vld [vmem:[#allocation2 + $0x78] sm:$0xf]  ;;  %v11856_v38 = vld [vmem:[%s15746_s3 + $0x30] sm:$0xff]  }
 0x197   : > { %v13365_v56 = vrot.slane %v3504_v62, 4  ;;  %v10879_v48 = vpack.c.bf16 %v3033_v32, %v3033_v32  ;;  %v13371_v45 = vrot.slane %v3507_v51, 5  ;;  %v3292_v33 = vshrl.u32 %v10876_v28, 16  ;;  %v3432_v54 = vld [vmem:[#allocation2 + $0x7c] sm:$0x1] }
 0x198   : > { %v3412_v11 = vsel %vm13294_vm14, %v3273_v52, %v3411_v7  ;;  %v3415_v10 = vsel %vm12830_vm10, %v3274_v63, %v3414_v9  ;;  %v3310_v44 = vrot.slane %v3308_v41, 7  ;;  %v3295_v39 = vshll.u32 %v10876_v28, 16  ;;  %v3447_v25 = vld [vmem:[#allocation2 + $0x90] sm:$0xf]  ;;  %v3450_v22 = vld [vmem:[#allocation2 + $0x94] sm:$0x1] }
 0x199   : > { %3413 = vst [vmem:[#allocation2 + $0x60] sm:$0xf] %v3412_v11  ;;  %3416 = vst [vmem:[#allocation2 + $0x64] sm:$0x1] %v3415_v10  ;;  %v3316_v15 = vshrl.u32 %v10879_v48, 16  ;;  %v3319_v0 = vshll.u32 %v10879_v48, 16  ;;  %v3015_v2 = vadd.f32 %v13250_v58, %v2992_v34  ;;  %v10308_v32 = vcombine.low %v13363_v12, %v3456_v36 }
 0x19a   : > { %v3518_v19 = vshrl.u32 %v13363_v12, 16  ;;  %v3521_v55 = vshll.u32 %v13363_v12, 16  ;;  %v3313_v42 = vor.u32 %v3311_v3, %v3310_v44  ;;  %v3314_v59 = vrot.slane %v3310_v44, 4  ;;  %v3457_v40 = vld [vmem:[#allocation2 + $0x20] sm:$0xf] }
 0x19b   : > { %v3294_v14 = vrot.slane %v3292_v33, 7  ;;  %v3318_v37 = vrot.slane %v3316_v15, 7  ;;  %v3532_v4 = vshrl.u32 %v3456_v36, 16  ;;  %v3458_v9 = vld [vmem:[#allocation2 + $0x28] sm:$0xf]  ;;  %v3031_v1 = vmax.f32 %v3015_v2, 0.0  ;;  %11394 = vmatmul.mubr.msk.bf16.vlgmr.msra.gmra.mxu0 %vm3754_vm15, %v10308_v32 }
 0x19c   : > { %v13378_v53 = vrot.slane %v3518_v19, 4  ;;  %v13380_v24 = vrot.slane %v3521_v55, 5  ;;  %v3442_v8 = vsel %vm13294_vm14, %v3313_v42, %v3441_v47  ;;  %v3445_v49 = vsel %vm12830_vm10, %v3314_v59, %v3444_v18  ;;  %v13400_v28 = vld [vmem:[#allocation2 + $0xc] sm:$0x1]  ;;  %v3459_v11 = vld [vmem:[#allocation2 + $0x30] sm:$0xf] }
 0x19d   : > { %v3297_v7 = vor.u32 %v3295_v39, %v3294_v14  ;;  %v3298_v31 = vrot.slane %v3294_v14, 4  ;;  %3443 = vst [vmem:[#allocation2 + $0x88] sm:$0xf] %v3442_v8  ;;  %3446 = vst [vmem:[#allocation2 + $0x8c] sm:$0x1] %v3445_v49  ;;  %v3321_v5 = vor.u32 %v3319_v0, %v3318_v37  ;;  %v3322_v58 = vrot.slane %v3318_v37, 4 }
 0x19e   : > { %v13386_v62 = vrot.slane %v3532_v4, 4  ;;  %v3535_v63 = vshll.u32 %v3456_v36, 16  ;;  %v10877_v41 = vpack.c.bf16 %v3031_v1, %v3031_v1  ;;  %v3546_v3 = vshrl.u32 %v3457_v40, 16  ;;  %v3460_v34 = vld [vmem:[#allocation2 + $0x38] sm:$0xf] }
 0x19f   : > { %v3430_v51 = vsel %vm13294_vm14, %v3297_v7, %v3429_v6  ;;  %v3433_v52 = vsel %vm12830_vm10, %v3298_v31, %v3432_v54  ;;  %v3448_v17 = vsel %vm13294_vm14, %v3321_v5, %v3447_v25  ;;  %v3451_v16 = vsel %vm12830_vm10, %v3322_v58, %v3450_v22  ;;  %v15845_v36 = vld [vmem:[#allocation15_spill] sm:$0xff]  ;;  %v3435_v6 = vld [vmem:[#allocation2 + $0x80] sm:$0xf]  ;;  %v3438_v59 = vld [vmem:[#allocation2 + $0x84] sm:$0x1] }
 0x1a0   : > { %3431 = vst [vmem:[#allocation2 + $0x78] sm:$0xf] %v3430_v51  ;;  %3434 = vst [vmem:[#allocation2 + $0x7c] sm:$0x1] %v3433_v52  ;;  %v3537_v12 = vrot.slane %v3535_v63, 5  ;;  %v3549_v10 = vshll.u32 %v3457_v40, 16  ;;  %v10309_v39 = vcombine.low %v3457_v40, %v3458_v9  ;;  %11430 = vmatpush3.bf16.msra.mxu0 %v15845_v36  ;;  %v3510_v19 = vor.u32 %v13371_v45, %v13365_v56 }
 0x1a1   : > { %3449 = vst [vmem:[#allocation2 + $0x90] sm:$0xf] %v3448_v17  ;;  %3452 = vst [vmem:[#allocation2 + $0x94] sm:$0x1] %v3451_v16  ;;  %v3560_v47 = vshrl.u32 %v3458_v9, 16  ;;  %v3563_v18 = vshll.u32 %v3458_v9, 16  ;;  %11431 = vmatprep.subr.bf16.mxu0 %v11856_v38  ;;  %v10310_v40 = vcombine.low %v3459_v11, %v3460_v34  ;;  %v3524_v1 = vor.u32 %v13380_v24, %v13378_v53 }
 0x1a2   : > { %v3300_v48 = vshrl.u32 %v10877_v41, 16  ;;  %v3303_v44 = vshll.u32 %v10877_v41, 16  ;;  %v13403_v33 = vrot.slane %v3546_v3, 4  ;;  %v3551_v54 = vrot.slane %v3549_v10, 5  ;;  %v13411_v55 = vld [vmem:[%s15746_s3 + $0x58] sm:$0xff]   ;;  %11397 = vmatprep.mubr.msk.bf16.mxu0 %vm3754_vm15, %v10309_v39 }
 0x1a3   : > { %v3562_v15 = vrot.slane %v3560_v47, 4  ;;  %v3565_v0 = vrot.slane %v3563_v18, 5  ;;  %v3513_v14 = vshll.u32 %v13400_v28, 16  ;;  %v3574_v25 = vshrl.u32 %v3459_v11, 16  ;;  %v13415_v8 = vld [vmem:[#allocation2 + $0x14] sm:$0x1]  ;;  %11398 = vmatmul.mubr.msk.bf16.gmra.mxu0 %vm3754_vm15, %v10310_v40 }
 0x1a4   : > { %v3302_v42 = vrot.slane %v3300_v48, 7  ;;  %v3577_v22 = vshll.u32 %v3459_v11, 16  ;;  %v3511_v2 = vrot.slane %v3510_v19, 4  ;;  %v3588_v37 = vshrl.u32 %v3460_v34, 16  ;;  %v13419_v31 = vld [vmem:[#allocation2 + $0x1c] sm:$0x1]  ;;  %11432 = vmatpush3.bf16.msra.mxu0 %v11856_v38 }
 0x1a5   : > { %v3591_v4 = vshll.u32 %v3460_v34, 16  ;;  %v3515_v49 = vrot.slane %v3513_v14, 5  ;;  %v13417_v7 = vrot.slane %v3574_v25, 4  ;;  %v3462_v51 = vld [vmem:[#allocation2 + $0x58] sm:$0xf]  ;;  %11469 = vmatprep.subr.bf16.mxu0 %v13411_v55  ;;  %v3527_v38 = vshll.u32 %v13415_v8, 16 }
 0x1a6   : > { %v3305_v56 = vor.u32 %v3303_v44, %v3302_v42  ;;  %v3306_v45 = vrot.slane %v3302_v42, 4  ;;  %v13421_v9 = vrot.slane %v3577_v22, 5  ;;  %v13423_v5 = vrot.slane %v3588_v37, 4  ;;  %v13437_v17 = vld [vmem:[#allocation2 + $0x24] sm:$0x1]  ;;  %v15846_v11 = vld [vmem:[#allocation37_spill] sm:$0xff] }
 0x1a7   : > { %v13425_v58 = vrot.slane %v3591_v4, 5  ;;  %v3516_v32 = vsel %vm12114_vm4, %v3511_v2, %v3515_v49  ;;  %v3525_v26 = vrot.slane %v3524_v1, 4  ;;  %v3538_v43 = vor.u32 %v3537_v12, %v13386_v62  ;;  %v13448_v47 = vld [vmem:[#allocation2 + $0x2c] sm:$0x1]  ;;  %v3464_v34 = vld [vmem:[#allocation2 + $0x68] sm:$0xf] }
 0x1a8   : > { %v3436_v52 = vsel %vm13294_vm14, %v3305_v56, %v3435_v6  ;;  %v3439_v63 = vsel %vm12830_vm10, %v3306_v45, %v3438_v59  ;;  %v10289_v53 = vcombine.low %v3502_v23, %v3516_v32  ;;  %v3541_v24 = vshll.u32 %v13419_v31, 16  ;;  %v3463_v23 = vld [vmem:[#allocation2 + $0x60] sm:$0xf]  ;;  %v13463_v25 = vld [vmem:[#allocation2 + $0x34] sm:$0x1] }
 0x1a9   : > { %3437 = vst [vmem:[#allocation2 + $0x80] sm:$0xf] %v3436_v52  ;;  %3440 = vst [vmem:[#allocation2 + $0x84] sm:$0x1] %v3439_v63  ;;  %v3529_v16 = vrot.slane %v3527_v38, 5  ;;  %v3616_v41 = vshrl.u32 %v3462_v51, 16  ;;  %v10311_v10 = vcombine.low %v15846_v11, %v3462_v51  ;;  %v3552_v61 = vor.u32 %v3551_v54, %v13403_v33 }
 0x1aa   : > { %v3619_v3 = vshll.u32 %v3462_v51, 16  ;;  %11373 = vmatprep.mubr.msk.bf16.mxu1 %vm3754_vm15, %v10289_v53  ;;  %v3539_v18 = vrot.slane %v3538_v43, 4  ;;  %v3543_v48 = vrot.slane %v3541_v24, 5  ;;  %v3555_v27 = vshll.u32 %v13437_v17, 16  ;;  %v11853_v22 = vld [vmem:[%s15746_s3 + $0x20] sm:$0xff]   ;;  %v11951_v52 = vld [vmem:[%s15746_s3 + $0x28] sm:$0xff]  }
 0x1ab   : > { %v3530_v62 = vsel %vm12114_vm4, %v3525_v26, %v3529_v16  ;;  %v13455_v12 = vrot.slane %v3616_v41, 4  ;;  %11401 = vmatprep.mubr.msk.bf16.mxu0 %vm3754_vm15, %v10311_v10  ;;  %v3566_v39 = vor.u32 %v3565_v0, %v3562_v15  ;;  %v3553_v6 = vrot.slane %v3552_v61, 4  ;;  %v13470_v4 = vld [vmem:[#allocation2 + $0x3c] sm:$0x1]  ;;  %v3465_v1 = vld [vmem:[#allocation2 + $0x70] sm:$0xf] }
 0x1ac   : > { %v13457_v44 = vrot.slane %v3619_v3, 5  ;;  %v3544_v36 = vsel %vm12114_vm4, %v3539_v18, %v3543_v48  ;;  %v3557_v19 = vrot.slane %v3555_v27, 5  ;;  %v3569_v33 = vshll.u32 %v13448_v47, 16  ;;  %v3466_v51 = vld [vmem:[#allocation2 + $0x78] sm:$0xf]  ;;  %v13496_v16 = vld [vmem:[%s15746_s3 + $0x48] sm:$0xff]  }
 0x1ad   : > { %v10290_v54 = vcombine.low %v3530_v62, %v3544_v36  ;;  %v3567_v42 = vrot.slane %v3566_v39, 4  ;;  %v3630_v59 = vshrl.u32 %v3463_v23, 16  ;;  %v3633_v14 = vshll.u32 %v3463_v23, 16  ;;  %v13491_v24 = vld [vmem:[#allocation2 + $0x5c] sm:$0x1] }
 0x1ae   : > { %v3558_v15 = vsel %vm12114_vm4, %v3553_v6, %v3557_v19  ;;  %v3571_v0 = vrot.slane %v3569_v33, 5  ;;  %v3644_v2 = vshrl.u32 %v3464_v34, 16  ;;  %v3647_v37 = vshll.u32 %v3464_v34, 16  ;;  %v3468_v18 = vld [vmem:[#allocation2 + $0x88] sm:$0xf] }
 0x1af   : > { %11374 = vmatmul.mubr.msk.bf16.vlgmr.msra.gmra.mxu1 %vm3754_vm15, %v10290_v54  ;;  %v13473_v40 = vrot.slane %v3630_v59, 4  ;;  %v13475_v56 = vrot.slane %v3633_v14, 5  ;;  %v10312_v45 = vcombine.low %v3463_v23, %v3464_v34  ;;  %v3580_v49 = vor.u32 %v13421_v9, %v13417_v7  ;;  %v13536_v57 = vld [vmem:[#allocation2 + $0x8c] sm:$0x1] }
 0x1b0   : > { %11410 = vmatpush3.bf16.msra.mxu1 %v11951_v52  ;;  %v3572_v63 = vsel %vm12114_vm4, %v3567_v42, %v3571_v0  ;;  %v13484_v32 = vrot.slane %v3644_v2, 4  ;;  %v3649_v38 = vrot.slane %v3647_v37, 5  ;;  %v3583_v53 = vshll.u32 %v13463_v25, 16  ;;  %v3467_v27 = vld [vmem:[#allocation2 + $0x80] sm:$0xf] }
 0x1b1   : > { %v10291_v26 = vcombine.low %v3558_v15, %v3572_v63  ;;  %11402 = vmatmul.mubr.msk.bf16.gmra.mxu0 %vm3754_vm15, %v10312_v45  ;;  %v3581_v43 = vrot.slane %v3580_v49, 4  ;;  %v3594_v7 = vor.u32 %v13425_v58, %v13423_v5  ;;  %v3597_v9 = vshll.u32 %v13470_v4, 16  ;;  %11411 = vmatprep.subr.bf16.mxu1 %v11853_v22  ;;  %v13508_v15 = vld [vmem:[#allocation2 + $0x64] sm:$0x1]  ;;  %v13510_v49 = vld [vmem:[#allocation2 + $0x6c] sm:$0x1] }
 0x1b2   : > { %v3585_v41 = vrot.slane %v3583_v53, 5  ;;  %v3658_v3 = vshrl.u32 %v3465_v1, 16  ;;  %v3661_v11 = vshll.u32 %v3465_v1, 16  ;;  %v3672_v10 = vshrl.u32 %v3466_v51, 16  ;;  %v13515_v52 = vld [vmem:[#allocation2 + $0x74] sm:$0x1] }
 0x1b3   : > { %11377 = vmatprep.mubr.msk.bf16.mxu1 %vm3754_vm15, %v10291_v26  ;;  %v3595_v48 = vrot.slane %v3594_v7, 4  ;;  %v3599_v61 = vrot.slane %v3597_v9, 5  ;;  %v3675_v5 = vshll.u32 %v3466_v51, 16  ;;  %v10313_v58 = vcombine.low %v3465_v1, %v3466_v51  ;;  %v13522_v7 = vld [vmem:[#allocation2 + $0x7c] sm:$0x1] }
 0x1b4   : > { %v3586_v23 = vsel %vm12114_vm4, %v3581_v43, %v3585_v41  ;;  %v3660_v62 = vrot.slane %v3658_v3, 4  ;;  %v3663_v39 = vrot.slane %v3661_v11, 5  ;;  %v3674_v34 = vrot.slane %v3672_v10, 4  ;;  %11412 = vmatpush3.bf16.msra.mxu1 %v11853_v22  ;;  %v11855_v22 = vld [vmem:[#allocation2 + $0x8] ss:$8 sps:$4 sm:$0xff]  }
 0x1b5   : > { %v3600_v36 = vsel %vm12114_vm4, %v3595_v48, %v3599_v61  ;;  %v3677_v6 = vrot.slane %v3675_v5, 5  ;;  %11405 = vmatprep.mubr.msk.bf16.mxu0 %vm3754_vm15, %v10313_v58  ;;  %v3622_v19 = vor.u32 %v13457_v44, %v13455_v12  ;;  %v3625_v33 = vshll.u32 %v13491_v24, 16  ;;  %11449 = vmatprep.subr.bf16.mxu1 %v13496_v16  ;;  %v13531_v3 = vld [vmem:[#allocation2 + $0x84] sm:$0x1] }
 0x1b6   : > { %v10292_v54 = vcombine.low %v3586_v23, %v3600_v36  ;;  %v3686_v42 = vshrl.u32 %v3467_v27, 16  ;;  %v3689_v59 = vshll.u32 %v3467_v27, 16  ;;  %v3700_v14 = vshrl.u32 %v3468_v18, 16  ;;  %v4050_v23 = vld [vmem:[#allocation2 + $0x8] sm:$0xe] }
 0x1b7   : > { %v3623_v0 = vrot.slane %v3622_v19, 4  ;;  %v3627_v2 = vrot.slane %v3625_v33, 5  ;;  %v3703_v37 = vshll.u32 %v3468_v18, 16  ;;  %v10314_v45 = vcombine.low %v3467_v27, %v3468_v18  ;;  %v4051_v19 = vld [vmem:[#allocation2 + $0x10] sm:$0xe] }
 0x1b8   : > { %11378 = vmatmul.mubr.msk.bf16.gmra.mxu1 %vm3754_vm15, %v10292_v54  ;;  %v3688_v12 = vrot.slane %v3686_v42, 4  ;;  %v3691_v44 = vrot.slane %v3689_v59, 5  ;;  %v3702_v1 = vrot.slane %v3700_v14, 4  ;;  %v3636_v51 = vor.u32 %v13475_v56, %v13473_v40  ;;  %v4052_v33 = vld [vmem:[#allocation2 + $0x18] sm:$0xe] }
 0x1b9   : > { %v3628_v63 = vsel %vm12114_vm4, %v3623_v0, %v3627_v2  ;;  %v3705_v53 = vrot.slane %v3703_v37, 5  ;;  %11406 = vmatmul.mubr.msk.bf16.gmra.mxu0 %vm3754_vm15, %v10314_v45  ;;  %v3639_v26 = vshll.u32 %v13508_v15, 16  ;;  %v3650_v43 = vor.u32 %v3649_v38, %v13484_v32  ;;  %v11857_v59 = vld [vmem:[#allocation2 + $0x18] ss:$8 sps:$4 sm:$0xff]   ;;  %v11858_v45 = vld [vmem:[#allocation2 + $0x28] ss:$8 sps:$4 sm:$0xff]  }
 0x1ba   : > { %v10293_v40 = vcombine.low %v3614_v21, %v3628_v63  ;;  %v3637_v56 = vrot.slane %v3636_v51, 4  ;;  %v3653_v9 = vshll.u32 %v13510_v49, 16  ;;  %11433 = vmatprep.mubr.msk.bf16.mxu0 %vm3754_vm15, %v11855_v22  ;;  %v3664_v41 = vor.u32 %v3663_v39, %v3660_v62  ;;  %v11867_v62 = vld [vmem:[%s15746_s3 + $0x50] sm:$0xff]   ;;  %v4053_v0 = vld [vmem:[#allocation2 + $0x20] sm:$0xe] }
 0x1bb   : > { %v3641_v11 = vrot.slane %v3639_v26, 5  ;;  %v3651_v10 = vrot.slane %v3650_v43, 4  ;;  %v3667_v32 = vshll.u32 %v13515_v52, 16  ;;  %v3678_v38 = vor.u32 %v3677_v6, %v3674_v34  ;;  %v4054_v26 = vld [vmem:[#allocation2 + $0x28] sm:$0xe] }
 0x1bc   : > { %11381 = vmatprep.mubr.msk.bf16.mxu1 %vm3754_vm15, %v10293_v40  ;;  %v3655_v18 = vrot.slane %v3653_v9, 5  ;;  %v3665_v48 = vrot.slane %v3664_v41, 4  ;;  %v3681_v35 = vshll.u32 %v13522_v7, 16  ;;  %v3692_v21 = vor.u32 %v3691_v44, %v3688_v12  ;;  %v4055_v9 = vld [vmem:[#allocation2 + $0x30] sm:$0xe]  ;;  %v13565_v41 = vld [vmem:[%s15746_s3 + $0x78] sm:$0xff]  }
 0x1bd   : > { %v3642_v61 = vsel %vm12114_vm4, %v3637_v56, %v3641_v11  ;;  %v3669_v5 = vrot.slane %v3667_v32, 5  ;;  %v3679_v58 = vrot.slane %v3678_v38, 4  ;;  %v3695_v27 = vshll.u32 %v13531_v3, 16  ;;  %v4058_v38 = vld [vmem:[#allocation2 + $0x58] sm:$0xe] }
 0x1be   : > { %v3656_v39 = vsel %vm12114_vm4, %v3651_v10, %v3655_v18  ;;  %v3683_v34 = vrot.slane %v3681_v35, 5  ;;  %v3693_v36 = vrot.slane %v3692_v21, 4  ;;  %v3706_v6 = vor.u32 %v3705_v53, %v3702_v1 }
 0x1bf   : > { %v10294_v54 = vcombine.low %v3642_v61, %v3656_v39  ;;  %v3670_v42 = vsel %vm12114_vm4, %v3665_v48, %v3669_v5  ;;  %v3697_v14 = vrot.slane %v3695_v27, 5  ;;  %v3709_v22 = vshll.u32 %v13536_v57, 16  ;;  %v13593_v61 = vld [vmem:[#allocation2 + $0xc] sm:$0x1]  ;;  %v13597_v39 = vld [vmem:[#allocation2 + $0x14] sm:$0x1] }
 0x1c0   : > { %v3684_v2 = vsel %vm12114_vm4, %v3679_v58, %v3683_v34  ;;  %v3707_v37 = vrot.slane %v3706_v6, 4  ;;  %v10326_v12 = vrot.slane %v4050_v23, 9  ;;  %v4103_v44 = vrot.slane %v13400_v28, 5  ;;  %v4984_v34 = vld [vmem:[#allocation2 + $0x10] sm:$0xe] }
 0x1c1   : > { %11382 = vmatmul.mubr.msk.bf16.gmra.mxu1 %vm3754_vm15, %v10294_v54  ;;  %v10295_v1 = vcombine.low %v3670_v42, %v3684_v2  ;;  %11434 = vmatmul.mubr.msk.bf16.vlgmr.msra.gmra.mxu0 %vm3754_vm15, %v11857_v59  ;;  %v3698_v51 = vsel %vm12114_vm4, %v3693_v36, %v3697_v14  ;;  %v3711_v63 = vrot.slane %v3709_v22, 5  ;;  %v10327_v53 = vrot.slane %v4051_v19, 9  ;;  %v11859_v36 = vld [vmem:[#allocation2 + $0x38] ss:$8 sps:$4 sm:$0xff]   ;;  %v4061_v59 = vld [vmem:[#allocation2 + $0x70] sm:$0xe] }
 0x1c2   : > { %11437 = vmatprep.mubr.msk.bf16.mxu0 %vm3754_vm15, %v11858_v45  ;;  %v4104_v43 = vsel %vm12231_vm7, %v10326_v12, %v4103_v44  ;;  %v4107_v40 = vrot.slane %v13415_v8, 5  ;;  %v10328_v56 = vrot.slane %v4052_v33, 9  ;;  %v4111_v28 = vrot.slane %v13419_v31, 5  ;;  %11470 = vmatpush3.bf16.msra.mxu0 %v13411_v55  ;;  %v4056_v8 = vld [vmem:[#allocation2 + $0x38] sm:$0xe] }
 0x1c3   : > { %11385 = vmatprep.mubr.msk.bf16.mxu1 %vm3754_vm15, %v10295_v1  ;;  %v3712_v11 = vsel %vm12114_vm4, %v3707_v37, %v3711_v63  ;;  %v10329_v10 = vrot.slane %v4053_v0, 9  ;;  %v4115_v32 = vrot.slane %v13437_v17, 5  ;;  %v13577_v55 = vsel %vm12231_vm7, %v10333_v29, %v4131_v50  ;;  %11471 = vmatprep.subr.bf16.mxu0 %v11867_v62  ;;  %v4059_v17 = vld [vmem:[#allocation2 + $0x60] sm:$0xe]  ;;  %v4060_v50 = vld [vmem:[#allocation2 + $0x68] sm:$0xe] }
 0x1c4   : > { %v10296_v31 = vcombine.low %v3698_v51, %v3712_v11  ;;  %v10345_v18 = vcombine.low %v13201_v13, %v4104_v43  ;;  %v13582_v48 = vsel %vm12231_vm7, %v10327_v53, %v4107_v40  ;;  %v10330_v35 = vrot.slane %v4054_v26, 9  ;;  %v4983_v13 = vld [vmem:[#allocation2 + $0x8] sm:$0xe]  ;;  %v13614_v14 = vld [vmem:[#allocation2 + $0x1c] sm:$0x1] }
 0x1c5   : > { %v13586_v21 = vsel %vm12231_vm7, %v10328_v56, %v4111_v28  ;;  %v13590_v60 = vsel %vm12231_vm7, %v10329_v10, %v4115_v32  ;;  %v4119_v20 = vrot.slane %v13448_v47, 5  ;;  %v10331_v29 = vrot.slane %v4055_v9, 9  ;;  %v4062_v2 = vld [vmem:[#allocation2 + $0x78] sm:$0xe]  ;;  %v13631_v37 = vld [vmem:[#allocation2 + $0x24] sm:$0x1] }
 0x1c6   : > { %v4123_v5 = vrot.slane %v13463_v25, 5  ;;  %v10332_v58 = vrot.slane %v4056_v8, 9  ;;  %v4127_v27 = vrot.slane %v13470_v4, 5  ;;  %v10334_v23 = vrot.slane %v4058_v38, 9  ;;  %11472 = vmatpush3.bf16.msra.mxu0 %v11867_v62  ;;  %v11861_v4 = vld [vmem:[#allocation2 + $0x58] ss:$8 sps:$4 sm:$0xff]  }
 0x1c7   : > { %v13601_v6 = vsel %vm12231_vm7, %v10330_v35, %v4119_v20  ;;  %v4135_v47 = vrot.slane %v13491_v24, 5  ;;  %v10335_v19 = vrot.slane %v4059_v17, 9  ;;  %v4139_v33 = vrot.slane %v13508_v15, 5  ;;  %11509 = vmatprep.subr.bf16.mxu0 %v13565_v41  ;;  %v4985_v51 = vld [vmem:[#allocation2 + $0x18] sm:$0xe]  ;;  %v11865_v32 = vld [vmem:[%s15746_s3 + $0x40] sm:$0xff]  }
 0x1c8   : > { %v10346_v25 = vcombine.low %v13582_v48, %v13586_v21  ;;  %v10347_v54 = vcombine.low %v13590_v60, %v13601_v6  ;;  %v13612_v62 = vsel %vm12231_vm7, %v10331_v29, %v4123_v5  ;;  %v10336_v42 = vrot.slane %v4060_v50, 9  ;;  %v4986_v43 = vld [vmem:[#allocation2 + $0x20] sm:$0xe]  ;;  %v11862_v10 = vld [vmem:[#allocation2 + $0x68] ss:$8 sps:$4 sm:$0xff]  }
 0x1c9   : > { %11386 = vmatmul.mubr.msk.bf16.gmra.mxu1 %vm3754_vm15, %v10296_v31  ;;  %11438 = vmatmul.mubr.msk.bf16.gmra.mxu0 %vm3754_vm15, %v11859_v36  ;;  %v13620_v24 = vsel %vm12231_vm7, %v10332_v58, %v4127_v27  ;;  %v13624_v15 = vsel %vm12231_vm7, %v10334_v23, %v4135_v47  ;;  %v13628_v22 = vsel %vm12231_vm7, %v10335_v19, %v4139_v33  ;;  %v4143_v0 = vrot.slane %v13510_v49, 5  ;;  %v4063_v11 = vld [vmem:[#allocation2 + $0x80] sm:$0xe]  ;;  %v4987_v48 = vld [vmem:[#allocation2 + $0x28] sm:$0xe] }
 0x1ca   : > { %11413 = vmatprep.mubr.msk.bf16.mxu1 %vm3754_vm15, %v10345_v18  ;;  %11441 = vmatprep.mubr.msk.bf16.mxu0 %vm3754_vm15, %v11861_v4  ;;  %v10348_v45 = vcombine.low %v13612_v62, %v13620_v24  ;;  %v10407_v12 = vrot.slane %v4983_v13, 9  ;;  %v5033_v44 = vrot.slane %v13593_v61, 5  ;;  %v10408_v1 = vrot.slane %v4984_v34, 9  ;;  %v4064_v18 = vld [vmem:[#allocation2 + $0x88] sm:$0xe] }
 0x1cb   : > { %v13640_v63 = vsel %vm12231_vm7, %v10336_v42, %v4143_v0  ;;  %v5037_v49 = vrot.slane %v13597_v39, 5  ;;  %v10337_v53 = vrot.slane %v4061_v59, 9  ;;  %v4147_v26 = vrot.slane %v13515_v52, 5  ;;  %v13670_v20 = vld [vmem:[#allocation2 + $0x2c] sm:$0x1] }
 0x1cc   : > { %v10349_v40 = vcombine.low %v13577_v55, %v13624_v15  ;;  %v10350_v56 = vcombine.low %v13628_v22, %v13640_v63  ;;  %v10338_v28 = vrot.slane %v4062_v2, 9  ;;  %v4151_v9 = vrot.slane %v13522_v7, 5  ;;  %v4988_v29 = vld [vmem:[#allocation2 + $0x30] sm:$0xe]  ;;  %v13679_v27 = vld [vmem:[#allocation2 + $0x34] sm:$0x1] }
 0x1cd   : > { %v13654_v8 = vsel %vm12231_vm7, %v10407_v12, %v5033_v44  ;;  %v13658_v52 = vsel %vm12231_vm7, %v10408_v1, %v5037_v49  ;;  %v10409_v38 = vrot.slane %v4985_v51, 9  ;;  %v5041_v31 = vrot.slane %v13614_v14, 5  ;;  %v4549_v23 = vld [vmem:[#allocation2 + $0x8] sm:$0xf]  ;;  %v4551_v33 = vld [vmem:[#allocation2 + $0x10] sm:$0xf] }
 0x1ce   : > { %v13663_v7 = vsel %vm12231_vm7, %v10337_v53, %v4147_v26  ;;  %v13667_v35 = vsel %vm12231_vm7, %v10338_v28, %v4151_v9  ;;  %v10410_v17 = vrot.slane %v4986_v43, 9  ;;  %v5045_v21 = vrot.slane %v13631_v37, 5  ;;  %v11863_v4 = vld [vmem:[#allocation2 + $0x78] ss:$8 sps:$4 sm:$0xff]   ;;  %v13693_v2 = vld [vmem:[#allocation2 + $0x3c] sm:$0x1] }
 0x1cf   : > { %v10427_v50 = vcombine.low %v13654_v8, %v13658_v52  ;;  %v13676_v13 = vsel %vm12231_vm7, %v10409_v38, %v5041_v31  ;;  %v10339_v5 = vrot.slane %v4063_v11, 9  ;;  %v4155_v58 = vrot.slane %v13531_v3, 5  ;;  %v13705_v1 = vld [vmem:[#allocation2 + $0x44] sm:$0x1]  ;;  %v13710_v51 = vld [vmem:[%s15746_s3 + $0x68] sm:$0xff]  }
 0x1d0   : > { %v13683_v34 = vsel %vm12231_vm7, %v10410_v17, %v5045_v21  ;;  %v10340_v36 = vrot.slane %v4064_v18, 9  ;;  %v4159_v47 = vrot.slane %v13536_v57, 5  ;;  %v10411_v19 = vrot.slane %v4987_v48, 9  ;;  %v4989_v49 = vld [vmem:[#allocation2 + $0x38] sm:$0xe] }
 0x1d1   : > { %11414 = vmatmul.mubr.msk.bf16.vlgmr.msra.gmra.mxu1 %vm3754_vm15, %v10346_v25  ;;  %11442 = vmatmul.mubr.msk.bf16.gmra.mxu0 %vm3754_vm15, %v11862_v10  ;;  %v10351_v3 = vcombine.low %v13663_v7, %v13667_v35  ;;  %v10428_v42 = vcombine.low %v13676_v13, %v13683_v34  ;;  %v5049_v59 = vrot.slane %v13670_v20, 5  ;;  %v10412_v0 = vrot.slane %v4988_v29, 9  ;;  %v4990_v53 = vld [vmem:[#allocation2 + $0x40] sm:$0xe]  ;;  %v4553_v11 = vld [vmem:[#allocation2 + $0x18] sm:$0xf] }
 0x1d2   : > { %11450 = vmatpush3.bf16.msra.mxu1 %v13496_v16  ;;  %11417 = vmatprep.mubr.msk.bf16.mxu1 %vm3754_vm15, %v10347_v54  ;;  %v13702_v57 = vsel %vm12231_vm7, %v10339_v5, %v4155_v58  ;;  %v5053_v25 = vrot.slane %v13679_v27, 5  ;;  %v4582_v12 = vshrl.u32 %v4549_v23, 16  ;;  %v4585_v44 = vshll.u32 %v4549_v23, 16  ;;  %v11864_v10 = vld [vmem:[#allocation2 + $0x88] ss:$8 sps:$4 sm:$0xff]  }
 0x1d3   : > { %11445 = vmatprep.mubr.msk.bf16.mxu0 %vm3754_vm15, %v11863_v4  ;;  %11451 = vmatprep.subr.bf16.mxu1 %v11865_v32  ;;  %v13715_v16 = vsel %vm12231_vm7, %v10340_v36, %v4159_v47  ;;  %v13719_v60 = vsel %vm12231_vm7, %v10411_v19, %v5049_v59  ;;  %v4591_v6 = vshll.u32 %v13593_v61, 16  ;;  %v4596_v54 = vshrl.u32 %v4551_v33, 16  ;;  %v4555_v48 = vld [vmem:[#allocation2 + $0x20] sm:$0xf]  ;;  %v4561_v34 = vld [vmem:[#allocation2 + $0x38] sm:$0xf] }
 0x1d4   : > { %v13724_v26 = vsel %vm12231_vm7, %v10412_v0, %v5053_v25  ;;  %v4584_v43 = vrot.slane %v4582_v12, 4  ;;  %v4587_v28 = vrot.slane %v4585_v44, 5  ;;  %v4599_v9 = vshll.u32 %v4551_v33, 16  ;;  %v13734_v0 = vld [vmem:[#allocation2 + $0x5c] sm:$0x1] }
 0x1d5   : > { %v10352_v38 = vcombine.low %v13702_v57, %v13715_v16  ;;  %v10429_v31 = vcombine.low %v13719_v60, %v13724_v26  ;;  %v4598_v18 = vrot.slane %v4596_v54, 4  ;;  %v4605_v61 = vshll.u32 %v13597_v39, 16  ;;  %v13746_v44 = vld [vmem:[#allocation2 + $0x64] sm:$0x1]  ;;  %v4992_v54 = vld [vmem:[#allocation2 + $0x60] sm:$0xe] }
 0x1d6   : > { %11452 = vmatpush3.bf16.msra.mxu1 %v11865_v32  ;;  %v4588_v17 = vor.u32 %v4587_v28, %v4584_v43  ;;  %v4601_v21 = vrot.slane %v4599_v9, 5  ;;  %v10413_v29 = vrot.slane %v4989_v49, 9  ;;  %v5057_v5 = vrot.slane %v13693_v2, 5  ;;  %v4557_v49 = vld [vmem:[#allocation2 + $0x28] sm:$0xf] }
 0x1d7   : > { %v4593_v58 = vrot.slane %v4591_v6, 5  ;;  %v10414_v23 = vrot.slane %v4990_v53, 9  ;;  %v5061_v36 = vrot.slane %v13705_v1, 5  ;;  %11489 = vmatprep.subr.bf16.mxu1 %v13710_v51  ;;  %v4610_v47 = vshrl.u32 %v4553_v11, 16  ;;  %v4991_v6 = vld [vmem:[#allocation2 + $0x58] sm:$0xe] }
 0x1d8   : > { %v4589_v19 = vrot.slane %v4588_v17, 4  ;;  %v4602_v33 = vor.u32 %v4601_v21, %v4598_v18  ;;  %v4607_v4 = vrot.slane %v4605_v61, 5  ;;  %v4613_v59 = vshll.u32 %v4553_v11, 16  ;;  %v4559_v28 = vld [vmem:[#allocation2 + $0x30] sm:$0xf] }
 0x1d9   : > { %11418 = vmatmul.mubr.msk.bf16.gmra.mxu1 %vm3754_vm15, %v10348_v45  ;;  %11446 = vmatmul.mubr.msk.bf16.gmra.mxu0 %vm3754_vm15, %v11864_v10  ;;  %v13743_v39 = vsel %vm12231_vm7, %v10414_v23, %v5061_v36  ;;  %v4612_v32 = vrot.slane %v4610_v47, 4  ;;  %v4619_v25 = vshll.u32 %v13614_v14, 16  ;;  %v4624_v12 = vshrl.u32 %v4555_v48, 16  ;;  %v4993_v36 = vld [vmem:[#allocation2 + $0x68] sm:$0xe] }
 0x1da   : > { %11421 = vmatprep.mubr.msk.bf16.mxu1 %vm3754_vm15, %v10349_v40  ;;  %11473 = vmatprep.mubr.msk.bf16.mxu0 %vm3754_vm15, %v10427_v50  ;;  %v4594_v62 = vsel %vm12114_vm4, %v4589_v19, %v4593_v58  ;;  %v4603_v24 = vrot.slane %v4602_v33, 4  ;;  %v13760_v14 = vsel %vm12231_vm7, %v10413_v29, %v5057_v5  ;;  %v4615_v45 = vrot.slane %v4613_v59, 5  ;;  %v13771_v29 = vld [vmem:[#allocation2 + $0x6c] sm:$0x1]  ;;  %v4994_v47 = vld [vmem:[#allocation2 + $0x70] sm:$0xe] }
 0x1db   : > { %v10430_v55 = vcombine.low %v13760_v14, %v13743_v39  ;;  %v4626_v15 = vrot.slane %v4624_v12, 4  ;;  %v4627_v40 = vshll.u32 %v4555_v48, 16  ;;  %v4633_v8 = vshll.u32 %v13631_v37, 16  ;;  %v4563_v35 = vld [vmem:[#allocation2 + $0x40] sm:$0xf] }
 0x1dc   : > { %v4608_v52 = vsel %vm12114_vm4, %v4603_v24, %v4607_v4  ;;  %v4616_v50 = vor.u32 %v4615_v45, %v4612_v32  ;;  %v10415_v53 = vrot.slane %v4991_v6, 9  ;;  %v5065_v43 = vrot.slane %v13734_v0, 5  ;;  %v11871_v32 = vld [vmem:[%s15746_s3 + $0x70] sm:$0xff]   ;;  %v4567_v14 = vld [vmem:[#allocation2 + $0x60] sm:$0xf] }
 0x1dd   : > { %v13768_v9 = vcombine.low %v4594_v62, %v4608_v52  ;;  %v4621_v11 = vrot.slane %v4619_v25, 5  ;;  %v4629_v10 = vrot.slane %v4627_v40, 5  ;;  %v10416_v18 = vrot.slane %v4992_v54, 9  ;;  %v13794_v62 = vld [vmem:[#allocation2 + $0x74] sm:$0x1] }
 0x1de   : > { %v4617_v61 = vrot.slane %v4616_v50, 4  ;;  %v4635_v17 = vrot.slane %v4633_v8, 5  ;;  %v5069_v21 = vrot.slane %v13746_v44, 5  ;;  %v4638_v48 = vshrl.u32 %v4557_v49, 16  ;;  %v13812_v40 = vld [vmem:[#allocation2 + $0x7c] sm:$0x1] }
 0x1df   : > { %v4630_v37 = vor.u32 %v4629_v10, %v4626_v15  ;;  %v13775_v5 = vsel %vm12231_vm7, %v10415_v53, %v5065_v43  ;;  %v4641_v58 = vshll.u32 %v4557_v49, 16  ;;  %v4652_v23 = vshrl.u32 %v4559_v28, 16  ;;  %v4995_v53 = vld [vmem:[#allocation2 + $0x78] sm:$0xe] }
 0x1e0   : > { %v5070_v19 = vsel %vm12231_vm7, %v10416_v18, %v5069_v21  ;;  %v4640_v33 = vrot.slane %v4638_v48, 4  ;;  %v4647_v4 = vshll.u32 %v13670_v20, 16  ;;  %v4655_v59 = vshll.u32 %v4559_v28, 16  ;;  %v13821_v18 = vld [vmem:[#allocation2 + $0x84] sm:$0x1] }
 0x1e1   : > { %11422 = vmatmul.mubr.msk.bf16.gmra.mxu1 %vm3754_vm15, %v10350_v56  ;;  %11474 = vmatmul.mubr.msk.bf16.vlgmr.msra.gmra.mxu0 %vm3754_vm15, %v10428_v42  ;;  %v4622_v25 = vsel %vm12114_vm4, %v4617_v61, %v4621_v11  ;;  %v4631_v12 = vrot.slane %v4630_v37, 4  ;;  %v10431_v20 = vcombine.low %v13775_v5, %v5070_v19  ;;  %v4643_v6 = vrot.slane %v4641_v58, 5  ;;  %v4996_v61 = vld [vmem:[#allocation2 + $0x80] sm:$0xe]  ;;  %v4565_v37 = vld [vmem:[#allocation2 + $0x58] sm:$0xf] }
 0x1e2   : > { %11425 = vmatprep.mubr.msk.bf16.mxu1 %vm3754_vm15, %v10351_v3  ;;  %11477 = vmatprep.mubr.msk.bf16.mxu0 %vm3754_vm15, %v10429_v31  ;;  %v4654_v22 = vrot.slane %v4652_v23, 4  ;;  %v4657_v63 = vrot.slane %v4655_v59, 5  ;;  %v4661_v56 = vshll.u32 %v13679_v27, 16  ;;  %v10417_v13 = vrot.slane %v4993_v36, 9 }
 0x1e3   : > { %v4636_v42 = vsel %vm12114_vm4, %v4631_v12, %v4635_v17  ;;  %v4644_v24 = vor.u32 %v4643_v6, %v4640_v33  ;;  %v5073_v45 = vrot.slane %v13771_v29, 5  ;;  %v10418_v7 = vrot.slane %v4994_v47, 9  ;;  %11510 = vmatpush3.bf16.msra.mxu0 %v13565_v41 }
 0x1e4   : > { %v13809_v3 = vcombine.low %v4622_v25, %v4636_v42  ;;  %v4649_v60 = vrot.slane %v4647_v4, 5  ;;  %v4658_v26 = vor.u32 %v4657_v63, %v4654_v22  ;;  %v5077_v31 = vrot.slane %v13794_v62, 5  ;;  %11511 = vmatprep.subr.bf16.mxu0 %v11871_v32  ;;  %v4997_v25 = vld [vmem:[#allocation2 + $0x88] sm:$0xe]  ;;  %v13848_v63 = vld [vmem:[#allocation2 + $0x94] sm:$0x1] }
 0x1e5   : > { %v4645_v27 = vrot.slane %v4644_v24, 4  ;;  %v4663_v54 = vrot.slane %v4661_v56, 5  ;;  %v4666_v49 = vshrl.u32 %v4561_v34, 16  ;;  %v4669_v15 = vshll.u32 %v4561_v34, 16  ;;  %v4998_v56 = vld [vmem:[#allocation2 + $0x90] sm:$0xe] }
 0x1e6   : > { %v4659_v8 = vrot.slane %v4658_v26, 4  ;;  %v5078_v52 = vsel %vm12231_vm7, %v10418_v7, %v5077_v31  ;;  %v4675_v50 = vshll.u32 %v13693_v2, 16  ;;  %v4680_v41 = vshrl.u32 %v4563_v35, 16  ;;  %v11869_v26 = vld [vmem:[%s15746_s3 + $0x60] sm:$0xff]  }
 0x1e7   : > { %v4650_v43 = vsel %vm12114_vm4, %v4645_v27, %v4649_v60  ;;  %v5074_v28 = vsel %vm12231_vm7, %v10417_v13, %v5073_v45  ;;  %v4668_v11 = vrot.slane %v4666_v49, 4  ;;  %v4671_v10 = vrot.slane %v4669_v15, 5  ;;  %11512 = vmatpush3.bf16.msra.mxu0 %v11871_v32  ;;  %v13842_v32 = vld [vmem:[#allocation2 + $0x8c] sm:$0x1]  ;;  %v4569_v13 = vld [vmem:[#allocation2 + $0x68] sm:$0xf] }
 0x1e8   : > { %v4664_v17 = vsel %vm12114_vm4, %v4659_v8, %v4663_v54  ;;  %v10432_v21 = vcombine.low %v5074_v28, %v5078_v52  ;;  %v4682_v48 = vrot.slane %v4680_v41, 4  ;;  %v4683_v2 = vshll.u32 %v4563_v35, 16  ;;  %v4571_v15 = vld [vmem:[#allocation2 + $0x70] sm:$0xf] }
 0x1e9   : > { %11426 = vmatmul.mubr.msk.bf16.gmra.mxu1 %vm3754_vm15, %v10352_v38  ;;  %11478 = vmatmul.mubr.msk.bf16.gmra.mxu0 %vm3754_vm15, %v10430_v55  ;;  %v4672_v5 = vor.u32 %v4671_v10, %v4668_v11  ;;  %v4677_v58 = vrot.slane %v4675_v50, 5  ;;  %v4689_v23 = vshll.u32 %v13705_v1, 16  ;;  %v10419_v36 = vrot.slane %v4995_v53, 9  ;;  %v5484_v11 = vld [vmem:[#allocation2 + $0x10] sm:$0xf] }
 0x1ea   : > { %11453 = vmatprep.mubr.msk.bf16.mxu1 %vm3754_vm15, %v13768_v9  ;;  %11481 = vmatprep.mubr.msk.bf16.mxu0 %vm3754_vm15, %v10431_v20  ;;  %v4685_v47 = vrot.slane %v4683_v2, 5  ;;  %v5081_v57 = vrot.slane %v13812_v40, 5  ;;  %v10420_v16 = vrot.slane %v4996_v61, 9  ;;  %v5085_v38 = vrot.slane %v13821_v18, 5 }
 0x1eb   : > { %v10391_v19 = vcombine.low %v4650_v43, %v4664_v17  ;;  %v4673_v39 = vrot.slane %v4672_v5, 4  ;;  %v4694_v55 = vshrl.u32 %v4565_v37, 16  ;;  %v4697_v33 = vshll.u32 %v4565_v37, 16 }
 0x1ec   : > { %v4686_v4 = vor.u32 %v4685_v47, %v4682_v48  ;;  %v4691_v59 = vrot.slane %v4689_v23, 5  ;;  %v5082_v1 = vsel %vm12231_vm7, %v10419_v36, %v5081_v57  ;;  %v4703_v9 = vshll.u32 %v13734_v0, 16  ;;  %v5486_v47 = vld [vmem:[#allocation2 + $0x18] sm:$0xf] }
 0x1ed   : > { %v4678_v12 = vsel %vm12114_vm4, %v4673_v39, %v4677_v58  ;;  %v5086_v20 = vsel %vm12231_vm7, %v10420_v16, %v5085_v38  ;;  %v4696_v6 = vrot.slane %v4694_v55, 4  ;;  %v4699_v22 = vrot.slane %v4697_v33, 5  ;;  %v13881_v33 = vld [vmem:[#allocation2 + $0x1c] sm:$0x1] }
 0x1ee   : > { %v4687_v34 = vrot.slane %v4686_v4, 4  ;;  %v4705_v42 = vrot.slane %v4703_v9, 5  ;;  %v4708_v24 = vshrl.u32 %v4567_v14, 16  ;;  %v4711_v45 = vshll.u32 %v4567_v14, 16 }
 0x1ef   : > { %v4700_v0 = vor.u32 %v4699_v22, %v4696_v6  ;;  %v4717_v7 = vshll.u32 %v13746_v44, 16  ;;  %v10421_v35 = vrot.slane %v4997_v25, 9  ;;  %v5089_v60 = vrot.slane %v13842_v32, 5 }
 0x1f0   : > { %v4692_v31 = vsel %vm12114_vm4, %v4687_v34, %v4691_v59  ;;  %v4710_v27 = vrot.slane %v4708_v24, 4  ;;  %v4713_v54 = vrot.slane %v4711_v45, 5  ;;  %v10422_v49 = vrot.slane %v4998_v56, 9  ;;  %v4573_v59 = vld [vmem:[#allocation2 + $0x78] sm:$0xf] }
 0x1f1   : > { %11454 = vmatmul.mubr.msk.bf16.vlgmr.msra.gmra.mxu1 %vm3754_vm15, %v13809_v3  ;;  %11482 = vmatmul.mubr.msk.bf16.gmra.mxu0 %vm3754_vm15, %v10432_v21  ;;  %v10392_v44 = vcombine.low %v4678_v12, %v4692_v31  ;;  %v10433_v8 = vcombine.low %v5082_v1, %v5086_v20  ;;  %v4701_v52 = vrot.slane %v4700_v0, 4  ;;  %v4719_v50 = vrot.slane %v4717_v7, 5 }
 0x1f2   : > { %11490 = vmatpush3.bf16.msra.mxu1 %v13710_v51  ;;  %11457 = vmatprep.mubr.msk.bf16.mxu1 %vm3754_vm15, %v10391_v19  ;;  %v4714_v41 = vor.u32 %v4713_v54, %v4710_v27  ;;  %v5093_v53 = vrot.slane %v13848_v63, 5  ;;  %v4722_v43 = vshrl.u32 %v4569_v13, 16  ;;  %v4725_v28 = vshll.u32 %v4569_v13, 16  ;;  %v13870_v51 = vld [vmem:[%s15746_s3 + $0x88] sm:$0xff]  }
 0x1f3   : > { %11485 = vmatprep.mubr.msk.bf16.mxu0 %vm3754_vm15, %v10433_v8  ;;  %v5090_v3 = vsel %vm12231_vm7, %v10421_v35, %v5089_v60  ;;  %11491 = vmatprep.subr.bf16.mxu1 %v11869_v26  ;;  %v4731_v10 = vshll.u32 %v13771_v29, 16  ;;  %v4736_v61 = vshrl.u32 %v4571_v15, 16  ;;  %v4739_v17 = vshll.u32 %v4571_v15, 16  ;;  %v13876_v29 = vld [vmem:[#allocation2 + $0x14] sm:$0x1] }
 0x1f4   : > { %v4715_v21 = vrot.slane %v4714_v41, 4  ;;  %v5094_v48 = vsel %vm12231_vm7, %v10422_v49, %v5093_v53  ;;  %v4724_v2 = vrot.slane %v4722_v43, 4  ;;  %v4727_v37 = vrot.slane %v4725_v28, 5  ;;  %v5488_v60 = vld [vmem:[#allocation2 + $0x20] sm:$0xf] }
 0x1f5   : > { %v4706_v5 = vsel %vm12114_vm4, %v4701_v52, %v4705_v42  ;;  %v10434_v58 = vcombine.low %v5090_v3, %v5094_v48  ;;  %v4738_v23 = vrot.slane %v4736_v61, 4  ;;  %v4741_v36 = vrot.slane %v4739_v17, 5  ;;  %v4575_v42 = vld [vmem:[#allocation2 + $0x80] sm:$0xf]  ;;  %v13894_v52 = vld [vmem:[#allocation2 + $0x24] sm:$0x1] }
 0x1f6   : > { %v4720_v57 = vsel %vm12114_vm4, %v4715_v21, %v4719_v50  ;;  %v4728_v16 = vor.u32 %v4727_v37, %v4724_v2  ;;  %v4745_v38 = vshll.u32 %v13794_v62, 16  ;;  %11492 = vmatpush3.bf16.msra.mxu1 %v11869_v26  ;;  %v5517_v19 = vshrl.u32 %v5484_v11, 16  ;;  %v5490_v43 = vld [vmem:[#allocation2 + $0x28] sm:$0xf]  ;;  %v13899_v21 = vld [vmem:[#allocation2 + $0x2c] sm:$0x1] }
 0x1f7   : > { %v10393_v39 = vcombine.low %v4706_v5, %v4720_v57  ;;  %v4733_v14 = vrot.slane %v4731_v10, 5  ;;  %v4742_v55 = vor.u32 %v4741_v36, %v4738_v23  ;;  %v5520_v4 = vshll.u32 %v5484_v11, 16  ;;  %11529 = vmatprep.subr.bf16.mxu1 %v13870_v51  ;;  %v4577_v23 = vld [vmem:[#allocation2 + $0x88] sm:$0xf] }
 0x1f8   : > { %v4729_v1 = vrot.slane %v4728_v16, 4  ;;  %v5519_v9 = vrot.slane %v5517_v19, 4  ;;  %v5526_v25 = vshll.u32 %v13876_v29, 16  ;;  %v5531_v12 = vshrl.u32 %v5486_v47, 16 }
 0x1f9   : > { %11458 = vmatmul.mubr.msk.bf16.gmra.mxu1 %vm3754_vm15, %v10392_v44  ;;  %11486 = vmatmul.mubr.msk.bf16.gmra.mxu0 %vm3754_vm15, %v10434_v58  ;;  %v4743_v62 = vrot.slane %v4742_v55, 4  ;;  %v4747_v20 = vrot.slane %v4745_v38, 5  ;;  %v5522_v6 = vrot.slane %v5520_v4, 5  ;;  %v5534_v22 = vshll.u32 %v5486_v47, 16  ;;  %v4579_v38 = vld [vmem:[#allocation2 + $0x90] sm:$0xf] }
 0x1fa   : > { %11461 = vmatprep.mubr.msk.bf16.mxu1 %vm3754_vm15, %v10393_v39  ;;  %v4734_v56 = vsel %vm12114_vm4, %v4729_v1, %v4733_v14  ;;  %v5533_v13 = vrot.slane %v5531_v12, 4  ;;  %v5540_v34 = vshll.u32 %v13881_v33, 16  ;;  %v4750_v24 = vshrl.u32 %v4573_v59, 16 }
 0x1fb   : > { %v4748_v45 = vsel %vm12114_vm4, %v4743_v62, %v4747_v20  ;;  %v5523_v0 = vor.u32 %v5522_v6, %v5519_v9  ;;  %v5536_v7 = vrot.slane %v5534_v22, 5  ;;  %v4753_v35 = vshll.u32 %v4573_v59, 16 }
 0x1fc   : > { %v10394_v26 = vcombine.low %v4734_v56, %v4748_v45  ;;  %v5528_v31 = vrot.slane %v5526_v25, 5  ;;  %v4752_v27 = vrot.slane %v4750_v24, 4  ;;  %v4759_v54 = vshll.u32 %v13812_v40, 16 }
 0x1fd   : > { %v5524_v49 = vrot.slane %v5523_v0, 4  ;;  %v5537_v15 = vor.u32 %v5536_v7, %v5533_v13  ;;  %v4755_v44 = vrot.slane %v4753_v35, 5  ;;  %v4764_v8 = vshrl.u32 %v4575_v42, 16  ;;  %v5494_v35 = vld [vmem:[#allocation2 + $0x38] sm:$0xf] }
 0x1fe   : > { %v5542_v50 = vrot.slane %v5540_v34, 5  ;;  %v4767_v41 = vshll.u32 %v4575_v42, 16  ;;  %v4773_v53 = vshll.u32 %v13821_v18, 16  ;;  %v5545_v28 = vshrl.u32 %v5488_v60, 16  ;;  %v5492_v34 = vld [vmem:[#allocation2 + $0x30] sm:$0xf] }
 0x1ff   : > { %v5529_v11 = vsel %vm12114_vm4, %v5524_v49, %v5528_v31  ;;  %v5538_v3 = vrot.slane %v5537_v15, 4  ;;  %v4756_v10 = vor.u32 %v4755_v44, %v4752_v27  ;;  %v4766_v61 = vrot.slane %v4764_v8, 4  ;;  %v13912_v42 = vld [vmem:[#allocation2 + $0x34] sm:$0x1] }
 0x200   : > { %v4761_v17 = vrot.slane %v4759_v54, 5  ;;  %v4769_v40 = vrot.slane %v4767_v41, 5  ;;  %v5547_v48 = vrot.slane %v5545_v28, 4  ;;  %v5548_v2 = vshll.u32 %v5488_v60, 16  ;;  %v13921_v41 = vld [vmem:[#allocation2 + $0x3c] sm:$0x1] }
 0x201   : > { %11462 = vmatmul.mubr.msk.bf16.gmra.mxu1 %vm3754_vm15, %v10394_v26  ;;  %v5543_v37 = vsel %vm12114_vm4, %v5538_v3, %v5542_v50  ;;  %v4757_v18 = vrot.slane %v4756_v10, 4  ;;  %v5554_v5 = vshll.u32 %v13894_v52, 16  ;;  %v5559_v58 = vshrl.u32 %v5490_v43, 16  ;;  %v13923_v10 = vld [vmem:[#allocation2 + $0x44] sm:$0x1] }
 0x202   : > { %v10471_v36 = vcombine.low %v5529_v11, %v5543_v37  ;;  %v4770_v47 = vor.u32 %v4769_v40, %v4766_v61  ;;  %v5550_v57 = vrot.slane %v5548_v2, 5  ;;  %v5562_v16 = vshll.u32 %v5490_v43, 16  ;;  %v5496_v43 = vld [vmem:[#allocation2 + $0x40] sm:$0xf]  ;;  %v5498_v2 = vld [vmem:[#allocation2 + $0x48] sm:$0xf] }
 0x203   : > { %v4762_v19 = vsel %vm12114_vm4, %v4757_v18, %v4761_v17  ;;  %v4775_v39 = vrot.slane %v4773_v53, 5  ;;  %v5561_v14 = vrot.slane %v5559_v58, 4  ;;  %v5568_v55 = vshll.u32 %v13899_v21, 16 }
 0x204   : > { %11513 = vmatprep.mubr.msk.bf16.mxu0 %vm3754_vm15, %v10471_v36  ;;  %v4771_v4 = vrot.slane %v4770_v47, 4  ;;  %v5551_v59 = vor.u32 %v5550_v57, %v5547_v48  ;;  %v5564_v1 = vrot.slane %v5562_v16, 5  ;;  %v4778_v9 = vshrl.u32 %v4577_v23, 16 }
 0x205   : > { %v5556_v25 = vrot.slane %v5554_v5, 5  ;;  %v4781_v12 = vshll.u32 %v4577_v23, 16  ;;  %v4787_v62 = vshll.u32 %v13842_v32, 16  ;;  %v4792_v20 = vshrl.u32 %v4579_v38, 16 }
 0x206   : > { %v4776_v6 = vsel %vm12114_vm4, %v4771_v4, %v4775_v39  ;;  %v5552_v22 = vrot.slane %v5551_v59, 4  ;;  %v5565_v56 = vor.u32 %v5564_v1, %v5561_v14  ;;  %v4780_v13 = vrot.slane %v4778_v9, 4  ;;  %v5500_v14 = vld [vmem:[#allocation2 + $0x60] sm:$0xf]  ;;  %v5502_v9 = vld [vmem:[#allocation2 + $0x68] sm:$0xf] }
 0x207   : > { %v10395_v24 = vcombine.low %v4762_v19, %v4776_v6  ;;  %v5570_v45 = vrot.slane %v5568_v55, 5  ;;  %v4783_v0 = vrot.slane %v4781_v12, 5  ;;  %v4789_v7 = vrot.slane %v4787_v62, 5  ;;  %v13934_v62 = vld [vmem:[#allocation2 + $0x4c] sm:$0x1] }
 0x208   : > { %v5566_v60 = vrot.slane %v5565_v56, 4  ;;  %v4794_v26 = vrot.slane %v4792_v20, 4  ;;  %v4795_v31 = vshll.u32 %v4579_v38, 16  ;;  %v4801_v32 = vshll.u32 %v13848_v63, 16 }
 0x209   : > { %11465 = vmatprep.mubr.msk.bf16.mxu1 %vm3754_vm15, %v10395_v24  ;;  %v4784_v27 = vor.u32 %v4783_v0, %v4780_v13  ;;  %v5573_v54 = vshrl.u32 %v5492_v34, 16  ;;  %v5576_v49 = vshll.u32 %v5492_v34, 16  ;;  %v5582_v15 = vshll.u32 %v13912_v42, 16  ;;  %v11872_v13 = vld [vmem:[#allocation2 + $0x10] ss:$8 sps:$4 sm:$0xff]  }
 0x20a   : > { %v5557_v44 = vsel %vm12114_vm4, %v5552_v22, %v5556_v25  ;;  %v5571_v8 = vsel %vm12114_vm4, %v5566_v60, %v5570_v45  ;;  %v4797_v50 = vrot.slane %v4795_v31, 5  ;;  %v5587_v53 = vshrl.u32 %v5494_v35, 16  ;;  %v13936_v22 = vld [vmem:[#allocation2 + $0x64] sm:$0x1] }
 0x20b   : > { %v10472_v28 = vcombine.low %v5557_v44, %v5571_v8  ;;  %v4785_v63 = vrot.slane %v4784_v27, 4  ;;  %v5575_v11 = vrot.slane %v5573_v54, 4  ;;  %v5578_v3 = vrot.slane %v5576_v49, 5  ;;  %v5504_v49 = vld [vmem:[#allocation2 + $0x70] sm:$0xf] }
 0x20c   : > { %v4798_v61 = vor.u32 %v4797_v50, %v4794_v26  ;;  %v4803_v17 = vrot.slane %v4801_v32, 5  ;;  %v5589_v40 = vrot.slane %v5587_v53, 4  ;;  %v5590_v48 = vshll.u32 %v5494_v35, 16  ;;  %v13940_v35 = vld [vmem:[#allocation2 + $0x6c] sm:$0x1] }
 0x20d   : > { %11514 = vmatmul.mubr.msk.bf16.vlgmr.msra.gmra.mxu0 %vm3754_vm15, %v10472_v28  ;;  %v5579_v37 = vor.u32 %v5578_v3, %v5575_v11  ;;  %v5584_v18 = vrot.slane %v5582_v15, 5  ;;  %v5596_v5 = vshll.u32 %v13921_v41, 16  ;;  %v5601_v58 = vshrl.u32 %v5496_v43, 16  ;;  %v5506_v53 = vld [vmem:[#allocation2 + $0x78] sm:$0xf] }
 0x20e   : > { %v4790_v23 = vsel %vm12114_vm4, %v4785_v63, %v4789_v7  ;;  %v4799_v36 = vrot.slane %v4798_v61, 4  ;;  %v5592_v47 = vrot.slane %v5590_v48, 5  ;;  %v5604_v57 = vshll.u32 %v5496_v43, 16  ;;  %v11874_v61 = vld [vmem:[#allocation2 + $0x20] ss:$8 sps:$4 sm:$0xff]  }
 0x20f   : > { %v5580_v16 = vrot.slane %v5579_v37, 4  ;;  %v5603_v38 = vrot.slane %v5601_v58, 4  ;;  %v5610_v19 = vshll.u32 %v13923_v10, 16  ;;  %v5615_v39 = vshrl.u32 %v5498_v2, 16 }
 0x210   : > { %v4804_v55 = vsel %vm12114_vm4, %v4799_v36, %v4803_v17  ;;  %v5593_v4 = vor.u32 %v5592_v47, %v5589_v40  ;;  %v5598_v59 = vrot.slane %v5596_v5, 5  ;;  %v5606_v1 = vrot.slane %v5604_v57, 5  ;;  %v13950_v40 = vld [vmem:[#allocation2 + $0x74] sm:$0x1]  ;;  %v13952_v5 = vld [vmem:[#allocation2 + $0x7c] sm:$0x1] }
 0x211   : > { %v10396_v25 = vcombine.low %v4790_v23, %v4804_v55  ;;  %v5585_v12 = vsel %vm12114_vm4, %v5580_v16, %v5584_v18  ;;  %v5617_v20 = vrot.slane %v5615_v39, 4  ;;  %v5618_v6 = vshll.u32 %v5498_v2, 16  ;;  %v5508_v16 = vld [vmem:[#allocation2 + $0x80] sm:$0xf] }
 0x212   : > { %v5594_v56 = vrot.slane %v5593_v4, 4  ;;  %v5607_v34 = vor.u32 %v5606_v1, %v5603_v38  ;;  %v5624_v24 = vshll.u32 %v13934_v62, 16  ;;  %v5629_v45 = vshrl.u32 %v5500_v14, 16  ;;  %v11878_v38 = vld [vmem:[%s15746_s3 + $0x80] sm:$0xff]   ;;  %v11875_v1 = vld [vmem:[#allocation2 + $0x30] ss:$8 sps:$4 sm:$0xff]  }
 0x213   : > { %11466 = vmatmul.mubr.msk.bf16.gmra.mxu1 %vm3754_vm15, %v10396_v25  ;;  %v5612_v0 = vrot.slane %v5610_v19, 5  ;;  %v5620_v7 = vrot.slane %v5618_v6, 5  ;;  %v5632_v60 = vshll.u32 %v5500_v14, 16  ;;  %v5643_v26 = vshrl.u32 %v5502_v9, 16  ;;  %v13960_v4 = vld [vmem:[#allocation2 + $0x84] sm:$0x1] }
 0x214   : > { %v5599_v31 = vsel %vm12114_vm4, %v5594_v56, %v5598_v59  ;;  %11493 = vmatprep.mubr.msk.bf16.mxu1 %vm3754_vm15, %v11872_v13  ;;  %v5608_v32 = vrot.slane %v5607_v34, 4  ;;  %v5631_v27 = vrot.slane %v5629_v45, 4  ;;  %v5638_v54 = vshll.u32 %v13936_v22, 16  ;;  %v5510_v59 = vld [vmem:[#allocation2 + $0x88] sm:$0xf] }
 0x215   : > { %v10473_v15 = vcombine.low %v5585_v12, %v5599_v31  ;;  %v5621_v44 = vor.u32 %v5620_v7, %v5617_v20  ;;  %v5626_v8 = vrot.slane %v5624_v24, 5  ;;  %v5634_v50 = vrot.slane %v5632_v60, 5  ;;  %v5512_v7 = vld [vmem:[#allocation2 + $0x90] sm:$0xf] }
 0x216   : > { %v5613_v43 = vsel %vm12114_vm4, %v5608_v32, %v5612_v0  ;;  %v5645_v28 = vrot.slane %v5643_v26, 4  ;;  %v5646_v63 = vshll.u32 %v5502_v9, 16  ;;  %v5652_v11 = vshll.u32 %v13940_v35, 16 }
 0x217   : > { %11517 = vmatprep.mubr.msk.bf16.mxu0 %vm3754_vm15, %v10473_v15  ;;  %v5622_v3 = vrot.slane %v5621_v44, 4  ;;  %v5635_v17 = vor.u32 %v5634_v50, %v5631_v27  ;;  %v5657_v48 = vshrl.u32 %v5504_v49, 16  ;;  %v5660_v2 = vshll.u32 %v5504_v49, 16  ;;  %v5514_v27 = vld [vmem:[#allocation2 + $0x98] sm:$0xf] }
 0x218   : > { %v5640_v37 = vrot.slane %v5638_v54, 5  ;;  %v5648_v18 = vrot.slane %v5646_v63, 5  ;;  %v5671_v58 = vshrl.u32 %v5506_v53, 16  ;;  %v5654_v14 = vrot.slane %v5652_v11, 5  ;;  %v13972_v44 = vld [vmem:[#allocation2 + $0x8c] sm:$0x1] }
 0x219   : > { %v5627_v23 = vsel %vm12114_vm4, %v5622_v3, %v5626_v8  ;;  %v5636_v36 = vrot.slane %v5635_v17, 4  ;;  %v5659_v47 = vrot.slane %v5657_v48, 4  ;;  %v5662_v57 = vrot.slane %v5660_v2, 5  ;;  %v11876_v11 = vld [vmem:[#allocation2 + $0x40] ss:$8 sps:$4 sm:$0xff]  }
 0x21a   : > { %v10474_v19 = vcombine.low %v5613_v43, %v5627_v23  ;;  %v5649_v39 = vor.u32 %v5648_v18, %v5645_v28  ;;  %v5666_v55 = vshll.u32 %v13950_v40, 16  ;;  %v5673_v25 = vrot.slane %v5671_v58, 4  ;;  %v13974_v43 = vld [vmem:[#allocation2 + $0x94] sm:$0x1]  ;;  %v11877_v18 = vld [vmem:[#allocation2 + $0x60] ss:$8 sps:$4 sm:$0xff]  }
 0x21b   : > { %11494 = vmatmul.mubr.msk.bf16.vlgmr.msra.gmra.mxu1 %vm3754_vm15, %v11874_v61  ;;  %v5663_v9 = vor.u32 %v5662_v57, %v5659_v47  ;;  %v5674_v12 = vshll.u32 %v5506_v53, 16  ;;  %v5680_v20 = vshll.u32 %v13952_v5, 16  ;;  %v5641_v6 = vsel %vm12114_vm4, %v5636_v36, %v5640_v37 }
 0x21c   : > { %11518 = vmatmul.mubr.msk.bf16.gmra.mxu0 %vm3754_vm15, %v10474_v19  ;;  %v5650_v56 = vrot.slane %v5649_v39, 4  ;;  %11530 = vmatpush3.bf16.msra.mxu1 %v13870_v51  ;;  %v5685_v13 = vshrl.u32 %v5508_v16, 16  ;;  %v5688_v34 = vshll.u32 %v5508_v16, 16  ;;  %v5694_v45 = vshll.u32 %v13960_v4, 16  ;;  %v13985_v19 = vld [vmem:[#allocation2 + $0x9c] sm:$0x1] }
 0x21d   : > { %11497 = vmatprep.mubr.msk.bf16.mxu1 %vm3754_vm15, %v11875_v1  ;;  %v5676_v24 = vrot.slane %v5674_v12, 5  ;;  %v5699_v0 = vshrl.u32 %v5510_v59, 16  ;;  %11531 = vmatprep.subr.bf16.mxu1 %v11878_v38  ;;  %v5668_v26 = vrot.slane %v5666_v55, 5  ;;  %v5664_v49 = vrot.slane %v5663_v9, 4 }
 0x21e   : > { %v5655_v60 = vsel %vm12114_vm4, %v5650_v56, %v5654_v14  ;;  %v5687_v31 = vrot.slane %v5685_v13, 4  ;;  %v5690_v32 = vrot.slane %v5688_v34, 5  ;;  %v5682_v15 = vrot.slane %v5680_v20, 5 }
 0x21f   : > { %v10475_v54 = vcombine.low %v5641_v6, %v5655_v60  ;;  %v5677_v51 = vor.u32 %v5676_v24, %v5673_v25  ;;  %v5701_v50 = vrot.slane %v5699_v0, 4  ;;  %v5702_v53 = vshll.u32 %v5510_v59, 16  ;;  %v5918_v24 = vld [vmem:[#allocation2 + $0x10] sm:$0xe] }
 0x220   : > { %v5691_v8 = vor.u32 %v5690_v32, %v5687_v31  ;;  %v5713_v28 = vshrl.u32 %v5512_v7, 16  ;;  %11532 = vmatpush3.bf16.msra.mxu1 %v11878_v38  ;;  %v5696_v3 = vrot.slane %v5694_v45, 5  ;;  %v5716_v61 = vshll.u32 %v5512_v7, 16  ;;  %v11879_v0 = vld [vmem:[#allocation2 + $0x70] ss:$8 sps:$4 sm:$0xff]  }
 0x221   : > { %11521 = vmatprep.mubr.msk.bf16.mxu0 %vm3754_vm15, %v10475_v54  ;;  %v5678_v63 = vrot.slane %v5677_v51, 4  ;;  %v5727_v17 = vshrl.u32 %v5514_v27, 16  ;;  %v5704_v2 = vrot.slane %v5702_v53, 5  ;;  %v5708_v37 = vshll.u32 %v13972_v44, 16  ;;  %v5919_v31 = vld [vmem:[#allocation2 + $0x18] sm:$0xe] }
 0x222   : > { %v5692_v48 = vrot.slane %v5691_v8, 4  ;;  %v5715_v58 = vrot.slane %v5713_v28, 4  ;;  %v5669_v23 = vsel %vm12114_vm4, %v5664_v49, %v5668_v26  ;;  %v5718_v47 = vrot.slane %v5716_v61, 5  ;;  %v11880_v26 = vld [vmem:[#allocation2 + $0x80] ss:$8 sps:$4 sm:$0xff]  }
 0x223   : > { %v5683_v36 = vsel %vm12114_vm4, %v5678_v63, %v5682_v15  ;;  %11498 = vmatmul.mubr.msk.bf16.gmra.mxu1 %vm3754_vm15, %v11876_v11  ;;  %v5722_v57 = vshll.u32 %v13974_v43, 16  ;;  %v5705_v38 = vor.u32 %v5704_v2, %v5701_v50  ;;  %v5729_v39 = vrot.slane %v5727_v17, 4  ;;  %v5921_v50 = vld [vmem:[#allocation2 + $0x28] sm:$0xe]  ;;  %v5922_v53 = vld [vmem:[#allocation2 + $0x30] sm:$0xe] }
 0x224   : > { %v10476_v16 = vcombine.low %v5669_v23, %v5683_v36  ;;  %11501 = vmatprep.mubr.msk.bf16.mxu1 %vm3754_vm15, %v11877_v18  ;;  %v5730_v14 = vshll.u32 %v5514_v27, 16  ;;  %v5719_v55 = vor.u32 %v5718_v47, %v5715_v58  ;;  %v5736_v59 = vshll.u32 %v13985_v19, 16  ;;  %v11881_v28 = vld [vmem:[#allocation2 + $0x90] ss:$8 sps:$4 sm:$0xff]   ;;  %v5920_v63 = vld [vmem:[#allocation2 + $0x20] sm:$0xe] }
 0x225   : > { %v5697_v1 = vsel %vm12114_vm4, %v5692_v48, %v5696_v3  ;;  %v5706_v9 = vrot.slane %v5705_v38, 4  ;;  %v5710_v25 = vrot.slane %v5708_v37, 5  ;;  %v5724_v56 = vrot.slane %v5722_v57, 5  ;;  %v5923_v17 = vld [vmem:[#allocation2 + $0x38] sm:$0xe] }
 0x226   : > { %11522 = vmatmul.mubr.msk.bf16.gmra.mxu0 %vm3754_vm15, %v10476_v16  ;;  %v5732_v12 = vrot.slane %v5730_v14, 5  ;;  %v5720_v20 = vrot.slane %v5719_v55, 4  ;;  %v5738_v34 = vrot.slane %v5736_v59, 5  ;;  %v10489_v32 = vrot.slane %v5918_v24, 9  ;;  %v5924_v36 = vld [vmem:[#allocation2 + $0x40] sm:$0xe] }
 0x227   : > { %v5711_v6 = vsel %vm12114_vm4, %v5706_v9, %v5710_v25  ;;  %v5968_v27 = vrot.slane %v13876_v29, 5  ;;  %v10490_v51 = vrot.slane %v5919_v31, 9  ;;  %v5972_v15 = vrot.slane %v13881_v33, 5  ;;  %v5925_v47 = vld [vmem:[#allocation2 + $0x48] sm:$0xe] }
 0x228   : > { %v5733_v13 = vor.u32 %v5732_v12, %v5729_v39  ;;  %v10477_v45 = vcombine.low %v5697_v1, %v5711_v6  ;;  %v5725_v7 = vsel %vm12114_vm4, %v5720_v20, %v5724_v56  ;;  %v10492_v3 = vrot.slane %v5921_v50, 9  ;;  %v5927_v59 = vld [vmem:[#allocation2 + $0x68] sm:$0xe]  ;;  %v5929_v6 = vld [vmem:[#allocation2 + $0x78] sm:$0xe] }
 0x229   : > { %v5969_v8 = vsel %vm12231_vm7, %v10489_v32, %v5968_v27  ;;  %v5973_v29 = vsel %vm12231_vm7, %v10490_v51, %v5972_v15  ;;  %v5980_v61 = vrot.slane %v13899_v21, 5  ;;  %v10493_v33 = vrot.slane %v5922_v53, 9  ;;  %v5930_v56 = vld [vmem:[#allocation2 + $0x80] sm:$0xe]  ;;  %v5933_v51 = vld [vmem:[#allocation2 + $0x98] sm:$0xe] }
 0x22a   : > { %v5734_v60 = vrot.slane %v5733_v13, 4  ;;  %11525 = vmatprep.mubr.msk.bf16.mxu0 %vm3754_vm15, %v10477_v45  ;;  %v10509_v11 = vcombine.low %v5969_v8, %v5973_v29  ;;  %v5984_v48 = vrot.slane %v13912_v42, 5  ;;  %v10491_v2 = vrot.slane %v5920_v63, 9  ;;  %v5926_v42 = vld [vmem:[#allocation2 + $0x60] sm:$0xe] }
 0x22b   : > { %11502 = vmatmul.mubr.msk.bf16.gmra.mxu1 %vm3754_vm15, %v11879_v0  ;;  %v5976_v37 = vrot.slane %v13894_v52, 5  ;;  %v10494_v18 = vrot.slane %v5923_v17, 9  ;;  %v5988_v58 = vrot.slane %v13921_v41, 5  ;;  %v5981_v23 = vsel %vm12231_vm7, %v10492_v3, %v5980_v61  ;;  %v5931_v0 = vld [vmem:[#allocation2 + $0x88] sm:$0xe] }
 0x22c   : > { %v5739_v54 = vsel %vm12114_vm4, %v5734_v60, %v5738_v34  ;;  %11505 = vmatprep.mubr.msk.bf16.mxu1 %vm3754_vm15, %v11880_v26  ;;  %v5985_v21 = vsel %vm12231_vm7, %v10493_v33, %v5984_v48  ;;  %v10495_v52 = vrot.slane %v5924_v36, 9  ;;  %v5992_v41 = vrot.slane %v13923_v10, 5  ;;  %v5928_v34 = vld [vmem:[#allocation2 + $0x70] sm:$0xe] }
 0x22d   : > { %v10478_v49 = vcombine.low %v5725_v7, %v5739_v54  ;;  %v5977_v57 = vsel %vm12231_vm7, %v10491_v2, %v5976_v37  ;;  %v5989_v38 = vsel %vm12231_vm7, %v10494_v18, %v5988_v58  ;;  %v10496_v14 = vrot.slane %v5925_v47, 9 }
 0x22e   : > { %v10510_v16 = vcombine.low %v5977_v57, %v5981_v23  ;;  %v10511_v39 = vcombine.low %v5985_v21, %v5989_v38  ;;  %v5996_v55 = vrot.slane %v13934_v62, 5  ;;  %v10497_v1 = vrot.slane %v5926_v42, 9 }
 0x22f   : > { %11526 = vmatmul.mubr.msk.bf16.gmra.mxu0 %vm3754_vm15, %v10478_v49  ;;  %v6000_v9 = vrot.slane %v13936_v22, 5  ;;  %v10498_v25 = vrot.slane %v5927_v59, 9  ;;  %v6004_v12 = vrot.slane %v13940_v35, 5  ;;  %v5993_v20 = vsel %vm12231_vm7, %v10495_v52, %v5992_v41  ;;  %v5932_v49 = vld [vmem:[#allocation2 + $0x90] sm:$0xe] }
 0x230   : > { %v5997_v10 = vsel %vm12231_vm7, %v10496_v14, %v5996_v55  ;;  %v10500_v45 = vrot.slane %v5929_v6, 9  ;;  %v6012_v35 = vrot.slane %v13952_v5, 5  ;;  %v10501_v7 = vrot.slane %v5930_v56, 9 }
 0x231   : > { %v6001_v62 = vsel %vm12231_vm7, %v10497_v1, %v6000_v9  ;;  %v10512_v13 = vcombine.low %v5993_v20, %v5997_v10  ;;  %v6005_v22 = vsel %vm12231_vm7, %v10498_v25, %v6004_v12  ;;  %v6016_v60 = vrot.slane %v13960_v4, 5  ;;  %v6275_v10 = vld [vmem:[#allocation3 + $0x18] sm:$0x1] }
 0x232   : > { %v10513_v24 = vcombine.low %v6001_v62, %v6005_v22  ;;  %v10499_v26 = vrot.slane %v5928_v34, 9  ;;  %v6008_v31 = vrot.slane %v13950_v40, 5  ;;  %v10502_v32 = vrot.slane %v5931_v0, 9  ;;  %v6324_v62 = vld [vmem:[#allocation3 + $0x1c] sm:$0x1] }
 0x233   : > { %11506 = vmatmul.mubr.msk.bf16.gmra.mxu1 %vm3754_vm15, %v11881_v28  ;;  %v6020_v27 = vrot.slane %v13972_v44, 5  ;;  %v6013_v54 = vsel %vm12231_vm7, %v10500_v45, %v6012_v35  ;;  %v6017_v5 = vsel %vm12231_vm7, %v10501_v7, %v6016_v60  ;;  %v10503_v50 = vrot.slane %v5932_v49, 9  ;;  %v11894_v45 = vld [vmem:[%s15748_s5 + $0x58] sm:$0xff]  }
 0x234   : > { %11533 = vmatprep.mubr.msk.bf16.mxu1 %vm3754_vm15, %v10509_v11  ;;  %v6009_v15 = vsel %vm12231_vm7, %v10499_v26, %v6008_v31  ;;  %v6024_v53 = vrot.slane %v13974_v43, 5  ;;  %v10504_v44 = vrot.slane %v5933_v51, 9  ;;  %v6028_v28 = vrot.slane %v13985_v19, 5 }
 0x235   : > { %v10514_v4 = vcombine.low %v6009_v15, %v6013_v54  ;;  %v6021_v8 = vsel %vm12231_vm7, %v10502_v32, %v6020_v27  ;;  %v15850_v22 = vmov 0   ;;  %v6325_v7 = vsel %vm14112_vm3, 0, %v6324_v62 }
 0x236   : > { %v10515_v40 = vcombine.low %v6017_v5, %v6021_v8  ;;  %v6025_v29 = vsel %vm12231_vm7, %v10503_v50, %v6024_v53  ;;  %v6029_v63 = vsel %vm12231_vm7, %v10504_v44, %v6028_v28  ;;  %6256 = vst.msk [vmem:[#allocation3] sm:$0xf] %vm6255_vm0, %v15850_v22  ;;  %6259 = vst.msk [vmem:[#allocation3 + $0x50] sm:$0xf] %vm6255_vm0, %v15850_v22  ;;  %v6269_v8 = vld [vmem:[#allocation3 + $0x8] sm:$0x1] }
 0x237   : > { %v10516_v11 = vcombine.low %v6025_v29, %v6029_v63  ;;  %6258 = vst.msk [vmem:[#allocation3 + $0x4] sm:$0x1] %vm6257_vm1, %v15850_v22  ;;  %6260 = vst.msk [vmem:[#allocation3 + $0x54] sm:$0x1] %vm6257_vm1, %v15850_v22  ;;  %v6318_v50 = vld [vmem:[#allocation3 + $0xc] sm:$0x1] }
 0x238   : > { %6262 = vst.msk [vmem:[#allocation3 + $0x48] sm:$0xf] %vm6255_vm0, %v15850_v22  ;;  %6264 = vst.msk [vmem:[#allocation3 + $0x98] sm:$0xf] %vm6255_vm0, %v15850_v22  ;;  %v6270_v53 = vsel %vm14086_vm2, 0, %v6269_v8  ;;  %v6319_v44 = vsel %vm14112_vm3, 0, %v6318_v50 }
 0x239   : > { %6263 = vst.msk [vmem:[#allocation3 + $0x4c] sm:$0x1] %vm6257_vm1, %v15850_v22  ;;  %6265 = vst.msk [vmem:[#allocation3 + $0x9c] sm:$0x1] %vm6257_vm1, %v15850_v22  ;;  %v6278_v63 = vld [vmem:[#allocation3 + $0x20] sm:$0x1] }
 0x23a   : > { %6326 = vst [vmem:[#allocation3 + $0x1c] sm:$0x1] %v6325_v7  ;;  %6271 = vst [vmem:[#allocation3 + $0x8] sm:$0x1] %v6270_v53  ;;  %v6281_v22 = vld [vmem:[#allocation3 + $0x28] sm:$0x1] }
 0x23b   : > { %11534 = vmatmul.mubr.msk.bf16.vlgmr.msra.gmra.mxu1 %vm3754_vm15, %v10510_v16  ;;  %6320 = vst [vmem:[#allocation3 + $0xc] sm:$0x1] %v6319_v44  ;;  %v6282_v7 = vsel %vm14086_vm2, 0, %v6281_v22  ;;  %v6339_v8 = vld [vmem:[#allocation3 + $0x44] sm:$0x1]  ;;  %v11884_v22 = vld [vmem:[%s15748_s5 + $0x18] sm:$0xff]  }
 0x23c   : > { %11537 = vmatprep.mubr.msk.bf16.mxu1 %vm3754_vm15, %v10511_v39  ;;  %6283 = vst [vmem:[#allocation3 + $0x28] sm:$0x1] %v6282_v7  ;;  %v6340_v50 = vsel %vm14112_vm3, 0, %v6339_v8  ;;  %11573 = vmatprep.subr.bf16.mxu1 %v11884_v22 }
 0x23d   : > { %6341 = vst [vmem:[#allocation3 + $0x44] sm:$0x1] %v6340_v50  ;;  %11574 = vmatpush3.bf16.msra.mxu1 %v11884_v22  ;;  %v6311_v22 = vld [vmem:[#allocation3 + $0x88] sm:$0x1] }
 0x243   : > { %11538 = vmatmul.mubr.msk.bf16.gmra.mxu1 %vm3754_vm15, %v10512_v13  ;;  %v15847_v13 = vmov 0 }
 0x244   : > { %11541 = vmatprep.mubr.msk.bf16.mxu1 %vm3754_vm15, %v10513_v24  ;;  %v15848_v13 = vsel %vm14086_vm2, 4294967295, %v15847_v13  ;;  %v6276_v24 = vsel %vm14086_vm2, 0, %v6275_v10 }
 0x245   : > { %15849 = vst [vmem:[#allocation16_spill] sm:$0xff] %v15848_v13  ;;  %6277 = vst [vmem:[#allocation3 + $0x18] sm:$0x1] %v6276_v24  ;;  %v6330_v24 = vld [vmem:[#allocation3 + $0x2c] sm:$0x1] }
 0x24b   : > { %11542 = vmatmul.mubr.msk.bf16.gmra.mxu1 %vm3754_vm15, %v10514_v4 }
 0x24c   : > { %11545 = vmatprep.mubr.msk.bf16.mxu1 %vm3754_vm15, %v10515_v40 }
 0x253   : > { %11546 = vmatmul.mubr.msk.bf16.gmra.mxu1 %vm3754_vm15, %v10516_v11  ;;  %v6327_v11 = vld [vmem:[#allocation3 + $0x24] sm:$0x1] }
 0x25b   : > { %v11395_v3 = vpop.f32.mrf.mxu0 }
 0x25d   : > { %v3986_v61 = vpop.f32.mrf.mxu0 }
 0x25f   : > { %v11396_v17 = vpop.f32.mrf.mxu0 }
 0x261   : > { %v14058_v43 = vpop.f32.mrf.mxu0 }
 0x263   : > { %v11399_v33 = vpop.f32.mrf.mxu0 }
 0x265   : > { %v4002_v19 = vpop.f32.mrf.mxu0 }
 0x267   : > { %v11400_v48 = vpop.f32.mrf.mxu0 }
 0x269   : > { %v14060_v2 = vpop.f32.mrf.mxu0 }
 0x26f   : > { %v11375_v37 = vpop.f32.mrf.mxu1 }
 0x270   : > { %v14062_v18 = vadd.f32 %v11395_v3, %v11375_v37  ;;  %v6321_v37 = vld [vmem:[#allocation3 + $0x14] sm:$0x1] }
 0x271   : > { %v3813_v58 = vpop.f32.mrf.mxu1  ;;  %v11403_v23 = vpop.f32.mrf.mxu0 }
 0x272   : > { %v14064_v36 = vadd.f32 %v3986_v61, %v3813_v58  ;;  %v6279_v61 = vsel %vm14086_vm2, 0, %v6278_v63 }
 0x273   : > { %v11376_v21 = vpop.f32.mrf.mxu1  ;;  %v4018_v47 = vpop.f32.mrf.mxu0  ;;  %6280 = vst [vmem:[#allocation3 + $0x20] sm:$0x1] %v6279_v61 }
 0x274   : > { %v14066_v57 = vadd.f32 %v11396_v17, %v11376_v21  ;;  %v6328_v17 = vsel %vm14112_vm3, 0, %v6327_v11 }
 0x275   : > { %v14068_v42 = vpop.f32.mrf.mxu1  ;;  %v11404_v16 = vpop.f32.mrf.mxu0  ;;  %6329 = vst [vmem:[#allocation3 + $0x24] sm:$0x1] %v6328_v17  ;;  %v6284_v17 = vld [vmem:[#allocation3 + $0x30] sm:$0x1] }
 0x277   : > { %v14070_v38 = vpop.f32.mrf.mxu0 }
 0x278   : > { %v11379_v52 = vpop.f32.mrf.mxu1 }
 0x279   : > { %v14072_v39 = vadd.f32 %v11399_v33, %v11379_v52  ;;  %v11407_v41 = vpop.f32.mrf.mxu0  ;;  %v6287_v52 = vld [vmem:[#allocation3 + $0x38] sm:$0x1] }
 0x27a   : > { %v3829_v14 = vpop.f32.mrf.mxu1 }
 0x27b   : > { %v14074_v55 = vadd.f32 %v4002_v19, %v3829_v14  ;;  %v4034_v59 = vpop.f32.mrf.mxu0 }
 0x27c   : > { %v11380_v1 = vpop.f32.mrf.mxu1 }
 0x27d   : > { %v14076_v9 = vadd.f32 %v11400_v48, %v11380_v1  ;;  %v11408_v25 = vpop.f32.mrf.mxu0  ;;  %v6272_v48 = vld [vmem:[#allocation3 + $0x10] sm:$0x1]  ;;  %v6288_v1 = vsel %vm14086_vm2, 0, %v6287_v52  ;;  %v6299_v52 = vld [vmem:[#allocation3 + $0x68] sm:$0x1] }
 0x27e   : > { %v14078_v12 = vpop.f32.mrf.mxu1  ;;  %v6273_v21 = vsel %vm14086_vm2, 0, %v6272_v48  ;;  %6289 = vst [vmem:[#allocation3 + $0x38] sm:$0x1] %v6288_v1  ;;  %v6333_v48 = vld [vmem:[#allocation3 + $0x34] sm:$0x1] }
 0x27f   : > { %v14080_v20 = vpop.f32.mrf.mxu0  ;;  %6274 = vst [vmem:[#allocation3 + $0x10] sm:$0x1] %v6273_v21  ;;  %v6285_v21 = vsel %vm14086_vm2, 0, %v6284_v17  ;;  %v6348_v1 = vld [vmem:[#allocation3 + $0x6c] sm:$0x1] }
 0x280   : > { %6286 = vst [vmem:[#allocation3 + $0x30] sm:$0x1] %v6285_v21  ;;  %v6296_v21 = vld [vmem:[#allocation3 + $0x60] sm:$0x1] }
 0x281   : > { %v11383_v6 = vpop.f32.mrf.mxu1  ;;  %v14082_v56 = vpop.f32.mrf.mxu0 }
 0x282   : > { %v14106_v34 = vadd.f32 %v11403_v23, %v11383_v6  ;;  %v11882_v6 = vld [vmem:[%s15748_s5 + $0x38] sm:$0xff]  }
 0x283   : > { %v3845_v35 = vpop.f32.mrf.mxu1  ;;  %v14116_v0 = vpop.f32.mrf.mxu0  ;;  %11549 = vmatprep.subr.bf16.mxu0 %v11882_v6 }
 0x284   : > { %v14120_v60 = vadd.f32 %v4018_v47, %v3845_v35  ;;  %v6322_v47 = vsel %vm14112_vm3, 0, %v6321_v37  ;;  %11550 = vmatpush3.bf16.msra.mxu0 %v11882_v6 }
 0x285   : > { %v11384_v26 = vpop.f32.mrf.mxu1  ;;  %v14122_v31 = vpop.f32.mrf.mxu0  ;;  %6323 = vst [vmem:[#allocation3 + $0x14] sm:$0x1] %v6322_v47  ;;  %v6334_v47 = vsel %vm14112_vm3, 0, %v6333_v48 }
 0x286   : > { %v14124_v32 = vadd.f32 %v11404_v16, %v11384_v26  ;;  %6335 = vst [vmem:[#allocation3 + $0x34] sm:$0x1] %v6334_v47 }
 0x287   : > { %v14126_v27 = vpop.f32.mrf.mxu1  ;;  %v14128_v54 = vpop.f32.mrf.mxu0 }
 0x289   : > { %v11387_v49 = vpop.f32.mrf.mxu1  ;;  %v14130_v5 = vpop.f32.mrf.mxu0 }
 0x28a   : > { %v14132_v51 = vadd.f32 %v11407_v41, %v11387_v49  ;;  %v6336_v41 = vld [vmem:[#allocation3 + $0x3c] sm:$0x1] }
 0x28b   : > { %v3861_v15 = vpop.f32.mrf.mxu1  ;;  %v14134_v4 = vpop.f32.mrf.mxu0 }
 0x28c   : > { %v14136_v40 = vadd.f32 %v4034_v59, %v3861_v15  ;;  %v6290_v15 = vld [vmem:[#allocation3 + $0x40] sm:$0x1] }
 0x28d   : > { %v11388_v28 = vpop.f32.mrf.mxu1  ;;  %v14142_v29 = vpop.f32.mrf.mxu0 }
 0x28e   : > { %v14144_v3 = vadd.f32 %v11408_v25, %v11388_v28  ;;  %v6337_v25 = vsel %vm14112_vm3, 0, %v6336_v41 }
 0x28f   : > { %v14150_v33 = vpop.f32.mrf.mxu1  ;;  %v14152_v19 = vpop.f32.mrf.mxu0  ;;  %6338 = vst [vmem:[#allocation3 + $0x3c] sm:$0x1] %v6337_v25  ;;  %v6349_v25 = vsel %vm14112_vm3, 0, %v6348_v1  ;;  %v6345_v1 = vld [vmem:[#allocation3 + $0x64] sm:$0x1] }
 0x290   : > { %6350 = vst [vmem:[#allocation3 + $0x6c] sm:$0x1] %v6349_v25 }
 0x291   : > { %v11415_v58 = vpop.f32.mrf.mxu1  ;;  %v14154_v23 = vpop.f32.mrf.mxu0 }
 0x292   : > { %v14161_v16 = vadd.f32 %v11415_v58, %v14062_v18 }
 0x293   : > { %v4260_v14 = vpop.f32.mrf.mxu1  ;;  %v14163_v59 = vpop.f32.mrf.mxu0 }
 0x294   : > { %v14170_v10 = vadd.f32 %v4260_v14, %v14064_v36  ;;  %v6331_v36 = vsel %vm14112_vm3, 0, %v6330_v24  ;;  %v6300_v14 = vsel %vm14086_vm2, 0, %v6299_v52  ;;  %v6293_v24 = vld [vmem:[#allocation3 + $0x58] sm:$0x1] }
 0x295   : > { %v11416_v18 = vpop.f32.mrf.mxu1  ;;  %v14172_v62 = vpop.f32.mrf.mxu0  ;;  %6332 = vst [vmem:[#allocation3 + $0x2c] sm:$0x1] %v6331_v36  ;;  %6301 = vst [vmem:[#allocation3 + $0x68] sm:$0x1] %v6300_v14  ;;  %v6294_v36 = vsel %vm14086_vm2, 0, %v6293_v24 }
 0x296   : > { %v14178_v35 = vadd.f32 %v11416_v18, %v14066_v57  ;;  %v6291_v57 = vsel %vm14086_vm2, 0, %v6290_v15  ;;  %v6342_v15 = vld [vmem:[#allocation3 + $0x5c] sm:$0x1]  ;;  %6295 = vst [vmem:[#allocation3 + $0x58] sm:$0x1] %v6294_v36 }
 0x297   : > { %v14184_v26 = vpop.f32.mrf.mxu1  ;;  %v14186_v49 = vpop.f32.mrf.mxu0  ;;  %6292 = vst [vmem:[#allocation3 + $0x40] sm:$0x1] %v6291_v57  ;;  %v6343_v50 = vsel %vm14112_vm3, 0, %v6342_v15  ;;  %v6360_v24 = vld [vmem:[#allocation3 + $0x8c] sm:$0x1] }
 0x298   : > { %6344 = vst [vmem:[#allocation3 + $0x5c] sm:$0x1] %v6343_v50 }
 0x299   : > { %v11419_v53 = vpop.f32.mrf.mxu1  ;;  %v14192_v44 = vpop.f32.mrf.mxu0 }
 0x29a   : > { %v14195_v28 = vadd.f32 %v11419_v53, %v14072_v39  ;;  %v6302_v53 = vld [vmem:[#allocation3 + $0x70] sm:$0x1] }
 0x29b   : > { %v4276_v63 = vpop.f32.mrf.mxu1  ;;  %v14197_v11 = vpop.f32.mrf.mxu0 }
 0x29c   : > { %v14200_v61 = vadd.f32 %v4276_v63, %v14074_v55  ;;  %v6351_v63 = vld [vmem:[#allocation3 + $0x74] sm:$0x1] }
 0x29d   : > { %v11420_v37 = vpop.f32.mrf.mxu1  ;;  %v14202_v58 = vpop.f32.mrf.mxu0  ;;  %v6352_v48 = vsel %vm14112_vm3, 0, %v6351_v63 }
 0x29e   : > { %v14209_v39 = vadd.f32 %v11420_v37, %v14076_v9  ;;  %v11883_v9 = vld [vmem:[%s15748_s5 + $0x30] sm:$0xff]   ;;  %6353 = vst [vmem:[#allocation3 + $0x74] sm:$0x1] %v6352_v48 }
 0x29f   : > { %v14211_v41 = vpop.f32.mrf.mxu1  ;;  %v14213_v55 = vpop.f32.mrf.mxu0  ;;  %11551 = vmatprep.subr.bf16.mxu0 %v11883_v9  ;;  %v11885_v37 = vld [vmem:[%s15748_s5 + $0x10] sm:$0xff]  }
 0x2a0   : > { %11552 = vmatpush3.bf16.msra.mxu0 %v11883_v9  ;;  %11575 = vmatprep.subr.bf16.mxu1 %v11885_v37  ;;  %v6346_v9 = vsel %vm14112_vm3, 0, %v6345_v1 }
 0x2a1   : > { %v11423_v18 = vpop.f32.mrf.mxu1  ;;  %v14219_v6 = vpop.f32.mrf.mxu0  ;;  %11576 = vmatpush3.bf16.msra.mxu1 %v11885_v37  ;;  %6347 = vst [vmem:[#allocation3 + $0x64] sm:$0x1] %v6346_v9  ;;  %v6305_v9 = vld [vmem:[#allocation3 + $0x78] sm:$0x1] }
 0x2a2   : > { %v14228_v7 = vadd.f32 %v11423_v18, %v14106_v34  ;;  %v6303_v34 = vsel %vm14086_vm2, 0, %v6302_v53 }
 0x2a3   : > { %v4292_v8 = vpop.f32.mrf.mxu1  ;;  %v14232_v57 = vpop.f32.mrf.mxu0  ;;  %6304 = vst [vmem:[#allocation3 + $0x70] sm:$0x1] %v6303_v34 }
 0x2a4   : > { %v14237_v17 = vadd.f32 %v4292_v8, %v14120_v60  ;;  %v6297_v60 = vsel %vm14086_vm2, 0, %v6296_v21  ;;  %v6361_v8 = vsel %vm14112_vm3, 0, %v6360_v24  ;;  %v6306_v24 = vsel %vm14086_vm2, 0, %v6305_v9 }
 0x2a5   : > { %v11424_v47 = vpop.f32.mrf.mxu1  ;;  %v14246_v52 = vpop.f32.mrf.mxu0  ;;  %6298 = vst [vmem:[#allocation3 + $0x60] sm:$0x1] %v6297_v60  ;;  %6362 = vst [vmem:[#allocation3 + $0x8c] sm:$0x1] %v6361_v8 }
 0x2a6   : > { %v14251_v14 = vadd.f32 %v11424_v47, %v14124_v32  ;;  %v6312_v32 = vsel %vm14086_vm2, 0, %v6311_v22  ;;  %v11886_v47 = vld [vmem:[%s15748_s5 + $0x28] sm:$0xff]   ;;  %6307 = vst [vmem:[#allocation3 + $0x78] sm:$0x1] %v6306_v24 }
 0x2a7   : > { %v14253_v25 = vpop.f32.mrf.mxu1  ;;  %v14255_v18 = vpop.f32.mrf.mxu0  ;;  %6313 = vst [vmem:[#allocation3 + $0x88] sm:$0x1] %v6312_v32  ;;  %11553 = vmatprep.subr.bf16.mxu0 %v11886_v47  ;;  %v6314_v32 = vld [vmem:[#allocation3 + $0x90] sm:$0x1] }
 0x2a8   : > { %11554 = vmatpush3.bf16.msra.mxu0 %v11886_v47  ;;  %v6357_v47 = vld [vmem:[#allocation3 + $0x84] sm:$0x1] }
 0x2a9   : > { %v11427_v36 = vpop.f32.mrf.mxu1  ;;  %v14259_v15 = vpop.f32.mrf.mxu0 }
 0x2aa   : > { %v4337_v50 = vadd.f32 %v11427_v36, %v14132_v51  ;;  %v11887_v51 = vld [vmem:[%s15748_s5 + $0x8] sm:$0xff]  }
 0x2ab   : > { %v4308_v53 = vpop.f32.mrf.mxu1  ;;  %v14266_v63 = vpop.f32.mrf.mxu0  ;;  %11577 = vmatprep.subr.bf16.mxu1 %v11887_v51 }
 0x2ac   : > { %15853 = vst [vmem:[#allocation18_spill] sm:$0xff] %v14266_v63  ;;  %v4335_v34 = vadd.f32 %v4308_v53, %v14136_v40  ;;  %v14270_v48 = vadd.f32 %v14192_v44, %v4337_v50  ;;  %v6354_v40 = vld [vmem:[#allocation3 + $0x7c] sm:$0x1]  ;;  %11578 = vmatpush3.bf16.msra.mxu1 %v11887_v51  ;;  %v11888_v50 = vld [vmem:[%s15748_s5] sm:$0xff]  }
 0x2ad   : > { %v11428_v37 = vpop.f32.mrf.mxu1  ;;  %v14272_v21 = vpop.f32.mrf.mxu0  ;;  %v6355_v36 = vsel %vm14112_vm3, 0, %v6354_v40  ;;  %11579 = vmatprep.subr.bf16.mxu1 %v11888_v50  ;;  %v6358_v40 = vsel %vm14112_vm3, 0, %v6357_v47 }
 0x2ae   : > { %15854 = vst [vmem:[#allocation19_spill] sm:$0xff] %v14272_v21  ;;  %v4338_v60 = vadd.f32 %v11428_v37, %v14144_v3  ;;  %v4545_v1 = vadd.f32 %v14197_v11, %v4335_v34  ;;  %6356 = vst [vmem:[#allocation3 + $0x7c] sm:$0x1] %v6355_v36  ;;  %v6315_v3 = vsel %vm14086_vm2, 0, %v6314_v32  ;;  %v6363_v11 = vld [vmem:[#allocation3 + $0x94] sm:$0x1] }
 0x2af   : > { %v14282_v22 = vpop.f32.mrf.mxu1  ;;  %v14284_v44 = vpop.f32.mrf.mxu0  ;;  %6316 = vst [vmem:[#allocation3 + $0x90] sm:$0x1] %v6315_v3  ;;  %v6308_v37 = vld [vmem:[#allocation3 + $0x80] sm:$0x1]  ;;  %6359 = vst [vmem:[#allocation3 + $0x84] sm:$0x1] %v6358_v40 }
 0x2b0   : > { %15855 = vst [vmem:[#allocation7_spill] sm:$0xff] %v14284_v44  ;;  %v4548_v8 = vadd.f32 %v14202_v58, %v4338_v60  ;;  %v6364_v58 = vsel %vm14112_vm3, 0, %v6363_v11  ;;  %v6309_v9 = vsel %vm14086_vm2, 0, %v6308_v37  ;;  %11580 = vmatpush3.bf16.msra.mxu1 %v11888_v50  ;;  %v11890_v3 = vld [vmem:[%s15748_s5 + $0x20] sm:$0xff]  }
 0x2b1   : > { %v14296_v53 = vpop.f32.mrf.mxu1  ;;  %v14298_v34 = vpop.f32.mrf.mxu0  ;;  %6365 = vst [vmem:[#allocation3 + $0x94] sm:$0x1] %v6364_v58  ;;  %6310 = vst [vmem:[#allocation3 + $0x80] sm:$0x1] %v6309_v9  ;;  %11555 = vmatprep.subr.bf16.mxu0 %v11890_v3  ;;  %11621 = vmatprep.subr.bf16.mxu1 %v14341_v30 }
 0x2b2   : > { %15856 = vst [vmem:[#allocation8_spill] sm:$0xff] %v14298_v34  ;;  %11556 = vmatpush3.bf16.msra.mxu0 %v11890_v3 }
 0x2b3   : > { %v14302_v51 = vpop.f32.mrf.mxu1  ;;  %v14304_v60 = vpop.f32.mrf.mxu0  ;;  %11597 = vmatprep.subr.bf16.mxu0 %v11894_v45 }
 0x2b4   : > { %15857 = vst [vmem:[#allocation9_spill] sm:$0xff] %v14304_v60 }
 0x2b5   : > { %v14310_v24 = vpop.f32.mrf.mxu1  ;;  %v14312_v36 = vpop.f32.mrf.mxu0 }
 0x2b6   : > { %15858 = vst [vmem:[#allocation10_spill] sm:$0xff] %v14312_v36 }
 0x2b7   : > { %v14314_v32 = vpop.f32.mrf.mxu1  ;;  %v14321_v58 = vpop.f32.mrf.mxu0 }
 0x2b8   : > { %15859 = vst [vmem:[#allocation11_spill] sm:$0xff] %v14321_v58 }
 0x2b9   : > { %v14319_v11 = vpop.f32.mrf.mxu1  ;;  %v14330_v47 = vpop.f32.mrf.mxu0 }
 0x2ba   : > { %15860 = vst [vmem:[#allocation27_spill] sm:$0xff] %v14330_v47 }
 0x2bb   : > { %v14326_v50 = vpop.f32.mrf.mxu1  ;;  %v14334_v40 = vpop.f32.mrf.mxu0 }
 0x2bc   : > { %15861 = vst [vmem:[#allocation12_spill] sm:$0xff] %v14334_v40 }
 0x2bd   : > { %v14328_v37 = vpop.f32.mrf.mxu1  ;;  %v14343_v58 = vpop.f32.mrf.mxu0 }
 0x2be   : > { %15863 = vst [vmem:[#allocation32_spill] sm:$0xff] %v14343_v58 }
 0x2bf   : > { %v14332_v9 = vpop.f32.mrf.mxu1  ;;  %v14348_v45 = vpop.f32.mrf.mxu0 }
 0x2c0   : > { %15864 = vst [vmem:[#allocation13_spill] sm:$0xff] %v14348_v45 }
 0x2c1   : > { %v14336_v13 = vpop.f32.mrf.mxu1 }
 0x2c3   : > { %v14346_v3 = vpop.f32.mrf.mxu1 }
 0x2c5   : > { %v14350_v47 = vpop.f32.mrf.mxu1 }
 0x2c6   : > { %15865 = vst [vmem:[#allocation14_spill] sm:$0xff] %v14350_v47 }
 0x2c7   : > { %v14354_v40 = vpop.f32.mrf.mxu1 }
 0x2c8   : > { %15867 = vst [vmem:[#allocation34_spill] sm:$0xff] %v14354_v40 }
 0x2cd   : > { %v14352_v36 = vpop.f32.mrf.mxu0 }
 0x2ce   : > { %15866 = vst [vmem:[#allocation17_spill] sm:$0xff] %v14352_v36 }
 0x2cf   : > { %v14356_v60 = vpop.f32.mrf.mxu0 }
 0x2d0   : > { %15868 = vst [vmem:[#allocation22_spill] sm:$0xff] %v14356_v60 }
 0x2d1   : > { %v14361_v21 = vpop.f32.mrf.mxu0 }
 0x2d2   : > { %15870 = vst [vmem:[#allocation24_spill] sm:$0xff] %v14361_v21 }
 0x2d3   : > { %v11467_v34 = vpop.f32.mrf.mxu1  ;;  %v14367_v45 = vpop.f32.mrf.mxu0 }
 0x2d4   : > { %v14359_v44 = vadd.f32 %v11467_v34, %v14270_v48  ;;  %15873 = vst [vmem:[#allocation36_spill] sm:$0xff] %v14367_v45 }
 0x2d5   : > { %v4952_v58 = vpop.f32.mrf.mxu1 }
 0x2d6   : > { %15869 = vst [vmem:[#allocation20_spill] sm:$0xff] %v14359_v44  ;;  %v14363_v30 = vadd.f32 %v4952_v58, %v4545_v1 }
 0x2d7   : > { %v11468_v46 = vpop.f32.mrf.mxu1 }
 0x2d8   : > { %15871 = vst [vmem:[#allocation21_spill] sm:$0xff] %v14363_v30  ;;  %v14365_v63 = vadd.f32 %v11468_v46, %v4548_v8  ;;  %v14385_v46 = vld [vmem:[#allocation3] sm:$0xf]  ;;  %v14397_v30 = vld [vmem:[#allocation3 + $0x50] sm:$0xf] }
 0x2d9   : > { %v14369_v47 = vpop.f32.mrf.mxu1  ;;  %15880 = vst [vmem:[#allocation38_spill] sm:$0xff] %v14385_v46  ;;  %v6705_v45 = vshrl.u32 %v14385_v46, 16  ;;  %15883 = vst [vmem:[#allocation15_spill] sm:$0xff] %v14397_v30 }
 0x2da   : > { %15872 = vst [vmem:[#allocation28_spill] sm:$0xff] %v14365_v63  ;;  %v3990_v63 = vadd.f32 %v14058_v43, %v14068_v42  ;;  %v6820_v43 = vshll.u32 %v14397_v30, 16  ;;  %v4022_v42 = vadd.f32 %v14070_v38, %v14126_v27  ;;  %v4539_v38 = vadd.f32 %v14130_v5, %v14195_v28 }
 0x2db   : > { %v14371_v36 = vpop.f32.mrf.mxu1  ;;  %v4541_v28 = vadd.f32 %v14163_v59, %v14237_v17  ;;  %v14458_v59 = vld [vmem:[#allocation3 + $0x54] sm:$0x1]  ;;  %v4544_v17 = vadd.f32 %v14172_v62, %v14251_v14 }
 0x2dc   : > { %v14373_v40 = vpop.f32.mrf.mxu0 }
 0x2dd   : > { %15874 = vst [vmem:[#allocation25_spill] sm:$0xff] %v14373_v40  ;;  %v14375_v60 = vpop.f32.mrf.mxu1  ;;  %v6708_v40 = vshll.u32 %v14385_v46, 16  ;;  %v6817_v46 = vshrl.u32 %v14397_v30, 16 }
 0x2de   : > { %15875 = vst [vmem:[#allocation23_spill] sm:$0xff] %v14375_v60  ;;  %v14377_v48 = vpop.f32.mrf.mxu0 }
 0x2df   : > { %15876 = vst [vmem:[#allocation26_spill] sm:$0xff] %v14377_v48  ;;  %v14379_v34 = vpop.f32.mrf.mxu1 }
 0x2e0   : > { %15877 = vst [vmem:[#allocation31_spill] sm:$0xff] %v14379_v34  ;;  %v14381_v21 = vpop.f32.mrf.mxu0  ;;  %v6710_v34 = vrot.slane %v6708_v40, 5  ;;  %v4536_v40 = vadd.f32 %v14122_v31, %v14178_v35  ;;  %v4540_v31 = vadd.f32 %v14142_v29, %v14209_v39 }
 0x2e1   : > { %15878 = vst [vmem:[#allocation33_spill] sm:$0xff] %v14381_v21  ;;  %v14383_v1 = vpop.f32.mrf.mxu1  ;;  %v4324_v21 = vadd.f32 %v14184_v26, %v3990_v63  ;;  %v4038_v26 = vadd.f32 %v14080_v20, %v14150_v33  ;;  %v4537_v20 = vadd.f32 %v14134_v4, %v14200_v61  ;;  %v4332_v33 = vadd.f32 %v14253_v25, %v4022_v42 }
 0x2e2   : > { %15879 = vst [vmem:[#allocation35_spill] sm:$0xff] %v14383_v1  ;;  %v14389_v58 = vpop.f32.mrf.mxu0  ;;  %v4543_v4 = vadd.f32 %v14154_v23, %v14228_v7  ;;  %v4970_v29 = vadd.f32 %v14310_v24, %v4536_v40  ;;  %v15889_v40 = vld [vmem:[#allocation19_spill] sm:$0xff] }
 0x2e3   : > { %v14387_v8 = vpop.f32.mrf.mxu1  ;;  %15882 = vst [vmem:[#allocation29_spill] sm:$0xff] %v14389_v58  ;;  %v6707_v58 = vrot.slane %v6705_v45, 4  ;;  %v4534_v45 = vadd.f32 %v14128_v54, %v4324_v21  ;;  %v4336_v35 = vadd.f32 %v14282_v22, %v4038_v26  ;;  %v4973_v21 = vadd.f32 %v14319_v11, %v4539_v38  ;;  %v15890_v38 = vld [vmem:[#allocation7_spill] sm:$0xff] }
 0x2e4   : > { %15881 = vst [vmem:[#allocation6_spill] sm:$0xff] %v14387_v8  ;;  %v4006_v8 = vadd.f32 %v14060_v2, %v14078_v12  ;;  %v4535_v2 = vadd.f32 %v14082_v56, %v14161_v16  ;;  %v4533_v12 = vadd.f32 %v14116_v0, %v14170_v10  ;;  %v6819_v16 = vrot.slane %v6817_v46, 4 }
 0x2e5   : > { %v14395_v48 = vpop.f32.mrf.mxu1  ;;  %v6711_v56 = vor.u32 %v6710_v34, %v6707_v58  ;;  %v6822_v10 = vrot.slane %v6820_v43, 5  ;;  %v4968_v39 = vadd.f32 %v14314_v32, %v4534_v45  ;;  %v6826_v32 = vshll.u32 %v14458_v59, 16 }
 0x2e6   : > { %v14404_v1 = vpop.f32.mrf.mxu0  ;;  %v4328_v63 = vadd.f32 %v14211_v41, %v4006_v8  ;;  %v4969_v61 = vadd.f32 %v14296_v53, %v4535_v2  ;;  %v4967_v41 = vadd.f32 %v14302_v51, %v4533_v12  ;;  %v4542_v53 = vadd.f32 %v14186_v49, %v4332_v33 }
 0x2e7   : > { %v14400_v44 = vpop.f32.mrf.mxu1  ;;  %15884 = vst [vmem:[#allocation37_spill] sm:$0xff] %v14404_v1  ;;  %v14424_v1 = vld [vmem:[#allocation3 + $0x4] sm:$0x1]  ;;  %v14454_v23 = vrot.slane %v6711_v56, 4  ;;  %v6823_v24 = vor.u32 %v6822_v10, %v6819_v16  ;;  %v4974_v11 = vadd.f32 %v14328_v37, %v4540_v31  ;;  %v4977_v34 = vadd.f32 %v14336_v13, %v4543_v4  ;;  %v15885_v37 = vld [vmem:[#allocation18_spill] sm:$0xff]  ;;  %v15892_v31 = vld [vmem:[#allocation23_spill] sm:$0xff] }
 0x2e8   : > { %v14430_v27 = vpop.f32.mrf.mxu0  ;;  %v6714_v0 = vshll.u32 %v14424_v1, 16  ;;  %v4538_v5 = vadd.f32 %v14152_v19, %v4328_v63  ;;  %v4971_v19 = vadd.f32 %v14326_v50, %v4537_v20  ;;  %v4546_v46 = vadd.f32 %v14213_v55, %v4336_v35  ;;  %v15891_v56 = vld [vmem:[#allocation8_spill] sm:$0xff]  ;;  %v15893_v4 = vld [vmem:[#allocation31_spill] sm:$0xff] }
 0x2e9   : > { %v14406_v60 = vpop.f32.mrf.mxu1  ;;  %v5259_v8 = vadd.f32 %v14219_v6, %v4969_v61  ;;  %v5257_v58 = vadd.f32 %v14232_v57, %v4967_v41  ;;  %v5260_v62 = vadd.f32 %v14246_v52, %v4970_v29  ;;  %v5258_v49 = vadd.f32 %v14255_v18, %v4968_v39  ;;  %v7292_v6 = vld [vmem:[#allocation3] sm:$0xe]  ;;  %v15887_v57 = vld [vmem:[#allocation14_spill] sm:$0xff]  ;;  %v15894_v61 = vld [vmem:[#allocation35_spill] sm:$0xff] }
 0x2ea   : > { %v14452_v22 = vpop.f32.mrf.mxu0  ;;  %v14456_v7 = vrot.slane %v6714_v0, 5  ;;  %v4972_v50 = vadd.f32 %v14332_v9, %v4538_v5  ;;  %v4975_v43 = vadd.f32 %v14346_v3, %v4541_v28  ;;  %v5263_v42 = vadd.f32 %v14259_v15, %v4973_v21  ;;  %v15888_v52 = vld [vmem:[#allocation34_spill] sm:$0xff]  ;;  %v15896_v21 = vld [vmem:[#allocation9_spill] sm:$0xff] }
 0x2eb   : > { %v14422_v30 = vpop.f32.mrf.mxu1  ;;  %v5261_v26 = vadd.f32 %v15885_v37, %v4971_v19  ;;  %v4978_v63 = vadd.f32 %v15887_v57, %v4544_v17  ;;  %v4976_v2 = vadd.f32 %v15888_v52, %v4542_v53  ;;  %v14485_v12 = vrot.slane %v6823_v24, 4  ;;  %v15895_v29 = vld [vmem:[#allocation6_spill] sm:$0xff]  ;;  %v15905_v37 = vld [vmem:[#allocation32_spill] sm:$0xff] }
 0x2ec   : > { %v14477_v9 = vpop.f32.mrf.mxu0  ;;  %v6717_v55 = vsel %vm12114_vm4, %v14454_v23, %v14456_v7  ;;  %v14487_v3 = vrot.slane %v6826_v32, 5  ;;  %v5470_v15 = vadd.f32 %v14371_v36, %v5259_v8  ;;  %v5264_v45 = vadd.f32 %v15889_v40, %v4974_v11  ;;  %v15897_v53 = vld [vmem:[#allocation10_spill] sm:$0xff]  ;;  %v14519_v52 = vld [vmem:[%s15747_s4] ss:$0 sm:$0xff] }
 0x2ed   : > { %v14436_v54 = vpop.f32.mrf.mxu1  ;;  %v5262_v20 = vadd.f32 %v15890_v38, %v4972_v50  ;;  %v5267_v0 = vadd.f32 %v15891_v56, %v4977_v34  ;;  %v4980_v33 = vadd.f32 %v14369_v47, %v4546_v46  ;;  %v5468_v16 = vadd.f32 %v15892_v31, %v5257_v58  ;;  %v15898_v47 = vld [vmem:[#allocation11_spill] sm:$0xff]  ;;  %v15899_v34 = vld [vmem:[#allocation20_spill] sm:$0xff]  ;;  %v15901_v58 = vld [vmem:[#allocation21_spill] sm:$0xff] }
 0x2ee   : > { %v10592_v35 = vrot.slane %v7292_v6, 9  ;;  %v7342_v5 = vrot.slane %v14424_v1, 5  ;;  %v5471_v28 = vadd.f32 %v15893_v4, %v5260_v62  ;;  %v5469_v41 = vadd.f32 %v15894_v61, %v5258_v49  ;;  %v15900_v46 = vld [vmem:[#allocation27_spill] sm:$0xff]  ;;  %v15902_v62 = vld [vmem:[#allocation12_spill] sm:$0xff]  ;;  %v15906_v6 = vld [vmem:[#allocation13_spill] sm:$0xff] }
 0x2ef   : > { %v14448_v25 = vpop.f32.mrf.mxu1  ;;  %v5474_v36 = vadd.f32 %v15895_v29, %v5263_v42  ;;  %v11527_v39 = vpop.f32.mrf.mxu0  ;;  %v5265_v19 = vadd.f32 %v15896_v21, %v4975_v43  ;;  %v5472_v17 = vadd.f32 %v14395_v48, %v5261_v26  ;;  %v5268_v24 = vadd.f32 %v15897_v53, %v4978_v63  ;;  %v15903_v43 = vld [vmem:[#allocation17_spill] sm:$0xff]  ;;  %v15904_v42 = vld [vmem:[#allocation28_spill] sm:$0xff]  ;;  %v14526_v38 = vld [vmem:[#allocation3 + $0x50] sm:$0xe] }
 0x2f0   : > { %v5266_v32 = vadd.f32 %v15898_v47, %v4976_v2  ;;  %v6829_v1 = vsel %vm12114_vm4, %v14485_v12, %v14487_v3  ;;  %v5475_v50 = vadd.f32 %v14400_v44, %v5264_v45  ;;  %v5271_v8 = vadd.f32 %v15900_v46, %v15899_v34  ;;  %v15907_v44 = vld [vmem:[#allocation22_spill] sm:$0xff]  ;;  %v15909_v31 = vld [vmem:[#allocation24_spill] sm:$0xff]  ;;  %v15911_v29 = vld [vmem:[#allocation25_spill] sm:$0xff] }
 0x2f1   : > { %v14463_v51 = vpop.f32.mrf.mxu1  ;;  %v5269_v49 = vadd.f32 %v15902_v62, %v15901_v58  ;;  %v5904_v48 = vadd.f32 %v15903_v43, %v5470_v15  ;;  %v5272_v26 = vadd.f32 %v15905_v37, %v15904_v42  ;;  %v5270_v57 = vadd.f32 %v15906_v6, %v4980_v33  ;;  %v5887_v15 = vpop.f32.mrf.mxu0  ;;  %v15910_v61 = vld [vmem:[#allocation36_spill] sm:$0xff]  ;;  %v15913_v62 = vld [vmem:[#allocation33_spill] sm:$0xff] }
 0x2f2   : > { %v5902_v2 = vadd.f32 %v15907_v44, %v5468_v16  ;;  %v14524_v45 = vsel %vm12231_vm7, %v10592_v35, %v7342_v5  ;;  %v5905_v4 = vadd.f32 %v15909_v31, %v5471_v28  ;;  %v5903_v33 = vadd.f32 %v15910_v61, %v5469_v41  ;;  %v15912_v16 = vld [vmem:[#allocation26_spill] sm:$0xff]  ;;  %v15914_v44 = vld [vmem:[#allocation29_spill] sm:$0xff] }
 0x2f3   : > { %v11507_v14 = vpop.f32.mrf.mxu1  ;;  %v5908_v21 = vadd.f32 %v15911_v29, %v5474_v36  ;;  %v5473_v53 = vadd.f32 %v14406_v60, %v5262_v20  ;;  %v5478_v47 = vadd.f32 %v14422_v30, %v5267_v0  ;;  %v5906_v46 = vadd.f32 %v15912_v16, %v5472_v17  ;;  %v11528_v0 = vpop.f32.mrf.mxu0 }
 0x2f4   : > { %v7374_v35 = vrot.slane %v14458_v59, 5  ;;  %v14537_v43 = vadd.f32 %v15913_v62, %v5475_v50  ;;  %v10600_v28 = vrot.slane %v14526_v38, 9  ;;  %v5476_v41 = vadd.f32 %v14436_v54, %v5265_v19 }
 0x2f5   : > { %v5453_v18 = vpop.f32.mrf.mxu1  ;;  %v5479_v36 = vadd.f32 %v14448_v25, %v5268_v24  ;;  %v5477_v60 = vadd.f32 %v14463_v51, %v5266_v32  ;;  %v5482_v30 = vadd.f32 %v11507_v14, %v5271_v8  ;;  %v5890_v8 = vpop.f32.mrf.mxu0 }
 0x2f6   : > { %v5480_v17 = vadd.f32 %v5453_v18, %v5269_v49  ;;  %v14552_v18 = vadd.f32 %v14430_v27, %v5476_v41 }
 0x2f7   : > { %v11508_v10 = vpop.f32.mrf.mxu1  ;;  %v14555_v32 = vadd.f32 %v14452_v22, %v5479_v36 }
 0x2f8   : > { %v5483_v6 = vadd.f32 %v11508_v10, %v5272_v26  ;;  %v14558_v10 = vadd.f32 %v14477_v9, %v5477_v60  ;;  %v14562_v31 = vadd.f32 %v5887_v15, %v5480_v17  ;;  %v6580_v15 = vld [vmem:[#allocation3 + $0x18] sm:$0xf] }
 0x2f9   : > { %v5456_v11 = vpop.f32.mrf.mxu1 }
 0x2fa   : > { %v14565_v27 = vadd.f32 %v11528_v0, %v5483_v6  ;;  %v6571_v0 = vld [vmem:[#allocation3 + $0xc] sm:$0x1] }
 0x2fb   : > { %v11535_v63 = vpop.f32.mrf.mxu1 }
 0x2fc   : > { %v6194_v56 = vadd.f32 %v11535_v63, %v5904_v48  ;;  %v5481_v63 = vadd.f32 %v5456_v11, %v5270_v57  ;;  %v14560_v11 = vadd.f32 %v11527_v39, %v5482_v30 }
 0x2fd   : > { %v6129_v34 = vpop.f32.mrf.mxu1 }
 0x2fe   : > { %v6217_v5 = vadd.f32 %v14519_v52, %v6194_v56  ;;  %v6192_v58 = vadd.f32 %v6129_v34, %v5902_v2  ;;  %v14545_v2 = vadd.f32 %v15914_v44, %v5473_v53  ;;  %v15915_v56 = vld [vmem:[#allocation37_spill] sm:$0xff]  ;;  %v14567_v29 = vadd.f32 %v5890_v8, %v5481_v63  ;;  %v6583_v34 = vld [vmem:[#allocation3 + $0x1c] sm:$0x1] }
 0x2ff   : > { %v11536_v20 = vpop.f32.mrf.mxu1  ;;  %v14548_v54 = vadd.f32 %v15915_v56, %v5478_v47 }
 0x300   : > { %v6233_v48 = vmax.f32 %v6217_v5, 0.0  ;;  %v6215_v42 = vadd.f32 %v14519_v52, %v6192_v58  ;;  %v6195_v37 = vadd.f32 %v11536_v20, %v5905_v4  ;;  %v6568_v20 = vld [vmem:[#allocation3 + $0x8] sm:$0xf] }
 0x301   : > { %v6132_v50 = vpop.f32.mrf.mxu1 }
 0x302   : > { %v10882_v25 = vpack.c.bf16 %v6233_v48, %v6233_v48  ;;  %v6231_v19 = vmax.f32 %v6215_v42, 0.0  ;;  %v6218_v51 = vadd.f32 %v14519_v52, %v6195_v37  ;;  %v6193_v14 = vadd.f32 %v6132_v50, %v5903_v33 }
 0x303   : > { %v11539_v24 = vpop.f32.mrf.mxu1 }
 0x304   : > { %v6423_v49 = vshrl.u32 %v10882_v25, 16  ;;  %v10880_v26 = vpack.c.bf16 %v6231_v19, %v6231_v19  ;;  %v6234_v57 = vmax.f32 %v6218_v51, 0.0  ;;  %v6216_v4 = vadd.f32 %v14519_v52, %v6193_v14 }
 0x305   : > { %v6198_v61 = vadd.f32 %v11539_v24, %v5908_v21  ;;  %v6145_v33 = vpop.f32.mrf.mxu1  ;;  %v6426_v53 = vshll.u32 %v10882_v25, 16 }
 0x306   : > { %v6425_v22 = vrot.slane %v6423_v49, 7  ;;  %v6407_v9 = vshrl.u32 %v10880_v26, 16  ;;  %v10883_v47 = vpack.c.bf16 %v6234_v57, %v6234_v57  ;;  %v6410_v16 = vshll.u32 %v10880_v26, 16  ;;  %v6586_v26 = vld [vmem:[#allocation3 + $0x20] sm:$0xf] }
 0x307   : > { %v6232_v5 = vmax.f32 %v6216_v4, 0.0  ;;  %v6221_v21 = vadd.f32 %v14519_v52, %v6198_v61  ;;  %v6196_v58 = vadd.f32 %v6145_v33, %v5906_v46  ;;  %v11540_v62 = vpop.f32.mrf.mxu1  ;;  %v6589_v57 = vld [vmem:[#allocation3 + $0x24] sm:$0x1] }
 0x308   : > { %v6428_v41 = vor.u32 %v6426_v53, %v6425_v22  ;;  %v6429_v36 = vrot.slane %v6425_v22, 4  ;;  %v6409_v60 = vrot.slane %v6407_v9, 7  ;;  %v6431_v30 = vshrl.u32 %v10883_v47, 16 }
 0x309   : > { %v6434_v17 = vshll.u32 %v10883_v47, 16  ;;  %v10881_v48 = vpack.c.bf16 %v6232_v5, %v6232_v5  ;;  %v6237_v42 = vmax.f32 %v6221_v21, 0.0  ;;  %v6219_v37 = vadd.f32 %v14519_v52, %v6196_v58  ;;  %v6148_v6 = vpop.f32.mrf.mxu1 }
 0x30a   : > { %v6581_v63 = vsel %vm14571_vm5, %v6428_v41, %v6580_v15  ;;  %v6584_v44 = vsel %vm14086_vm2, %v6429_v36, %v6583_v34  ;;  %v6412_v46 = vor.u32 %v6410_v16, %v6409_v60  ;;  %v6413_v56 = vrot.slane %v6409_v60, 4  ;;  %v6574_v15 = vld [vmem:[#allocation3 + $0x10] sm:$0xf]  ;;  %v6577_v34 = vld [vmem:[#allocation3 + $0x14] sm:$0x1] }
 0x30b   : > { %6582 = vst [vmem:[#allocation3 + $0x18] sm:$0xf] %v6581_v63  ;;  %6585 = vst [vmem:[#allocation3 + $0x1c] sm:$0x1] %v6584_v44  ;;  %v6433_v25 = vrot.slane %v6431_v30, 7  ;;  %v6415_v19 = vshrl.u32 %v10881_v48, 16  ;;  %v10886_v14 = vpack.c.bf16 %v6237_v42, %v6237_v42  ;;  %v11543_v24 = vpop.f32.mrf.mxu1  ;;  %v6199_v61 = vadd.f32 %v11540_v62, %v14537_v43 }
 0x30c   : > { %v6418_v51 = vshll.u32 %v10881_v48, 16  ;;  %v6569_v8 = vsel %vm14571_vm5, %v6412_v46, %v6568_v20  ;;  %v6572_v49 = vsel %vm14086_vm2, %v6413_v56, %v6571_v0  ;;  %v6235_v4 = vmax.f32 %v6219_v37, 0.0  ;;  %v6604_v42 = vld [vmem:[#allocation3 + $0x38] sm:$0xf]  ;;  %v6607_v37 = vld [vmem:[#allocation3 + $0x3c] sm:$0x1] }
 0x30d   : > { %6570 = vst [vmem:[#allocation3 + $0x8] sm:$0xf] %v6569_v8  ;;  %6573 = vst [vmem:[#allocation3 + $0xc] sm:$0x1] %v6572_v49  ;;  %v6436_v33 = vor.u32 %v6434_v17, %v6433_v25  ;;  %v6437_v22 = vrot.slane %v6433_v25, 4  ;;  %v6417_v53 = vrot.slane %v6415_v19, 7  ;;  %v6161_v47 = vpop.f32.mrf.mxu1  ;;  %v6222_v21 = vadd.f32 %v14519_v52, %v6199_v61 }
 0x30e   : > { %v6455_v9 = vshrl.u32 %v10886_v14, 16  ;;  %v6458_v16 = vshll.u32 %v10886_v14, 16  ;;  %v10884_v5 = vpack.c.bf16 %v6235_v4, %v6235_v4  ;;  %v6197_v58 = vadd.f32 %v6148_v6, %v14545_v2  ;;  %v6592_v19 = vld [vmem:[#allocation3 + $0x28] sm:$0xf]  ;;  %v6595_v14 = vld [vmem:[#allocation3 + $0x2c] sm:$0x1] }
 0x30f   : > { %v6587_v41 = vsel %vm14571_vm5, %v6436_v33, %v6586_v26  ;;  %v6590_v43 = vsel %vm14086_vm2, %v6437_v22, %v6589_v57  ;;  %v6420_v62 = vor.u32 %v6418_v51, %v6417_v53  ;;  %v6421_v36 = vrot.slane %v6417_v53, 4  ;;  %v11544_v60 = vpop.f32.mrf.mxu1 }
 0x310   : > { %6588 = vst [vmem:[#allocation3 + $0x20] sm:$0xf] %v6587_v41  ;;  %6591 = vst [vmem:[#allocation3 + $0x24] sm:$0x1] %v6590_v43  ;;  %v6457_v30 = vrot.slane %v6455_v9, 7  ;;  %v6439_v20 = vshrl.u32 %v10884_v5, 16  ;;  %v6220_v6 = vadd.f32 %v14519_v52, %v6197_v58  ;;  %v6202_v63 = vadd.f32 %v11543_v24, %v14548_v54 }
 0x311   : > { %v6442_v0 = vshll.u32 %v10884_v5, 16  ;;  %v6238_v17 = vmax.f32 %v6222_v21, 0.0  ;;  %v6575_v48 = vsel %vm14571_vm5, %v6420_v62, %v6574_v15  ;;  %v6578_v2 = vsel %vm14086_vm2, %v6421_v36, %v6577_v34  ;;  %v6164_v44 = vpop.f32.mrf.mxu1  ;;  %v6610_v5 = vld [vmem:[#allocation3 + $0x40] sm:$0xf]  ;;  %v6613_v43 = vld [vmem:[#allocation3 + $0x44] sm:$0x1] }
 0x312   : > { %6576 = vst [vmem:[#allocation3 + $0x10] sm:$0xf] %v6575_v48  ;;  %6579 = vst [vmem:[#allocation3 + $0x14] sm:$0x1] %v6578_v2  ;;  %v6460_v46 = vor.u32 %v6458_v16, %v6457_v30  ;;  %v6461_v56 = vrot.slane %v6457_v30, 4  ;;  %v6441_v25 = vrot.slane %v6439_v20, 7  ;;  %v6225_v49 = vadd.f32 %v14519_v52, %v6202_v63 }
 0x313   : > { %v10887_v51 = vpack.c.bf16 %v6238_v17, %v6238_v17  ;;  %v6236_v8 = vmax.f32 %v6220_v6, 0.0  ;;  %v6200_v26 = vadd.f32 %v6161_v47, %v14552_v18  ;;  %v6203_v57 = vadd.f32 %v11544_v60, %v14555_v32  ;;  %v11547_v33 = vpop.f32.mrf.mxu1  ;;  %v6598_v2 = vld [vmem:[#allocation3 + $0x30] sm:$0xf] }
 0x314   : > { %v6605_v4 = vsel %vm14571_vm5, %v6460_v46, %v6604_v42  ;;  %v6608_v54 = vsel %vm14086_vm2, %v6461_v56, %v6607_v37  ;;  %v6444_v24 = vor.u32 %v6442_v0, %v6441_v25  ;;  %v6445_v61 = vrot.slane %v6441_v25, 4  ;;  %v6601_v37 = vld [vmem:[#allocation3 + $0x34] sm:$0x1] }
 0x315   : > { %6606 = vst [vmem:[#allocation3 + $0x38] sm:$0xf] %v6605_v4  ;;  %6609 = vst [vmem:[#allocation3 + $0x3c] sm:$0x1] %v6608_v54  ;;  %v6463_v22 = vshrl.u32 %v10887_v51, 16  ;;  %v6466_v53 = vshll.u32 %v10887_v51, 16  ;;  %v10885_v9 = vpack.c.bf16 %v6236_v8, %v6236_v8  ;;  %v6223_v47 = vadd.f32 %v14519_v52, %v6200_v26  ;;  %v6177_v20 = vpop.f32.mrf.mxu1 }
 0x316   : > { %v6241_v15 = vmax.f32 %v6225_v49, 0.0  ;;  %v6593_v18 = vsel %vm14571_vm5, %v6444_v24, %v6592_v19  ;;  %v6596_v32 = vsel %vm14086_vm2, %v6445_v61, %v6595_v14  ;;  %v6226_v34 = vadd.f32 %v14519_v52, %v6203_v57  ;;  %v6628_v51 = vld [vmem:[#allocation3 + $0x68] sm:$0xf]  ;;  %v6631_v54 = vld [vmem:[#allocation3 + $0x6c] sm:$0x1] }
 0x317   : > { %6594 = vst [vmem:[#allocation3 + $0x28] sm:$0xf] %v6593_v18  ;;  %6597 = vst [vmem:[#allocation3 + $0x2c] sm:$0x1] %v6596_v32  ;;  %v6465_v16 = vrot.slane %v6463_v22, 7  ;;  %v6447_v21 = vshrl.u32 %v10885_v9, 16  ;;  %v6201_v60 = vadd.f32 %v6164_v44, %v14558_v10  ;;  %v6206_v30 = vadd.f32 %v11547_v33, %v14560_v11  ;;  %v11548_v26 = vpop.f32.mrf.mxu1 }
 0x318   : > { %v6450_v58 = vshll.u32 %v10885_v9, 16  ;;  %v10890_v41 = vpack.c.bf16 %v6241_v15, %v6241_v15  ;;  %v6239_v62 = vmax.f32 %v6223_v47, 0.0  ;;  %v6242_v36 = vmax.f32 %v6226_v34, 0.0  ;;  %v6616_v15 = vld [vmem:[#allocation3 + $0x58] sm:$0xf] }
 0x319   : > { %v6468_v0 = vor.u32 %v6466_v53, %v6465_v16  ;;  %v6469_v17 = vrot.slane %v6465_v16, 4  ;;  %v6449_v48 = vrot.slane %v6447_v21, 7  ;;  %v6224_v56 = vadd.f32 %v14519_v52, %v6201_v60  ;;  %v6619_v18 = vld [vmem:[#allocation3 + $0x5c] sm:$0x1] }
 0x31a   : > { %v6487_v42 = vshrl.u32 %v10890_v41, 16  ;;  %v6490_v6 = vshll.u32 %v10890_v41, 16  ;;  %v10888_v63 = vpack.c.bf16 %v6239_v62, %v6239_v62  ;;  %v10891_v46 = vpack.c.bf16 %v6242_v36, %v6242_v36  ;;  %v6637_v62 = vld [vmem:[#allocation3 + $0x74] sm:$0x1] }
 0x31b   : > { %v6611_v25 = vsel %vm14571_vm5, %v6468_v0, %v6610_v5  ;;  %v6614_v10 = vsel %vm14086_vm2, %v6469_v17, %v6613_v43  ;;  %v6452_v44 = vor.u32 %v6450_v58, %v6449_v48  ;;  %v6453_v11 = vrot.slane %v6449_v48, 4  ;;  %v6634_v43 = vld [vmem:[#allocation3 + $0x70] sm:$0xf]  ;;  %v6665_v17 = vld [vmem:[#allocation3 + $0x8] sm:$0xf] }
 0x31c   : > { %6612 = vst [vmem:[#allocation3 + $0x40] sm:$0xf] %v6611_v25  ;;  %6615 = vst [vmem:[#allocation3 + $0x44] sm:$0x1] %v6614_v10  ;;  %v6489_v19 = vrot.slane %v6487_v42, 7  ;;  %v6471_v14 = vshrl.u32 %v10888_v63, 16  ;;  %v6229_v47 = vadd.f32 %v14519_v52, %v6206_v30  ;;  %v6204_v34 = vadd.f32 %v6177_v20, %v14562_v31 }
 0x31d   : > { %v6474_v8 = vshll.u32 %v10888_v63, 16  ;;  %v6495_v49 = vshrl.u32 %v10891_v46, 16  ;;  %v6599_v57 = vsel %vm14571_vm5, %v6452_v44, %v6598_v2  ;;  %v6602_v4 = vsel %vm14086_vm2, %v6453_v11, %v6601_v37 }
 0x31e   : > { %v6498_v24 = vshll.u32 %v10891_v46, 16  ;;  %v6240_v61 = vmax.f32 %v6224_v56, 0.0  ;;  %6600 = vst [vmem:[#allocation3 + $0x30] sm:$0xf] %v6599_v57  ;;  %6603 = vst [vmem:[#allocation3 + $0x34] sm:$0x1] %v6602_v4  ;;  %v6492_v33 = vor.u32 %v6490_v6, %v6489_v19  ;;  %v6207_v16 = vadd.f32 %v11548_v26, %v14565_v27 }
 0x31f   : > { %v6493_v22 = vrot.slane %v6489_v19, 4  ;;  %v6473_v53 = vrot.slane %v6471_v14, 7  ;;  %v6497_v9 = vrot.slane %v6495_v49, 7  ;;  %v6245_v20 = vmax.f32 %v6229_v47, 0.0  ;;  %v6622_v6 = vld [vmem:[#allocation3 + $0x60] sm:$0xf]  ;;  %v6180_v49 = vpop.f32.mrf.mxu1 }
 0x320   : > { %v10889_v32 = vpack.c.bf16 %v6240_v61, %v6240_v61  ;;  %v6629_v5 = vsel %vm14571_vm5, %v6492_v33, %v6628_v51  ;;  %v6227_v48 = vadd.f32 %v14519_v52, %v6204_v34  ;;  %v6230_v63 = vadd.f32 %v14519_v52, %v6207_v16  ;;  %v6625_v46 = vld [vmem:[#allocation3 + $0x64] sm:$0x1]  ;;  %v15919_v14 = vld [vmem:[#allocation38_spill] sm:$0xff]  ;;  %v6667_v16 = vld [vmem:[#allocation3 + $0x18] sm:$0xf] }
 0x321   : > { %v6632_v21 = vsel %vm14086_vm2, %v6493_v22, %v6631_v54  ;;  %v6476_v58 = vor.u32 %v6474_v8, %v6473_v53  ;;  %v6477_v41 = vrot.slane %v6473_v53, 4  ;;  %6630 = vst [vmem:[#allocation3 + $0x68] sm:$0xf] %v6629_v5  ;;  %v6500_v36 = vor.u32 %v6498_v24, %v6497_v9  ;;  %v14640_v26 = vld [vmem:[#allocation3 + $0x10] sm:$0xf] }
 0x322   : > { %6633 = vst [vmem:[#allocation3 + $0x6c] sm:$0x1] %v6632_v21  ;;  %v6501_v60 = vrot.slane %v6497_v9, 4  ;;  %v6479_v0 = vshrl.u32 %v10889_v32, 16  ;;  %v6482_v30 = vshll.u32 %v10889_v32, 16  ;;  %v10894_v56 = vpack.c.bf16 %v6245_v20, %v6245_v20 }
 0x323   : > { %v6617_v31 = vsel %vm14571_vm5, %v6476_v58, %v6616_v15  ;;  %v6620_v27 = vsel %vm14086_vm2, %v6477_v41, %v6619_v18  ;;  %v6635_v2 = vsel %vm14571_vm5, %v6500_v36, %v6634_v43  ;;  %v6243_v25 = vmax.f32 %v6227_v48, 0.0  ;;  %v6652_v22 = vld [vmem:[#allocation3 + $0x88] sm:$0xf]  ;;  %v6655_v53 = vld [vmem:[#allocation3 + $0x8c] sm:$0x1] }
 0x324   : > { %6618 = vst [vmem:[#allocation3 + $0x58] sm:$0xf] %v6617_v31  ;;  %6621 = vst [vmem:[#allocation3 + $0x5c] sm:$0x1] %v6620_v27  ;;  %v6638_v42 = vsel %vm14086_vm2, %v6501_v60, %v6637_v62  ;;  %v6481_v37 = vrot.slane %v6479_v0, 7  ;;  %v6719_v10 = vshrl.u32 %v6665_v17, 16  ;;  %v10572_v8 = vcombine.low %v15919_v14, %v6665_v17 }
 0x325   : > { %6636 = vst [vmem:[#allocation3 + $0x70] sm:$0xf] %v6635_v2  ;;  %6639 = vst [vmem:[#allocation3 + $0x74] sm:$0x1] %v6638_v42  ;;  %v6722_v44 = vshll.u32 %v6665_v17, 16  ;;  %v6246_v51 = vmax.f32 %v6230_v63, 0.0  ;;  %v10892_v54 = vpack.c.bf16 %v6243_v25, %v6243_v25  ;;  %v6205_v34 = vadd.f32 %v6180_v49, %v14567_v29 }
 0x326   : > { %v6484_v11 = vor.u32 %v6482_v30, %v6481_v37  ;;  %v6485_v19 = vrot.slane %v6481_v37, 4  ;;  %v6519_v57 = vshrl.u32 %v10894_v56, 16  ;;  %v6522_v4 = vshll.u32 %v10894_v56, 16  ;;  %11581 = vmatprep.mubr.msk.bf16.mxu1 %vm6985_vm6, %v10572_v8  ;;  %v6640_v5 = vld [vmem:[#allocation3 + $0x78] sm:$0xf]  ;;  %v11900_v14 = vld [vmem:[%s15748_s5 + $0x70] sm:$0xff]  }
 0x327   : > { %v14642_v24 = vrot.slane %v6719_v10, 4  ;;  %v10895_v9 = vpack.c.bf16 %v6246_v51, %v6246_v51  ;;  %v14648_v15 = vrot.slane %v6722_v44, 5  ;;  %v6503_v32 = vshrl.u32 %v10892_v54, 16  ;;  %v6643_v21 = vld [vmem:[#allocation3 + $0x7c] sm:$0x1] }
 0x328   : > { %v6623_v61 = vsel %vm14571_vm5, %v6484_v11, %v6622_v6  ;;  %v6626_v33 = vsel %vm14086_vm2, %v6485_v19, %v6625_v46  ;;  %v6521_v18 = vrot.slane %v6519_v57, 7  ;;  %v6506_v47 = vshll.u32 %v10892_v54, 16  ;;  %v6658_v30 = vld [vmem:[#allocation3 + $0x90] sm:$0xf]  ;;  %v6661_v17 = vld [vmem:[#allocation3 + $0x94] sm:$0x1] }
 0x329   : > { %6624 = vst [vmem:[#allocation3 + $0x60] sm:$0xf] %v6623_v61  ;;  %6627 = vst [vmem:[#allocation3 + $0x64] sm:$0x1] %v6626_v33  ;;  %v6527_v58 = vshrl.u32 %v10895_v9, 16  ;;  %v6530_v41 = vshll.u32 %v10895_v9, 16  ;;  %v6228_v31 = vadd.f32 %v14519_v52, %v6205_v34  ;;  %v10573_v51 = vcombine.low %v14640_v26, %v6667_v16 }
 0x32a   : > { %v6733_v43 = vshrl.u32 %v14640_v26, 16  ;;  %v6736_v62 = vshll.u32 %v14640_v26, 16  ;;  %v6524_v36 = vor.u32 %v6522_v4, %v6521_v18  ;;  %v6525_v60 = vrot.slane %v6521_v18, 4  ;;  %v6668_v2 = vld [vmem:[#allocation3 + $0x20] sm:$0xf] }
 0x32b   : > { %v6505_v0 = vrot.slane %v6503_v32, 7  ;;  %v6529_v27 = vrot.slane %v6527_v58, 7  ;;  %v6747_v48 = vshrl.u32 %v6667_v16, 16  ;;  %v6669_v46 = vld [vmem:[#allocation3 + $0x28] sm:$0xf]  ;;  %v6244_v25 = vmax.f32 %v6228_v31, 0.0  ;;  %11582 = vmatmul.mubr.msk.bf16.vlgmr.msra.gmra.mxu1 %vm6985_vm6, %v10573_v51 }
 0x32c   : > { %v14655_v20 = vrot.slane %v6733_v43, 4  ;;  %v14657_v29 = vrot.slane %v6736_v62, 5  ;;  %v6653_v42 = vsel %vm14571_vm5, %v6524_v36, %v6652_v22  ;;  %v6656_v37 = vsel %vm14086_vm2, %v6525_v60, %v6655_v53  ;;  %v14677_v54 = vld [vmem:[#allocation3 + $0xc] sm:$0x1]  ;;  %v6670_v61 = vld [vmem:[#allocation3 + $0x30] sm:$0xf] }
 0x32d   : > { %v6508_v6 = vor.u32 %v6506_v47, %v6505_v0  ;;  %v6509_v63 = vrot.slane %v6505_v0, 4  ;;  %6654 = vst [vmem:[#allocation3 + $0x88] sm:$0xf] %v6653_v42  ;;  %6657 = vst [vmem:[#allocation3 + $0x8c] sm:$0x1] %v6656_v37  ;;  %v6532_v56 = vor.u32 %v6530_v41, %v6529_v27  ;;  %v6533_v52 = vrot.slane %v6529_v27, 4 }
 0x32e   : > { %v14663_v10 = vrot.slane %v6747_v48, 4  ;;  %v6750_v19 = vshll.u32 %v6667_v16, 16  ;;  %v10893_v57 = vpack.c.bf16 %v6244_v25, %v6244_v25  ;;  %v6761_v4 = vshrl.u32 %v6668_v2, 16  ;;  %v6671_v34 = vld [vmem:[#allocation3 + $0x38] sm:$0xf]  ;;  %v15920_v16 = vld [vmem:[#allocation30_spill] sm:$0xff] }
 0x32f   : > { %v6641_v44 = vsel %vm14571_vm5, %v6508_v6, %v6640_v5  ;;  %v6644_v11 = vsel %vm14086_vm2, %v6509_v63, %v6643_v21  ;;  %v6659_v8 = vsel %vm14571_vm5, %v6532_v56, %v6658_v30  ;;  %v6662_v49 = vsel %vm14086_vm2, %v6533_v52, %v6661_v17  ;;  %11622 = vmatpush3.bf16.msra.mxu1 %v15920_v16  ;;  %v6646_v5 = vld [vmem:[#allocation3 + $0x80] sm:$0xf]  ;;  %v11903_v62 = vld [vmem:[%s15748_s5 + $0x68] sm:$0xff]   ;;  %v6649_v60 = vld [vmem:[#allocation3 + $0x84] sm:$0x1] }
 0x330   : > { %6642 = vst [vmem:[#allocation3 + $0x78] sm:$0xf] %v6641_v44  ;;  %6645 = vst [vmem:[#allocation3 + $0x7c] sm:$0x1] %v6644_v11  ;;  %v6752_v26 = vrot.slane %v6750_v19, 5  ;;  %v6764_v33 = vshll.u32 %v6668_v2, 16  ;;  %v10574_v47 = vcombine.low %v6668_v2, %v6669_v46  ;;  %v6725_v43 = vor.u32 %v14648_v15, %v14642_v24  ;;  %11623 = vmatprep.subr.bf16.mxu1 %v11900_v14 }
 0x331   : > { %6660 = vst [vmem:[#allocation3 + $0x90] sm:$0xf] %v6659_v8  ;;  %6663 = vst [vmem:[#allocation3 + $0x94] sm:$0x1] %v6662_v49  ;;  %v6775_v22 = vshrl.u32 %v6669_v46, 16  ;;  %v6778_v53 = vshll.u32 %v6669_v46, 16  ;;  %v10575_v2 = vcombine.low %v6670_v61, %v6671_v34  ;;  %v6739_v25 = vor.u32 %v14657_v29, %v14655_v20 }
 0x332   : > { %v6511_v9 = vshrl.u32 %v10893_v57, 16  ;;  %v6514_v18 = vshll.u32 %v10893_v57, 16  ;;  %v14680_v32 = vrot.slane %v6761_v4, 4  ;;  %v14683_v21 = vrot.slane %v6764_v33, 5  ;;  %11585 = vmatprep.mubr.msk.bf16.mxu1 %vm6985_vm6, %v10574_v47  ;;  %v14696_v42 = vld [vmem:[#allocation3 + $0x14] sm:$0x1] }
 0x333   : > { %v14685_v58 = vrot.slane %v6775_v22, 4  ;;  %v14687_v41 = vrot.slane %v6778_v53, 5  ;;  %v6728_v0 = vshll.u32 %v14677_v54, 16  ;;  %v6789_v30 = vshrl.u32 %v6670_v61, 16  ;;  %v14700_v63 = vld [vmem:[#allocation3 + $0x1c] sm:$0x1]  ;;  %11624 = vmatpush3.bf16.msra.mxu1 %v11900_v14 }
 0x334   : > { %v6513_v36 = vrot.slane %v6511_v9, 7  ;;  %v6792_v17 = vshll.u32 %v6670_v61, 16  ;;  %v6726_v31 = vrot.slane %v6725_v43, 4  ;;  %v6803_v27 = vshrl.u32 %v6671_v34, 16  ;;  %v6673_v44 = vld [vmem:[#allocation3 + $0x58] sm:$0xf]  ;;  %11625 = vmatprep.subr.bf16.mxu1 %v11903_v62  ;;  %11586 = vmatmul.mubr.msk.bf16.gmra.mxu1 %vm6985_vm6, %v10575_v2 }
 0x335   : > { %v6806_v48 = vshll.u32 %v6671_v34, 16  ;;  %v6730_v37 = vrot.slane %v6728_v0, 5  ;;  %v14698_v6 = vrot.slane %v6789_v30, 4  ;;  %v11905_v11 = vld [vmem:[%s15748_s5 + $0x60] sm:$0xff]   ;;  %v6742_v8 = vshll.u32 %v14696_v42, 16  ;;  %v15921_v33 = vld [vmem:[#allocation15_spill] sm:$0xff] }
 0x336   : > { %v6516_v24 = vor.u32 %v6514_v18, %v6513_v36  ;;  %v6517_v15 = vrot.slane %v6513_v36, 4  ;;  %v14702_v46 = vrot.slane %v6792_v17, 5  ;;  %v14704_v56 = vrot.slane %v6803_v27, 4  ;;  %v14720_v49 = vld [vmem:[#allocation3 + $0x24] sm:$0x1]  ;;  %v11897_v17 = vld [vmem:[%s15748_s5 + $0x50] sm:$0xff]  }
 0x337   : > { %v14706_v52 = vrot.slane %v6806_v48, 5  ;;  %v6731_v14 = vsel %vm12114_vm4, %v6726_v31, %v6730_v37  ;;  %v6740_v39 = vrot.slane %v6739_v25, 4  ;;  %v6753_v50 = vor.u32 %v6752_v26, %v14663_v10  ;;  %v14731_v53 = vld [vmem:[#allocation3 + $0x2c] sm:$0x1]  ;;  %11626 = vmatpush3.bf16.msra.mxu1 %v11903_v62  ;;  %v6674_v10 = vld [vmem:[#allocation3 + $0x60] sm:$0xf] }
 0x338   : > { %v6647_v19 = vsel %vm14571_vm5, %v6516_v24, %v6646_v5  ;;  %v6650_v51 = vsel %vm14086_vm2, %v6517_v15, %v6649_v60  ;;  %v10552_v20 = vcombine.low %v6717_v55, %v6731_v14  ;;  %v6756_v29 = vshll.u32 %v14700_v63, 16  ;;  %11627 = vmatprep.subr.bf16.mxu1 %v11905_v11  ;;  %v14740_v26 = vld [vmem:[%s15748_s5 + $0xb8] sm:$0xff]   ;;  %v6675_v16 = vld [vmem:[#allocation3 + $0x68] sm:$0xf]  ;;  %v14757_v31 = vld [vmem:[#allocation3 + $0x34] sm:$0x1] }
 0x339   : > { %6648 = vst [vmem:[#allocation3 + $0x80] sm:$0xf] %v6647_v19  ;;  %6651 = vst [vmem:[#allocation3 + $0x84] sm:$0x1] %v6650_v51  ;;  %v6744_v57 = vrot.slane %v6742_v8, 5  ;;  %v6831_v4 = vshrl.u32 %v6673_v44, 16  ;;  %v10576_v22 = vcombine.low %v15921_v33, %v6673_v44  ;;  %v6767_v7 = vor.u32 %v14683_v21, %v14680_v32 }
 0x33a   : > { %v6834_v61 = vshll.u32 %v6673_v44, 16  ;;  %11557 = vmatprep.mubr.msk.bf16.mxu0 %vm6985_vm6, %v10552_v20  ;;  %v6754_v9 = vrot.slane %v6753_v50, 4  ;;  %v6758_v23 = vrot.slane %v6756_v29, 5  ;;  %v6770_v55 = vshll.u32 %v14720_v49, 16  ;;  %v14761_v2 = vld [vmem:[#allocation3 + $0x3c] sm:$0x1] }
 0x33b   : > { %v6745_v18 = vsel %vm12114_vm4, %v6740_v39, %v6744_v57  ;;  %v14744_v47 = vrot.slane %v6831_v4, 4  ;;  %11589 = vmatprep.mubr.msk.bf16.mxu1 %vm6985_vm6, %v10576_v22  ;;  %v6781_v32 = vor.u32 %v14687_v41, %v14685_v58  ;;  %v6768_v21 = vrot.slane %v6767_v7, 4  ;;  %11628 = vmatpush3.bf16.msra.mxu1 %v11905_v11  ;;  %v6676_v44 = vld [vmem:[#allocation3 + $0x70] sm:$0xf]  ;;  %v6677_v11 = vld [vmem:[#allocation3 + $0x78] sm:$0xf] }
 0x33c   : > { %v14746_v34 = vrot.slane %v6834_v61, 5  ;;  %v6759_v5 = vsel %vm12114_vm4, %v6754_v9, %v6758_v23  ;;  %v6772_v43 = vrot.slane %v6770_v55, 5  ;;  %v6784_v62 = vshll.u32 %v14731_v53, 16  ;;  %11669 = vmatprep.subr.bf16.mxu1 %v14740_v26  ;;  %v11952_v19 = vld [vmem:[%s15748_s5 + $0x58] sm:$0xff]   ;;  %v11902_v57 = vld [vmem:[%s15748_s5 + $0x48] sm:$0xff]  }
 0x33d   : > { %v10553_v36 = vcombine.low %v6745_v18, %v6759_v5  ;;  %v6782_v60 = vrot.slane %v6781_v32, 4  ;;  %v6845_v0 = vshrl.u32 %v6674_v10, 16  ;;  %v6848_v30 = vshll.u32 %v6674_v10, 16  ;;  %v14785_v29 = vld [vmem:[#allocation3 + $0x5c] sm:$0x1] }
 0x33e   : > { %v6773_v58 = vsel %vm12114_vm4, %v6768_v21, %v6772_v43  ;;  %v6786_v41 = vrot.slane %v6784_v62, 5  ;;  %v6859_v27 = vshrl.u32 %v6675_v16, 16  ;;  %v6862_v48 = vshll.u32 %v6675_v16, 16  ;;  %v6679_v9 = vld [vmem:[#allocation3 + $0x88] sm:$0xf] }
 0x33f   : > { %11558 = vmatmul.mubr.msk.bf16.vlgmr.msra.gmra.mxu0 %vm6985_vm6, %v10553_v36  ;;  %v14765_v24 = vrot.slane %v6845_v0, 4  ;;  %v14767_v15 = vrot.slane %v6848_v30, 5  ;;  %v10577_v37 = vcombine.low %v6674_v10, %v6675_v16  ;;  %v6795_v25 = vor.u32 %v14702_v46, %v14698_v6 }
 0x340   : > { %11598 = vmatpush3.bf16.msra.mxu0 %v11952_v19  ;;  %v6787_v51 = vsel %vm12114_vm4, %v6782_v60, %v6786_v41  ;;  %v14776_v14 = vrot.slane %v6859_v27, 4  ;;  %v14778_v8 = vrot.slane %v6862_v48, 5  ;;  %v6798_v20 = vshll.u32 %v14757_v31, 16  ;;  %v11906_v41 = vld [vmem:[%s15748_s5 + $0x40] sm:$0xff]  }
 0x341   : > { %v10554_v39 = vcombine.low %v6773_v58, %v6787_v51  ;;  %11590 = vmatmul.mubr.msk.bf16.gmra.mxu1 %vm6985_vm6, %v10577_v37  ;;  %11599 = vmatprep.subr.bf16.mxu0 %v11897_v17  ;;  %v6796_v6 = vrot.slane %v6795_v25, 4  ;;  %v6809_v46 = vor.u32 %v14706_v52, %v14704_v56  ;;  %v6812_v50 = vshll.u32 %v14761_v2, 16  ;;  %v6678_v56 = vld [vmem:[#allocation3 + $0x80] sm:$0xf]  ;;  %v11904_v58 = vld [vmem:[#allocation3 + $0x8] ss:$8 sps:$4 sm:$0xff]  }
 0x342   : > { %v6800_v4 = vrot.slane %v6798_v20, 5  ;;  %v6873_v61 = vshrl.u32 %v6676_v44, 16  ;;  %v6876_v33 = vshll.u32 %v6676_v44, 16  ;;  %v6887_v22 = vshrl.u32 %v6677_v11, 16  ;;  %v14809_v51 = vld [vmem:[#allocation3 + $0x74] sm:$0x1] }
 0x343   : > { %11561 = vmatprep.mubr.msk.bf16.mxu0 %vm6985_vm6, %v10554_v39  ;;  %v6810_v23 = vrot.slane %v6809_v46, 4  ;;  %v6814_v7 = vrot.slane %v6812_v50, 5  ;;  %v6890_v55 = vshll.u32 %v6677_v11, 16  ;;  %v10578_v10 = vcombine.low %v6676_v44, %v6677_v11  ;;  %v14804_v44 = vld [vmem:[#allocation3 + $0x6c] sm:$0x1] }
 0x344   : > { %v6801_v52 = vsel %vm12114_vm4, %v6796_v6, %v6800_v4  ;;  %11600 = vmatpush3.bf16.msra.mxu0 %v11897_v17  ;;  %v6875_v18 = vrot.slane %v6873_v61, 4  ;;  %v6878_v32 = vrot.slane %v6876_v33, 5  ;;  %v6889_v16 = vrot.slane %v6887_v22, 4  ;;  %v14799_v17 = vld [vmem:[#allocation3 + $0x64] sm:$0x1] }
 0x345   : > { %v6815_v5 = vsel %vm12114_vm4, %v6810_v23, %v6814_v7  ;;  %v6892_v21 = vrot.slane %v6890_v55, 5  ;;  %11593 = vmatprep.mubr.msk.bf16.mxu1 %vm6985_vm6, %v10578_v10  ;;  %v6837_v43 = vor.u32 %v14746_v34, %v14744_v47  ;;  %v6840_v62 = vshll.u32 %v14785_v29, 16  ;;  %11601 = vmatprep.subr.bf16.mxu0 %v11902_v57  ;;  %v14817_v50 = vld [vmem:[#allocation3 + $0x7c] sm:$0x1]  ;;  %v14826_v33 = vld [vmem:[#allocation3 + $0x84] sm:$0x1] }
 0x346   : > { %v10555_v36 = vcombine.low %v6801_v52, %v6815_v5  ;;  %v6901_v60 = vshrl.u32 %v6678_v56, 16  ;;  %v6904_v0 = vshll.u32 %v6678_v56, 16  ;;  %v6915_v30 = vshrl.u32 %v6679_v9, 16  ;;  %v14836_v23 = vld [vmem:[#allocation3 + $0x8c] sm:$0x1] }
 0x347   : > { %v6838_v27 = vrot.slane %v6837_v43, 4  ;;  %v6842_v48 = vrot.slane %v6840_v62, 5  ;;  %v6918_v37 = vshll.u32 %v6679_v9, 16  ;;  %v10579_v25 = vcombine.low %v6678_v56, %v6679_v9  ;;  %v7294_v62 = vld [vmem:[#allocation3 + $0x10] sm:$0xe] }
 0x348   : > { %11562 = vmatmul.mubr.msk.bf16.gmra.mxu0 %vm6985_vm6, %v10555_v36  ;;  %v6903_v47 = vrot.slane %v6901_v60, 4  ;;  %v6906_v34 = vrot.slane %v6904_v0, 5  ;;  %v6917_v11 = vrot.slane %v6915_v30, 4  ;;  %v6851_v19 = vor.u32 %v14767_v15, %v14765_v24  ;;  %v7295_v36 = vld [vmem:[#allocation3 + $0x18] sm:$0xe] }
 0x349   : > { %v6843_v20 = vsel %vm12114_vm4, %v6838_v27, %v6842_v48  ;;  %v6920_v39 = vrot.slane %v6918_v37, 5  ;;  %11594 = vmatmul.mubr.msk.bf16.gmra.mxu1 %vm6985_vm6, %v10579_v25  ;;  %v6854_v6 = vshll.u32 %v14799_v17, 16  ;;  %v6865_v46 = vor.u32 %v14778_v8, %v14776_v14  ;;  %11602 = vmatpush3.bf16.msra.mxu0 %v11902_v57  ;;  %v14831_v14 = vld [vmem:[%s15748_s5 + $0x98] sm:$0xff]   ;;  %v7296_v27 = vld [vmem:[#allocation3 + $0x20] sm:$0xe] }
 0x34a   : > { %v10556_v24 = vcombine.low %v6829_v1, %v6843_v20  ;;  %v6852_v15 = vrot.slane %v6851_v19, 4  ;;  %v6868_v4 = vshll.u32 %v14804_v44, 16  ;;  %11629 = vmatprep.mubr.msk.bf16.mxu1 %vm6985_vm6, %v11904_v58  ;;  %v6879_v61 = vor.u32 %v6878_v32, %v6875_v18  ;;  %11603 = vmatprep.subr.bf16.mxu0 %v11906_v41  ;;  %v7293_v18 = vld [vmem:[#allocation3 + $0x8] sm:$0xe]  ;;  %v11916_v32 = vld [vmem:[%s15748_s5 + $0xb0] sm:$0xff]  }
 0x34b   : > { %v6856_v8 = vrot.slane %v6854_v6, 5  ;;  %v6866_v57 = vrot.slane %v6865_v46, 4  ;;  %v6882_v22 = vshll.u32 %v14809_v51, 16  ;;  %v6893_v12 = vor.u32 %v6892_v21, %v6889_v16  ;;  %v11907_v30 = vld [vmem:[#allocation3 + $0x18] ss:$8 sps:$4 sm:$0xff]  }
 0x34c   : > { %11565 = vmatprep.mubr.msk.bf16.mxu0 %vm6985_vm6, %v10556_v24  ;;  %v6870_v3 = vrot.slane %v6868_v4, 5  ;;  %v6880_v1 = vrot.slane %v6879_v61, 4  ;;  %v6896_v9 = vshll.u32 %v14817_v50, 16  ;;  %v6907_v7 = vor.u32 %v6906_v34, %v6903_v47  ;;  %v11908_v25 = vld [vmem:[#allocation3 + $0x28] ss:$8 sps:$4 sm:$0xff]  }
 0x34d   : > { %v6857_v55 = vsel %vm12114_vm4, %v6852_v15, %v6856_v8  ;;  %v6884_v10 = vrot.slane %v6882_v22, 5  ;;  %v6894_v56 = vrot.slane %v6893_v12, 4  ;;  %v6910_v52 = vshll.u32 %v14826_v33, 16  ;;  %11604 = vmatpush3.bf16.msra.mxu0 %v11906_v41  ;;  %v7297_v6 = vld [vmem:[#allocation3 + $0x28] sm:$0xe] }
 0x34e   : > { %v6871_v16 = vsel %vm12114_vm4, %v6866_v57, %v6870_v3  ;;  %v6898_v5 = vrot.slane %v6896_v9, 5  ;;  %v6908_v21 = vrot.slane %v6907_v7, 4  ;;  %v6921_v43 = vor.u32 %v6920_v39, %v6917_v11  ;;  %11645 = vmatprep.subr.bf16.mxu0 %v14831_v14  ;;  %v7298_v4 = vld [vmem:[#allocation3 + $0x30] sm:$0xe]  ;;  %v11919_v61 = vld [vmem:[%s15748_s5 + $0xa8] sm:$0xff]  }
 0x34f   : > { %v10557_v60 = vcombine.low %v6857_v55, %v6871_v16  ;;  %v6885_v0 = vsel %vm12114_vm4, %v6880_v1, %v6884_v10  ;;  %v6912_v58 = vrot.slane %v6910_v52, 5  ;;  %v6924_v41 = vshll.u32 %v14836_v23, 16  ;;  %v7299_v12 = vld [vmem:[#allocation3 + $0x38] sm:$0xe]  ;;  %v14892_v55 = vld [vmem:[#allocation3 + $0xc] sm:$0x1] }
 0x350   : > { %v6899_v48 = vsel %vm12114_vm4, %v6894_v56, %v6898_v5  ;;  %v6922_v37 = vrot.slane %v6921_v43, 4  ;;  %v10593_v47 = vrot.slane %v7293_v18, 9  ;;  %v7346_v34 = vrot.slane %v14677_v54, 5  ;;  %v14896_v16 = vld [vmem:[#allocation3 + $0x14] sm:$0x1] }
 0x351   : > { %11566 = vmatmul.mubr.msk.bf16.gmra.mxu0 %vm6985_vm6, %v10557_v60  ;;  %v10558_v11 = vcombine.low %v6885_v0, %v6899_v48  ;;  %11630 = vmatmul.mubr.msk.bf16.vlgmr.msra.gmra.mxu1 %vm6985_vm6, %v11907_v30  ;;  %v6913_v19 = vsel %vm12114_vm4, %v6908_v21, %v6912_v58  ;;  %v6926_v20 = vrot.slane %v6924_v41, 5  ;;  %v10594_v39 = vrot.slane %v7294_v62, 9  ;;  %v8275_v5 = vld [vmem:[#allocation3 + $0x10] sm:$0xe]  ;;  %v11909_v21 = vld [vmem:[#allocation3 + $0x38] ss:$8 sps:$4 sm:$0xff]  }
 0x352   : > { %11633 = vmatprep.mubr.msk.bf16.mxu1 %vm6985_vm6, %v11908_v25  ;;  %v7347_v46 = vsel %vm12231_vm7, %v10593_v47, %v7346_v34  ;;  %v7350_v24 = vrot.slane %v14696_v42, 5  ;;  %v10595_v15 = vrot.slane %v7295_v36, 9  ;;  %v7354_v54 = vrot.slane %v14700_v63, 5  ;;  %11670 = vmatpush3.bf16.msra.mxu1 %v14740_v26  ;;  %v7301_v42 = vld [vmem:[#allocation3 + $0x58] sm:$0xe] }
 0x353   : > { %11569 = vmatprep.mubr.msk.bf16.mxu0 %vm6985_vm6, %v10558_v11  ;;  %v6927_v8 = vsel %vm12114_vm4, %v6922_v37, %v6926_v20  ;;  %v10596_v57 = vrot.slane %v7296_v27, 9  ;;  %v7358_v22 = vrot.slane %v14720_v49, 5  ;;  %v14876_v63 = vsel %vm12231_vm7, %v10600_v28, %v7374_v35  ;;  %11671 = vmatprep.subr.bf16.mxu1 %v11916_v32  ;;  %v7302_v49 = vld [vmem:[#allocation3 + $0x60] sm:$0xe]  ;;  %v7303_v28 = vld [vmem:[#allocation3 + $0x68] sm:$0xe] }
 0x354   : > { %v10559_v26 = vcombine.low %v6913_v19, %v6927_v8  ;;  %v10616_v3 = vcombine.low %v14524_v45, %v7347_v46  ;;  %v14881_v1 = vsel %vm12231_vm7, %v10594_v39, %v7350_v24  ;;  %v10597_v9 = vrot.slane %v7297_v6, 9  ;;  %v8274_v45 = vld [vmem:[#allocation3 + $0x8] sm:$0xe]  ;;  %v7304_v30 = vld [vmem:[#allocation3 + $0x70] sm:$0xe] }
 0x355   : > { %v14885_v7 = vsel %vm12231_vm7, %v10595_v15, %v7354_v54  ;;  %v14889_v59 = vsel %vm12231_vm7, %v10596_v57, %v7358_v22  ;;  %v7362_v38 = vrot.slane %v14731_v53, 5  ;;  %v10598_v35 = vrot.slane %v7298_v4, 9  ;;  %v14915_v58 = vld [vmem:[#allocation3 + $0x1c] sm:$0x1]  ;;  %v7305_v37 = vld [vmem:[#allocation3 + $0x78] sm:$0xe] }
 0x356   : > { %v7366_v10 = vrot.slane %v14757_v31, 5  ;;  %v10599_v56 = vrot.slane %v7299_v12, 9  ;;  %v7370_v52 = vrot.slane %v14761_v2, 5  ;;  %v10601_v18 = vrot.slane %v7301_v42, 9  ;;  %11672 = vmatpush3.bf16.msra.mxu1 %v11916_v32  ;;  %v11911_v2 = vld [vmem:[#allocation3 + $0x58] ss:$8 sps:$4 sm:$0xff]  }
 0x357   : > { %v14900_v43 = vsel %vm12231_vm7, %v10597_v9, %v7362_v38  ;;  %v7378_v53 = vrot.slane %v14785_v29, 5  ;;  %11673 = vmatprep.subr.bf16.mxu1 %v11919_v61  ;;  %v10602_v62 = vrot.slane %v7302_v49, 9  ;;  %v7382_v36 = vrot.slane %v14799_v17, 5  ;;  %v11920_v29 = vld [vmem:[%s15748_s5 + $0xa0] sm:$0xff]   ;;  %v8276_v20 = vld [vmem:[#allocation3 + $0x18] sm:$0xe] }
 0x358   : > { %v10617_v31 = vcombine.low %v14881_v1, %v14885_v7  ;;  %v10618_v32 = vcombine.low %v14889_v59, %v14900_v43  ;;  %v14910_v60 = vsel %vm12231_vm7, %v10598_v35, %v7366_v10  ;;  %v10603_v0 = vrot.slane %v7303_v28, 9  ;;  %v14932_v25 = vld [vmem:[#allocation3 + $0x24] sm:$0x1]  ;;  %v8277_v24 = vld [vmem:[#allocation3 + $0x20] sm:$0xe]  ;;  %v11918_v1 = vld [vmem:[%s15748_s5 + $0x88] sm:$0xff]  }
 0x359   : > { %11570 = vmatmul.mubr.msk.bf16.gmra.mxu0 %vm6985_vm6, %v10559_v26  ;;  %11634 = vmatmul.mubr.msk.bf16.gmra.mxu1 %vm6985_vm6, %v11909_v21  ;;  %v14921_v17 = vsel %vm12231_vm7, %v10599_v56, %v7370_v52  ;;  %v14925_v41 = vsel %vm12231_vm7, %v10601_v18, %v7378_v53  ;;  %v14929_v27 = vsel %vm12231_vm7, %v10602_v62, %v7382_v36  ;;  %v7386_v48 = vrot.slane %v14804_v44, 5  ;;  %v7306_v57 = vld [vmem:[#allocation3 + $0x80] sm:$0xe]  ;;  %v11912_v22 = vld [vmem:[#allocation3 + $0x68] ss:$8 sps:$4 sm:$0xff]  }
 0x35a   : > { %11605 = vmatprep.mubr.msk.bf16.mxu0 %vm6985_vm6, %v10616_v3  ;;  %11637 = vmatprep.mubr.msk.bf16.mxu1 %vm6985_vm6, %v11911_v2  ;;  %v10619_v47 = vcombine.low %v14910_v60, %v14921_v17  ;;  %v10692_v34 = vrot.slane %v8274_v45, 9  ;;  %v8324_v11 = vrot.slane %v14892_v55, 5  ;;  %v10693_v19 = vrot.slane %v8275_v5, 9  ;;  %v7307_v3 = vld [vmem:[#allocation3 + $0x88] sm:$0xe] }
 0x35b   : > { %v14941_v39 = vsel %vm12231_vm7, %v10603_v0, %v7386_v48  ;;  %11674 = vmatpush3.bf16.msra.mxu1 %v11919_v61  ;;  %v8328_v44 = vrot.slane %v14896_v16, 5  ;;  %v10604_v6 = vrot.slane %v7304_v30, 9  ;;  %v7390_v46 = vrot.slane %v14809_v51, 5  ;;  %v14953_v61 = vld [vmem:[%s15748_s5 + $0xf8] sm:$0xff]   ;;  %v11913_v51 = vld [vmem:[%s15748_s5 + $0x90] sm:$0xff]  }
 0x35c   : > { %v10620_v15 = vcombine.low %v14876_v63, %v14925_v41  ;;  %v10621_v54 = vcombine.low %v14929_v27, %v14941_v39  ;;  %v10605_v4 = vrot.slane %v7305_v37, 9  ;;  %v7394_v8 = vrot.slane %v14817_v50, 5  ;;  %11675 = vmatprep.subr.bf16.mxu1 %v11920_v29  ;;  %v8278_v9 = vld [vmem:[#allocation3 + $0x28] sm:$0xe]  ;;  %v14976_v45 = vld [vmem:[#allocation3 + $0x2c] sm:$0x1] }
 0x35d   : > { %v14960_v12 = vsel %vm12231_vm7, %v10692_v34, %v8324_v11  ;;  %v14964_v42 = vsel %vm12231_vm7, %v10693_v19, %v8328_v44  ;;  %v10694_v50 = vrot.slane %v8276_v20, 9  ;;  %v8332_v26 = vrot.slane %v14915_v58, 5  ;;  %v8279_v10 = vld [vmem:[#allocation3 + $0x30] sm:$0xe]  ;;  %v14985_v21 = vld [vmem:[#allocation3 + $0x34] sm:$0x1] }
 0x35e   : > { %v14969_v49 = vsel %vm12231_vm7, %v10604_v6, %v7390_v46  ;;  %v14973_v38 = vsel %vm12231_vm7, %v10605_v4, %v7394_v8  ;;  %v10695_v35 = vrot.slane %v8277_v24, 9  ;;  %v8336_v28 = vrot.slane %v14932_v25, 5  ;;  %v7824_v53 = vld [vmem:[#allocation3 + $0x8] sm:$0xf]  ;;  %v7826_v30 = vld [vmem:[#allocation3 + $0x10] sm:$0xf] }
 0x35f   : > { %v10716_v56 = vcombine.low %v14960_v12, %v14964_v42  ;;  %11676 = vmatpush3.bf16.msra.mxu1 %v11920_v29  ;;  %v14982_v52 = vsel %vm12231_vm7, %v10694_v50, %v8332_v26  ;;  %v10606_v18 = vrot.slane %v7306_v57, 9  ;;  %v7398_v5 = vrot.slane %v14826_v33, 5  ;;  %v11915_v33 = vld [vmem:[#allocation3 + $0x78] ss:$8 sps:$4 sm:$0xff]   ;;  %v15003_v34 = vld [vmem:[#allocation3 + $0x3c] sm:$0x1] }
 0x360   : > { %v14989_v62 = vsel %vm12231_vm7, %v10695_v35, %v8336_v28  ;;  %v10607_v36 = vrot.slane %v7307_v3, 9  ;;  %v7402_v2 = vrot.slane %v14836_v23, 5  ;;  %v10696_v0 = vrot.slane %v8278_v9, 9  ;;  %11717 = vmatprep.subr.bf16.mxu1 %v14953_v61  ;;  %v15018_v20 = vld [vmem:[#allocation3 + $0x44] sm:$0x1]  ;;  %v15077_v41 = vld [vmem:[%s15748_s5 + $0xd8] sm:$0xff]  }
 0x361   : > { %11606 = vmatmul.mubr.msk.bf16.vlgmr.msra.gmra.mxu0 %vm6985_vm6, %v10617_v31  ;;  %11638 = vmatmul.mubr.msk.bf16.gmra.mxu1 %vm6985_vm6, %v11912_v22  ;;  %v10622_v29 = vcombine.low %v14969_v49, %v14973_v38  ;;  %v10717_v48 = vcombine.low %v14982_v52, %v14989_v62  ;;  %v8340_v23 = vrot.slane %v14976_v45, 5  ;;  %v10697_v37 = vrot.slane %v8279_v10, 9  ;;  %v8280_v44 = vld [vmem:[#allocation3 + $0x38] sm:$0xe]  ;;  %v8281_v6 = vld [vmem:[#allocation3 + $0x40] sm:$0xe] }
 0x362   : > { %11646 = vmatpush3.bf16.msra.mxu0 %v14831_v14  ;;  %11609 = vmatprep.mubr.msk.bf16.mxu0 %vm6985_vm6, %v10618_v32  ;;  %v15015_v7 = vsel %vm12231_vm7, %v10606_v18, %v7398_v5  ;;  %v8344_v31 = vrot.slane %v14985_v21, 5  ;;  %v7857_v11 = vshrl.u32 %v7824_v53, 16  ;;  %v7860_v19 = vshll.u32 %v7824_v53, 16  ;;  %v7828_v57 = vld [vmem:[#allocation3 + $0x18] sm:$0xf]  ;;  %v11921_v35 = vld [vmem:[%s15748_s5 + $0x80] sm:$0xff]  }
 0x363   : > { %11647 = vmatprep.subr.bf16.mxu0 %v11913_v51  ;;  %11641 = vmatprep.mubr.msk.bf16.mxu1 %vm6985_vm6, %v11915_v33  ;;  %v15023_v14 = vsel %vm12231_vm7, %v10607_v36, %v7402_v2  ;;  %v15027_v59 = vsel %vm12231_vm7, %v10696_v0, %v8340_v23  ;;  %v7866_v43 = vshll.u32 %v14892_v55, 16  ;;  %v7871_v32 = vshrl.u32 %v7826_v30, 16  ;;  %v11917_v22 = vld [vmem:[#allocation3 + $0x88] ss:$8 sps:$4 sm:$0xff]   ;;  %v7830_v9 = vld [vmem:[#allocation3 + $0x20] sm:$0xf] }
 0x364   : > { %v15032_v46 = vsel %vm12231_vm7, %v10697_v37, %v8344_v31  ;;  %v7859_v24 = vrot.slane %v7857_v11, 4  ;;  %v7862_v4 = vrot.slane %v7860_v19, 5  ;;  %v7874_v8 = vshll.u32 %v7826_v30, 16  ;;  %v7836_v62 = vld [vmem:[#allocation3 + $0x38] sm:$0xf] }
 0x365   : > { %v10623_v50 = vcombine.low %v15015_v7, %v15023_v14  ;;  %v10718_v26 = vcombine.low %v15027_v59, %v15032_v46  ;;  %v7873_v3 = vrot.slane %v7871_v32, 4  ;;  %v7880_v55 = vshll.u32 %v14896_v16, 16  ;;  %v8282_v32 = vld [vmem:[#allocation3 + $0x58] sm:$0xe]  ;;  %v7838_v38 = vld [vmem:[#allocation3 + $0x40] sm:$0xf] }
 0x366   : > { %11648 = vmatpush3.bf16.msra.mxu0 %v11913_v51  ;;  %v7863_v28 = vor.u32 %v7862_v4, %v7859_v24  ;;  %v7876_v10 = vrot.slane %v7874_v8, 5  ;;  %v10698_v18 = vrot.slane %v8280_v44, 9  ;;  %v8348_v5 = vrot.slane %v15003_v34, 5  ;;  %v15044_v51 = vld [vmem:[#allocation3 + $0x5c] sm:$0x1] }
 0x367   : > { %11649 = vmatprep.subr.bf16.mxu0 %v11918_v1  ;;  %v7868_v53 = vrot.slane %v7866_v43, 5  ;;  %v10699_v36 = vrot.slane %v8281_v6, 9  ;;  %v8352_v2 = vrot.slane %v15018_v20, 5  ;;  %v7885_v0 = vshrl.u32 %v7828_v57, 16  ;;  %v15056_v43 = vld [vmem:[#allocation3 + $0x64] sm:$0x1] }
 0x368   : > { %v7864_v30 = vrot.slane %v7863_v28, 4  ;;  %v7877_v33 = vor.u32 %v7876_v10, %v7873_v3  ;;  %v7882_v16 = vrot.slane %v7880_v55, 5  ;;  %v7888_v23 = vshll.u32 %v7828_v57, 16  ;;  %v7832_v6 = vld [vmem:[#allocation3 + $0x28] sm:$0xf] }
 0x369   : > { %11610 = vmatmul.mubr.msk.bf16.gmra.mxu0 %vm6985_vm6, %v10619_v47  ;;  %11642 = vmatmul.mubr.msk.bf16.gmra.mxu1 %vm6985_vm6, %v11917_v22  ;;  %v15053_v37 = vsel %vm12231_vm7, %v10699_v36, %v8352_v2  ;;  %v7887_v31 = vrot.slane %v7885_v0, 4  ;;  %v7894_v11 = vshll.u32 %v14915_v58, 16  ;;  %v7899_v19 = vshrl.u32 %v7830_v9, 16  ;;  %v8283_v58 = vld [vmem:[#allocation3 + $0x60] sm:$0xe] }
 0x36a   : > { %11613 = vmatprep.mubr.msk.bf16.mxu0 %vm6985_vm6, %v10620_v15  ;;  %11650 = vmatpush3.bf16.msra.mxu0 %v11918_v1  ;;  %v7869_v60 = vsel %vm12114_vm4, %v7864_v30, %v7868_v53  ;;  %v7878_v17 = vrot.slane %v7877_v33, 4  ;;  %v15066_v47 = vsel %vm12231_vm7, %v10698_v18, %v8348_v5  ;;  %v7890_v44 = vrot.slane %v7888_v23, 5  ;;  %v8284_v0 = vld [vmem:[#allocation3 + $0x68] sm:$0xe]  ;;  %v8285_v30 = vld [vmem:[#allocation3 + $0x70] sm:$0xe] }
 0x36b   : > { %11677 = vmatprep.mubr.msk.bf16.mxu1 %vm6985_vm6, %v10716_v56  ;;  %11651 = vmatprep.subr.bf16.mxu0 %v11921_v35  ;;  %v10719_v63 = vcombine.low %v15066_v47, %v15053_v37  ;;  %v7901_v15 = vrot.slane %v7899_v19, 4  ;;  %v7902_v1 = vshll.u32 %v7830_v9, 16  ;;  %v7908_v24 = vshll.u32 %v14932_v25, 16  ;;  %v7834_v56 = vld [vmem:[#allocation3 + $0x30] sm:$0xf] }
 0x36c   : > { %v7883_v4 = vsel %vm12114_vm4, %v7878_v17, %v7882_v16  ;;  %v7891_v8 = vor.u32 %v7890_v44, %v7887_v31  ;;  %v10700_v12 = vrot.slane %v8282_v32, 9  ;;  %v8356_v42 = vrot.slane %v15044_v51, 5  ;;  %v15086_v25 = vld [vmem:[#allocation3 + $0x6c] sm:$0x1]  ;;  %v11925_v31 = vld [vmem:[%s15748_s5 + $0xf0] sm:$0xff]  }
 0x36d   : > { %v15083_v57 = vcombine.low %v7869_v60, %v7883_v4  ;;  %v7896_v22 = vrot.slane %v7894_v11, 5  ;;  %v7904_v3 = vrot.slane %v7902_v1, 5  ;;  %v10701_v55 = vrot.slane %v8283_v58, 9  ;;  %v15113_v60 = vld [vmem:[#allocation3 + $0x74] sm:$0x1] }
 0x36e   : > { %11652 = vmatpush3.bf16.msra.mxu0 %v11921_v35  ;;  %v7892_v28 = vrot.slane %v7891_v8, 4  ;;  %v7910_v10 = vrot.slane %v7908_v24, 5  ;;  %v8360_v9 = vrot.slane %v15056_v43, 5  ;;  %v7913_v18 = vshrl.u32 %v7832_v6, 16  ;;  %v15134_v24 = vld [vmem:[#allocation3 + $0x7c] sm:$0x1] }
 0x36f   : > { %11693 = vmatprep.subr.bf16.mxu0 %v15077_v41  ;;  %v7905_v5 = vor.u32 %v7904_v3, %v7901_v15  ;;  %v15091_v53 = vsel %vm12231_vm7, %v10700_v12, %v8356_v42  ;;  %v7916_v36 = vshll.u32 %v7832_v6, 16  ;;  %v7927_v2 = vshrl.u32 %v7834_v56, 16  ;;  %v8286_v42 = vld [vmem:[#allocation3 + $0x78] sm:$0xe]  ;;  %v7842_v47 = vld [vmem:[#allocation3 + $0x60] sm:$0xf] }
 0x370   : > { %v15095_v35 = vsel %vm12231_vm7, %v10701_v55, %v8360_v9  ;;  %v7915_v33 = vrot.slane %v7913_v18, 4  ;;  %v7922_v16 = vshll.u32 %v14976_v45, 16  ;;  %v7930_v23 = vshll.u32 %v7834_v56, 16 }
 0x371   : > { %11614 = vmatmul.mubr.msk.bf16.gmra.mxu0 %vm6985_vm6, %v10621_v54  ;;  %11678 = vmatmul.mubr.msk.bf16.vlgmr.msra.gmra.mxu1 %vm6985_vm6, %v10717_v48  ;;  %v7897_v11 = vsel %vm12114_vm4, %v7892_v28, %v7896_v22  ;;  %v7906_v19 = vrot.slane %v7905_v5, 4  ;;  %v10720_v45 = vcombine.low %v15091_v53, %v15095_v35  ;;  %v7918_v32 = vrot.slane %v7916_v36, 5  ;;  %v15145_v28 = vld [vmem:[#allocation3 + $0x84] sm:$0x1]  ;;  %v7840_v53 = vld [vmem:[#allocation3 + $0x58] sm:$0xf] }
 0x372   : > { %11617 = vmatprep.mubr.msk.bf16.mxu0 %vm6985_vm6, %v10622_v29  ;;  %11681 = vmatprep.mubr.msk.bf16.mxu1 %vm6985_vm6, %v10718_v26  ;;  %v7929_v27 = vrot.slane %v7927_v2, 4  ;;  %v7932_v39 = vrot.slane %v7930_v23, 5  ;;  %v7936_v54 = vshll.u32 %v14985_v21, 16  ;;  %v10702_v52 = vrot.slane %v8284_v0, 9  ;;  %v11927_v21 = vld [vmem:[%s15748_s5 + $0xe8] sm:$0xff]   ;;  %v11928_v36 = vld [vmem:[%s15748_s5 + $0xe0] sm:$0xff]  }
 0x373   : > { %v7911_v48 = vsel %vm12114_vm4, %v7906_v19, %v7910_v10  ;;  %v7919_v17 = vor.u32 %v7918_v32, %v7915_v33  ;;  %v8364_v44 = vrot.slane %v15086_v25, 5  ;;  %v10703_v49 = vrot.slane %v8285_v30, 9  ;;  %11718 = vmatpush3.bf16.msra.mxu1 %v14953_v61  ;;  %v8287_v10 = vld [vmem:[#allocation3 + $0x80] sm:$0xe]  ;;  %v15170_v19 = vld [vmem:[#allocation3 + $0x8c] sm:$0x1] }
 0x374   : > { %v15128_v29 = vcombine.low %v7897_v11, %v7911_v48  ;;  %v7924_v59 = vrot.slane %v7922_v16, 5  ;;  %v7933_v46 = vor.u32 %v7932_v39, %v7929_v27  ;;  %v8368_v26 = vrot.slane %v15113_v60, 5  ;;  %11719 = vmatprep.subr.bf16.mxu1 %v11925_v31  ;;  %v7844_v48 = vld [vmem:[#allocation3 + $0x68] sm:$0xf] }
 0x375   : > { %v7920_v58 = vrot.slane %v7919_v17, 4  ;;  %v7938_v6 = vrot.slane %v7936_v54, 5  ;;  %v7941_v15 = vshrl.u32 %v7836_v62, 16  ;;  %v7944_v1 = vshll.u32 %v7836_v62, 16  ;;  %v8289_v62 = vld [vmem:[#allocation3 + $0x90] sm:$0xe] }
 0x376   : > { %v7934_v4 = vrot.slane %v7933_v46, 4  ;;  %v15138_v61 = vsel %vm12231_vm7, %v10703_v49, %v8368_v26  ;;  %v7950_v8 = vshll.u32 %v15003_v34, 16  ;;  %v7955_v12 = vshrl.u32 %v7838_v38, 16 }
 0x377   : > { %v7925_v56 = vsel %vm12114_vm4, %v7920_v58, %v7924_v59  ;;  %v8365_v22 = vsel %vm12231_vm7, %v10702_v52, %v8364_v44  ;;  %v7943_v3 = vrot.slane %v7941_v15, 4  ;;  %v7946_v55 = vrot.slane %v7944_v1, 5  ;;  %11720 = vmatpush3.bf16.msra.mxu1 %v11925_v31  ;;  %v15176_v52 = vld [vmem:[#allocation3 + $0x94] sm:$0x1] }
 0x378   : > { %v7939_v9 = vsel %vm12114_vm4, %v7934_v4, %v7938_v6  ;;  %v10721_v18 = vcombine.low %v8365_v22, %v15138_v61  ;;  %v7957_v34 = vrot.slane %v7955_v12, 4  ;;  %v7958_v5 = vshll.u32 %v7838_v38, 16  ;;  %11721 = vmatprep.subr.bf16.mxu1 %v11927_v21  ;;  %v11923_v38 = vld [vmem:[%s15748_s5 + $0xd0] sm:$0xff]  }
 0x379   : > { %11618 = vmatmul.mubr.msk.bf16.gmra.mxu0 %vm6985_vm6, %v10623_v50  ;;  %11682 = vmatmul.mubr.msk.bf16.gmra.mxu1 %vm6985_vm6, %v10719_v63  ;;  %v7947_v2 = vor.u32 %v7946_v55, %v7943_v3  ;;  %v7952_v0 = vrot.slane %v7950_v8, 5  ;;  %v7964_v30 = vshll.u32 %v15018_v20, 16  ;;  %v10704_v35 = vrot.slane %v8286_v42, 9  ;;  %v7846_v4 = vld [vmem:[#allocation3 + $0x70] sm:$0xf] }
 0x37a   : > { %11653 = vmatprep.mubr.msk.bf16.mxu0 %vm6985_vm6, %v15083_v57  ;;  %11685 = vmatprep.mubr.msk.bf16.mxu1 %vm6985_vm6, %v10720_v45  ;;  %v7960_v33 = vrot.slane %v7958_v5, 5  ;;  %v8372_v7 = vrot.slane %v15134_v24, 5  ;;  %v10705_v14 = vrot.slane %v8287_v10, 9  ;;  %v8376_v50 = vrot.slane %v15145_v28, 5  ;;  %v8288_v45 = vld [vmem:[#allocation3 + $0x88] sm:$0xe] }
 0x37b   : > { %v10674_v16 = vcombine.low %v7925_v56, %v7939_v9  ;;  %v7948_v37 = vrot.slane %v7947_v2, 4  ;;  %v7969_v63 = vshrl.u32 %v7840_v53, 16  ;;  %v7972_v23 = vshll.u32 %v7840_v53, 16  ;;  %11722 = vmatpush3.bf16.msra.mxu1 %v11927_v21  ;;  %v8807_v55 = vld [vmem:[#allocation3 + $0x10] sm:$0xf]  ;;  %v11926_v10 = vld [vmem:[%s15748_s5 + $0xc8] sm:$0xff]  }
 0x37c   : > { %v7961_v31 = vor.u32 %v7960_v33, %v7957_v34  ;;  %v7966_v20 = vrot.slane %v7964_v30, 5  ;;  %v8373_v11 = vsel %vm12231_vm7, %v10704_v35, %v8372_v7  ;;  %v7978_v57 = vshll.u32 %v15044_v51, 16  ;;  %11723 = vmatprep.subr.bf16.mxu1 %v11928_v36  ;;  %v15202_v33 = vld [vmem:[#allocation3 + $0x14] sm:$0x1]  ;;  %v8809_v7 = vld [vmem:[#allocation3 + $0x18] sm:$0xf] }
 0x37d   : > { %v7953_v32 = vsel %vm12114_vm4, %v7948_v37, %v7952_v0  ;;  %v8377_v27 = vsel %vm12231_vm7, %v10705_v14, %v8376_v50  ;;  %v7971_v39 = vrot.slane %v7969_v63, 4  ;;  %v7974_v54 = vrot.slane %v7972_v23, 5  ;;  %v11929_v37 = vld [vmem:[%s15748_s5 + $0xc0] sm:$0xff]  }
 0x37e   : > { %v7962_v17 = vrot.slane %v7961_v31, 4  ;;  %v7980_v44 = vrot.slane %v7978_v57, 5  ;;  %v7983_v49 = vshrl.u32 %v7842_v47, 16  ;;  %v7986_v51 = vshll.u32 %v7842_v47, 16  ;;  %v15210_v31 = vld [vmem:[#allocation3 + $0x1c] sm:$0x1] }
 0x37f   : > { %v7975_v59 = vor.u32 %v7974_v54, %v7971_v39  ;;  %v7992_v46 = vshll.u32 %v15056_v43, 16  ;;  %v10706_v26 = vrot.slane %v8288_v45, 9  ;;  %v8380_v21 = vrot.slane %v15170_v19, 5  ;;  %11724 = vmatpush3.bf16.msra.mxu1 %v11928_v36 }
 0x380   : > { %v7967_v58 = vsel %vm12114_vm4, %v7962_v17, %v7966_v20  ;;  %v7985_v6 = vrot.slane %v7983_v49, 4  ;;  %v7988_v15 = vrot.slane %v7986_v51, 5  ;;  %v10707_v1 = vrot.slane %v8289_v62, 9  ;;  %v7850_v49 = vld [vmem:[#allocation3 + $0x80] sm:$0xf] }
 0x381   : > { %11654 = vmatmul.mubr.msk.bf16.vlgmr.msra.gmra.mxu0 %vm6985_vm6, %v15128_v29  ;;  %11686 = vmatmul.mubr.msk.bf16.gmra.mxu1 %vm6985_vm6, %v10721_v18  ;;  %v10675_v61 = vcombine.low %v7953_v32, %v7967_v58  ;;  %v10722_v8 = vcombine.low %v8373_v11, %v8377_v27  ;;  %v7976_v12 = vrot.slane %v7975_v59, 4  ;;  %v7994_v43 = vrot.slane %v7992_v46, 5  ;;  %v7848_v11 = vld [vmem:[#allocation3 + $0x78] sm:$0xf] }
 0x382   : > { %11694 = vmatpush3.bf16.msra.mxu0 %v15077_v41  ;;  %11657 = vmatprep.mubr.msk.bf16.mxu0 %vm6985_vm6, %v10674_v16  ;;  %v7989_v42 = vor.u32 %v7988_v15, %v7985_v6  ;;  %v8384_v56 = vrot.slane %v15176_v52, 5  ;;  %v7997_v22 = vshrl.u32 %v7844_v48, 16  ;;  %v8000_v3 = vshll.u32 %v7844_v48, 16  ;;  %v15224_v58 = vld [vmem:[%s15748_s5 + $0x118] sm:$0xff]  }
 0x383   : > { %11695 = vmatprep.subr.bf16.mxu0 %v11923_v38  ;;  %11689 = vmatprep.mubr.msk.bf16.mxu1 %vm6985_vm6, %v10722_v8  ;;  %v8381_v29 = vsel %vm12231_vm7, %v10706_v26, %v8380_v21  ;;  %v8006_v41 = vshll.u32 %v15086_v25, 16  ;;  %v8011_v9 = vshrl.u32 %v7846_v4, 16  ;;  %v8014_v18 = vshll.u32 %v7846_v4, 16  ;;  %v8811_v21 = vld [vmem:[#allocation3 + $0x20] sm:$0xf] }
 0x384   : > { %v7990_v34 = vrot.slane %v7989_v42, 4  ;;  %v8385_v5 = vsel %vm12231_vm7, %v10707_v1, %v8384_v56  ;;  %v7999_v53 = vrot.slane %v7997_v22, 4  ;;  %v8002_v36 = vrot.slane %v8000_v3, 5  ;;  %v15227_v42 = vld [vmem:[#allocation3 + $0x24] sm:$0x1] }
 0x385   : > { %v7981_v2 = vsel %vm12114_vm4, %v7976_v12, %v7980_v44  ;;  %v10723_v0 = vcombine.low %v8381_v29, %v8385_v5  ;;  %v8013_v30 = vrot.slane %v8011_v9, 4  ;;  %v8016_v35 = vrot.slane %v8014_v18, 5  ;;  %v15233_v5 = vld [vmem:[#allocation3 + $0x2c] sm:$0x1] }
 0x386   : > { %11696 = vmatpush3.bf16.msra.mxu0 %v11923_v38  ;;  %v7995_v25 = vsel %vm12114_vm4, %v7990_v34, %v7994_v43  ;;  %v8003_v14 = vor.u32 %v8002_v36, %v7999_v53  ;;  %v8020_v50 = vshll.u32 %v15113_v60, 16  ;;  %v8840_v16 = vshrl.u32 %v8807_v55, 16 }
 0x387   : > { %v10676_v47 = vcombine.low %v7981_v2, %v7995_v25  ;;  %11697 = vmatprep.subr.bf16.mxu0 %v11926_v10  ;;  %v8008_v63 = vrot.slane %v8006_v41, 5  ;;  %v8017_v23 = vor.u32 %v8016_v35, %v8013_v30  ;;  %v8843_v20 = vshll.u32 %v8807_v55, 16  ;;  %v8813_v55 = vld [vmem:[#allocation3 + $0x28] sm:$0xf] }
 0x388   : > { %v8004_v57 = vrot.slane %v8003_v14, 4  ;;  %v8842_v45 = vrot.slane %v8840_v16, 4  ;;  %v8849_v32 = vshll.u32 %v15202_v33, 16  ;;  %v8854_v27 = vshrl.u32 %v8809_v7, 16  ;;  %v7852_v35 = vld [vmem:[#allocation3 + $0x88] sm:$0xf] }
 0x389   : > { %11658 = vmatmul.mubr.msk.bf16.gmra.mxu0 %vm6985_vm6, %v10675_v61  ;;  %11690 = vmatmul.mubr.msk.bf16.gmra.mxu1 %vm6985_vm6, %v10723_v0  ;;  %v8018_v60 = vrot.slane %v8017_v23, 4  ;;  %v8022_v39 = vrot.slane %v8020_v50, 5  ;;  %v8845_v54 = vrot.slane %v8843_v20, 5  ;;  %v8857_v62 = vshll.u32 %v8809_v7, 16  ;;  %v7854_v16 = vld [vmem:[#allocation3 + $0x90] sm:$0xf] }
 0x38a   : > { %11661 = vmatprep.mubr.msk.bf16.mxu0 %vm6985_vm6, %v10676_v47  ;;  %v8009_v48 = vsel %vm12114_vm4, %v8004_v57, %v8008_v63  ;;  %11698 = vmatpush3.bf16.msra.mxu0 %v11926_v10  ;;  %v8856_v17 = vrot.slane %v8854_v27, 4  ;;  %v8863_v44 = vshll.u32 %v15210_v31, 16  ;;  %v8025_v51 = vshrl.u32 %v7848_v11, 16 }
 0x38b   : > { %v8023_v38 = vsel %vm12114_vm4, %v8018_v60, %v8022_v39  ;;  %v8846_v59 = vor.u32 %v8845_v54, %v8842_v45  ;;  %v8859_v46 = vrot.slane %v8857_v62, 5  ;;  %v8028_v26 = vshll.u32 %v7848_v11, 16  ;;  %11699 = vmatprep.subr.bf16.mxu0 %v11929_v37 }
 0x38c   : > { %v10677_v6 = vcombine.low %v8009_v48, %v8023_v38  ;;  %v8851_v15 = vrot.slane %v8849_v32, 5  ;;  %v8027_v1 = vrot.slane %v8025_v51, 4  ;;  %v8034_v4 = vshll.u32 %v15134_v24, 16 }
 0x38d   : > { %v8847_v61 = vrot.slane %v8846_v59, 4  ;;  %v8860_v8 = vor.u32 %v8859_v46, %v8856_v17  ;;  %v8030_v12 = vrot.slane %v8028_v26, 5  ;;  %v8039_v43 = vshrl.u32 %v7850_v49, 16  ;;  %v8817_v26 = vld [vmem:[#allocation3 + $0x38] sm:$0xf] }
 0x38e   : > { %v8865_v56 = vrot.slane %v8863_v44, 5  ;;  %v8042_v22 = vshll.u32 %v7850_v49, 16  ;;  %v8048_v3 = vshll.u32 %v15145_v28, 16  ;;  %v8868_v29 = vshrl.u32 %v8811_v21, 16  ;;  %11700 = vmatpush3.bf16.msra.mxu0 %v11929_v37  ;;  %v8815_v44 = vld [vmem:[#allocation3 + $0x30] sm:$0xf] }
 0x38f   : > { %v8852_v10 = vsel %vm12114_vm4, %v8847_v61, %v8851_v15  ;;  %v8861_v41 = vrot.slane %v8860_v8, 4  ;;  %v8031_v9 = vor.u32 %v8030_v12, %v8027_v1  ;;  %v8041_v18 = vrot.slane %v8039_v43, 4  ;;  %11741 = vmatprep.subr.bf16.mxu0 %v15224_v58  ;;  %v15246_v49 = vld [vmem:[#allocation3 + $0x34] sm:$0x1] }
 0x390   : > { %v8036_v24 = vrot.slane %v8034_v4, 5  ;;  %v8044_v34 = vrot.slane %v8042_v22, 5  ;;  %v8870_v53 = vrot.slane %v8868_v29, 4  ;;  %v8871_v36 = vshll.u32 %v8811_v21, 16  ;;  %v15255_v22 = vld [vmem:[#allocation3 + $0x3c] sm:$0x1] }
 0x391   : > { %11662 = vmatmul.mubr.msk.bf16.gmra.mxu0 %vm6985_vm6, %v10677_v6  ;;  %v8866_v28 = vsel %vm12114_vm4, %v8861_v41, %v8865_v56  ;;  %v8032_v2 = vrot.slane %v8031_v9, 4  ;;  %v8877_v0 = vshll.u32 %v15227_v42, 16  ;;  %v8882_v30 = vshrl.u32 %v8813_v55, 16  ;;  %v15257_v9 = vld [vmem:[#allocation3 + $0x44] sm:$0x1] }
 0x392   : > { %v10772_v7 = vcombine.low %v8852_v10, %v8866_v28  ;;  %v8045_v25 = vor.u32 %v8044_v34, %v8041_v18  ;;  %v8873_v14 = vrot.slane %v8871_v36, 5  ;;  %v8885_v50 = vshll.u32 %v8813_v55, 16  ;;  %v8819_v55 = vld [vmem:[#allocation3 + $0x40] sm:$0xf]  ;;  %v8821_v36 = vld [vmem:[#allocation3 + $0x48] sm:$0xf] }
 0x393   : > { %v8037_v37 = vsel %vm12114_vm4, %v8032_v2, %v8036_v24  ;;  %v8050_v47 = vrot.slane %v8048_v3, 5  ;;  %v8884_v63 = vrot.slane %v8882_v30, 4  ;;  %v8891_v23 = vshll.u32 %v15233_v5, 16 }
 0x394   : > { %11725 = vmatprep.mubr.msk.bf16.mxu1 %vm6985_vm6, %v10772_v7  ;;  %v8046_v20 = vrot.slane %v8045_v25, 4  ;;  %v8874_v11 = vor.u32 %v8873_v14, %v8870_v53  ;;  %v8887_v57 = vrot.slane %v8885_v50, 5  ;;  %v8053_v45 = vshrl.u32 %v7852_v35, 16 }
 0x395   : > { %v8879_v32 = vrot.slane %v8877_v0, 5  ;;  %v8056_v27 = vshll.u32 %v7852_v35, 16  ;;  %v8062_v60 = vshll.u32 %v15170_v19, 16  ;;  %v8067_v39 = vshrl.u32 %v7854_v16, 16 }
 0x396   : > { %v8051_v54 = vsel %vm12114_vm4, %v8046_v20, %v8050_v47  ;;  %v8875_v62 = vrot.slane %v8874_v11, 4  ;;  %v8888_v48 = vor.u32 %v8887_v57, %v8884_v63  ;;  %v8055_v17 = vrot.slane %v8053_v45, 4  ;;  %v8823_v63 = vld [vmem:[#allocation3 + $0x60] sm:$0xf]  ;;  %v8825_v45 = vld [vmem:[#allocation3 + $0x68] sm:$0xf] }
 0x397   : > { %v10678_v51 = vcombine.low %v8037_v37, %v8051_v54  ;;  %v8893_v38 = vrot.slane %v8891_v23, 5  ;;  %v8058_v59 = vrot.slane %v8056_v27, 5  ;;  %v8064_v46 = vrot.slane %v8062_v60, 5  ;;  %v15268_v60 = vld [vmem:[#allocation3 + $0x4c] sm:$0x1] }
 0x398   : > { %v8889_v21 = vrot.slane %v8888_v48, 4  ;;  %v8069_v6 = vrot.slane %v8067_v39, 4  ;;  %v8070_v15 = vshll.u32 %v7854_v16, 16  ;;  %v8076_v19 = vshll.u32 %v15176_v52, 16 }
 0x399   : > { %11665 = vmatprep.mubr.msk.bf16.mxu0 %vm6985_vm6, %v10678_v51  ;;  %v8059_v1 = vor.u32 %v8058_v59, %v8055_v17  ;;  %v8896_v4 = vshrl.u32 %v8815_v44, 16  ;;  %v8899_v61 = vshll.u32 %v8815_v44, 16  ;;  %v8905_v8 = vshll.u32 %v15246_v49, 16  ;;  %v11930_v17 = vld [vmem:[#allocation3 + $0x10] ss:$8 sps:$4 sm:$0xff]  }
 0x39a   : > { %v8880_v12 = vsel %vm12114_vm4, %v8875_v62, %v8879_v32  ;;  %v8894_v43 = vsel %vm12114_vm4, %v8889_v21, %v8893_v38  ;;  %v8072_v56 = vrot.slane %v8070_v15, 5  ;;  %v8910_v3 = vshrl.u32 %v8817_v26, 16  ;;  %v15270_v62 = vld [vmem:[#allocation3 + $0x64] sm:$0x1] }
 0x39b   : > { %v10773_v29 = vcombine.low %v8880_v12, %v8894_v43  ;;  %v8060_v52 = vrot.slane %v8059_v1, 4  ;;  %v8898_v10 = vrot.slane %v8896_v4, 4  ;;  %v8901_v41 = vrot.slane %v8899_v61, 5  ;;  %v8827_v61 = vld [vmem:[#allocation3 + $0x70] sm:$0xf] }
 0x39c   : > { %v8073_v18 = vor.u32 %v8072_v56, %v8069_v6  ;;  %v8078_v24 = vrot.slane %v8076_v19, 5  ;;  %v8912_v34 = vrot.slane %v8910_v3, 4  ;;  %v8913_v53 = vshll.u32 %v8817_v26, 16  ;;  %v15274_v26 = vld [vmem:[#allocation3 + $0x6c] sm:$0x1] }
 0x39d   : > { %11726 = vmatmul.mubr.msk.bf16.vlgmr.msra.gmra.mxu1 %vm6985_vm6, %v10773_v29  ;;  %v8902_v28 = vor.u32 %v8901_v41, %v8898_v10  ;;  %v8907_v2 = vrot.slane %v8905_v8, 5  ;;  %v8919_v0 = vshll.u32 %v15255_v22, 16  ;;  %v8924_v30 = vshrl.u32 %v8819_v55, 16  ;;  %v8829_v3 = vld [vmem:[#allocation3 + $0x78] sm:$0xf] }
 0x39e   : > { %v8065_v35 = vsel %vm12114_vm4, %v8060_v52, %v8064_v46  ;;  %v8074_v7 = vrot.slane %v8073_v18, 4  ;;  %v8915_v25 = vrot.slane %v8913_v53, 5  ;;  %v8927_v14 = vshll.u32 %v8819_v55, 16  ;;  %v11932_v18 = vld [vmem:[#allocation3 + $0x20] ss:$8 sps:$4 sm:$0xff]  }
 0x39f   : > { %v8903_v50 = vrot.slane %v8902_v28, 4  ;;  %v8926_v16 = vrot.slane %v8924_v30, 4  ;;  %v8933_v37 = vshll.u32 %v15257_v9, 16  ;;  %v8938_v47 = vshrl.u32 %v8821_v36, 16 }
 0x3a0   : > { %v8079_v23 = vsel %vm12114_vm4, %v8074_v7, %v8078_v24  ;;  %v8916_v20 = vor.u32 %v8915_v25, %v8912_v34  ;;  %v8921_v11 = vrot.slane %v8919_v0, 5  ;;  %v8929_v57 = vrot.slane %v8927_v14, 5  ;;  %v15284_v34 = vld [vmem:[#allocation3 + $0x74] sm:$0x1]  ;;  %v15286_v0 = vld [vmem:[#allocation3 + $0x7c] sm:$0x1] }
 0x3a1   : > { %v10679_v32 = vcombine.low %v8065_v35, %v8079_v23  ;;  %v8908_v27 = vsel %vm12114_vm4, %v8903_v50, %v8907_v2  ;;  %v8940_v39 = vrot.slane %v8938_v47, 4  ;;  %v8941_v54 = vshll.u32 %v8821_v36, 16  ;;  %v11934_v50 = vld [vmem:[%s15748_s5 + $0x110] sm:$0xff]  }
 0x3a2   : > { %v8917_v48 = vrot.slane %v8916_v20, 4  ;;  %v8930_v44 = vor.u32 %v8929_v57, %v8926_v16  ;;  %v8947_v51 = vshll.u32 %v15268_v60, 16  ;;  %v8952_v38 = vshrl.u32 %v8823_v63, 16  ;;  %v8831_v16 = vld [vmem:[#allocation3 + $0x80] sm:$0xf] }
 0x3a3   : > { %11666 = vmatmul.mubr.msk.bf16.gmra.mxu0 %vm6985_vm6, %v10679_v32  ;;  %v8935_v59 = vrot.slane %v8933_v37, 5  ;;  %v8943_v46 = vrot.slane %v8941_v54, 5  ;;  %v8955_v21 = vshll.u32 %v8823_v63, 16  ;;  %v8966_v6 = vshrl.u32 %v8825_v45, 16  ;;  %v15294_v20 = vld [vmem:[#allocation3 + $0x84] sm:$0x1] }
 0x3a4   : > { %v8922_v15 = vsel %vm12114_vm4, %v8917_v48, %v8921_v11  ;;  %11701 = vmatprep.mubr.msk.bf16.mxu0 %vm6985_vm6, %v11930_v17  ;;  %v8931_v19 = vrot.slane %v8930_v44, 4  ;;  %v8954_v1 = vrot.slane %v8952_v38, 4  ;;  %v8961_v4 = vshll.u32 %v15270_v62, 16  ;;  %v8833_v11 = vld [vmem:[#allocation3 + $0x88] sm:$0xf] }
 0x3a5   : > { %v10774_v8 = vcombine.low %v8908_v27, %v8922_v15  ;;  %v8944_v12 = vor.u32 %v8943_v46, %v8940_v39  ;;  %v8949_v43 = vrot.slane %v8947_v51, 5  ;;  %v8957_v56 = vrot.slane %v8955_v21, 5  ;;  %v11933_v57 = vld [vmem:[#allocation3 + $0x30] ss:$8 sps:$4 sm:$0xff]   ;;  %v11937_v21 = vld [vmem:[%s15748_s5 + $0x108] sm:$0xff]  }
 0x3a6   : > { %v8936_v55 = vsel %vm12114_vm4, %v8931_v19, %v8935_v59  ;;  %v8968_v29 = vrot.slane %v8966_v6, 4  ;;  %v8969_v52 = vshll.u32 %v8825_v45, 16  ;;  %v8975_v10 = vshll.u32 %v15274_v26, 16  ;;  %v8835_v46 = vld [vmem:[#allocation3 + $0x90] sm:$0xf] }
 0x3a7   : > { %11729 = vmatprep.mubr.msk.bf16.mxu1 %vm6985_vm6, %v10774_v8  ;;  %v8945_v41 = vrot.slane %v8944_v12, 4  ;;  %v8958_v24 = vor.u32 %v8957_v56, %v8954_v1  ;;  %v8980_v53 = vshrl.u32 %v8827_v61, 16  ;;  %v8983_v36 = vshll.u32 %v8827_v61, 16  ;;  %v8837_v1 = vld [vmem:[#allocation3 + $0x98] sm:$0xf] }
 0x3a8   : > { %v8963_v28 = vrot.slane %v8961_v4, 5  ;;  %v8971_v2 = vrot.slane %v8969_v52, 5  ;;  %v8994_v30 = vshrl.u32 %v8829_v3, 16  ;;  %v8977_v63 = vrot.slane %v8975_v10, 5  ;;  %v11940_v10 = vld [vmem:[%s15748_s5 + $0x100] sm:$0xff]  }
 0x3a9   : > { %v8950_v35 = vsel %vm12114_vm4, %v8945_v41, %v8949_v43  ;;  %v8959_v7 = vrot.slane %v8958_v24, 4  ;;  %v8982_v25 = vrot.slane %v8980_v53, 4  ;;  %v8985_v14 = vrot.slane %v8983_v36, 5  ;;  %v15309_v43 = vld [vmem:[#allocation3 + $0x8c] sm:$0x1] }
 0x3aa   : > { %v10775_v37 = vcombine.low %v8936_v55, %v8950_v35  ;;  %v8972_v47 = vor.u32 %v8971_v2, %v8968_v29  ;;  %v8989_v23 = vshll.u32 %v15284_v34, 16  ;;  %v8996_v32 = vrot.slane %v8994_v30, 4  ;;  %v15311_v29 = vld [vmem:[#allocation3 + $0x94] sm:$0x1]  ;;  %v11936_v35 = vld [vmem:[#allocation3 + $0x60] ss:$8 sps:$4 sm:$0xff]  }
 0x3ab   : > { %11702 = vmatmul.mubr.msk.bf16.vlgmr.msra.gmra.mxu0 %vm6985_vm6, %v11932_v18  ;;  %v8986_v45 = vor.u32 %v8985_v14, %v8982_v25  ;;  %v8997_v27 = vshll.u32 %v8829_v3, 16  ;;  %v9003_v39 = vshll.u32 %v15286_v0, 16  ;;  %v8964_v54 = vsel %vm12114_vm4, %v8959_v7, %v8963_v28  ;;  %v11935_v18 = vld [vmem:[#allocation3 + $0x40] ss:$8 sps:$4 sm:$0xff]  }
 0x3ac   : > { %11730 = vmatmul.mubr.msk.bf16.gmra.mxu1 %vm6985_vm6, %v10775_v37  ;;  %v8973_v48 = vrot.slane %v8972_v47, 4  ;;  %11742 = vmatpush3.bf16.msra.mxu0 %v15224_v58  ;;  %v9008_v17 = vshrl.u32 %v8831_v16, 16  ;;  %v9011_v44 = vshll.u32 %v8831_v16, 16  ;;  %v9017_v38 = vshll.u32 %v15294_v20, 16 }
 0x3ad   : > { %11705 = vmatprep.mubr.msk.bf16.mxu0 %vm6985_vm6, %v11933_v57  ;;  %v8999_v51 = vrot.slane %v8997_v27, 5  ;;  %11743 = vmatprep.subr.bf16.mxu0 %v11934_v50  ;;  %v9022_v59 = vshrl.u32 %v8833_v11, 16  ;;  %v8991_v15 = vrot.slane %v8989_v23, 5  ;;  %v8987_v61 = vrot.slane %v8986_v45, 4 }
 0x3ae   : > { %v8978_v6 = vsel %vm12114_vm4, %v8973_v48, %v8977_v63  ;;  %v9010_v19 = vrot.slane %v9008_v17, 4  ;;  %v9013_v58 = vrot.slane %v9011_v44, 5  ;;  %v9005_v12 = vrot.slane %v9003_v39, 5  ;;  %v15325_v63 = vld [vmem:[#allocation3 + $0x9c] sm:$0x1] }
 0x3af   : > { %v10776_v4 = vcombine.low %v8964_v54, %v8978_v6  ;;  %v9000_v8 = vor.u32 %v8999_v51, %v8996_v32  ;;  %v9024_v3 = vrot.slane %v9022_v59, 4  ;;  %v9025_v55 = vshll.u32 %v8833_v11, 16  ;;  %v9257_v59 = vld [vmem:[#allocation3 + $0x10] sm:$0xe] }
 0x3b0   : > { %v9014_v56 = vor.u32 %v9013_v58, %v9010_v19  ;;  %11744 = vmatpush3.bf16.msra.mxu0 %v11934_v50  ;;  %v9036_v52 = vshrl.u32 %v8835_v46, 16  ;;  %v9019_v24 = vrot.slane %v9017_v38, 5  ;;  %v9039_v53 = vshll.u32 %v8835_v46, 16  ;;  %v11939_v19 = vld [vmem:[#allocation3 + $0x80] ss:$8 sps:$4 sm:$0xff]  }
 0x3b1   : > { %11733 = vmatprep.mubr.msk.bf16.mxu1 %vm6985_vm6, %v10776_v4  ;;  %v9001_v41 = vrot.slane %v9000_v8, 4  ;;  %v9050_v36 = vshrl.u32 %v8837_v1, 16  ;;  %11745 = vmatprep.subr.bf16.mxu0 %v11937_v21  ;;  %v9027_v2 = vrot.slane %v9025_v55, 5  ;;  %v9031_v30 = vshll.u32 %v15309_v43, 16  ;;  %v9258_v58 = vld [vmem:[#allocation3 + $0x18] sm:$0xe] }
 0x3b2   : > { %v9015_v28 = vrot.slane %v9014_v56, 4  ;;  %v9038_v7 = vrot.slane %v9036_v52, 4  ;;  %v8992_v25 = vsel %vm12114_vm4, %v8987_v61, %v8991_v15  ;;  %v9041_v50 = vrot.slane %v9039_v53, 5  ;;  %v9260_v55 = vld [vmem:[#allocation3 + $0x28] sm:$0xe] }
 0x3b3   : > { %v9006_v14 = vsel %vm12114_vm4, %v9001_v41, %v9005_v12  ;;  %11706 = vmatmul.mubr.msk.bf16.gmra.mxu0 %vm6985_vm6, %v11935_v18  ;;  %v9045_v16 = vshll.u32 %v15311_v29, 16  ;;  %v9028_v47 = vor.u32 %v9027_v2, %v9024_v3  ;;  %v9052_v23 = vrot.slane %v9050_v36, 4  ;;  %v9261_v52 = vld [vmem:[#allocation3 + $0x30] sm:$0xe]  ;;  %v9259_v41 = vld [vmem:[#allocation3 + $0x20] sm:$0xe] }
 0x3b4   : > { %v10777_v37 = vcombine.low %v8992_v25, %v9006_v14  ;;  %11709 = vmatprep.mubr.msk.bf16.mxu0 %vm6985_vm6, %v11936_v35  ;;  %v9053_v11 = vshll.u32 %v8837_v1, 16  ;;  %11746 = vmatpush3.bf16.msra.mxu0 %v11937_v21  ;;  %v9042_v57 = vor.u32 %v9041_v50, %v9038_v7  ;;  %v9059_v45 = vshll.u32 %v15325_v63, 16  ;;  %v11938_v21 = vld [vmem:[#allocation3 + $0x70] ss:$8 sps:$4 sm:$0xff]   ;;  %v9263_v25 = vld [vmem:[#allocation3 + $0x40] sm:$0xe] }
 0x3b5   : > { %11747 = vmatprep.subr.bf16.mxu0 %v11940_v10  ;;  %v9020_v32 = vsel %vm12114_vm4, %v9015_v28, %v9019_v24  ;;  %v9029_v27 = vrot.slane %v9028_v47, 4  ;;  %v9033_v39 = vrot.slane %v9031_v30, 5  ;;  %v9047_v44 = vrot.slane %v9045_v16, 5  ;;  %v9262_v53 = vld [vmem:[#allocation3 + $0x38] sm:$0xe] }
 0x3b6   : > { %11734 = vmatmul.mubr.msk.bf16.gmra.mxu1 %vm6985_vm6, %v10777_v37  ;;  %v9055_v54 = vrot.slane %v9053_v11, 5  ;;  %v9043_v48 = vrot.slane %v9042_v57, 4  ;;  %v9061_v38 = vrot.slane %v9059_v45, 5  ;;  %v10792_v1 = vrot.slane %v9257_v59, 9  ;;  %v9264_v14 = vld [vmem:[#allocation3 + $0x48] sm:$0xe] }
 0x3b7   : > { %v9034_v17 = vsel %vm12114_vm4, %v9029_v27, %v9033_v39  ;;  %v9307_v4 = vrot.slane %v15202_v33, 5  ;;  %v10793_v12 = vrot.slane %v9258_v58, 9  ;;  %v9311_v56 = vrot.slane %v15210_v31, 5  ;;  %v9266_v57 = vld [vmem:[#allocation3 + $0x68] sm:$0xe] }
 0x3b8   : > { %v9056_v51 = vor.u32 %v9055_v54, %v9052_v23  ;;  %11748 = vmatpush3.bf16.msra.mxu0 %v11940_v10  ;;  %v10778_v46 = vcombine.low %v9020_v32, %v9034_v17  ;;  %v9048_v6 = vsel %vm12114_vm4, %v9043_v48, %v9047_v44  ;;  %v11941_v10 = vld [vmem:[#allocation3 + $0x90] ss:$8 sps:$4 sm:$0xff]   ;;  %v10795_v18 = vrot.slane %v9260_v55, 9  ;;  %v9269_v17 = vld [vmem:[#allocation3 + $0x80] sm:$0xe] }
 0x3b9   : > { %v9308_v3 = vsel %vm12231_vm7, %v10792_v1, %v9307_v4  ;;  %v9312_v33 = vsel %vm12231_vm7, %v10793_v12, %v9311_v56  ;;  %v9319_v24 = vrot.slane %v15233_v5, 5  ;;  %v10796_v31 = vrot.slane %v9261_v52, 9  ;;  %v9268_v48 = vld [vmem:[#allocation3 + $0x78] sm:$0xe] }
 0x3ba   : > { %v9057_v15 = vrot.slane %v9056_v51, 4  ;;  %11737 = vmatprep.mubr.msk.bf16.mxu1 %vm6985_vm6, %v10778_v46  ;;  %v10816_v13 = vcombine.low %v9308_v3, %v9312_v33  ;;  %v9323_v36 = vrot.slane %v15246_v49, 5  ;;  %v10794_v28 = vrot.slane %v9259_v41, 9  ;;  %v9265_v49 = vld [vmem:[#allocation3 + $0x60] sm:$0xe] }
 0x3bb   : > { %11710 = vmatmul.mubr.msk.bf16.gmra.mxu0 %vm6985_vm6, %v11938_v21  ;;  %v9315_v2 = vrot.slane %v15227_v42, 5  ;;  %v10797_v30 = vrot.slane %v9262_v53, 9  ;;  %v9327_v35 = vrot.slane %v15255_v22, 5  ;;  %v9320_v7 = vsel %vm12231_vm7, %v10795_v18, %v9319_v24  ;;  %v9267_v51 = vld [vmem:[#allocation3 + $0x70] sm:$0xe] }
 0x3bc   : > { %v9062_v61 = vsel %vm12114_vm4, %v9057_v15, %v9061_v38  ;;  %11713 = vmatprep.mubr.msk.bf16.mxu0 %vm6985_vm6, %v11939_v19  ;;  %v9324_v5 = vsel %vm12231_vm7, %v10796_v31, %v9323_v36  ;;  %v10798_v42 = vrot.slane %v9263_v25, 9  ;;  %v9331_v22 = vrot.slane %v15257_v9, 5  ;;  %v9270_v46 = vld [vmem:[#allocation3 + $0x88] sm:$0xe] }
 0x3bd   : > { %v10779_v8 = vcombine.low %v9048_v6, %v9062_v61  ;;  %v9316_v50 = vsel %vm12231_vm7, %v10794_v28, %v9315_v2  ;;  %v9328_v37 = vsel %vm12231_vm7, %v10797_v30, %v9327_v35  ;;  %v10799_v23 = vrot.slane %v9264_v14, 9  ;;  %v9271_v61 = vld [vmem:[#allocation3 + $0x90] sm:$0xe]  ;;  %v11942_v2 = vld [vmem:[%s15750_s7 + $0x38] sm:$0xff]  }
 0x3be   : > { %v10817_v16 = vcombine.low %v9316_v50, %v9320_v7  ;;  %v10818_v47 = vcombine.low %v9324_v5, %v9328_v37  ;;  %v9335_v11 = vrot.slane %v15268_v60, 5  ;;  %v10800_v45 = vrot.slane %v9265_v49, 9  ;;  %11765 = vmatprep.subr.bf16.mxu1 %v11942_v2  ;;  %v11943_v14 = vld [vmem:[%s15750_s7 + $0x30] sm:$0xff]   ;;  %v11944_v37 = vld [vmem:[%s15750_s7 + $0x28] sm:$0xff]  }
 0x3bf   : > { %11738 = vmatmul.mubr.msk.bf16.gmra.mxu1 %vm6985_vm6, %v10779_v8  ;;  %v9339_v32 = vrot.slane %v15270_v62, 5  ;;  %v10801_v27 = vrot.slane %v9266_v57, 9  ;;  %v9343_v39 = vrot.slane %v15274_v26, 5  ;;  %v9332_v54 = vsel %vm12231_vm7, %v10798_v42, %v9331_v22  ;;  %v9272_v8 = vld [vmem:[#allocation3 + $0x98] sm:$0xe]  ;;  %v11945_v22 = vld [vmem:[%s15750_s7 + $0x20] sm:$0xff]  }
 0x3c0   : > { %v9336_v9 = vsel %vm12231_vm7, %v10799_v23, %v9335_v11  ;;  %v10803_v59 = vrot.slane %v9268_v48, 9  ;;  %v9351_v26 = vrot.slane %v15286_v0, 5  ;;  %v10804_v21 = vrot.slane %v9269_v17, 9  ;;  %11766 = vmatpush3.bf16.msra.mxu1 %v11942_v2 }
 0x3c1   : > { %v9340_v60 = vsel %vm12231_vm7, %v10800_v45, %v9339_v32  ;;  %v10819_v44 = vcombine.low %v9332_v54, %v9336_v9  ;;  %v9344_v62 = vsel %vm12231_vm7, %v10801_v27, %v9343_v39  ;;  %v9355_v6 = vrot.slane %v15294_v20, 5  ;;  %11767 = vmatprep.subr.bf16.mxu1 %v11943_v14  ;;  %v11946_v39 = vld [vmem:[%s15750_s7 + $0x18] sm:$0xff]  }
 0x3c2   : > { %v10820_v38 = vcombine.low %v9340_v60, %v9344_v62  ;;  %v10802_v15 = vrot.slane %v9267_v51, 9  ;;  %v9347_v19 = vrot.slane %v15284_v34, 5  ;;  %v10805_v58 = vrot.slane %v9270_v46, 9 }
 0x3c3   : > { %11714 = vmatmul.mubr.msk.bf16.gmra.mxu0 %vm6985_vm6, %v11941_v10  ;;  %v9359_v1 = vrot.slane %v15309_v43, 5  ;;  %v9352_v4 = vsel %vm12231_vm7, %v10803_v59, %v9351_v26  ;;  %v9356_v0 = vsel %vm12231_vm7, %v10804_v21, %v9355_v6  ;;  %v10806_v3 = vrot.slane %v9271_v61, 9  ;;  %v11947_v59 = vld [vmem:[%s15750_s7 + $0x10] sm:$0xff]  }
 0x3c4   : > { %11749 = vmatprep.mubr.msk.bf16.mxu0 %vm6985_vm6, %v10816_v13  ;;  %v9348_v12 = vsel %vm12231_vm7, %v10802_v15, %v9347_v19  ;;  %v9363_v55 = vrot.slane %v15311_v29, 5  ;;  %v10807_v43 = vrot.slane %v9272_v8, 9  ;;  %v9367_v52 = vrot.slane %v15325_v63, 5  ;;  %11768 = vmatpush3.bf16.msra.mxu1 %v11943_v14 }
 0x3c5   : > { %v10821_v20 = vcombine.low %v9348_v12, %v9352_v4  ;;  %v9360_v56 = vsel %vm12231_vm7, %v10805_v58, %v9359_v1  ;;  %11769 = vmatprep.subr.bf16.mxu1 %v11944_v37  ;;  %v11948_v58 = vld [vmem:[%s15750_s7 + $0x8] sm:$0xff]   ;;  %vm9858_vm4 = vcmask 60416  }
 0x3c6   : > { %v10822_v34 = vcombine.low %v9356_v0, %v9360_v56  ;;  %v9364_v10 = vsel %vm12231_vm7, %v10806_v3, %v9363_v55  ;;  %v9368_v33 = vsel %vm12231_vm7, %v10807_v43, %v9367_v52 }
 0x3c7   : > { %v10823_v41 = vcombine.low %v9364_v10, %v9368_v33 }
 0x3c8   : > { %11770 = vmatpush3.bf16.msra.mxu1 %v11944_v37 }
 0x3c9   : > { %11771 = vmatprep.subr.bf16.mxu1 %v11945_v22 }
 0x3cb   : > { %11750 = vmatmul.mubr.msk.bf16.vlgmr.msra.gmra.mxu0 %vm6985_vm6, %v10817_v16 }
 0x3cc   : > { %11753 = vmatprep.mubr.msk.bf16.mxu0 %vm6985_vm6, %v10818_v47  ;;  %11772 = vmatpush3.bf16.msra.mxu1 %v11945_v22 }
 0x3cd   : > { %11773 = vmatprep.subr.bf16.mxu1 %v11946_v39 }
 0x3d0   : > { %11774 = vmatpush3.bf16.msra.mxu1 %v11946_v39 }
 0x3d1   : > { %11775 = vmatprep.subr.bf16.mxu1 %v11947_v59 }
 0x3d3   : > { %11754 = vmatmul.mubr.msk.bf16.gmra.mxu0 %vm6985_vm6, %v10819_v44 }
 0x3d4   : > { %11757 = vmatprep.mubr.msk.bf16.mxu0 %vm6985_vm6, %v10820_v38  ;;  %11776 = vmatpush3.bf16.msra.mxu1 %v11947_v59 }
 0x3d5   : > { %11777 = vmatprep.subr.bf16.mxu1 %v11948_v58 }
 0x3d8   : > { %11778 = vmatpush3.bf16.msra.mxu1 %v11948_v58 }
 0x3db   : > { %11758 = vmatmul.mubr.msk.bf16.gmra.mxu0 %vm6985_vm6, %v10821_v20  ;;  %v11949_v20 = vld [vmem:[%s15750_s7] sm:$0xff]  }
 0x3dc   : > { %11761 = vmatprep.mubr.msk.bf16.mxu0 %vm6985_vm6, %v10822_v34  ;;  %11779 = vmatprep.subr.bf16.mxu1 %v11949_v20 }
 0x3dd   : > { %11780 = vmatpush3.bf16.msra.mxu1 %v11949_v20 }
 0x3e3   : > { %11762 = vmatmul.mubr.msk.bf16.gmra.mxu0 %vm6985_vm6, %v10823_v41 }
 0x3eb   : > { %v11583_v13 = vpop.f32.mrf.mxu1 }
 0x3ed   : > { %v7229_v18 = vpop.f32.mrf.mxu1 }
 0x3ef   : > { %v11584_v24 = vpop.f32.mrf.mxu1 }
 0x3f1   : > { %v7232_v29 = vpop.f32.mrf.mxu1 }
 0x3f4   : > { %v11587_v53 = vpop.f32.mrf.mxu1 }
 0x3f6   : > { %v7245_v31 = vpop.f32.mrf.mxu1 }
 0x3f8   : > { %v11588_v63 = vpop.f32.mrf.mxu1 }
 0x3fa   : > { %v7248_v36 = vpop.f32.mrf.mxu1 }
 0x3ff   : > { %v11559_v28 = vpop.f32.mrf.mxu0 }
 0x400   : > { %v15401_v30 = vadd.f32 %v11583_v13, %v11559_v28 }
 0x401   : > { %v7044_v40 = vpop.f32.mrf.mxu0  ;;  %v11591_v35 = vpop.f32.mrf.mxu1 }
 0x402   : > { %v15403_v7 = vadd.f32 %v7229_v18, %v7044_v40 }
 0x403   : > { %v11560_v25 = vpop.f32.mrf.mxu0  ;;  %v7261_v5 = vpop.f32.mrf.mxu1 }
 0x404   : > { %v15408_v50 = vadd.f32 %v11584_v24, %v11560_v25 }
 0x405   : > { %v7047_v49 = vpop.f32.mrf.mxu0  ;;  %v11592_v16 = vpop.f32.mrf.mxu1 }
 0x406   : > { %v15413_v42 = vadd.f32 %v7232_v29, %v7047_v49 }
 0x407   : > { %v7264_v47 = vpop.f32.mrf.mxu1 }
 0x408   : > { %v11563_v23 = vpop.f32.mrf.mxu0 }
 0x409   : > { %v15418_v11 = vadd.f32 %v11587_v53, %v11563_v23  ;;  %v11595_v57 = vpop.f32.mrf.mxu1 }
 0x40a   : > { %v7060_v45 = vpop.f32.mrf.mxu0 }
 0x40b   : > { %v15420_v32 = vadd.f32 %v7245_v31, %v7060_v45  ;;  %v7277_v27 = vpop.f32.mrf.mxu1 }
 0x40c   : > { %v11564_v54 = vpop.f32.mrf.mxu0 }
 0x40d   : > { %v7257_v9 = vadd.f32 %v11588_v63, %v11564_v54  ;;  %v11596_v60 = vpop.f32.mrf.mxu1 }
 0x40e   : > { %v7063_v48 = vpop.f32.mrf.mxu0 }
 0x40f   : > { %v7249_v17 = vadd.f32 %v7248_v36, %v7063_v48  ;;  %v7280_v44 = vpop.f32.mrf.mxu1 }
 0x411   : > { %v11567_v62 = vpop.f32.mrf.mxu0  ;;  %v15425_v51 = vpop.f32.mrf.mxu1 }
 0x412   : > { %v7270_v38 = vadd.f32 %v11591_v35, %v11567_v62 }
 0x413   : > { %v7076_v26 = vpop.f32.mrf.mxu0  ;;  %v15430_v46 = vpop.f32.mrf.mxu1 }
 0x414   : > { %v7262_v21 = vadd.f32 %v7261_v5, %v7076_v26 }
 0x415   : > { %v11568_v6 = vpop.f32.mrf.mxu0  ;;  %v15432_v15 = vpop.f32.mrf.mxu1 }
 0x416   : > { %v7273_v19 = vadd.f32 %v11592_v16, %v11568_v6 }
 0x417   : > { %v7079_v1 = vpop.f32.mrf.mxu0  ;;  %v15437_v4 = vpop.f32.mrf.mxu1 }
 0x418   : > { %v7265_v61 = vadd.f32 %v7264_v47, %v7079_v1 }
 0x419   : > { %v11571_v0 = vpop.f32.mrf.mxu0  ;;  %v15439_v8 = vpop.f32.mrf.mxu1 }
 0x41a   : > { %v7286_v12 = vadd.f32 %v11595_v57, %v11571_v0 }
 0x41b   : > { %v7092_v56 = vpop.f32.mrf.mxu0  ;;  %v15444_v3 = vpop.f32.mrf.mxu1 }
 0x41c   : > { %v7278_v34 = vadd.f32 %v7277_v27, %v7092_v56 }
 0x41d   : > { %v11572_v55 = vpop.f32.mrf.mxu0  ;;  %v15446_v43 = vpop.f32.mrf.mxu1 }
 0x41e   : > { %v7289_v52 = vadd.f32 %v11596_v60, %v11572_v55 }
 0x41f   : > { %v7095_v10 = vpop.f32.mrf.mxu0  ;;  %v15448_v33 = vpop.f32.mrf.mxu1 }
 0x420   : > { %v7281_v41 = vadd.f32 %v7280_v44, %v7095_v10 }
 0x421   : > { %v11607_v13 = vpop.f32.mrf.mxu0  ;;  %v15450_v18 = vpop.f32.mrf.mxu1 }
 0x422   : > { %v15453_v24 = vadd.f32 %v11607_v13, %v15401_v30 }
 0x423   : > { %v7519_v29 = vpop.f32.mrf.mxu0  ;;  %v15455_v53 = vpop.f32.mrf.mxu1 }
 0x424   : > { %v15458_v31 = vadd.f32 %v7519_v29, %v15403_v7 }
 0x425   : > { %v11608_v63 = vpop.f32.mrf.mxu0  ;;  %v15460_v36 = vpop.f32.mrf.mxu1 }
 0x426   : > { %v15463_v28 = vadd.f32 %v11608_v63, %v15408_v50 }
 0x427   : > { %v7522_v2 = vpop.f32.mrf.mxu0  ;;  %v15465_v40 = vpop.f32.mrf.mxu1 }
 0x428   : > { %v15468_v35 = vadd.f32 %v7522_v2, %v15413_v42 }
 0x429   : > { %v11611_v30 = vpop.f32.mrf.mxu0  ;;  %v15470_v25 = vpop.f32.mrf.mxu1 }
 0x42a   : > { %v15473_v5 = vadd.f32 %v11611_v30, %v15418_v11 }
 0x42b   : > { %v7535_v7 = vpop.f32.mrf.mxu0  ;;  %v15475_v14 = vpop.f32.mrf.mxu1 }
 0x42c   : > { %15922 = vst [vmem:[#allocation18_spill] sm:$0xff] %v15475_v14  ;;  %v15478_v49 = vadd.f32 %v7535_v7, %v15420_v32  ;;  %v7808_v14 = vadd.f32 %v15430_v46, %v15458_v31  ;;  %v7814_v46 = vadd.f32 %v15439_v8, %v15473_v5 }
 0x42d   : > { %v11612_v50 = vpop.f32.mrf.mxu0  ;;  %v15480_v16 = vpop.f32.mrf.mxu1 }
 0x42e   : > { %15923 = vst [vmem:[#allocation4_spill] sm:$0xff] %v15480_v16  ;;  %v15482_v37 = vadd.f32 %v11612_v50, %v7257_v9 }
 0x42f   : > { %v7538_v47 = vpop.f32.mrf.mxu0  ;;  %v15484_v42 = vpop.f32.mrf.mxu1 }
 0x430   : > { %15924 = vst [vmem:[#allocation14_spill] sm:$0xff] %v15484_v42  ;;  %v15486_v22 = vadd.f32 %v7538_v47, %v7249_v17 }
 0x431   : > { %v11615_v23 = vpop.f32.mrf.mxu0  ;;  %v15488_v57 = vpop.f32.mrf.mxu1 }
 0x432   : > { %v15490_v11 = vadd.f32 %v11615_v23, %v7270_v38 }
 0x433   : > { %v7551_v45 = vpop.f32.mrf.mxu0  ;;  %v15492_v27 = vpop.f32.mrf.mxu1 }
 0x434   : > { %v15494_v32 = vadd.f32 %v7551_v45, %v7262_v21 }
 0x435   : > { %v11616_v39 = vpop.f32.mrf.mxu0  ;;  %v15496_v54 = vpop.f32.mrf.mxu1 }
 0x436   : > { %v15498_v9 = vadd.f32 %v11616_v39, %v7273_v19 }
 0x437   : > { %v7554_v60 = vpop.f32.mrf.mxu0  ;;  %v15500_v48 = vpop.f32.mrf.mxu1 }
 0x438   : > { %v15502_v17 = vadd.f32 %v7554_v60, %v7265_v61 }
 0x439   : > { %v11619_v44 = vpop.f32.mrf.mxu0  ;;  %v15506_v59 = vpop.f32.mrf.mxu1 }
 0x43a   : > { %v15504_v62 = vadd.f32 %v11619_v44, %v7286_v12 }
 0x43b   : > { %v7567_v38 = vpop.f32.mrf.mxu0  ;;  %v15512_v1 = vpop.f32.mrf.mxu1 }
 0x43c   : > { %v15508_v26 = vadd.f32 %v7567_v38, %v7278_v34 }
 0x43d   : > { %v11620_v21 = vpop.f32.mrf.mxu0  ;;  %v15516_v61 = vpop.f32.mrf.mxu1 }
 0x43e   : > { %15925 = vst [vmem:[#allocation34_spill] sm:$0xff] %v15508_v26  ;;  %v15510_v6 = vadd.f32 %v11620_v21, %v7289_v52 }
 0x43f   : > { %v7570_v58 = vpop.f32.mrf.mxu0  ;;  %v15518_v12 = vpop.f32.mrf.mxu1 }
 0x440   : > { %15926 = vst [vmem:[#allocation19_spill] sm:$0xff] %v15510_v6  ;;  %v15514_v19 = vadd.f32 %v7570_v58, %v7281_v41  ;;  %15928 = vst [vmem:[#allocation8_spill] sm:$0xff] %v15518_v12 }
 0x441   : > { %v11655_v0 = vpop.f32.mrf.mxu0  ;;  %v15520_v13 = vpop.f32.mrf.mxu1 }
 0x442   : > { %15927 = vst [vmem:[#allocation7_spill] sm:$0xff] %v15514_v19  ;;  %15929 = vst [vmem:[#allocation23_spill] sm:$0xff] %v15520_v13 }
 0x443   : > { %v8195_v20 = vpop.f32.mrf.mxu0  ;;  %v15522_v52 = vpop.f32.mrf.mxu1 }
 0x444   : > { %15930 = vst [vmem:[#allocation31_spill] sm:$0xff] %v15522_v52 }
 0x445   : > { %v11656_v56 = vpop.f32.mrf.mxu0  ;;  %v15526_v2 = vpop.f32.mrf.mxu1 }
 0x446   : > { %15931 = vst [vmem:[#allocation35_spill] sm:$0xff] %v15526_v2 }
 0x447   : > { %v8198_v55 = vpop.f32.mrf.mxu0  ;;  %v15530_v30 = vpop.f32.mrf.mxu1 }
 0x448   : > { %15932 = vst [vmem:[#allocation6_spill] sm:$0xff] %v15530_v30 }
 0x449   : > { %v11659_v10 = vpop.f32.mrf.mxu0  ;;  %v15534_v50 = vpop.f32.mrf.mxu1 }
 0x44a   : > { %15933 = vst [vmem:[#allocation9_spill] sm:$0xff] %v15534_v50 }
 0x44b   : > { %v8211_v34 = vpop.f32.mrf.mxu0  ;;  %v15538_v23 = vpop.f32.mrf.mxu1 }
 0x44c   : > { %15935 = vst [vmem:[#allocation11_spill] sm:$0xff] %v15538_v23 }
 0x44d   : > { %v11660_v29 = vpop.f32.mrf.mxu0  ;;  %v15542_v39 = vpop.f32.mrf.mxu1 }
 0x44e   : > { %15937 = vst [vmem:[#allocation27_spill] sm:$0xff] %v15542_v39 }
 0x44f   : > { %v15524_v63 = vpop.f32.mrf.mxu0  ;;  %v15548_v38 = vpop.f32.mrf.mxu1 }
 0x450   : > { %15940 = vst [vmem:[#allocation17_spill] sm:$0xff] %v15548_v38 }
 0x451   : > { %v15528_v41 = vpop.f32.mrf.mxu0 }
 0x453   : > { %v15532_v7 = vpop.f32.mrf.mxu0 }
 0x455   : > { %v15536_v47 = vpop.f32.mrf.mxu0 }
 0x456   : > { %15934 = vst [vmem:[#allocation10_spill] sm:$0xff] %v15536_v47 }
 0x457   : > { %v15540_v45 = vpop.f32.mrf.mxu0 }
 0x458   : > { %15936 = vst [vmem:[#allocation20_spill] sm:$0xff] %v15540_v45  ;;  %v7810_v45 = vadd.f32 %v15425_v51, %v15453_v24  ;;  %v7809_v51 = vadd.f32 %v15437_v4, %v15468_v35 }
 0x45a   : > { %v8260_v12 = vadd.f32 %v11655_v0, %v7810_v45  ;;  %v8259_v45 = vadd.f32 %v8198_v55, %v7809_v51 }
 0x45c   : > { %v8566_v24 = vadd.f32 %v15488_v57, %v8260_v12  ;;  %v7815_v12 = vadd.f32 %v15446_v43, %v15482_v37  ;;  %v8565_v5 = vadd.f32 %v15500_v48, %v8259_v45  ;;  %v7818_v37 = vadd.f32 %v15450_v18, %v15490_v11 }
 0x45d   : > { %v11727_v30 = vpop.f32.mrf.mxu1  ;;  %v7816_v48 = vadd.f32 %v15455_v53, %v15494_v32  ;;  %v7817_v18 = vadd.f32 %v15465_v40, %v15502_v17  ;;  %v15951_v17 = vld [vmem:[#allocation8_spill] sm:$0xff] }
 0x45f   : > { %v9178_v19 = vpop.f32.mrf.mxu1 }
 0x461   : > { %v11728_v16 = vpop.f32.mrf.mxu1 }
 0x463   : > { %v15544_v60 = vpop.f32.mrf.mxu0  ;;  %v15554_v39 = vpop.f32.mrf.mxu1 }
 0x464   : > { %15938 = vst [vmem:[#allocation21_spill] sm:$0xff] %v15544_v60 }
 0x465   : > { %v15546_v44 = vpop.f32.mrf.mxu0 }
 0x466   : > { %15939 = vst [vmem:[#allocation12_spill] sm:$0xff] %v15546_v44 }
 0x467   : > { %v15550_v21 = vpop.f32.mrf.mxu0 }
 0x468   : > { %15941 = vst [vmem:[#allocation28_spill] sm:$0xff] %v15550_v21 }
 0x469   : > { %v15552_v58 = vpop.f32.mrf.mxu0 }
 0x46a   : > { %15942 = vst [vmem:[#allocation32_spill] sm:$0xff] %v15552_v58 }
 0x46b   : > { %v11703_v50 = vpop.f32.mrf.mxu0 }
 0x46c   : > { %v15560_v38 = vpop.f32.mrf.mxu1  ;;  %v8793_v31 = vadd.f32 %v11703_v50, %v8566_v24  ;;  %v8265_v50 = vadd.f32 %v11660_v29, %v7815_v12 }
 0x46d   : > { %v8728_v42 = vpop.f32.mrf.mxu0  ;;  %15945 = vst [vmem:[#allocation5_spill] sm:$0xff] %v15560_v38  ;;  %v7811_v38 = vadd.f32 %v15432_v15, %v15463_v28  ;;  %v7812_v15 = vadd.f32 %v15444_v3, %v15478_v49  ;;  %v7813_v3 = vadd.f32 %v15448_v33, %v15486_v22  ;;  %v15616_v33 = vld [vmem:[%s15749_s6] ss:$0 sm:$0xff] }
 0x46e   : > { %v15568_v13 = vpop.f32.mrf.mxu1  ;;  %v8571_v32 = vadd.f32 %v15516_v61, %v8265_v50  ;;  %v15956_v50 = vld [vmem:[#allocation20_spill] sm:$0xff] }
 0x46f   : > { %v11704_v2 = vpop.f32.mrf.mxu0  ;;  %v8261_v26 = vadd.f32 %v11656_v56, %v7811_v38  ;;  %v8264_v56 = vadd.f32 %v11659_v10, %v7814_v46  ;;  %v8262_v57 = vadd.f32 %v8211_v34, %v7812_v15  ;;  %v8263_v43 = vadd.f32 %v15524_v63, %v7813_v3 }
 0x470   : > { %v8267_v3 = vadd.f32 %v15956_v50, %v7817_v18  ;;  %v15963_v18 = vld [vmem:[#allocation35_spill] sm:$0xff] }
 0x471   : > { %v8731_v23 = vpop.f32.mrf.mxu0  ;;  %v8567_v35 = vadd.f32 %v15496_v54, %v8261_v26  ;;  %v8570_v54 = vadd.f32 %v15506_v59, %v8264_v56  ;;  %v8568_v29 = vadd.f32 %v15512_v1, %v8262_v57  ;;  %v7819_v59 = vadd.f32 %v15460_v36, %v15498_v9  ;;  %v15948_v9 = vld [vmem:[#allocation34_spill] sm:$0xff]  ;;  %v15955_v56 = vld [vmem:[#allocation23_spill] sm:$0xff] }
 0x473   : > { %v11707_v6 = vpop.f32.mrf.mxu0  ;;  %v8794_v8 = vadd.f32 %v11704_v2, %v8567_v35 }
 0x475   : > { %v8744_v52 = vpop.f32.mrf.mxu0  ;;  %v9244_v63 = vadd.f32 %v11728_v16, %v8794_v8  ;;  %v8266_v16 = vadd.f32 %v15532_v7, %v7816_v48 }
 0x476   : > { %v8795_v11 = vadd.f32 %v8744_v52, %v8568_v29  ;;  %v8569_v52 = vadd.f32 %v15951_v17, %v8263_v43 }
 0x477   : > { %v15556_v60 = vpop.f32.mrf.mxu0 }
 0x478   : > { %15943 = vst [vmem:[#allocation13_spill] sm:$0xff] %v15556_v60  ;;  %v9245_v57 = vadd.f32 %v15568_v13, %v8795_v11 }
 0x479   : > { %v15558_v44 = vpop.f32.mrf.mxu0 }
 0x47a   : > { %15944 = vst [vmem:[#allocation22_spill] sm:$0xff] %v15558_v44  ;;  %v8258_v44 = vadd.f32 %v8195_v20, %v7808_v14 }
 0x47b   : > { %v15562_v21 = vpop.f32.mrf.mxu0 }
 0x47c   : > { %15946 = vst [vmem:[#allocation24_spill] sm:$0xff] %v15562_v21  ;;  %v15578_v21 = vpop.f32.mrf.mxu1  ;;  %v8564_v14 = vadd.f32 %v15492_v27, %v8258_v44  ;;  %v9243_v27 = vadd.f32 %v11727_v30, %v8793_v31  ;;  %v8268_v30 = vadd.f32 %v15528_v41, %v7818_v37  ;;  %v15953_v31 = vld [vmem:[#allocation10_spill] sm:$0xff] }
 0x47d   : > { %v15564_v58 = vpop.f32.mrf.mxu0 }
 0x47e   : > { %15947 = vst [vmem:[#allocation36_spill] sm:$0xff] %v15564_v58  ;;  %v15592_v28 = vpop.f32.mrf.mxu1  ;;  %v8791_v4 = vadd.f32 %v8728_v42, %v8564_v14  ;;  %v8792_v42 = vadd.f32 %v8731_v23, %v8565_v5  ;;  %v7822_v23 = vadd.f32 %v15470_v25, %v15504_v62  ;;  %v15952_v62 = vld [vmem:[#allocation5_spill] sm:$0xff]  ;;  %v8269_v14 = vadd.f32 %v15953_v31, %v7819_v59 }
 0x47f   : > { %v15570_v47 = vpop.f32.mrf.mxu0  ;;  %v15950_v51 = vld [vmem:[#allocation13_spill] sm:$0xff] }
 0x480   : > { %v15604_v49 = vpop.f32.mrf.mxu1  ;;  %v9241_v34 = vadd.f32 %v9178_v19, %v8791_v4  ;;  %v8797_v19 = vadd.f32 %v11707_v6, %v8570_v54  ;;  %v9242_v36 = vadd.f32 %v15554_v39, %v8792_v42  ;;  %v15949_v6 = vld [vmem:[#allocation18_spill] sm:$0xff]  ;;  %v8798_v40 = vadd.f32 %v15950_v51, %v8571_v32  ;;  %v15958_v54 = vld [vmem:[#allocation31_spill] sm:$0xff]  ;;  %v15959_v59 = vld [vmem:[#allocation21_spill] sm:$0xff] }
 0x481   : > { %v15574_v60 = vpop.f32.mrf.mxu0  ;;  %v7820_v41 = vadd.f32 %v15949_v6, %v15948_v9  ;;  %v15954_v15 = vld [vmem:[#allocation22_spill] sm:$0xff]  ;;  %v8574_v4 = vadd.f32 %v15955_v56, %v8268_v30  ;;  %v8272_v13 = vadd.f32 %v15959_v59, %v7822_v23  ;;  %v15964_v9 = vld [vmem:[#allocation12_spill] sm:$0xff]  ;;  %v15965_v51 = vld [vmem:[#allocation7_spill] sm:$0xff] }
 0x482   : > { %v9210_v53 = vpop.f32.mrf.mxu1  ;;  %v9247_v46 = vadd.f32 %v15952_v62, %v8797_v19  ;;  %v8796_v7 = vadd.f32 %v15954_v15, %v8569_v52  ;;  %v9248_v43 = vadd.f32 %v15578_v21, %v8798_v40  ;;  %v15960_v19 = vld [vmem:[#allocation19_spill] sm:$0xff]  ;;  %v15966_v40 = vld [vmem:[#allocation14_spill] sm:$0xff]  ;;  %v15969_v15 = vld [vmem:[#allocation9_spill] sm:$0xff] }
 0x483   : > { %v15580_v58 = vpop.f32.mrf.mxu0  ;;  %v8270_v6 = vadd.f32 %v15964_v9, %v7820_v41  ;;  %v7821_v23 = vadd.f32 %v15966_v40, %v15965_v51  ;;  %v15967_v52 = vld [vmem:[#allocation6_spill] sm:$0xff] }
 0x484   : > { %v11736_v39 = vpop.f32.mrf.mxu1  ;;  %v9246_v21 = vadd.f32 %v15592_v28, %v8796_v7  ;;  %v15968_v28 = vld [vmem:[#allocation28_spill] sm:$0xff]  ;;  %v8578_v7 = vadd.f32 %v15969_v15, %v8272_v13 }
 0x485   : > { %v15585_v0 = vpop.f32.mrf.mxu0  ;;  %v15962_v11 = vld [vmem:[#allocation36_spill] sm:$0xff] }
 0x486   : > { %v9213_v30 = vpop.f32.mrf.mxu1 }
 0x487   : > { %v15594_v20 = vpop.f32.mrf.mxu0 }
 0x489   : > { %v15599_v55 = vpop.f32.mrf.mxu0 }
 0x48b   : > { %v11751_v10 = vpop.f32.mrf.mxu0 }
 0x48c   : > { %v9549_v26 = vadd.f32 %v11751_v10, %v9243_v27  ;;  %v15957_v10 = vld [vmem:[#allocation24_spill] sm:$0xff] }
 0x48d   : > { %v9484_v22 = vpop.f32.mrf.mxu0  ;;  %v8801_v42 = vadd.f32 %v15957_v10, %v8574_v4 }
 0x48e   : > { %v9547_v2 = vadd.f32 %v9484_v22, %v9241_v34  ;;  %v9572_v44 = vadd.f32 %v15616_v33, %v9549_v26  ;;  %v8572_v26 = vadd.f32 %v15958_v54, %v8266_v16 }
 0x48f   : > { %v11752_v1 = vpop.f32.mrf.mxu0 }
 0x490   : > { %v9550_v38 = vadd.f32 %v11752_v1, %v9244_v63  ;;  %v9570_v61 = vadd.f32 %v15616_v33, %v9547_v2  ;;  %v9588_v12 = vmax.f32 %v9572_v44, 0.0  ;;  %v15961_v2 = vld [vmem:[#allocation4_spill] sm:$0xff]  ;;  %v8799_v32 = vadd.f32 %v15962_v11, %v8572_v26 }
 0x491   : > { %v9487_v24 = vpop.f32.mrf.mxu0  ;;  %v7823_v63 = vadd.f32 %v15961_v2, %v15960_v19  ;;  %v8575_v1 = vadd.f32 %v15963_v18, %v8269_v14  ;;  %v11739_v14 = vpop.f32.mrf.mxu1  ;;  %v15973_v19 = vld [vmem:[#allocation17_spill] sm:$0xff] }
 0x492   : > { %v9573_v45 = vadd.f32 %v15616_v33, %v9550_v38  ;;  %v9548_v25 = vadd.f32 %v9487_v24, %v9242_v36  ;;  %v9586_v37 = vmax.f32 %v9570_v61, 0.0  ;;  %v8573_v24 = vadd.f32 %v15967_v52, %v8267_v3 }
 0x493   : > { %v11755_v35 = vpop.f32.mrf.mxu0  ;;  %v8802_v17 = vadd.f32 %v15570_v47, %v8575_v1  ;;  %v8273_v31 = vadd.f32 %v15968_v28, %v7823_v63  ;;  %v9249_v47 = vadd.f32 %v9210_v53, %v8799_v32 }
 0x494   : > { %v9589_v8 = vmax.f32 %v9573_v45, 0.0  ;;  %v9571_v5 = vadd.f32 %v15616_v33, %v9548_v25  ;;  %v9553_v27 = vadd.f32 %v11755_v35, %v9247_v46  ;;  %v9251_v46 = vadd.f32 %v15604_v49, %v8801_v42  ;;  %v15971_v49 = vld [vmem:[#allocation11_spill] sm:$0xff] }
 0x495   : > { %v9500_v34 = vpop.f32.mrf.mxu0  ;;  %v8800_v41 = vadd.f32 %v15574_v60, %v8573_v24  ;;  %v8576_v50 = vadd.f32 %v15971_v49, %v8270_v6  ;;  %v9252_v10 = vadd.f32 %v11736_v39, %v8802_v17 }
 0x496   : > { %v9603_v48 = vpack.c.bf16 %v9589_v8, %v9588_v12  ;;  %v9587_v29 = vmax.f32 %v9571_v5, 0.0  ;;  %v9551_v22 = vadd.f32 %v9500_v34, %v9245_v57  ;;  %v9576_v38 = vadd.f32 %v15616_v33, %v9553_v27  ;;  %v15970_v8 = vld [vmem:[#allocation32_spill] sm:$0xff]  ;;  %v9226_v34 = vpop.f32.mrf.mxu1 }
 0x497   : > { %v11756_v44 = vpop.f32.mrf.mxu0  ;;  %v8271_v5 = vadd.f32 %v15970_v8, %v7821_v23  ;;  %v8805_v27 = vadd.f32 %v15580_v58, %v8578_v7  ;;  %v8803_v53 = vadd.f32 %v15585_v0, %v8576_v50  ;;  %v9250_v59 = vadd.f32 %v9213_v30, %v8800_v41 }
 0x498   : > { %v9554_v36 = vadd.f32 %v11756_v44, %v9248_v43  ;;  %v9602_v16 = vpack.c.bf16 %v9587_v29, %v9586_v37  ;;  %v9574_v45 = vadd.f32 %v15616_v33, %v9551_v22  ;;  %v9592_v4 = vmax.f32 %v9576_v38, 0.0  ;;  %v15972_v43 = vld [vmem:[#allocation27_spill] sm:$0xff]  ;;  %v11740_v18 = vpop.f32.mrf.mxu1 }
 0x499   : > { %v9503_v61 = vpop.f32.mrf.mxu0  ;;  %v8579_v37 = vadd.f32 %v15972_v43, %v8273_v31  ;;  %v8577_v2 = vadd.f32 %v15973_v19, %v8271_v5  ;;  %v9255_v0 = vadd.f32 %v11739_v14, %v8805_v27  ;;  %v9253_v38 = vadd.f32 %v9226_v34, %v8803_v53 }
 0x49a   : > { %v9577_v25 = vadd.f32 %v15616_v33, %v9554_v36  ;;  %v9552_v62 = vadd.f32 %v9503_v61, %v9246_v21  ;;  %11781 = vmatprep.mubr.bf16.mxu1 %v9602_v16  ;;  %v9590_v42 = vmax.f32 %v9574_v45, 0.0  ;;  %v9229_v17 = vpop.f32.mrf.mxu1 }
 0x49b   : > { %v11759_v56 = vpop.f32.mrf.mxu0  ;;  %11782 = vmatmul.mubr.bf16.vlgmr.msra.gmra.mxu1 %v9603_v48  ;;  %v8806_v58 = vadd.f32 %v15594_v20, %v8579_v37  ;;  %v8804_v1 = vadd.f32 %v15599_v55, %v8577_v2 }
 0x49c   : > { %v9593_v35 = vmax.f32 %v9577_v25, 0.0  ;;  %v9575_v57 = vadd.f32 %v15616_v33, %v9552_v62  ;;  %v9557_v12 = vadd.f32 %v11759_v56, %v9251_v46 }
 0x49d   : > { %v9516_v3 = vpop.f32.mrf.mxu0  ;;  %v9256_v9 = vadd.f32 %v11740_v18, %v8806_v58  ;;  %v9254_v55 = vadd.f32 %v9229_v17, %v8804_v1 }
 0x49e   : > { %v9605_v60 = vpack.c.bf16 %v9593_v35, %v9592_v4  ;;  %v9591_v54 = vmax.f32 %v9575_v57, 0.0  ;;  %v9555_v26 = vadd.f32 %v9516_v3, %v9249_v47  ;;  %v9580_v29 = vadd.f32 %v15616_v33, %v9557_v12  ;;  %v15685_v4 = vld [vmem:[%s15751_s8] ss:$0 sm:$0xff] }
 0x49f   : > { %v11760_v48 = vpop.f32.mrf.mxu0 }
 0x4a0   : > { %v9558_v22 = vadd.f32 %v11760_v48, %v9252_v10  ;;  %v9604_v13 = vpack.c.bf16 %v9591_v54, %v9590_v42  ;;  %v9578_v63 = vadd.f32 %v15616_v33, %v9555_v26  ;;  %v9596_v30 = vmax.f32 %v9580_v29, 0.0 }
 0x4a1   : > { %v9519_v39 = vpop.f32.mrf.mxu0 }
 0x4a2   : > { %v9581_v11 = vadd.f32 %v15616_v33, %v9558_v22  ;;  %v9556_v32 = vadd.f32 %v9519_v39, %v9250_v59  ;;  %11785 = vmatprep.mubr.bf16.mxu1 %v9604_v13  ;;  %v9594_v6 = vmax.f32 %v9578_v63, 0.0 }
 0x4a3   : > { %v11763_v44 = vpop.f32.mrf.mxu0  ;;  %11786 = vmatmul.mubr.bf16.gmra.mxu1 %v9605_v60 }
 0x4a4   : > { %v9597_v36 = vmax.f32 %v9581_v11, 0.0  ;;  %v9579_v20 = vadd.f32 %v15616_v33, %v9556_v32  ;;  %v9561_v21 = vadd.f32 %v11763_v44, %v9255_v0 }
 0x4a5   : > { %v9532_v16 = vpop.f32.mrf.mxu0 }
 0x4a6   : > { %v9607_v51 = vpack.c.bf16 %v9597_v36, %v9596_v30  ;;  %v9595_v40 = vmax.f32 %v9579_v20, 0.0  ;;  %v9559_v23 = vadd.f32 %v9532_v16, %v9253_v38  ;;  %v9584_v24 = vadd.f32 %v15616_v33, %v9561_v21 }
 0x4a7   : > { %v11764_v52 = vpop.f32.mrf.mxu0 }
 0x4a8   : > { %v9562_v61 = vadd.f32 %v11764_v52, %v9256_v9  ;;  %v9606_v45 = vpack.c.bf16 %v9595_v40, %v9594_v6  ;;  %v9582_v62 = vadd.f32 %v15616_v33, %v9559_v23  ;;  %v9600_v31 = vmax.f32 %v9584_v24, 0.0 }
 0x4a9   : > { %v9535_v25 = vpop.f32.mrf.mxu0 }
 0x4aa   : > { %v9585_v46 = vadd.f32 %v15616_v33, %v9562_v61  ;;  %v9560_v28 = vadd.f32 %v9535_v25, %v9254_v55  ;;  %11789 = vmatprep.mubr.bf16.mxu1 %v9606_v45  ;;  %v9598_v15 = vmax.f32 %v9582_v62, 0.0 }
 0x4ab   : > { %11790 = vmatmul.mubr.bf16.gmra.mxu1 %v9607_v51 }
 0x4ac   : > { %v9601_v14 = vmax.f32 %v9585_v46, 0.0  ;;  %v9583_v41 = vadd.f32 %v15616_v33, %v9560_v28 }
 0x4ae   : > { %v9609_v7 = vpack.c.bf16 %v9601_v14, %v9600_v31  ;;  %v9599_v56 = vmax.f32 %v9583_v41, 0.0 }
 0x4b0   : > { %v9608_v47 = vpack.c.bf16 %v9599_v56, %v9598_v15 }
 0x4b2   : > { %11793 = vmatprep.mubr.bf16.mxu1 %v9608_v47 }
 0x4b3   : > { %11794 = vmatmul.mubr.bf16.gmra.mxu1 %v9609_v7 }
 0x55b   : > { %v11783_v35 = vpop.f32.mrf.mxu1 }
 0x55c   : > { %v9724_v57 = vadd.f32 %v11783_v35, %v15685_v4 }
 0x55d   : > { %v9715_v33 = vpop.f32.mrf.mxu1 }
 0x55e   : > { %v9780_v12 = vmax.f32 %v9724_v57, 0.0  ;;  %v9716_v8 = vadd.f32 %v15685_v4, %v9715_v33 }
 0x55f   : > { %v11784_v5 = vpop.f32.mrf.mxu1 }
 0x560   : > { %v10898_v27 = vpack.c.bf16 %v9780_v12, %v9780_v12  ;;  %v9778_v49 = vmax.f32 %v9716_v8, 0.0  ;;  %v9727_v50 = vadd.f32 %v11784_v5, %v15685_v4 }
 0x561   : > { %v9718_v3 = vpop.f32.mrf.mxu1 }
 0x562   : > { %9861 = vst.msk [vmem:[%s15692_s24 + $0x8] sm:$0xf] %vm9858_vm4, %v10898_v27  ;;  %v10896_v10 = vpack.c.bf16 %v9778_v49, %v9778_v49  ;;  %v9781_v42 = vmax.f32 %v9727_v50, 0.0  ;;  %v9719_v60 = vadd.f32 %v15685_v4, %v9718_v3 }
 0x563   : > { %v11787_v54 = vpop.f32.mrf.mxu1 }
 0x564   : > { %9859 = vst.msk [vmem:[%s15692_s24] sm:$0xf] %vm9858_vm4, %v10896_v10  ;;  %v10899_v26 = vpack.c.bf16 %v9781_v42, %v9781_v42  ;;  %v9779_v34 = vmax.f32 %v9719_v60, 0.0  ;;  %v9740_v53 = vadd.f32 %v11787_v54, %v15685_v4 }
 0x565   : > { %v9731_v43 = vpop.f32.mrf.mxu1 }
 0x566   : > { %9862 = vst.msk [vmem:[%s15692_s24 + $0xc] sm:$0xf] %vm9858_vm4, %v10899_v26  ;;  %v10897_v37 = vpack.c.bf16 %v9779_v34, %v9779_v34  ;;  %v9784_v48 = vmax.f32 %v9740_v53, 0.0  ;;  %v9732_v29 = vadd.f32 %v15685_v4, %v9731_v43 }
 0x567   : > { %v11788_v22 = vpop.f32.mrf.mxu1 }
 0x568   : > { %9860 = vst.msk [vmem:[%s15692_s24 + $0x4] sm:$0xf] %vm9858_vm4, %v10897_v37  ;;  %v10902_v59 = vpack.c.bf16 %v9784_v48, %v9784_v48  ;;  %v9782_v13 = vmax.f32 %v9732_v29, 0.0  ;;  %v9743_v58 = vadd.f32 %v11788_v22, %v15685_v4 }
 0x569   : > { %v9734_v19 = vpop.f32.mrf.mxu1 }
 0x56a   : > { %9865 = vst.msk [vmem:[%s15692_s24 + $0x18] sm:$0xf] %vm9858_vm4, %v10902_v59  ;;  %v10900_v2 = vpack.c.bf16 %v9782_v13, %v9782_v13  ;;  %v9785_v39 = vmax.f32 %v9743_v58, 0.0  ;;  %v9735_v63 = vadd.f32 %v15685_v4, %v9734_v19 }
 0x56b   : > { %v11791_v11 = vpop.f32.mrf.mxu1 }
 0x56c   : > { %9863 = vst.msk [vmem:[%s15692_s24 + $0x10] sm:$0xf] %vm9858_vm4, %v10900_v2  ;;  %v10903_v32 = vpack.c.bf16 %v9785_v39, %v9785_v39  ;;  %v9783_v0 = vmax.f32 %v9735_v63, 0.0  ;;  %v9756_v18 = vadd.f32 %v11791_v11, %v15685_v4 }
 0x56d   : > { %v9747_v1 = vpop.f32.mrf.mxu1 }
 0x56e   : > { %9866 = vst.msk [vmem:[%s15692_s24 + $0x1c] sm:$0xf] %vm9858_vm4, %v10903_v32  ;;  %v10901_v44 = vpack.c.bf16 %v9783_v0, %v9783_v0  ;;  %v9788_v38 = vmax.f32 %v9756_v18, 0.0  ;;  %v9748_v30 = vadd.f32 %v15685_v4, %v9747_v1 }
 0x56f   : > { %v11792_v36 = vpop.f32.mrf.mxu1 }
 0x570   : > { %9864 = vst.msk [vmem:[%s15692_s24 + $0x14] sm:$0xf] %vm9858_vm4, %v10901_v44  ;;  %v10906_v20 = vpack.c.bf16 %v9788_v38, %v9788_v38  ;;  %v9786_v21 = vmax.f32 %v9748_v30, 0.0  ;;  %v9759_v16 = vadd.f32 %v11792_v36, %v15685_v4 }
 0x571   : > { %v9750_v9 = vpop.f32.mrf.mxu1 }
 0x572   : > { %9869 = vst.msk [vmem:[%s15692_s24 + $0x28] sm:$0xf] %vm9858_vm4, %v10906_v20  ;;  %v10904_v6 = vpack.c.bf16 %v9786_v21, %v9786_v21  ;;  %v9789_v51 = vmax.f32 %v9759_v16, 0.0  ;;  %v9751_v40 = vadd.f32 %v15685_v4, %v9750_v9 }
 0x573   : > { %v11795_v23 = vpop.f32.mrf.mxu1 }
 0x574   : > { %9867 = vst.msk [vmem:[%s15692_s24 + $0x20] sm:$0xf] %vm9858_vm4, %v10904_v6  ;;  %v10907_v17 = vpack.c.bf16 %v9789_v51, %v9789_v51  ;;  %v9787_v52 = vmax.f32 %v9751_v40, 0.0  ;;  %v9772_v24 = vadd.f32 %v11795_v23, %v15685_v4 }
 0x575   : > { %v9763_v61 = vpop.f32.mrf.mxu1 }
 0x576   : > { %9870 = vst.msk [vmem:[%s15692_s24 + $0x2c] sm:$0xf] %vm9858_vm4, %v10907_v17  ;;  %v10905_v55 = vpack.c.bf16 %v9787_v52, %v9787_v52  ;;  %v9792_v45 = vmax.f32 %v9772_v24, 0.0  ;;  %v9764_v25 = vadd.f32 %v15685_v4, %v9763_v61 }
 0x577   : > { %v11796_v62 = vpop.f32.mrf.mxu1 }
 0x578   : > { %9868 = vst.msk [vmem:[%s15692_s24 + $0x24] sm:$0xf] %vm9858_vm4, %v10905_v55  ;;  %v10910_v46 = vpack.c.bf16 %v9792_v45, %v9792_v45  ;;  %v9790_v28 = vmax.f32 %v9764_v25, 0.0  ;;  %v9775_v31 = vadd.f32 %v11796_v62, %v15685_v4 }
 0x579   : > { %v9766_v14 = vpop.f32.mrf.mxu1 }
 0x57a   : > { %9873 = vst.msk [vmem:[%s15692_s24 + $0x38] sm:$0xf] %vm9858_vm4, %v10910_v46  ;;  %v10908_v41 = vpack.c.bf16 %v9790_v28, %v9790_v28  ;;  %v9793_v15 = vmax.f32 %v9775_v31, 0.0  ;;  %v9767_v7 = vadd.f32 %v15685_v4, %v9766_v14 }
 0x57c   : > { %9871 = vst.msk [vmem:[%s15692_s24 + $0x30] sm:$0xf] %vm9858_vm4, %v10908_v41  ;;  %v10911_v56 = vpack.c.bf16 %v9793_v15, %v9793_v15  ;;  %v9791_v47 = vmax.f32 %v9767_v7, 0.0 }
 0x57e   : > { %9874 = vst.msk [vmem:[%s15692_s24 + $0x3c] sm:$0xf] %vm9858_vm4, %v10911_v56  ;;  %v10909_v35 = vpack.c.bf16 %v9791_v47, %v9791_v47 }
 0x580   : > { %9872 = vst.msk [vmem:[%s15692_s24 + $0x34] sm:$0xf] %vm9858_vm4, %v10909_v35 }
 0x581 PF: > { %s19_s30 = sadd.s32 1, %s11959_s30  }
 0x582   : > { %p16_p5 = scmp.ge.s32.totalorder %s19_s30, 4  }
 0x584   :  { %18 = sbr.rel (!%p16_p5) target bundleno = 1 (0x1), region = 118 }

</bundles_post_ra>
